<compile_context>
chip_gen: v7x
topology: tpu7x:2x2x1
jax: 0.10.0
libtpu: 0.0.40
codegen_flags: <defaults>
</compile_context>

<pallas_src>
import functools
import math

import jax
import jax.numpy as jnp
from jax.experimental import pallas as pl
from jax.experimental.pallas import tpu as pltpu


# ----------------------------------------------------------------------------
# Fused Pallas kernel: full rollout of the causal transformer + loss sums.
# Token layout inside the kernel: x is (S, D) with S = history * objects,
# tokens ordered time-major ((h, n) -> h * N + n), D on the 128-lane axis.
# ----------------------------------------------------------------------------
def _make_fused_kernel(H, N, D, R, L, NH, F, use_bf16, eps=1e-5):
    S = H * N
    HD = D // NH
    scale = 1.0 / math.sqrt(HD)

    def cast(a):
        return a.astype(jnp.bfloat16) if use_bf16 else a

    def kernel(dyn_ref, pos_ref, neg_ref, pe_ref, mask_ref,
               w_attn_ref, w1_ref, w2_ref, vecs_ref,
               pred_ref, pos_out_ref, neg_out_ref):
        pe = pe_ref[...]                 # (S, D) per-token positional encoding
        mask = mask_ref[...]             # (S, S) additive causal block mask
        dyn = dyn_ref[0]                 # (S, D) dynamic slots for this batch el.

        def encoder_layer(x, l):
            wl = w_attn_ref[l]           # (D, 4D) = [Wqkv | Wo]
            vl = vecs_ref[l]             # (10, D) = [bq,bk,bv,bo,b1,b2,ln1w,ln1b,ln2w,ln2b]
            wqkv = wl[:, :3 * D]
            wo = wl[:, 3 * D:]
            # fused QKV projection: (S,D) @ (D,3D)
            qkv = jnp.dot(cast(x), cast(wqkv), preferred_element_type=jnp.float32)
            q = qkv[:, 0 * D:1 * D] + vl[0:1]
            k = qkv[:, 1 * D:2 * D] + vl[1:2]
            v = qkv[:, 2 * D:3 * D] + vl[2:3]
            heads = []
            for h in range(NH):          # static unroll over heads
                lo, hi = h * HD, (h + 1) * HD
                qh, kh, vh = q[:, lo:hi], k[:, lo:hi], v[:, lo:hi]
                s = jnp.dot(qh, kh.T, preferred_element_type=jnp.float32) * scale + mask
                s = s - jnp.max(s, axis=-1, keepdims=True)
                e = jnp.exp(s)
                p = e * pl.reciprocal(jnp.sum(e, axis=-1, keepdims=True), approx=True)
                heads.append(jnp.dot(p, vh, preferred_element_type=jnp.float32))
            attn = jnp.concatenate(heads, axis=-1)        # (S, D)
            # single output projection (S,D)@(D,D); residual; dropout = eval
            x = x + jnp.dot(cast(attn), cast(wo),
                            preferred_element_type=jnp.float32) + vl[3:4]
            # LayerNorm 1 (post-norm)
            mu = jnp.mean(x, axis=-1, keepdims=True)
            xc = x - mu
            var = jnp.mean(xc * xc, axis=-1, keepdims=True)
            x = xc * jax.lax.rsqrt(var + eps) * vl[6:7] + vl[7:8]
            # Feed-forward (ReLU)
            h1 = jnp.maximum(
                jnp.dot(cast(x), cast(w1_ref[l]),
                        preferred_element_type=jnp.float32) + vl[4:5, :F], 0.0)
            ff = jnp.dot(cast(h1), cast(w2_ref[l]),
                         preferred_element_type=jnp.float32) + vl[5:6]
            x = x + ff
            # LayerNorm 2
            mu = jnp.mean(x, axis=-1, keepdims=True)
            xc = x - mu
            var = jnp.mean(xc * xc, axis=-1, keepdims=True)
            x = xc * jax.lax.rsqrt(var + eps) * vl[8:9] + vl[9:10]
            return x

        pos_sums = []
        neg_sums = []
        last = (H - 1) * N
        for i in range(R):               # static unroll over rollout steps
            x = dyn + pe                 # PositionEmbedding
            for l in range(L):           # static unroll over encoder layers
                x = encoder_layer(x, l)
            delta = x[last:, :]          # last timestep (N, D)
            future_dyn = dyn[last:, :] + delta
            pred_ref[0, i] = future_dyn
            # contrastive squared-error epilogue (per batch element, per step)
            dp = future_dyn - pos_ref[0, i]
            dn = future_dyn - neg_ref[0, i]
            pos_sums.append(jnp.sum(dp * dp, axis=(0, 1), keepdims=True))  # (1,1)
            neg_sums.append(jnp.sum(dn * dn, axis=(0, 1), keepdims=True))  # (1,1)
            # autoregressive update: drop oldest timestep, append prediction
            dyn = jnp.concatenate([dyn[N:], future_dyn], axis=0)

        pos_out_ref[0] = jnp.concatenate(pos_sums, axis=1)    # (1, R)
        neg_out_ref[0] = jnp.concatenate(neg_sums, axis=1)    # (1, R)

    return kernel


def fused_rollout(dyn_tokens, pos, neg, pe_tokens, mask,
                  w_attn, w1, w2, vecs, *,
                  history, objects, rollout, num_layers, num_heads,
                  use_bf16=False):
    B, S, D = dyn_tokens.shape
    R, N, L = rollout, objects, num_layers
    F = w1.shape[-1]
    kernel = _make_fused_kernel(history, N, D, R, L, num_heads, F, use_bf16)

    return pl.pallas_call(
        kernel,
        grid=(B,),
        out_shape=(jax.ShapeDtypeStruct((B, R, N, D), jnp.float32),
                   jax.ShapeDtypeStruct((B, 1, R), jnp.float32),
                   jax.ShapeDtypeStruct((B, 1, R), jnp.float32)),
        in_specs=[
            pl.BlockSpec((1, S, D), lambda b: (b, 0, 0)),          # dyn tokens
            pl.BlockSpec((1, R, N, D), lambda b: (b, 0, 0, 0)),    # positives
            pl.BlockSpec((1, R, N, D), lambda b: (b, 0, 0, 0)),    # negatives
            pl.BlockSpec((S, D), lambda b: (0, 0)),                # PE (per-token)
            pl.BlockSpec((S, S), lambda b: (0, 0)),                # causal mask
            pl.BlockSpec((L, D, 4 * D), lambda b: (0, 0, 0)),      # [Wqkv|Wo]
            pl.BlockSpec((L, D, F), lambda b: (0, 0, 0)),          # W1
            pl.BlockSpec((L, F, D), lambda b: (0, 0, 0)),          # W2
            pl.BlockSpec((L, 10, D), lambda b: (0, 0, 0)),         # biases / LN
        ],
        out_specs=(
            pl.BlockSpec((1, R, N, D), lambda b: (b, 0, 0, 0)),    # pred dyn
            pl.BlockSpec((1, 1, R), lambda b: (b, 0, 0)),          # pos sums
            pl.BlockSpec((1, 1, R), lambda b: (b, 0, 0)),          # neg sums
        ),
        compiler_params=pltpu.CompilerParams(
            dimension_semantics=("parallel",)),
    )(dyn_tokens, pos, neg, pe_tokens, mask, w_attn, w1, w2, vecs)


# ----------------------------------------------------------------------------
# JAX glue: positional encoding, causal block mask, params, forward.
# ----------------------------------------------------------------------------
def _positional_encoding(max_len, dim):
    seq = jnp.exp(-jnp.arange(0, dim, 2).astype(jnp.float32) / float(dim)
                  * math.log(10000.0))
    pos = jnp.arange(max_len, dtype=jnp.float32)[:, None]
    pe = jnp.zeros((max_len, dim), jnp.float32)
    pe = pe.at[:, 0::2].set(jnp.sin(pos * seq[None, :]))
    pe = pe.at[:, 1::2].set(jnp.cos(pos * seq[None, :]))
    return pe


def _causal_block_mask(history, objects):
    t = jnp.arange(history)
    base = jnp.where(t[None, :] > t[:, None], -1e30, 0.0).astype(jnp.float32)
    return jnp.kron(base, jnp.ones((objects, objects), jnp.float32))  # (S, S)


def init_params(key, dim, num_heads, num_layers):
    ff = int(dim / num_heads)            # dim_feedforward = dim / num_heads (reference)
    k_sel, key = jax.random.split(key)
    params = {'static_selector': jax.random.uniform(k_sel, (dim,), jnp.float32) - 0.5}
    w_attn, w1s, w2s, vecs = [], [], [], []
    for _ in range(num_layers):
        key, k1, k2, k3, k4 = jax.random.split(key, 5)
        wqkv = jax.random.normal(k1, (dim, 3 * dim), jnp.float32) * 0.05
        wo = jax.random.normal(k2, (dim, dim), jnp.float32) * 0.05
        w1 = jax.random.normal(k3, (dim, ff), jnp.float32) * 0.05
        w2 = jax.random.normal(k4, (ff, dim), jnp.float32) * 0.05
        w_attn.append(jnp.concatenate([wqkv, wo], axis=1))   # (D, 4D), 128 lanes
        w1s.append(w1)
        w2s.append(w2)
        # rows: 0 bq, 1 bk, 2 bv, 3 bo, 4 b1 (first ff cols), 5 b2,
        #       6 ln1w, 7 ln1b, 8 ln2w, 9 ln2b
        v = jnp.zeros((10, dim), jnp.float32)
        v = v.at[6].set(1.0).at[8].set(1.0)
        vecs.append(v)
    params['w_attn'] = jnp.stack(w_attn)   # (L, D, 4D)
    params['w1'] = jnp.stack(w1s)          # (L, D, F)
    params['w2'] = jnp.stack(w2s)          # (L, F, D)
    params['vecs'] = jnp.stack(vecs)       # (L, 10, D)
    return params


def contrastive_forward(slots, params, *, history, rollout, objects,
                        num_layers, num_heads, max_len, hinge=1.0,
                        use_bf16_matmul=False):
    B, T, N, D = slots.shape
    ss = jax.nn.sigmoid(params['static_selector'])              # (D,)
    input_slots = slots[:, :history]                            # B x H x N x D
    rollout_slots = slots[:, history:history + rollout]         # B x R x N x D
    input_static = input_slots * ss
    input_dyn = input_slots - input_static
    rollout_static = rollout_slots * ss
    rollout_dyn = rollout_slots - rollout_static
    static_part = input_static[:, -1]                           # B x N x D
    sanity_loss = -jnp.sum(ss ** 2)

    H = history
    S = H * objects
    pe = _positional_encoding(max_len, D)[:H]                   # (H, D)
    pe_tokens = jnp.repeat(pe, objects, axis=0)                 # (S, D) per token
    mask = _causal_block_mask(H, objects)                       # (S, S)

    # TODO(synk): reference uses np.random.permutation per step for negatives and
    # dropout(0.1) inside the transformer; both are stochastic — here we use a
    # fixed roll-by-one permutation and eval-mode (no dropout) for determinism.
    perm = (jnp.arange(B) + 1) % B
    neg_rollout_dyn = rollout_dyn[perm]                         # B x R x N x D

    dyn_tokens = input_dyn.reshape(B, S, D)                     # time-major tokens

    pred_dyn, pos_sums, neg_sums = fused_rollout(
        dyn_tokens, rollout_dyn, neg_rollout_dyn, pe_tokens, mask,
        params['w_attn'], params['w1'], params['w2'], params['vecs'],
        history=H, objects=objects, rollout=rollout,
        num_layers=num_layers, num_heads=num_heads,
        use_bf16=use_bf16_matmul)

    # tiny (B, R) epilogue in plain JAX (XLA fuses this; no extra kernel launch)
    pos_sums = pos_sums.reshape(B, rollout)
    neg_sums = neg_sums.reshape(B, rollout)
    pos_step = jnp.sum(pos_sums, axis=0)                                  # (R,)
    neg_step = jnp.maximum(0.0, hinge - jnp.sum(neg_sums, axis=0))        # (R,)
    closs = jnp.sum(pos_step + neg_step).reshape(1)

    pred_slots = pred_dyn * (1.0 - ss) + static_part[:, None] * ss        # B x R x N x D

    return {
        'contrastive_loss': closs,
        'vel_loss': jnp.zeros((1,), jnp.float32),
        'decoder_loss': jnp.zeros((1,), jnp.float32),
        'sanity_loss': sanity_loss,
        'pair_loss': jnp.zeros((1,), jnp.float32),
        'pred_slots': pred_slots,
    }


if __name__ == "__main__":
    B, HISTORY, ROLLOUT, OBJECTS, DIM = 2, 4, 3, 3, 32
    NUM_HEADS, NUM_LAYERS, MAX_LEN = 4, 2, 16

    key = jax.random.PRNGKey(0)
    k_slots, k_params = jax.random.split(key)
    slots = jax.random.normal(
        k_slots, (B, HISTORY + ROLLOUT, OBJECTS, DIM), jnp.float32)
    params = init_params(k_params, DIM, NUM_HEADS, NUM_LAYERS)

    fwd = jax.jit(functools.partial(
        contrastive_forward, history=HISTORY, rollout=ROLLOUT, objects=OBJECTS,
        num_layers=NUM_LAYERS, num_heads=NUM_HEADS, max_len=MAX_LEN))

    out = fwd(slots, params)
    jax.block_until_ready(out['pred_slots'])
    jax.block_until_ready(out['contrastive_loss'])
    assert out['pred_slots'].shape == (B, ROLLOUT, OBJECTS, DIM)
    assert out['contrastive_loss'].shape == (1,)
    print("KERNEL_OK")
</pallas_src>

<mosaic_0001>
module attributes {stable_mosaic.version = 11 : i64} {
  func.func @kernel(%arg0: i32, %arg1: memref<1x12x32xf32, #tpu.memory_space<vmem>>, %arg2: memref<1x3x3x32xf32, #tpu.memory_space<vmem>>, %arg3: memref<1x3x3x32xf32, #tpu.memory_space<vmem>>, %arg4: memref<12x32xf32, #tpu.memory_space<vmem>>, %arg5: memref<12x12xf32, #tpu.memory_space<vmem>>, %arg6: memref<2x32x128xf32, #tpu.memory_space<vmem>>, %arg7: memref<2x32x8xf32, #tpu.memory_space<vmem>>, %arg8: memref<2x8x32xf32, #tpu.memory_space<vmem>>, %arg9: memref<2x10x32xf32, #tpu.memory_space<vmem>>, %arg10: memref<1x3x3x32xf32, #tpu.memory_space<vmem>>, %arg11: memref<1x1x3xf32, #tpu.memory_space<vmem>>, %arg12: memref<1x1x3xf32, #tpu.memory_space<vmem>>) attributes {dimension_semantics = [#tpu.dimension_semantics<parallel>], iteration_bounds = array<i64: 2>, scalar_prefetch = 0 : i64, scratch_operands = 0 : i64, tpu.core_type = #tpu.core_type<tc>, window_params = [{transform_indices = @transform_0, window_bounds = array<i64: 1, 12, 32>}, {transform_indices = @transform_1, window_bounds = array<i64: 1, 3, 3, 32>}, {transform_indices = @transform_2, window_bounds = array<i64: 1, 3, 3, 32>}, {pipeline_mode = #tpu.pipeline_mode<synchronous>, transform_indices = @transform_3, window_bounds = array<i64: 12, 32>}, {pipeline_mode = #tpu.pipeline_mode<synchronous>, transform_indices = @transform_4, window_bounds = array<i64: 12, 12>}, {pipeline_mode = #tpu.pipeline_mode<synchronous>, transform_indices = @transform_5, window_bounds = array<i64: 2, 32, 128>}, {pipeline_mode = #tpu.pipeline_mode<synchronous>, transform_indices = @transform_6, window_bounds = array<i64: 2, 32, 8>}, {pipeline_mode = #tpu.pipeline_mode<synchronous>, transform_indices = @transform_7, window_bounds = array<i64: 2, 8, 32>}, {pipeline_mode = #tpu.pipeline_mode<synchronous>, transform_indices = @transform_8, window_bounds = array<i64: 2, 10, 32>}, {transform_indices = @transform_9, window_bounds = array<i64: 1, 3, 3, 32>}, {transform_indices = @transform_10, window_bounds = array<i64: 1, 1, 3>}, {transform_indices = @transform_11, window_bounds = array<i64: 1, 1, 3>}]} {
    %c0 = arith.constant 0 : index
    %c0_0 = arith.constant 0 : index
    %0 = vector.load %arg4[%c0, %c0_0] : memref<12x32xf32, #tpu.memory_space<vmem>>, vector<12x32xf32>
    %c0_1 = arith.constant 0 : index
    %c0_2 = arith.constant 0 : index
    %1 = vector.load %arg5[%c0_1, %c0_2] : memref<12x12xf32, #tpu.memory_space<vmem>>, vector<12x12xf32>
    %c0_3 = arith.constant 0 : index
    %c0_4 = arith.constant 0 : index
    %c0_5 = arith.constant 0 : index
    %2 = vector.load %arg1[%c0_3, %c0_4, %c0_5] : memref<1x12x32xf32, #tpu.memory_space<vmem>>, vector<1x12x32xf32>
    %3 = vector.shape_cast %2 : vector<1x12x32xf32> to vector<12x32xf32>
    %4 = arith.addf %3, %0 : vector<12x32xf32>
    %c0_6 = arith.constant 0 : index
    %c0_7 = arith.constant 0 : index
    %c0_8 = arith.constant 0 : index
    %5 = vector.load %arg6[%c0_6, %c0_7, %c0_8] : memref<2x32x128xf32, #tpu.memory_space<vmem>>, vector<1x32x128xf32>
    %6 = vector.shape_cast %5 : vector<1x32x128xf32> to vector<32x128xf32>
    %c0_9 = arith.constant 0 : index
    %c0_10 = arith.constant 0 : index
    %c0_11 = arith.constant 0 : index
    %7 = vector.load %arg9[%c0_9, %c0_10, %c0_11] : memref<2x10x32xf32, #tpu.memory_space<vmem>>, vector<1x10x32xf32>
    %8 = vector.shape_cast %7 : vector<1x10x32xf32> to vector<10x32xf32>
    %9 = vector.extract_strided_slice %6 {offsets = [0, 0], sizes = [32, 96], strides = [1, 1]} : vector<32x128xf32> to vector<32x96xf32>
    %10 = vector.extract_strided_slice %6 {offsets = [0, 96], sizes = [32, 32], strides = [1, 1]} : vector<32x128xf32> to vector<32x32xf32>
    %cst = arith.constant dense<0.000000e+00> : vector<12x96xf32>
    %11 = tpu.matmul %4, %9, %cst {dimension_numbers = #tpu.dot_dimension_numbers<[1], [0], [0], [1], [0, 0, 1, 1], [], []>} : vector<12x32xf32>, vector<32x96xf32>, vector<12x96xf32> -> vector<12x96xf32>
    %12 = vector.extract_strided_slice %11 {offsets = [0, 0], sizes = [12, 32], strides = [1, 1]} : vector<12x96xf32> to vector<12x32xf32>
    %13 = vector.extract_strided_slice %8 {offsets = [0, 0], sizes = [1, 32], strides = [1, 1]} : vector<10x32xf32> to vector<1x32xf32>
    %14 = vector.broadcast %13 : vector<1x32xf32> to vector<12x32xf32>
    %15 = arith.addf %12, %14 : vector<12x32xf32>
    %16 = vector.extract_strided_slice %11 {offsets = [0, 32], sizes = [12, 32], strides = [1, 1]} : vector<12x96xf32> to vector<12x32xf32>
    %17 = vector.extract_strided_slice %8 {offsets = [1, 0], sizes = [1, 32], strides = [1, 1]} : vector<10x32xf32> to vector<1x32xf32>
    %18 = vector.broadcast %17 : vector<1x32xf32> to vector<12x32xf32>
    %19 = arith.addf %16, %18 : vector<12x32xf32>
    %20 = vector.extract_strided_slice %11 {offsets = [0, 64], sizes = [12, 32], strides = [1, 1]} : vector<12x96xf32> to vector<12x32xf32>
    %21 = vector.extract_strided_slice %8 {offsets = [2, 0], sizes = [1, 32], strides = [1, 1]} : vector<10x32xf32> to vector<1x32xf32>
    %22 = vector.broadcast %21 : vector<1x32xf32> to vector<12x32xf32>
    %23 = arith.addf %20, %22 : vector<12x32xf32>
    %24 = vector.extract_strided_slice %15 {offsets = [0, 0], sizes = [12, 8], strides = [1, 1]} : vector<12x32xf32> to vector<12x8xf32>
    %25 = vector.extract_strided_slice %19 {offsets = [0, 0], sizes = [12, 8], strides = [1, 1]} : vector<12x32xf32> to vector<12x8xf32>
    %26 = vector.extract_strided_slice %23 {offsets = [0, 0], sizes = [12, 8], strides = [1, 1]} : vector<12x32xf32> to vector<12x8xf32>
    %27 = tpu.transpose %25, [1, 0] : vector<12x8xf32> -> vector<8x12xf32>
    %cst_12 = arith.constant dense<0.000000e+00> : vector<12x12xf32>
    %28 = tpu.matmul %24, %27, %cst_12 {dimension_numbers = #tpu.dot_dimension_numbers<[1], [0], [0], [1], [0, 0, 1, 1], [], []>} : vector<12x8xf32>, vector<8x12xf32>, vector<12x12xf32> -> vector<12x12xf32>
    %cst_13 = arith.constant 0.353553385 : f32
    %29 = vector.broadcast %cst_13 : f32 to vector<12x12xf32>
    %30 = arith.mulf %28, %29 : vector<12x12xf32>
    %31 = arith.addf %30, %1 : vector<12x12xf32>
    %cst_14 = arith.constant dense<0xFF800000> : vector<12xf32>
    %32 = vector.multi_reduction <maximumf>, %31, %cst_14 [1] : vector<12x12xf32> to vector<12xf32>
    %33 = vector.shape_cast %32 : vector<12xf32> to vector<12x1xf32>
    %34 = vector.broadcast %33 : vector<12x1xf32> to vector<12x12xf32>
    %35 = arith.subf %31, %34 : vector<12x12xf32>
    %36 = math.exp %35 : vector<12x12xf32>
    %cst_15 = arith.constant dense<0.000000e+00> : vector<12xf32>
    %37 = vector.multi_reduction <add>, %36, %cst_15 [1] : vector<12x12xf32> to vector<12xf32>
    %38 = vector.shape_cast %37 : vector<12xf32> to vector<12x1xf32>
    %39 = tpu.reciprocal %38 {approx = true} : vector<12x1xf32> -> vector<12x1xf32>
    %40 = vector.broadcast %39 : vector<12x1xf32> to vector<12x12xf32>
    %41 = arith.mulf %36, %40 : vector<12x12xf32>
    %cst_16 = arith.constant dense<0.000000e+00> : vector<12x8xf32>
    %42 = tpu.matmul %41, %26, %cst_16 {dimension_numbers = #tpu.dot_dimension_numbers<[1], [0], [0], [1], [0, 0, 1, 1], [], []>} : vector<12x12xf32>, vector<12x8xf32>, vector<12x8xf32> -> vector<12x8xf32>
    %43 = vector.extract_strided_slice %15 {offsets = [0, 8], sizes = [12, 8], strides = [1, 1]} : vector<12x32xf32> to vector<12x8xf32>
    %44 = vector.extract_strided_slice %19 {offsets = [0, 8], sizes = [12, 8], strides = [1, 1]} : vector<12x32xf32> to vector<12x8xf32>
    %45 = vector.extract_strided_slice %23 {offsets = [0, 8], sizes = [12, 8], strides = [1, 1]} : vector<12x32xf32> to vector<12x8xf32>
    %46 = tpu.transpose %44, [1, 0] : vector<12x8xf32> -> vector<8x12xf32>
    %cst_17 = arith.constant dense<0.000000e+00> : vector<12x12xf32>
    %47 = tpu.matmul %43, %46, %cst_17 {dimension_numbers = #tpu.dot_dimension_numbers<[1], [0], [0], [1], [0, 0, 1, 1], [], []>} : vector<12x8xf32>, vector<8x12xf32>, vector<12x12xf32> -> vector<12x12xf32>
    %cst_18 = arith.constant 0.353553385 : f32
    %48 = vector.broadcast %cst_18 : f32 to vector<12x12xf32>
    %49 = arith.mulf %47, %48 : vector<12x12xf32>
    %50 = arith.addf %49, %1 : vector<12x12xf32>
    %cst_19 = arith.constant dense<0xFF800000> : vector<12xf32>
    %51 = vector.multi_reduction <maximumf>, %50, %cst_19 [1] : vector<12x12xf32> to vector<12xf32>
    %52 = vector.shape_cast %51 : vector<12xf32> to vector<12x1xf32>
    %53 = vector.broadcast %52 : vector<12x1xf32> to vector<12x12xf32>
    %54 = arith.subf %50, %53 : vector<12x12xf32>
    %55 = math.exp %54 : vector<12x12xf32>
    %cst_20 = arith.constant dense<0.000000e+00> : vector<12xf32>
    %56 = vector.multi_reduction <add>, %55, %cst_20 [1] : vector<12x12xf32> to vector<12xf32>
    %57 = vector.shape_cast %56 : vector<12xf32> to vector<12x1xf32>
    %58 = tpu.reciprocal %57 {approx = true} : vector<12x1xf32> -> vector<12x1xf32>
    %59 = vector.broadcast %58 : vector<12x1xf32> to vector<12x12xf32>
    %60 = arith.mulf %55, %59 : vector<12x12xf32>
    %cst_21 = arith.constant dense<0.000000e+00> : vector<12x8xf32>
    %61 = tpu.matmul %60, %45, %cst_21 {dimension_numbers = #tpu.dot_dimension_numbers<[1], [0], [0], [1], [0, 0, 1, 1], [], []>} : vector<12x12xf32>, vector<12x8xf32>, vector<12x8xf32> -> vector<12x8xf32>
    %62 = vector.extract_strided_slice %15 {offsets = [0, 16], sizes = [12, 8], strides = [1, 1]} : vector<12x32xf32> to vector<12x8xf32>
    %63 = vector.extract_strided_slice %19 {offsets = [0, 16], sizes = [12, 8], strides = [1, 1]} : vector<12x32xf32> to vector<12x8xf32>
    %64 = vector.extract_strided_slice %23 {offsets = [0, 16], sizes = [12, 8], strides = [1, 1]} : vector<12x32xf32> to vector<12x8xf32>
    %65 = tpu.transpose %63, [1, 0] : vector<12x8xf32> -> vector<8x12xf32>
    %cst_22 = arith.constant dense<0.000000e+00> : vector<12x12xf32>
    %66 = tpu.matmul %62, %65, %cst_22 {dimension_numbers = #tpu.dot_dimension_numbers<[1], [0], [0], [1], [0, 0, 1, 1], [], []>} : vector<12x8xf32>, vector<8x12xf32>, vector<12x12xf32> -> vector<12x12xf32>
    %cst_23 = arith.constant 0.353553385 : f32
    %67 = vector.broadcast %cst_23 : f32 to vector<12x12xf32>
    %68 = arith.mulf %66, %67 : vector<12x12xf32>
    %69 = arith.addf %68, %1 : vector<12x12xf32>
    %cst_24 = arith.constant dense<0xFF800000> : vector<12xf32>
    %70 = vector.multi_reduction <maximumf>, %69, %cst_24 [1] : vector<12x12xf32> to vector<12xf32>
    %71 = vector.shape_cast %70 : vector<12xf32> to vector<12x1xf32>
    %72 = vector.broadcast %71 : vector<12x1xf32> to vector<12x12xf32>
    %73 = arith.subf %69, %72 : vector<12x12xf32>
    %74 = math.exp %73 : vector<12x12xf32>
    %cst_25 = arith.constant dense<0.000000e+00> : vector<12xf32>
    %75 = vector.multi_reduction <add>, %74, %cst_25 [1] : vector<12x12xf32> to vector<12xf32>
    %76 = vector.shape_cast %75 : vector<12xf32> to vector<12x1xf32>
    %77 = tpu.reciprocal %76 {approx = true} : vector<12x1xf32> -> vector<12x1xf32>
    %78 = vector.broadcast %77 : vector<12x1xf32> to vector<12x12xf32>
    %79 = arith.mulf %74, %78 : vector<12x12xf32>
    %cst_26 = arith.constant dense<0.000000e+00> : vector<12x8xf32>
    %80 = tpu.matmul %79, %64, %cst_26 {dimension_numbers = #tpu.dot_dimension_numbers<[1], [0], [0], [1], [0, 0, 1, 1], [], []>} : vector<12x12xf32>, vector<12x8xf32>, vector<12x8xf32> -> vector<12x8xf32>
    %81 = vector.extract_strided_slice %15 {offsets = [0, 24], sizes = [12, 8], strides = [1, 1]} : vector<12x32xf32> to vector<12x8xf32>
    %82 = vector.extract_strided_slice %19 {offsets = [0, 24], sizes = [12, 8], strides = [1, 1]} : vector<12x32xf32> to vector<12x8xf32>
    %83 = vector.extract_strided_slice %23 {offsets = [0, 24], sizes = [12, 8], strides = [1, 1]} : vector<12x32xf32> to vector<12x8xf32>
    %84 = tpu.transpose %82, [1, 0] : vector<12x8xf32> -> vector<8x12xf32>
    %cst_27 = arith.constant dense<0.000000e+00> : vector<12x12xf32>
    %85 = tpu.matmul %81, %84, %cst_27 {dimension_numbers = #tpu.dot_dimension_numbers<[1], [0], [0], [1], [0, 0, 1, 1], [], []>} : vector<12x8xf32>, vector<8x12xf32>, vector<12x12xf32> -> vector<12x12xf32>
    %cst_28 = arith.constant 0.353553385 : f32
    %86 = vector.broadcast %cst_28 : f32 to vector<12x12xf32>
    %87 = arith.mulf %85, %86 : vector<12x12xf32>
    %88 = arith.addf %87, %1 : vector<12x12xf32>
    %cst_29 = arith.constant dense<0xFF800000> : vector<12xf32>
    %89 = vector.multi_reduction <maximumf>, %88, %cst_29 [1] : vector<12x12xf32> to vector<12xf32>
    %90 = vector.shape_cast %89 : vector<12xf32> to vector<12x1xf32>
    %91 = vector.broadcast %90 : vector<12x1xf32> to vector<12x12xf32>
    %92 = arith.subf %88, %91 : vector<12x12xf32>
    %93 = math.exp %92 : vector<12x12xf32>
    %cst_30 = arith.constant dense<0.000000e+00> : vector<12xf32>
    %94 = vector.multi_reduction <add>, %93, %cst_30 [1] : vector<12x12xf32> to vector<12xf32>
    %95 = vector.shape_cast %94 : vector<12xf32> to vector<12x1xf32>
    %96 = tpu.reciprocal %95 {approx = true} : vector<12x1xf32> -> vector<12x1xf32>
    %97 = vector.broadcast %96 : vector<12x1xf32> to vector<12x12xf32>
    %98 = arith.mulf %93, %97 : vector<12x12xf32>
    %cst_31 = arith.constant dense<0.000000e+00> : vector<12x8xf32>
    %99 = tpu.matmul %98, %83, %cst_31 {dimension_numbers = #tpu.dot_dimension_numbers<[1], [0], [0], [1], [0, 0, 1, 1], [], []>} : vector<12x12xf32>, vector<12x8xf32>, vector<12x8xf32> -> vector<12x8xf32>
    %100 = tpu.concatenate %42, %61, %80, %99 in 1 : vector<12x8xf32>, vector<12x8xf32>, vector<12x8xf32>, vector<12x8xf32> -> vector<12x32xf32>
    %cst_32 = arith.constant dense<0.000000e+00> : vector<12x32xf32>
    %101 = tpu.matmul %100, %10, %cst_32 {dimension_numbers = #tpu.dot_dimension_numbers<[1], [0], [0], [1], [0, 0, 1, 1], [], []>} : vector<12x32xf32>, vector<32x32xf32>, vector<12x32xf32> -> vector<12x32xf32>
    %102 = arith.addf %4, %101 : vector<12x32xf32>
    %103 = vector.extract_strided_slice %8 {offsets = [3, 0], sizes = [1, 32], strides = [1, 1]} : vector<10x32xf32> to vector<1x32xf32>
    %104 = vector.broadcast %103 : vector<1x32xf32> to vector<12x32xf32>
    %105 = arith.addf %102, %104 : vector<12x32xf32>
    %cst_33 = arith.constant dense<0.000000e+00> : vector<12xf32>
    %106 = vector.multi_reduction <add>, %105, %cst_33 [1] : vector<12x32xf32> to vector<12xf32>
    %107 = vector.shape_cast %106 : vector<12xf32> to vector<12x1xf32>
    %cst_34 = arith.constant 3.200000e+01 : f32
    %108 = vector.broadcast %cst_34 : f32 to vector<12x1xf32>
    %109 = arith.divf %107, %108 : vector<12x1xf32>
    %110 = vector.broadcast %109 : vector<12x1xf32> to vector<12x32xf32>
    %111 = arith.subf %105, %110 : vector<12x32xf32>
    %112 = arith.mulf %111, %111 : vector<12x32xf32>
    %cst_35 = arith.constant dense<0.000000e+00> : vector<12xf32>
    %113 = vector.multi_reduction <add>, %112, %cst_35 [1] : vector<12x32xf32> to vector<12xf32>
    %114 = vector.shape_cast %113 : vector<12xf32> to vector<12x1xf32>
    %cst_36 = arith.constant 3.200000e+01 : f32
    %115 = vector.broadcast %cst_36 : f32 to vector<12x1xf32>
    %116 = arith.divf %114, %115 : vector<12x1xf32>
    %cst_37 = arith.constant 9.99999974E-6 : f32
    %117 = vector.broadcast %cst_37 : f32 to vector<12x1xf32>
    %118 = arith.addf %116, %117 : vector<12x1xf32>
    %119 = math.rsqrt %118 : vector<12x1xf32>
    %120 = vector.broadcast %119 : vector<12x1xf32> to vector<12x32xf32>
    %121 = arith.mulf %111, %120 : vector<12x32xf32>
    %122 = vector.extract_strided_slice %8 {offsets = [6, 0], sizes = [1, 32], strides = [1, 1]} : vector<10x32xf32> to vector<1x32xf32>
    %123 = vector.broadcast %122 : vector<1x32xf32> to vector<12x32xf32>
    %124 = arith.mulf %121, %123 : vector<12x32xf32>
    %125 = vector.extract_strided_slice %8 {offsets = [7, 0], sizes = [1, 32], strides = [1, 1]} : vector<10x32xf32> to vector<1x32xf32>
    %126 = vector.broadcast %125 : vector<1x32xf32> to vector<12x32xf32>
    %127 = arith.addf %124, %126 : vector<12x32xf32>
    %c0_38 = arith.constant 0 : index
    %c0_39 = arith.constant 0 : index
    %c0_40 = arith.constant 0 : index
    %128 = vector.load %arg7[%c0_38, %c0_39, %c0_40] : memref<2x32x8xf32, #tpu.memory_space<vmem>>, vector<1x32x8xf32>
    %129 = vector.shape_cast %128 : vector<1x32x8xf32> to vector<32x8xf32>
    %cst_41 = arith.constant dense<0.000000e+00> : vector<12x8xf32>
    %130 = tpu.matmul %127, %129, %cst_41 {dimension_numbers = #tpu.dot_dimension_numbers<[1], [0], [0], [1], [0, 0, 1, 1], [], []>} : vector<12x32xf32>, vector<32x8xf32>, vector<12x8xf32> -> vector<12x8xf32>
    %131 = vector.extract_strided_slice %8 {offsets = [4, 0], sizes = [1, 8], strides = [1, 1]} : vector<10x32xf32> to vector<1x8xf32>
    %132 = vector.broadcast %131 : vector<1x8xf32> to vector<12x8xf32>
    %133 = arith.addf %130, %132 : vector<12x8xf32>
    %cst_42 = arith.constant 0.000000e+00 : f32
    %134 = vector.broadcast %cst_42 : f32 to vector<12x8xf32>
    %135 = arith.maximumf %133, %134 : vector<12x8xf32>
    %c0_43 = arith.constant 0 : index
    %c0_44 = arith.constant 0 : index
    %c0_45 = arith.constant 0 : index
    %136 = vector.load %arg8[%c0_43, %c0_44, %c0_45] : memref<2x8x32xf32, #tpu.memory_space<vmem>>, vector<1x8x32xf32>
    %137 = vector.shape_cast %136 : vector<1x8x32xf32> to vector<8x32xf32>
    %cst_46 = arith.constant dense<0.000000e+00> : vector<12x32xf32>
    %138 = tpu.matmul %135, %137, %cst_46 {dimension_numbers = #tpu.dot_dimension_numbers<[1], [0], [0], [1], [0, 0, 1, 1], [], []>} : vector<12x8xf32>, vector<8x32xf32>, vector<12x32xf32> -> vector<12x32xf32>
    %139 = vector.extract_strided_slice %8 {offsets = [5, 0], sizes = [1, 32], strides = [1, 1]} : vector<10x32xf32> to vector<1x32xf32>
    %140 = vector.broadcast %139 : vector<1x32xf32> to vector<12x32xf32>
    %141 = arith.addf %138, %140 : vector<12x32xf32>
    %142 = arith.addf %127, %141 : vector<12x32xf32>
    %cst_47 = arith.constant dense<0.000000e+00> : vector<12xf32>
    %143 = vector.multi_reduction <add>, %142, %cst_47 [1] : vector<12x32xf32> to vector<12xf32>
    %144 = vector.shape_cast %143 : vector<12xf32> to vector<12x1xf32>
    %cst_48 = arith.constant 3.200000e+01 : f32
    %145 = vector.broadcast %cst_48 : f32 to vector<12x1xf32>
    %146 = arith.divf %144, %145 : vector<12x1xf32>
    %147 = vector.broadcast %146 : vector<12x1xf32> to vector<12x32xf32>
    %148 = arith.subf %142, %147 : vector<12x32xf32>
    %149 = arith.mulf %148, %148 : vector<12x32xf32>
    %cst_49 = arith.constant dense<0.000000e+00> : vector<12xf32>
    %150 = vector.multi_reduction <add>, %149, %cst_49 [1] : vector<12x32xf32> to vector<12xf32>
    %151 = vector.shape_cast %150 : vector<12xf32> to vector<12x1xf32>
    %cst_50 = arith.constant 3.200000e+01 : f32
    %152 = vector.broadcast %cst_50 : f32 to vector<12x1xf32>
    %153 = arith.divf %151, %152 : vector<12x1xf32>
    %cst_51 = arith.constant 9.99999974E-6 : f32
    %154 = vector.broadcast %cst_51 : f32 to vector<12x1xf32>
    %155 = arith.addf %153, %154 : vector<12x1xf32>
    %156 = math.rsqrt %155 : vector<12x1xf32>
    %157 = vector.broadcast %156 : vector<12x1xf32> to vector<12x32xf32>
    %158 = arith.mulf %148, %157 : vector<12x32xf32>
    %159 = vector.extract_strided_slice %8 {offsets = [8, 0], sizes = [1, 32], strides = [1, 1]} : vector<10x32xf32> to vector<1x32xf32>
    %160 = vector.broadcast %159 : vector<1x32xf32> to vector<12x32xf32>
    %161 = arith.mulf %158, %160 : vector<12x32xf32>
    %162 = vector.extract_strided_slice %8 {offsets = [9, 0], sizes = [1, 32], strides = [1, 1]} : vector<10x32xf32> to vector<1x32xf32>
    %163 = vector.broadcast %162 : vector<1x32xf32> to vector<12x32xf32>
    %164 = arith.addf %161, %163 : vector<12x32xf32>
    %c1 = arith.constant 1 : index
    %c0_52 = arith.constant 0 : index
    %c0_53 = arith.constant 0 : index
    %165 = vector.load %arg6[%c1, %c0_52, %c0_53] : memref<2x32x128xf32, #tpu.memory_space<vmem>>, vector<1x32x128xf32>
    %166 = vector.shape_cast %165 : vector<1x32x128xf32> to vector<32x128xf32>
    %c1_54 = arith.constant 1 : index
    %c0_55 = arith.constant 0 : index
    %c0_56 = arith.constant 0 : index
    %167 = vector.load %arg9[%c1_54, %c0_55, %c0_56] : memref<2x10x32xf32, #tpu.memory_space<vmem>>, vector<1x10x32xf32>
    %168 = vector.shape_cast %167 : vector<1x10x32xf32> to vector<10x32xf32>
    %169 = vector.extract_strided_slice %166 {offsets = [0, 0], sizes = [32, 96], strides = [1, 1]} : vector<32x128xf32> to vector<32x96xf32>
    %170 = vector.extract_strided_slice %166 {offsets = [0, 96], sizes = [32, 32], strides = [1, 1]} : vector<32x128xf32> to vector<32x32xf32>
    %cst_57 = arith.constant dense<0.000000e+00> : vector<12x96xf32>
    %171 = tpu.matmul %164, %169, %cst_57 {dimension_numbers = #tpu.dot_dimension_numbers<[1], [0], [0], [1], [0, 0, 1, 1], [], []>} : vector<12x32xf32>, vector<32x96xf32>, vector<12x96xf32> -> vector<12x96xf32>
    %172 = vector.extract_strided_slice %171 {offsets = [0, 0], sizes = [12, 32], strides = [1, 1]} : vector<12x96xf32> to vector<12x32xf32>
    %173 = vector.extract_strided_slice %168 {offsets = [0, 0], sizes = [1, 32], strides = [1, 1]} : vector<10x32xf32> to vector<1x32xf32>
    %174 = vector.broadcast %173 : vector<1x32xf32> to vector<12x32xf32>
    %175 = arith.addf %172, %174 : vector<12x32xf32>
    %176 = vector.extract_strided_slice %171 {offsets = [0, 32], sizes = [12, 32], strides = [1, 1]} : vector<12x96xf32> to vector<12x32xf32>
    %177 = vector.extract_strided_slice %168 {offsets = [1, 0], sizes = [1, 32], strides = [1, 1]} : vector<10x32xf32> to vector<1x32xf32>
    %178 = vector.broadcast %177 : vector<1x32xf32> to vector<12x32xf32>
    %179 = arith.addf %176, %178 : vector<12x32xf32>
    %180 = vector.extract_strided_slice %171 {offsets = [0, 64], sizes = [12, 32], strides = [1, 1]} : vector<12x96xf32> to vector<12x32xf32>
    %181 = vector.extract_strided_slice %168 {offsets = [2, 0], sizes = [1, 32], strides = [1, 1]} : vector<10x32xf32> to vector<1x32xf32>
    %182 = vector.broadcast %181 : vector<1x32xf32> to vector<12x32xf32>
    %183 = arith.addf %180, %182 : vector<12x32xf32>
    %184 = vector.extract_strided_slice %175 {offsets = [0, 0], sizes = [12, 8], strides = [1, 1]} : vector<12x32xf32> to vector<12x8xf32>
    %185 = vector.extract_strided_slice %179 {offsets = [0, 0], sizes = [12, 8], strides = [1, 1]} : vector<12x32xf32> to vector<12x8xf32>
    %186 = vector.extract_strided_slice %183 {offsets = [0, 0], sizes = [12, 8], strides = [1, 1]} : vector<12x32xf32> to vector<12x8xf32>
    %187 = tpu.transpose %185, [1, 0] : vector<12x8xf32> -> vector<8x12xf32>
    %cst_58 = arith.constant dense<0.000000e+00> : vector<12x12xf32>
    %188 = tpu.matmul %184, %187, %cst_58 {dimension_numbers = #tpu.dot_dimension_numbers<[1], [0], [0], [1], [0, 0, 1, 1], [], []>} : vector<12x8xf32>, vector<8x12xf32>, vector<12x12xf32> -> vector<12x12xf32>
    %cst_59 = arith.constant 0.353553385 : f32
    %189 = vector.broadcast %cst_59 : f32 to vector<12x12xf32>
    %190 = arith.mulf %188, %189 : vector<12x12xf32>
    %191 = arith.addf %190, %1 : vector<12x12xf32>
    %cst_60 = arith.constant dense<0xFF800000> : vector<12xf32>
    %192 = vector.multi_reduction <maximumf>, %191, %cst_60 [1] : vector<12x12xf32> to vector<12xf32>
    %193 = vector.shape_cast %192 : vector<12xf32> to vector<12x1xf32>
    %194 = vector.broadcast %193 : vector<12x1xf32> to vector<12x12xf32>
    %195 = arith.subf %191, %194 : vector<12x12xf32>
    %196 = math.exp %195 : vector<12x12xf32>
    %cst_61 = arith.constant dense<0.000000e+00> : vector<12xf32>
    %197 = vector.multi_reduction <add>, %196, %cst_61 [1] : vector<12x12xf32> to vector<12xf32>
    %198 = vector.shape_cast %197 : vector<12xf32> to vector<12x1xf32>
    %199 = tpu.reciprocal %198 {approx = true} : vector<12x1xf32> -> vector<12x1xf32>
    %200 = vector.broadcast %199 : vector<12x1xf32> to vector<12x12xf32>
    %201 = arith.mulf %196, %200 : vector<12x12xf32>
    %cst_62 = arith.constant dense<0.000000e+00> : vector<12x8xf32>
    %202 = tpu.matmul %201, %186, %cst_62 {dimension_numbers = #tpu.dot_dimension_numbers<[1], [0], [0], [1], [0, 0, 1, 1], [], []>} : vector<12x12xf32>, vector<12x8xf32>, vector<12x8xf32> -> vector<12x8xf32>
    %203 = vector.extract_strided_slice %175 {offsets = [0, 8], sizes = [12, 8], strides = [1, 1]} : vector<12x32xf32> to vector<12x8xf32>
    %204 = vector.extract_strided_slice %179 {offsets = [0, 8], sizes = [12, 8], strides = [1, 1]} : vector<12x32xf32> to vector<12x8xf32>
    %205 = vector.extract_strided_slice %183 {offsets = [0, 8], sizes = [12, 8], strides = [1, 1]} : vector<12x32xf32> to vector<12x8xf32>
    %206 = tpu.transpose %204, [1, 0] : vector<12x8xf32> -> vector<8x12xf32>
    %cst_63 = arith.constant dense<0.000000e+00> : vector<12x12xf32>
    %207 = tpu.matmul %203, %206, %cst_63 {dimension_numbers = #tpu.dot_dimension_numbers<[1], [0], [0], [1], [0, 0, 1, 1], [], []>} : vector<12x8xf32>, vector<8x12xf32>, vector<12x12xf32> -> vector<12x12xf32>
    %cst_64 = arith.constant 0.353553385 : f32
    %208 = vector.broadcast %cst_64 : f32 to vector<12x12xf32>
    %209 = arith.mulf %207, %208 : vector<12x12xf32>
    %210 = arith.addf %209, %1 : vector<12x12xf32>
    %cst_65 = arith.constant dense<0xFF800000> : vector<12xf32>
    %211 = vector.multi_reduction <maximumf>, %210, %cst_65 [1] : vector<12x12xf32> to vector<12xf32>
    %212 = vector.shape_cast %211 : vector<12xf32> to vector<12x1xf32>
    %213 = vector.broadcast %212 : vector<12x1xf32> to vector<12x12xf32>
    %214 = arith.subf %210, %213 : vector<12x12xf32>
    %215 = math.exp %214 : vector<12x12xf32>
    %cst_66 = arith.constant dense<0.000000e+00> : vector<12xf32>
    %216 = vector.multi_reduction <add>, %215, %cst_66 [1] : vector<12x12xf32> to vector<12xf32>
    %217 = vector.shape_cast %216 : vector<12xf32> to vector<12x1xf32>
    %218 = tpu.reciprocal %217 {approx = true} : vector<12x1xf32> -> vector<12x1xf32>
    %219 = vector.broadcast %218 : vector<12x1xf32> to vector<12x12xf32>
    %220 = arith.mulf %215, %219 : vector<12x12xf32>
    %cst_67 = arith.constant dense<0.000000e+00> : vector<12x8xf32>
    %221 = tpu.matmul %220, %205, %cst_67 {dimension_numbers = #tpu.dot_dimension_numbers<[1], [0], [0], [1], [0, 0, 1, 1], [], []>} : vector<12x12xf32>, vector<12x8xf32>, vector<12x8xf32> -> vector<12x8xf32>
    %222 = vector.extract_strided_slice %175 {offsets = [0, 16], sizes = [12, 8], strides = [1, 1]} : vector<12x32xf32> to vector<12x8xf32>
    %223 = vector.extract_strided_slice %179 {offsets = [0, 16], sizes = [12, 8], strides = [1, 1]} : vector<12x32xf32> to vector<12x8xf32>
    %224 = vector.extract_strided_slice %183 {offsets = [0, 16], sizes = [12, 8], strides = [1, 1]} : vector<12x32xf32> to vector<12x8xf32>
    %225 = tpu.transpose %223, [1, 0] : vector<12x8xf32> -> vector<8x12xf32>
    %cst_68 = arith.constant dense<0.000000e+00> : vector<12x12xf32>
    %226 = tpu.matmul %222, %225, %cst_68 {dimension_numbers = #tpu.dot_dimension_numbers<[1], [0], [0], [1], [0, 0, 1, 1], [], []>} : vector<12x8xf32>, vector<8x12xf32>, vector<12x12xf32> -> vector<12x12xf32>
    %cst_69 = arith.constant 0.353553385 : f32
    %227 = vector.broadcast %cst_69 : f32 to vector<12x12xf32>
    %228 = arith.mulf %226, %227 : vector<12x12xf32>
    %229 = arith.addf %228, %1 : vector<12x12xf32>
    %cst_70 = arith.constant dense<0xFF800000> : vector<12xf32>
    %230 = vector.multi_reduction <maximumf>, %229, %cst_70 [1] : vector<12x12xf32> to vector<12xf32>
    %231 = vector.shape_cast %230 : vector<12xf32> to vector<12x1xf32>
    %232 = vector.broadcast %231 : vector<12x1xf32> to vector<12x12xf32>
    %233 = arith.subf %229, %232 : vector<12x12xf32>
    %234 = math.exp %233 : vector<12x12xf32>
    %cst_71 = arith.constant dense<0.000000e+00> : vector<12xf32>
    %235 = vector.multi_reduction <add>, %234, %cst_71 [1] : vector<12x12xf32> to vector<12xf32>
    %236 = vector.shape_cast %235 : vector<12xf32> to vector<12x1xf32>
    %237 = tpu.reciprocal %236 {approx = true} : vector<12x1xf32> -> vector<12x1xf32>
    %238 = vector.broadcast %237 : vector<12x1xf32> to vector<12x12xf32>
    %239 = arith.mulf %234, %238 : vector<12x12xf32>
    %cst_72 = arith.constant dense<0.000000e+00> : vector<12x8xf32>
    %240 = tpu.matmul %239, %224, %cst_72 {dimension_numbers = #tpu.dot_dimension_numbers<[1], [0], [0], [1], [0, 0, 1, 1], [], []>} : vector<12x12xf32>, vector<12x8xf32>, vector<12x8xf32> -> vector<12x8xf32>
    %241 = vector.extract_strided_slice %175 {offsets = [0, 24], sizes = [12, 8], strides = [1, 1]} : vector<12x32xf32> to vector<12x8xf32>
    %242 = vector.extract_strided_slice %179 {offsets = [0, 24], sizes = [12, 8], strides = [1, 1]} : vector<12x32xf32> to vector<12x8xf32>
    %243 = vector.extract_strided_slice %183 {offsets = [0, 24], sizes = [12, 8], strides = [1, 1]} : vector<12x32xf32> to vector<12x8xf32>
    %244 = tpu.transpose %242, [1, 0] : vector<12x8xf32> -> vector<8x12xf32>
    %cst_73 = arith.constant dense<0.000000e+00> : vector<12x12xf32>
    %245 = tpu.matmul %241, %244, %cst_73 {dimension_numbers = #tpu.dot_dimension_numbers<[1], [0], [0], [1], [0, 0, 1, 1], [], []>} : vector<12x8xf32>, vector<8x12xf32>, vector<12x12xf32> -> vector<12x12xf32>
    %cst_74 = arith.constant 0.353553385 : f32
    %246 = vector.broadcast %cst_74 : f32 to vector<12x12xf32>
    %247 = arith.mulf %245, %246 : vector<12x12xf32>
    %248 = arith.addf %247, %1 : vector<12x12xf32>
    %cst_75 = arith.constant dense<0xFF800000> : vector<12xf32>
    %249 = vector.multi_reduction <maximumf>, %248, %cst_75 [1] : vector<12x12xf32> to vector<12xf32>
    %250 = vector.shape_cast %249 : vector<12xf32> to vector<12x1xf32>
    %251 = vector.broadcast %250 : vector<12x1xf32> to vector<12x12xf32>
    %252 = arith.subf %248, %251 : vector<12x12xf32>
    %253 = math.exp %252 : vector<12x12xf32>
    %cst_76 = arith.constant dense<0.000000e+00> : vector<12xf32>
    %254 = vector.multi_reduction <add>, %253, %cst_76 [1] : vector<12x12xf32> to vector<12xf32>
    %255 = vector.shape_cast %254 : vector<12xf32> to vector<12x1xf32>
    %256 = tpu.reciprocal %255 {approx = true} : vector<12x1xf32> -> vector<12x1xf32>
    %257 = vector.broadcast %256 : vector<12x1xf32> to vector<12x12xf32>
    %258 = arith.mulf %253, %257 : vector<12x12xf32>
    %cst_77 = arith.constant dense<0.000000e+00> : vector<12x8xf32>
    %259 = tpu.matmul %258, %243, %cst_77 {dimension_numbers = #tpu.dot_dimension_numbers<[1], [0], [0], [1], [0, 0, 1, 1], [], []>} : vector<12x12xf32>, vector<12x8xf32>, vector<12x8xf32> -> vector<12x8xf32>
    %260 = tpu.concatenate %202, %221, %240, %259 in 1 : vector<12x8xf32>, vector<12x8xf32>, vector<12x8xf32>, vector<12x8xf32> -> vector<12x32xf32>
    %cst_78 = arith.constant dense<0.000000e+00> : vector<12x32xf32>
    %261 = tpu.matmul %260, %170, %cst_78 {dimension_numbers = #tpu.dot_dimension_numbers<[1], [0], [0], [1], [0, 0, 1, 1], [], []>} : vector<12x32xf32>, vector<32x32xf32>, vector<12x32xf32> -> vector<12x32xf32>
    %262 = arith.addf %164, %261 : vector<12x32xf32>
    %263 = vector.extract_strided_slice %168 {offsets = [3, 0], sizes = [1, 32], strides = [1, 1]} : vector<10x32xf32> to vector<1x32xf32>
    %264 = vector.broadcast %263 : vector<1x32xf32> to vector<12x32xf32>
    %265 = arith.addf %262, %264 : vector<12x32xf32>
    %cst_79 = arith.constant dense<0.000000e+00> : vector<12xf32>
    %266 = vector.multi_reduction <add>, %265, %cst_79 [1] : vector<12x32xf32> to vector<12xf32>
    %267 = vector.shape_cast %266 : vector<12xf32> to vector<12x1xf32>
    %cst_80 = arith.constant 3.200000e+01 : f32
    %268 = vector.broadcast %cst_80 : f32 to vector<12x1xf32>
    %269 = arith.divf %267, %268 : vector<12x1xf32>
    %270 = vector.broadcast %269 : vector<12x1xf32> to vector<12x32xf32>
    %271 = arith.subf %265, %270 : vector<12x32xf32>
    %272 = arith.mulf %271, %271 : vector<12x32xf32>
    %cst_81 = arith.constant dense<0.000000e+00> : vector<12xf32>
    %273 = vector.multi_reduction <add>, %272, %cst_81 [1] : vector<12x32xf32> to vector<12xf32>
    %274 = vector.shape_cast %273 : vector<12xf32> to vector<12x1xf32>
    %cst_82 = arith.constant 3.200000e+01 : f32
    %275 = vector.broadcast %cst_82 : f32 to vector<12x1xf32>
    %276 = arith.divf %274, %275 : vector<12x1xf32>
    %cst_83 = arith.constant 9.99999974E-6 : f32
    %277 = vector.broadcast %cst_83 : f32 to vector<12x1xf32>
    %278 = arith.addf %276, %277 : vector<12x1xf32>
    %279 = math.rsqrt %278 : vector<12x1xf32>
    %280 = vector.broadcast %279 : vector<12x1xf32> to vector<12x32xf32>
    %281 = arith.mulf %271, %280 : vector<12x32xf32>
    %282 = vector.extract_strided_slice %168 {offsets = [6, 0], sizes = [1, 32], strides = [1, 1]} : vector<10x32xf32> to vector<1x32xf32>
    %283 = vector.broadcast %282 : vector<1x32xf32> to vector<12x32xf32>
    %284 = arith.mulf %281, %283 : vector<12x32xf32>
    %285 = vector.extract_strided_slice %168 {offsets = [7, 0], sizes = [1, 32], strides = [1, 1]} : vector<10x32xf32> to vector<1x32xf32>
    %286 = vector.broadcast %285 : vector<1x32xf32> to vector<12x32xf32>
    %287 = arith.addf %284, %286 : vector<12x32xf32>
    %c1_84 = arith.constant 1 : index
    %c0_85 = arith.constant 0 : index
    %c0_86 = arith.constant 0 : index
    %288 = vector.load %arg7[%c1_84, %c0_85, %c0_86] : memref<2x32x8xf32, #tpu.memory_space<vmem>>, vector<1x32x8xf32>
    %289 = vector.shape_cast %288 : vector<1x32x8xf32> to vector<32x8xf32>
    %cst_87 = arith.constant dense<0.000000e+00> : vector<12x8xf32>
    %290 = tpu.matmul %287, %289, %cst_87 {dimension_numbers = #tpu.dot_dimension_numbers<[1], [0], [0], [1], [0, 0, 1, 1], [], []>} : vector<12x32xf32>, vector<32x8xf32>, vector<12x8xf32> -> vector<12x8xf32>
    %291 = vector.extract_strided_slice %168 {offsets = [4, 0], sizes = [1, 8], strides = [1, 1]} : vector<10x32xf32> to vector<1x8xf32>
    %292 = vector.broadcast %291 : vector<1x8xf32> to vector<12x8xf32>
    %293 = arith.addf %290, %292 : vector<12x8xf32>
    %cst_88 = arith.constant 0.000000e+00 : f32
    %294 = vector.broadcast %cst_88 : f32 to vector<12x8xf32>
    %295 = arith.maximumf %293, %294 : vector<12x8xf32>
    %c1_89 = arith.constant 1 : index
    %c0_90 = arith.constant 0 : index
    %c0_91 = arith.constant 0 : index
    %296 = vector.load %arg8[%c1_89, %c0_90, %c0_91] : memref<2x8x32xf32, #tpu.memory_space<vmem>>, vector<1x8x32xf32>
    %297 = vector.shape_cast %296 : vector<1x8x32xf32> to vector<8x32xf32>
    %cst_92 = arith.constant dense<0.000000e+00> : vector<12x32xf32>
    %298 = tpu.matmul %295, %297, %cst_92 {dimension_numbers = #tpu.dot_dimension_numbers<[1], [0], [0], [1], [0, 0, 1, 1], [], []>} : vector<12x8xf32>, vector<8x32xf32>, vector<12x32xf32> -> vector<12x32xf32>
    %299 = vector.extract_strided_slice %168 {offsets = [5, 0], sizes = [1, 32], strides = [1, 1]} : vector<10x32xf32> to vector<1x32xf32>
    %300 = vector.broadcast %299 : vector<1x32xf32> to vector<12x32xf32>
    %301 = arith.addf %298, %300 : vector<12x32xf32>
    %302 = arith.addf %287, %301 : vector<12x32xf32>
    %cst_93 = arith.constant dense<0.000000e+00> : vector<12xf32>
    %303 = vector.multi_reduction <add>, %302, %cst_93 [1] : vector<12x32xf32> to vector<12xf32>
    %304 = vector.shape_cast %303 : vector<12xf32> to vector<12x1xf32>
    %cst_94 = arith.constant 3.200000e+01 : f32
    %305 = vector.broadcast %cst_94 : f32 to vector<12x1xf32>
    %306 = arith.divf %304, %305 : vector<12x1xf32>
    %307 = vector.broadcast %306 : vector<12x1xf32> to vector<12x32xf32>
    %308 = arith.subf %302, %307 : vector<12x32xf32>
    %309 = arith.mulf %308, %308 : vector<12x32xf32>
    %cst_95 = arith.constant dense<0.000000e+00> : vector<12xf32>
    %310 = vector.multi_reduction <add>, %309, %cst_95 [1] : vector<12x32xf32> to vector<12xf32>
    %311 = vector.shape_cast %310 : vector<12xf32> to vector<12x1xf32>
    %cst_96 = arith.constant 3.200000e+01 : f32
    %312 = vector.broadcast %cst_96 : f32 to vector<12x1xf32>
    %313 = arith.divf %311, %312 : vector<12x1xf32>
    %cst_97 = arith.constant 9.99999974E-6 : f32
    %314 = vector.broadcast %cst_97 : f32 to vector<12x1xf32>
    %315 = arith.addf %313, %314 : vector<12x1xf32>
    %316 = math.rsqrt %315 : vector<12x1xf32>
    %317 = vector.broadcast %316 : vector<12x1xf32> to vector<12x32xf32>
    %318 = arith.mulf %308, %317 : vector<12x32xf32>
    %319 = vector.extract_strided_slice %168 {offsets = [8, 0], sizes = [1, 32], strides = [1, 1]} : vector<10x32xf32> to vector<1x32xf32>
    %320 = vector.broadcast %319 : vector<1x32xf32> to vector<12x32xf32>
    %321 = arith.mulf %318, %320 : vector<12x32xf32>
    %322 = vector.extract_strided_slice %168 {offsets = [9, 0], sizes = [1, 32], strides = [1, 1]} : vector<10x32xf32> to vector<1x32xf32>
    %323 = vector.broadcast %322 : vector<1x32xf32> to vector<12x32xf32>
    %324 = arith.addf %321, %323 : vector<12x32xf32>
    %325 = vector.extract_strided_slice %324 {offsets = [9, 0], sizes = [3, 32], strides = [1, 1]} : vector<12x32xf32> to vector<3x32xf32>
    %326 = vector.extract_strided_slice %3 {offsets = [9, 0], sizes = [3, 32], strides = [1, 1]} : vector<12x32xf32> to vector<3x32xf32>
    %327 = arith.addf %326, %325 : vector<3x32xf32>
    %c0_98 = arith.constant 0 : index
    %c0_99 = arith.constant 0 : index
    %c0_100 = arith.constant 0 : index
    %c0_101 = arith.constant 0 : index
    %328 = vector.load %arg10[%c0_98, %c0_99, %c0_100, %c0_101] : memref<1x3x3x32xf32, #tpu.memory_space<vmem>>, vector<1x1x3x32xf32>
    %329 = vector.shape_cast %328 : vector<1x1x3x32xf32> to vector<3x32xf32>
    %330 = vector.shape_cast %327 : vector<3x32xf32> to vector<1x1x3x32xf32>
    tpu.vector_store %arg10[%c0_98, %c0_99, %c0_100, %c0_101], %330 {strides = array<i32>} : memref<1x3x3x32xf32, #tpu.memory_space<vmem>>, vector<1x1x3x32xf32>,
    %c0_102 = arith.constant 0 : index
    %c0_103 = arith.constant 0 : index
    %c0_104 = arith.constant 0 : index
    %c0_105 = arith.constant 0 : index
    %331 = vector.load %arg2[%c0_102, %c0_103, %c0_104, %c0_105] : memref<1x3x3x32xf32, #tpu.memory_space<vmem>>, vector<1x1x3x32xf32>
    %332 = vector.shape_cast %331 : vector<1x1x3x32xf32> to vector<3x32xf32>
    %333 = arith.subf %327, %332 : vector<3x32xf32>
    %c0_106 = arith.constant 0 : index
    %c0_107 = arith.constant 0 : index
    %c0_108 = arith.constant 0 : index
    %c0_109 = arith.constant 0 : index
    %334 = vector.load %arg3[%c0_106, %c0_107, %c0_108, %c0_109] : memref<1x3x3x32xf32, #tpu.memory_space<vmem>>, vector<1x1x3x32xf32>
    %335 = vector.shape_cast %334 : vector<1x1x3x32xf32> to vector<3x32xf32>
    %336 = arith.subf %327, %335 : vector<3x32xf32>
    %337 = arith.mulf %333, %333 : vector<3x32xf32>
    %338 = vector.shape_cast %337 : vector<3x32xf32> to vector<1x3x32xf32>
    %cst_110 = arith.constant dense<0.000000e+00> : vector<1xf32>
    %339 = vector.multi_reduction <add>, %338, %cst_110 [1, 2] : vector<1x3x32xf32> to vector<1xf32>
    %340 = vector.shape_cast %339 : vector<1xf32> to vector<1x1x1xf32>
    %341 = vector.extract %340[0, 0, 0] : f32 from vector<1x1x1xf32>
    %342 = vector.broadcast %341 : f32 to vector<1x1xf32>
    %343 = arith.mulf %336, %336 : vector<3x32xf32>
    %344 = vector.shape_cast %343 : vector<3x32xf32> to vector<1x3x32xf32>
    %cst_111 = arith.constant dense<0.000000e+00> : vector<1xf32>
    %345 = vector.multi_reduction <add>, %344, %cst_111 [1, 2] : vector<1x3x32xf32> to vector<1xf32>
    %346 = vector.shape_cast %345 : vector<1xf32> to vector<1x1x1xf32>
    %347 = vector.extract %346[0, 0, 0] : f32 from vector<1x1x1xf32>
    %348 = vector.broadcast %347 : f32 to vector<1x1xf32>
    %349 = vector.extract_strided_slice %3 {offsets = [3, 0], sizes = [9, 32], strides = [1, 1]} : vector<12x32xf32> to vector<9x32xf32>
    %350 = tpu.concatenate %349, %327 in 0 : vector<9x32xf32>, vector<3x32xf32> -> vector<12x32xf32>
    %351 = arith.addf %350, %0 : vector<12x32xf32>
    %c0_112 = arith.constant 0 : index
    %c0_113 = arith.constant 0 : index
    %c0_114 = arith.constant 0 : index
    %352 = vector.load %arg6[%c0_112, %c0_113, %c0_114] : memref<2x32x128xf32, #tpu.memory_space<vmem>>, vector<1x32x128xf32>
    %353 = vector.shape_cast %352 : vector<1x32x128xf32> to vector<32x128xf32>
    %c0_115 = arith.constant 0 : index
    %c0_116 = arith.constant 0 : index
    %c0_117 = arith.constant 0 : index
    %354 = vector.load %arg9[%c0_115, %c0_116, %c0_117] : memref<2x10x32xf32, #tpu.memory_space<vmem>>, vector<1x10x32xf32>
    %355 = vector.shape_cast %354 : vector<1x10x32xf32> to vector<10x32xf32>
    %356 = vector.extract_strided_slice %353 {offsets = [0, 0], sizes = [32, 96], strides = [1, 1]} : vector<32x128xf32> to vector<32x96xf32>
    %357 = vector.extract_strided_slice %353 {offsets = [0, 96], sizes = [32, 32], strides = [1, 1]} : vector<32x128xf32> to vector<32x32xf32>
    %cst_118 = arith.constant dense<0.000000e+00> : vector<12x96xf32>
    %358 = tpu.matmul %351, %356, %cst_118 {dimension_numbers = #tpu.dot_dimension_numbers<[1], [0], [0], [1], [0, 0, 1, 1], [], []>} : vector<12x32xf32>, vector<32x96xf32>, vector<12x96xf32> -> vector<12x96xf32>
    %359 = vector.extract_strided_slice %358 {offsets = [0, 0], sizes = [12, 32], strides = [1, 1]} : vector<12x96xf32> to vector<12x32xf32>
    %360 = vector.extract_strided_slice %355 {offsets = [0, 0], sizes = [1, 32], strides = [1, 1]} : vector<10x32xf32> to vector<1x32xf32>
    %361 = vector.broadcast %360 : vector<1x32xf32> to vector<12x32xf32>
    %362 = arith.addf %359, %361 : vector<12x32xf32>
    %363 = vector.extract_strided_slice %358 {offsets = [0, 32], sizes = [12, 32], strides = [1, 1]} : vector<12x96xf32> to vector<12x32xf32>
    %364 = vector.extract_strided_slice %355 {offsets = [1, 0], sizes = [1, 32], strides = [1, 1]} : vector<10x32xf32> to vector<1x32xf32>
    %365 = vector.broadcast %364 : vector<1x32xf32> to vector<12x32xf32>
    %366 = arith.addf %363, %365 : vector<12x32xf32>
    %367 = vector.extract_strided_slice %358 {offsets = [0, 64], sizes = [12, 32], strides = [1, 1]} : vector<12x96xf32> to vector<12x32xf32>
    %368 = vector.extract_strided_slice %355 {offsets = [2, 0], sizes = [1, 32], strides = [1, 1]} : vector<10x32xf32> to vector<1x32xf32>
    %369 = vector.broadcast %368 : vector<1x32xf32> to vector<12x32xf32>
    %370 = arith.addf %367, %369 : vector<12x32xf32>
    %371 = vector.extract_strided_slice %362 {offsets = [0, 0], sizes = [12, 8], strides = [1, 1]} : vector<12x32xf32> to vector<12x8xf32>
    %372 = vector.extract_strided_slice %366 {offsets = [0, 0], sizes = [12, 8], strides = [1, 1]} : vector<12x32xf32> to vector<12x8xf32>
    %373 = vector.extract_strided_slice %370 {offsets = [0, 0], sizes = [12, 8], strides = [1, 1]} : vector<12x32xf32> to vector<12x8xf32>
    %374 = tpu.transpose %372, [1, 0] : vector<12x8xf32> -> vector<8x12xf32>
    %cst_119 = arith.constant dense<0.000000e+00> : vector<12x12xf32>
    %375 = tpu.matmul %371, %374, %cst_119 {dimension_numbers = #tpu.dot_dimension_numbers<[1], [0], [0], [1], [0, 0, 1, 1], [], []>} : vector<12x8xf32>, vector<8x12xf32>, vector<12x12xf32> -> vector<12x12xf32>
    %cst_120 = arith.constant 0.353553385 : f32
    %376 = vector.broadcast %cst_120 : f32 to vector<12x12xf32>
    %377 = arith.mulf %375, %376 : vector<12x12xf32>
    %378 = arith.addf %377, %1 : vector<12x12xf32>
    %cst_121 = arith.constant dense<0xFF800000> : vector<12xf32>
    %379 = vector.multi_reduction <maximumf>, %378, %cst_121 [1] : vector<12x12xf32> to vector<12xf32>
    %380 = vector.shape_cast %379 : vector<12xf32> to vector<12x1xf32>
    %381 = vector.broadcast %380 : vector<12x1xf32> to vector<12x12xf32>
    %382 = arith.subf %378, %381 : vector<12x12xf32>
    %383 = math.exp %382 : vector<12x12xf32>
    %cst_122 = arith.constant dense<0.000000e+00> : vector<12xf32>
    %384 = vector.multi_reduction <add>, %383, %cst_122 [1] : vector<12x12xf32> to vector<12xf32>
    %385 = vector.shape_cast %384 : vector<12xf32> to vector<12x1xf32>
    %386 = tpu.reciprocal %385 {approx = true} : vector<12x1xf32> -> vector<12x1xf32>
    %387 = vector.broadcast %386 : vector<12x1xf32> to vector<12x12xf32>
    %388 = arith.mulf %383, %387 : vector<12x12xf32>
    %cst_123 = arith.constant dense<0.000000e+00> : vector<12x8xf32>
    %389 = tpu.matmul %388, %373, %cst_123 {dimension_numbers = #tpu.dot_dimension_numbers<[1], [0], [0], [1], [0, 0, 1, 1], [], []>} : vector<12x12xf32>, vector<12x8xf32>, vector<12x8xf32> -> vector<12x8xf32>
    %390 = vector.extract_strided_slice %362 {offsets = [0, 8], sizes = [12, 8], strides = [1, 1]} : vector<12x32xf32> to vector<12x8xf32>
    %391 = vector.extract_strided_slice %366 {offsets = [0, 8], sizes = [12, 8], strides = [1, 1]} : vector<12x32xf32> to vector<12x8xf32>
    %392 = vector.extract_strided_slice %370 {offsets = [0, 8], sizes = [12, 8], strides = [1, 1]} : vector<12x32xf32> to vector<12x8xf32>
    %393 = tpu.transpose %391, [1, 0] : vector<12x8xf32> -> vector<8x12xf32>
    %cst_124 = arith.constant dense<0.000000e+00> : vector<12x12xf32>
    %394 = tpu.matmul %390, %393, %cst_124 {dimension_numbers = #tpu.dot_dimension_numbers<[1], [0], [0], [1], [0, 0, 1, 1], [], []>} : vector<12x8xf32>, vector<8x12xf32>, vector<12x12xf32> -> vector<12x12xf32>
    %cst_125 = arith.constant 0.353553385 : f32
    %395 = vector.broadcast %cst_125 : f32 to vector<12x12xf32>
    %396 = arith.mulf %394, %395 : vector<12x12xf32>
    %397 = arith.addf %396, %1 : vector<12x12xf32>
    %cst_126 = arith.constant dense<0xFF800000> : vector<12xf32>
    %398 = vector.multi_reduction <maximumf>, %397, %cst_126 [1] : vector<12x12xf32> to vector<12xf32>
    %399 = vector.shape_cast %398 : vector<12xf32> to vector<12x1xf32>
    %400 = vector.broadcast %399 : vector<12x1xf32> to vector<12x12xf32>
    %401 = arith.subf %397, %400 : vector<12x12xf32>
    %402 = math.exp %401 : vector<12x12xf32>
    %cst_127 = arith.constant dense<0.000000e+00> : vector<12xf32>
    %403 = vector.multi_reduction <add>, %402, %cst_127 [1] : vector<12x12xf32> to vector<12xf32>
    %404 = vector.shape_cast %403 : vector<12xf32> to vector<12x1xf32>
    %405 = tpu.reciprocal %404 {approx = true} : vector<12x1xf32> -> vector<12x1xf32>
    %406 = vector.broadcast %405 : vector<12x1xf32> to vector<12x12xf32>
    %407 = arith.mulf %402, %406 : vector<12x12xf32>
    %cst_128 = arith.constant dense<0.000000e+00> : vector<12x8xf32>
    %408 = tpu.matmul %407, %392, %cst_128 {dimension_numbers = #tpu.dot_dimension_numbers<[1], [0], [0], [1], [0, 0, 1, 1], [], []>} : vector<12x12xf32>, vector<12x8xf32>, vector<12x8xf32> -> vector<12x8xf32>
    %409 = vector.extract_strided_slice %362 {offsets = [0, 16], sizes = [12, 8], strides = [1, 1]} : vector<12x32xf32> to vector<12x8xf32>
    %410 = vector.extract_strided_slice %366 {offsets = [0, 16], sizes = [12, 8], strides = [1, 1]} : vector<12x32xf32> to vector<12x8xf32>
    %411 = vector.extract_strided_slice %370 {offsets = [0, 16], sizes = [12, 8], strides = [1, 1]} : vector<12x32xf32> to vector<12x8xf32>
    %412 = tpu.transpose %410, [1, 0] : vector<12x8xf32> -> vector<8x12xf32>
    %cst_129 = arith.constant dense<0.000000e+00> : vector<12x12xf32>
    %413 = tpu.matmul %409, %412, %cst_129 {dimension_numbers = #tpu.dot_dimension_numbers<[1], [0], [0], [1], [0, 0, 1, 1], [], []>} : vector<12x8xf32>, vector<8x12xf32>, vector<12x12xf32> -> vector<12x12xf32>
    %cst_130 = arith.constant 0.353553385 : f32
    %414 = vector.broadcast %cst_130 : f32 to vector<12x12xf32>
    %415 = arith.mulf %413, %414 : vector<12x12xf32>
    %416 = arith.addf %415, %1 : vector<12x12xf32>
    %cst_131 = arith.constant dense<0xFF800000> : vector<12xf32>
    %417 = vector.multi_reduction <maximumf>, %416, %cst_131 [1] : vector<12x12xf32> to vector<12xf32>
    %418 = vector.shape_cast %417 : vector<12xf32> to vector<12x1xf32>
    %419 = vector.broadcast %418 : vector<12x1xf32> to vector<12x12xf32>
    %420 = arith.subf %416, %419 : vector<12x12xf32>
    %421 = math.exp %420 : vector<12x12xf32>
    %cst_132 = arith.constant dense<0.000000e+00> : vector<12xf32>
    %422 = vector.multi_reduction <add>, %421, %cst_132 [1] : vector<12x12xf32> to vector<12xf32>
    %423 = vector.shape_cast %422 : vector<12xf32> to vector<12x1xf32>
    %424 = tpu.reciprocal %423 {approx = true} : vector<12x1xf32> -> vector<12x1xf32>
    %425 = vector.broadcast %424 : vector<12x1xf32> to vector<12x12xf32>
    %426 = arith.mulf %421, %425 : vector<12x12xf32>
    %cst_133 = arith.constant dense<0.000000e+00> : vector<12x8xf32>
    %427 = tpu.matmul %426, %411, %cst_133 {dimension_numbers = #tpu.dot_dimension_numbers<[1], [0], [0], [1], [0, 0, 1, 1], [], []>} : vector<12x12xf32>, vector<12x8xf32>, vector<12x8xf32> -> vector<12x8xf32>
    %428 = vector.extract_strided_slice %362 {offsets = [0, 24], sizes = [12, 8], strides = [1, 1]} : vector<12x32xf32> to vector<12x8xf32>
    %429 = vector.extract_strided_slice %366 {offsets = [0, 24], sizes = [12, 8], strides = [1, 1]} : vector<12x32xf32> to vector<12x8xf32>
    %430 = vector.extract_strided_slice %370 {offsets = [0, 24], sizes = [12, 8], strides = [1, 1]} : vector<12x32xf32> to vector<12x8xf32>
    %431 = tpu.transpose %429, [1, 0] : vector<12x8xf32> -> vector<8x12xf32>
    %cst_134 = arith.constant dense<0.000000e+00> : vector<12x12xf32>
    %432 = tpu.matmul %428, %431, %cst_134 {dimension_numbers = #tpu.dot_dimension_numbers<[1], [0], [0], [1], [0, 0, 1, 1], [], []>} : vector<12x8xf32>, vector<8x12xf32>, vector<12x12xf32> -> vector<12x12xf32>
    %cst_135 = arith.constant 0.353553385 : f32
    %433 = vector.broadcast %cst_135 : f32 to vector<12x12xf32>
    %434 = arith.mulf %432, %433 : vector<12x12xf32>
    %435 = arith.addf %434, %1 : vector<12x12xf32>
    %cst_136 = arith.constant dense<0xFF800000> : vector<12xf32>
    %436 = vector.multi_reduction <maximumf>, %435, %cst_136 [1] : vector<12x12xf32> to vector<12xf32>
    %437 = vector.shape_cast %436 : vector<12xf32> to vector<12x1xf32>
    %438 = vector.broadcast %437 : vector<12x1xf32> to vector<12x12xf32>
    %439 = arith.subf %435, %438 : vector<12x12xf32>
    %440 = math.exp %439 : vector<12x12xf32>
    %cst_137 = arith.constant dense<0.000000e+00> : vector<12xf32>
    %441 = vector.multi_reduction <add>, %440, %cst_137 [1] : vector<12x12xf32> to vector<12xf32>
    %442 = vector.shape_cast %441 : vector<12xf32> to vector<12x1xf32>
    %443 = tpu.reciprocal %442 {approx = true} : vector<12x1xf32> -> vector<12x1xf32>
    %444 = vector.broadcast %443 : vector<12x1xf32> to vector<12x12xf32>
    %445 = arith.mulf %440, %444 : vector<12x12xf32>
    %cst_138 = arith.constant dense<0.000000e+00> : vector<12x8xf32>
    %446 = tpu.matmul %445, %430, %cst_138 {dimension_numbers = #tpu.dot_dimension_numbers<[1], [0], [0], [1], [0, 0, 1, 1], [], []>} : vector<12x12xf32>, vector<12x8xf32>, vector<12x8xf32> -> vector<12x8xf32>
    %447 = tpu.concatenate %389, %408, %427, %446 in 1 : vector<12x8xf32>, vector<12x8xf32>, vector<12x8xf32>, vector<12x8xf32> -> vector<12x32xf32>
    %cst_139 = arith.constant dense<0.000000e+00> : vector<12x32xf32>
    %448 = tpu.matmul %447, %357, %cst_139 {dimension_numbers = #tpu.dot_dimension_numbers<[1], [0], [0], [1], [0, 0, 1, 1], [], []>} : vector<12x32xf32>, vector<32x32xf32>, vector<12x32xf32> -> vector<12x32xf32>
    %449 = arith.addf %351, %448 : vector<12x32xf32>
    %450 = vector.extract_strided_slice %355 {offsets = [3, 0], sizes = [1, 32], strides = [1, 1]} : vector<10x32xf32> to vector<1x32xf32>
    %451 = vector.broadcast %450 : vector<1x32xf32> to vector<12x32xf32>
    %452 = arith.addf %449, %451 : vector<12x32xf32>
    %cst_140 = arith.constant dense<0.000000e+00> : vector<12xf32>
    %453 = vector.multi_reduction <add>, %452, %cst_140 [1] : vector<12x32xf32> to vector<12xf32>
    %454 = vector.shape_cast %453 : vector<12xf32> to vector<12x1xf32>
    %cst_141 = arith.constant 3.200000e+01 : f32
    %455 = vector.broadcast %cst_141 : f32 to vector<12x1xf32>
    %456 = arith.divf %454, %455 : vector<12x1xf32>
    %457 = vector.broadcast %456 : vector<12x1xf32> to vector<12x32xf32>
    %458 = arith.subf %452, %457 : vector<12x32xf32>
    %459 = arith.mulf %458, %458 : vector<12x32xf32>
    %cst_142 = arith.constant dense<0.000000e+00> : vector<12xf32>
    %460 = vector.multi_reduction <add>, %459, %cst_142 [1] : vector<12x32xf32> to vector<12xf32>
    %461 = vector.shape_cast %460 : vector<12xf32> to vector<12x1xf32>
    %cst_143 = arith.constant 3.200000e+01 : f32
    %462 = vector.broadcast %cst_143 : f32 to vector<12x1xf32>
    %463 = arith.divf %461, %462 : vector<12x1xf32>
    %cst_144 = arith.constant 9.99999974E-6 : f32
    %464 = vector.broadcast %cst_144 : f32 to vector<12x1xf32>
    %465 = arith.addf %463, %464 : vector<12x1xf32>
    %466 = math.rsqrt %465 : vector<12x1xf32>
    %467 = vector.broadcast %466 : vector<12x1xf32> to vector<12x32xf32>
    %468 = arith.mulf %458, %467 : vector<12x32xf32>
    %469 = vector.extract_strided_slice %355 {offsets = [6, 0], sizes = [1, 32], strides = [1, 1]} : vector<10x32xf32> to vector<1x32xf32>
    %470 = vector.broadcast %469 : vector<1x32xf32> to vector<12x32xf32>
    %471 = arith.mulf %468, %470 : vector<12x32xf32>
    %472 = vector.extract_strided_slice %355 {offsets = [7, 0], sizes = [1, 32], strides = [1, 1]} : vector<10x32xf32> to vector<1x32xf32>
    %473 = vector.broadcast %472 : vector<1x32xf32> to vector<12x32xf32>
    %474 = arith.addf %471, %473 : vector<12x32xf32>
    %c0_145 = arith.constant 0 : index
    %c0_146 = arith.constant 0 : index
    %c0_147 = arith.constant 0 : index
    %475 = vector.load %arg7[%c0_145, %c0_146, %c0_147] : memref<2x32x8xf32, #tpu.memory_space<vmem>>, vector<1x32x8xf32>
    %476 = vector.shape_cast %475 : vector<1x32x8xf32> to vector<32x8xf32>
    %cst_148 = arith.constant dense<0.000000e+00> : vector<12x8xf32>
    %477 = tpu.matmul %474, %476, %cst_148 {dimension_numbers = #tpu.dot_dimension_numbers<[1], [0], [0], [1], [0, 0, 1, 1], [], []>} : vector<12x32xf32>, vector<32x8xf32>, vector<12x8xf32> -> vector<12x8xf32>
    %478 = vector.extract_strided_slice %355 {offsets = [4, 0], sizes = [1, 8], strides = [1, 1]} : vector<10x32xf32> to vector<1x8xf32>
    %479 = vector.broadcast %478 : vector<1x8xf32> to vector<12x8xf32>
    %480 = arith.addf %477, %479 : vector<12x8xf32>
    %cst_149 = arith.constant 0.000000e+00 : f32
    %481 = vector.broadcast %cst_149 : f32 to vector<12x8xf32>
    %482 = arith.maximumf %480, %481 : vector<12x8xf32>
    %c0_150 = arith.constant 0 : index
    %c0_151 = arith.constant 0 : index
    %c0_152 = arith.constant 0 : index
    %483 = vector.load %arg8[%c0_150, %c0_151, %c0_152] : memref<2x8x32xf32, #tpu.memory_space<vmem>>, vector<1x8x32xf32>
    %484 = vector.shape_cast %483 : vector<1x8x32xf32> to vector<8x32xf32>
    %cst_153 = arith.constant dense<0.000000e+00> : vector<12x32xf32>
    %485 = tpu.matmul %482, %484, %cst_153 {dimension_numbers = #tpu.dot_dimension_numbers<[1], [0], [0], [1], [0, 0, 1, 1], [], []>} : vector<12x8xf32>, vector<8x32xf32>, vector<12x32xf32> -> vector<12x32xf32>
    %486 = vector.extract_strided_slice %355 {offsets = [5, 0], sizes = [1, 32], strides = [1, 1]} : vector<10x32xf32> to vector<1x32xf32>
    %487 = vector.broadcast %486 : vector<1x32xf32> to vector<12x32xf32>
    %488 = arith.addf %485, %487 : vector<12x32xf32>
    %489 = arith.addf %474, %488 : vector<12x32xf32>
    %cst_154 = arith.constant dense<0.000000e+00> : vector<12xf32>
    %490 = vector.multi_reduction <add>, %489, %cst_154 [1] : vector<12x32xf32> to vector<12xf32>
    %491 = vector.shape_cast %490 : vector<12xf32> to vector<12x1xf32>
    %cst_155 = arith.constant 3.200000e+01 : f32
    %492 = vector.broadcast %cst_155 : f32 to vector<12x1xf32>
    %493 = arith.divf %491, %492 : vector<12x1xf32>
    %494 = vector.broadcast %493 : vector<12x1xf32> to vector<12x32xf32>
    %495 = arith.subf %489, %494 : vector<12x32xf32>
    %496 = arith.mulf %495, %495 : vector<12x32xf32>
    %cst_156 = arith.constant dense<0.000000e+00> : vector<12xf32>
    %497 = vector.multi_reduction <add>, %496, %cst_156 [1] : vector<12x32xf32> to vector<12xf32>
    %498 = vector.shape_cast %497 : vector<12xf32> to vector<12x1xf32>
    %cst_157 = arith.constant 3.200000e+01 : f32
    %499 = vector.broadcast %cst_157 : f32 to vector<12x1xf32>
    %500 = arith.divf %498, %499 : vector<12x1xf32>
    %cst_158 = arith.constant 9.99999974E-6 : f32
    %501 = vector.broadcast %cst_158 : f32 to vector<12x1xf32>
    %502 = arith.addf %500, %501 : vector<12x1xf32>
    %503 = math.rsqrt %502 : vector<12x1xf32>
    %504 = vector.broadcast %503 : vector<12x1xf32> to vector<12x32xf32>
    %505 = arith.mulf %495, %504 : vector<12x32xf32>
    %506 = vector.extract_strided_slice %355 {offsets = [8, 0], sizes = [1, 32], strides = [1, 1]} : vector<10x32xf32> to vector<1x32xf32>
    %507 = vector.broadcast %506 : vector<1x32xf32> to vector<12x32xf32>
    %508 = arith.mulf %505, %507 : vector<12x32xf32>
    %509 = vector.extract_strided_slice %355 {offsets = [9, 0], sizes = [1, 32], strides = [1, 1]} : vector<10x32xf32> to vector<1x32xf32>
    %510 = vector.broadcast %509 : vector<1x32xf32> to vector<12x32xf32>
    %511 = arith.addf %508, %510 : vector<12x32xf32>
    %c1_159 = arith.constant 1 : index
    %c0_160 = arith.constant 0 : index
    %c0_161 = arith.constant 0 : index
    %512 = vector.load %arg6[%c1_159, %c0_160, %c0_161] : memref<2x32x128xf32, #tpu.memory_space<vmem>>, vector<1x32x128xf32>
    %513 = vector.shape_cast %512 : vector<1x32x128xf32> to vector<32x128xf32>
    %c1_162 = arith.constant 1 : index
    %c0_163 = arith.constant 0 : index
    %c0_164 = arith.constant 0 : index
    %514 = vector.load %arg9[%c1_162, %c0_163, %c0_164] : memref<2x10x32xf32, #tpu.memory_space<vmem>>, vector<1x10x32xf32>
    %515 = vector.shape_cast %514 : vector<1x10x32xf32> to vector<10x32xf32>
    %516 = vector.extract_strided_slice %513 {offsets = [0, 0], sizes = [32, 96], strides = [1, 1]} : vector<32x128xf32> to vector<32x96xf32>
    %517 = vector.extract_strided_slice %513 {offsets = [0, 96], sizes = [32, 32], strides = [1, 1]} : vector<32x128xf32> to vector<32x32xf32>
    %cst_165 = arith.constant dense<0.000000e+00> : vector<12x96xf32>
    %518 = tpu.matmul %511, %516, %cst_165 {dimension_numbers = #tpu.dot_dimension_numbers<[1], [0], [0], [1], [0, 0, 1, 1], [], []>} : vector<12x32xf32>, vector<32x96xf32>, vector<12x96xf32> -> vector<12x96xf32>
    %519 = vector.extract_strided_slice %518 {offsets = [0, 0], sizes = [12, 32], strides = [1, 1]} : vector<12x96xf32> to vector<12x32xf32>
    %520 = vector.extract_strided_slice %515 {offsets = [0, 0], sizes = [1, 32], strides = [1, 1]} : vector<10x32xf32> to vector<1x32xf32>
    %521 = vector.broadcast %520 : vector<1x32xf32> to vector<12x32xf32>
    %522 = arith.addf %519, %521 : vector<12x32xf32>
    %523 = vector.extract_strided_slice %518 {offsets = [0, 32], sizes = [12, 32], strides = [1, 1]} : vector<12x96xf32> to vector<12x32xf32>
    %524 = vector.extract_strided_slice %515 {offsets = [1, 0], sizes = [1, 32], strides = [1, 1]} : vector<10x32xf32> to vector<1x32xf32>
    %525 = vector.broadcast %524 : vector<1x32xf32> to vector<12x32xf32>
    %526 = arith.addf %523, %525 : vector<12x32xf32>
    %527 = vector.extract_strided_slice %518 {offsets = [0, 64], sizes = [12, 32], strides = [1, 1]} : vector<12x96xf32> to vector<12x32xf32>
    %528 = vector.extract_strided_slice %515 {offsets = [2, 0], sizes = [1, 32], strides = [1, 1]} : vector<10x32xf32> to vector<1x32xf32>
    %529 = vector.broadcast %528 : vector<1x32xf32> to vector<12x32xf32>
    %530 = arith.addf %527, %529 : vector<12x32xf32>
    %531 = vector.extract_strided_slice %522 {offsets = [0, 0], sizes = [12, 8], strides = [1, 1]} : vector<12x32xf32> to vector<12x8xf32>
    %532 = vector.extract_strided_slice %526 {offsets = [0, 0], sizes = [12, 8], strides = [1, 1]} : vector<12x32xf32> to vector<12x8xf32>
    %533 = vector.extract_strided_slice %530 {offsets = [0, 0], sizes = [12, 8], strides = [1, 1]} : vector<12x32xf32> to vector<12x8xf32>
    %534 = tpu.transpose %532, [1, 0] : vector<12x8xf32> -> vector<8x12xf32>
    %cst_166 = arith.constant dense<0.000000e+00> : vector<12x12xf32>
    %535 = tpu.matmul %531, %534, %cst_166 {dimension_numbers = #tpu.dot_dimension_numbers<[1], [0], [0], [1], [0, 0, 1, 1], [], []>} : vector<12x8xf32>, vector<8x12xf32>, vector<12x12xf32> -> vector<12x12xf32>
    %cst_167 = arith.constant 0.353553385 : f32
    %536 = vector.broadcast %cst_167 : f32 to vector<12x12xf32>
    %537 = arith.mulf %535, %536 : vector<12x12xf32>
    %538 = arith.addf %537, %1 : vector<12x12xf32>
    %cst_168 = arith.constant dense<0xFF800000> : vector<12xf32>
    %539 = vector.multi_reduction <maximumf>, %538, %cst_168 [1] : vector<12x12xf32> to vector<12xf32>
    %540 = vector.shape_cast %539 : vector<12xf32> to vector<12x1xf32>
    %541 = vector.broadcast %540 : vector<12x1xf32> to vector<12x12xf32>
    %542 = arith.subf %538, %541 : vector<12x12xf32>
    %543 = math.exp %542 : vector<12x12xf32>
    %cst_169 = arith.constant dense<0.000000e+00> : vector<12xf32>
    %544 = vector.multi_reduction <add>, %543, %cst_169 [1] : vector<12x12xf32> to vector<12xf32>
    %545 = vector.shape_cast %544 : vector<12xf32> to vector<12x1xf32>
    %546 = tpu.reciprocal %545 {approx = true} : vector<12x1xf32> -> vector<12x1xf32>
    %547 = vector.broadcast %546 : vector<12x1xf32> to vector<12x12xf32>
    %548 = arith.mulf %543, %547 : vector<12x12xf32>
    %cst_170 = arith.constant dense<0.000000e+00> : vector<12x8xf32>
    %549 = tpu.matmul %548, %533, %cst_170 {dimension_numbers = #tpu.dot_dimension_numbers<[1], [0], [0], [1], [0, 0, 1, 1], [], []>} : vector<12x12xf32>, vector<12x8xf32>, vector<12x8xf32> -> vector<12x8xf32>
    %550 = vector.extract_strided_slice %522 {offsets = [0, 8], sizes = [12, 8], strides = [1, 1]} : vector<12x32xf32> to vector<12x8xf32>
    %551 = vector.extract_strided_slice %526 {offsets = [0, 8], sizes = [12, 8], strides = [1, 1]} : vector<12x32xf32> to vector<12x8xf32>
    %552 = vector.extract_strided_slice %530 {offsets = [0, 8], sizes = [12, 8], strides = [1, 1]} : vector<12x32xf32> to vector<12x8xf32>
    %553 = tpu.transpose %551, [1, 0] : vector<12x8xf32> -> vector<8x12xf32>
    %cst_171 = arith.constant dense<0.000000e+00> : vector<12x12xf32>
    %554 = tpu.matmul %550, %553, %cst_171 {dimension_numbers = #tpu.dot_dimension_numbers<[1], [0], [0], [1], [0, 0, 1, 1], [], []>} : vector<12x8xf32>, vector<8x12xf32>, vector<12x12xf32> -> vector<12x12xf32>
    %cst_172 = arith.constant 0.353553385 : f32
    %555 = vector.broadcast %cst_172 : f32 to vector<12x12xf32>
    %556 = arith.mulf %554, %555 : vector<12x12xf32>
    %557 = arith.addf %556, %1 : vector<12x12xf32>
    %cst_173 = arith.constant dense<0xFF800000> : vector<12xf32>
    %558 = vector.multi_reduction <maximumf>, %557, %cst_173 [1] : vector<12x12xf32> to vector<12xf32>
    %559 = vector.shape_cast %558 : vector<12xf32> to vector<12x1xf32>
    %560 = vector.broadcast %559 : vector<12x1xf32> to vector<12x12xf32>
    %561 = arith.subf %557, %560 : vector<12x12xf32>
    %562 = math.exp %561 : vector<12x12xf32>
    %cst_174 = arith.constant dense<0.000000e+00> : vector<12xf32>
    %563 = vector.multi_reduction <add>, %562, %cst_174 [1] : vector<12x12xf32> to vector<12xf32>
    %564 = vector.shape_cast %563 : vector<12xf32> to vector<12x1xf32>
    %565 = tpu.reciprocal %564 {approx = true} : vector<12x1xf32> -> vector<12x1xf32>
    %566 = vector.broadcast %565 : vector<12x1xf32> to vector<12x12xf32>
    %567 = arith.mulf %562, %566 : vector<12x12xf32>
    %cst_175 = arith.constant dense<0.000000e+00> : vector<12x8xf32>
    %568 = tpu.matmul %567, %552, %cst_175 {dimension_numbers = #tpu.dot_dimension_numbers<[1], [0], [0], [1], [0, 0, 1, 1], [], []>} : vector<12x12xf32>, vector<12x8xf32>, vector<12x8xf32> -> vector<12x8xf32>
    %569 = vector.extract_strided_slice %522 {offsets = [0, 16], sizes = [12, 8], strides = [1, 1]} : vector<12x32xf32> to vector<12x8xf32>
    %570 = vector.extract_strided_slice %526 {offsets = [0, 16], sizes = [12, 8], strides = [1, 1]} : vector<12x32xf32> to vector<12x8xf32>
    %571 = vector.extract_strided_slice %530 {offsets = [0, 16], sizes = [12, 8], strides = [1, 1]} : vector<12x32xf32> to vector<12x8xf32>
    %572 = tpu.transpose %570, [1, 0] : vector<12x8xf32> -> vector<8x12xf32>
    %cst_176 = arith.constant dense<0.000000e+00> : vector<12x12xf32>
    %573 = tpu.matmul %569, %572, %cst_176 {dimension_numbers = #tpu.dot_dimension_numbers<[1], [0], [0], [1], [0, 0, 1, 1], [], []>} : vector<12x8xf32>, vector<8x12xf32>, vector<12x12xf32> -> vector<12x12xf32>
    %cst_177 = arith.constant 0.353553385 : f32
    %574 = vector.broadcast %cst_177 : f32 to vector<12x12xf32>
    %575 = arith.mulf %573, %574 : vector<12x12xf32>
    %576 = arith.addf %575, %1 : vector<12x12xf32>
    %cst_178 = arith.constant dense<0xFF800000> : vector<12xf32>
    %577 = vector.multi_reduction <maximumf>, %576, %cst_178 [1] : vector<12x12xf32> to vector<12xf32>
    %578 = vector.shape_cast %577 : vector<12xf32> to vector<12x1xf32>
    %579 = vector.broadcast %578 : vector<12x1xf32> to vector<12x12xf32>
    %580 = arith.subf %576, %579 : vector<12x12xf32>
    %581 = math.exp %580 : vector<12x12xf32>
    %cst_179 = arith.constant dense<0.000000e+00> : vector<12xf32>
    %582 = vector.multi_reduction <add>, %581, %cst_179 [1] : vector<12x12xf32> to vector<12xf32>
    %583 = vector.shape_cast %582 : vector<12xf32> to vector<12x1xf32>
    %584 = tpu.reciprocal %583 {approx = true} : vector<12x1xf32> -> vector<12x1xf32>
    %585 = vector.broadcast %584 : vector<12x1xf32> to vector<12x12xf32>
    %586 = arith.mulf %581, %585 : vector<12x12xf32>
    %cst_180 = arith.constant dense<0.000000e+00> : vector<12x8xf32>
    %587 = tpu.matmul %586, %571, %cst_180 {dimension_numbers = #tpu.dot_dimension_numbers<[1], [0], [0], [1], [0, 0, 1, 1], [], []>} : vector<12x12xf32>, vector<12x8xf32>, vector<12x8xf32> -> vector<12x8xf32>
    %588 = vector.extract_strided_slice %522 {offsets = [0, 24], sizes = [12, 8], strides = [1, 1]} : vector<12x32xf32> to vector<12x8xf32>
    %589 = vector.extract_strided_slice %526 {offsets = [0, 24], sizes = [12, 8], strides = [1, 1]} : vector<12x32xf32> to vector<12x8xf32>
    %590 = vector.extract_strided_slice %530 {offsets = [0, 24], sizes = [12, 8], strides = [1, 1]} : vector<12x32xf32> to vector<12x8xf32>
    %591 = tpu.transpose %589, [1, 0] : vector<12x8xf32> -> vector<8x12xf32>
    %cst_181 = arith.constant dense<0.000000e+00> : vector<12x12xf32>
    %592 = tpu.matmul %588, %591, %cst_181 {dimension_numbers = #tpu.dot_dimension_numbers<[1], [0], [0], [1], [0, 0, 1, 1], [], []>} : vector<12x8xf32>, vector<8x12xf32>, vector<12x12xf32> -> vector<12x12xf32>
    %cst_182 = arith.constant 0.353553385 : f32
    %593 = vector.broadcast %cst_182 : f32 to vector<12x12xf32>
    %594 = arith.mulf %592, %593 : vector<12x12xf32>
    %595 = arith.addf %594, %1 : vector<12x12xf32>
    %cst_183 = arith.constant dense<0xFF800000> : vector<12xf32>
    %596 = vector.multi_reduction <maximumf>, %595, %cst_183 [1] : vector<12x12xf32> to vector<12xf32>
    %597 = vector.shape_cast %596 : vector<12xf32> to vector<12x1xf32>
    %598 = vector.broadcast %597 : vector<12x1xf32> to vector<12x12xf32>
    %599 = arith.subf %595, %598 : vector<12x12xf32>
    %600 = math.exp %599 : vector<12x12xf32>
    %cst_184 = arith.constant dense<0.000000e+00> : vector<12xf32>
    %601 = vector.multi_reduction <add>, %600, %cst_184 [1] : vector<12x12xf32> to vector<12xf32>
    %602 = vector.shape_cast %601 : vector<12xf32> to vector<12x1xf32>
    %603 = tpu.reciprocal %602 {approx = true} : vector<12x1xf32> -> vector<12x1xf32>
    %604 = vector.broadcast %603 : vector<12x1xf32> to vector<12x12xf32>
    %605 = arith.mulf %600, %604 : vector<12x12xf32>
    %cst_185 = arith.constant dense<0.000000e+00> : vector<12x8xf32>
    %606 = tpu.matmul %605, %590, %cst_185 {dimension_numbers = #tpu.dot_dimension_numbers<[1], [0], [0], [1], [0, 0, 1, 1], [], []>} : vector<12x12xf32>, vector<12x8xf32>, vector<12x8xf32> -> vector<12x8xf32>
    %607 = tpu.concatenate %549, %568, %587, %606 in 1 : vector<12x8xf32>, vector<12x8xf32>, vector<12x8xf32>, vector<12x8xf32> -> vector<12x32xf32>
    %cst_186 = arith.constant dense<0.000000e+00> : vector<12x32xf32>
    %608 = tpu.matmul %607, %517, %cst_186 {dimension_numbers = #tpu.dot_dimension_numbers<[1], [0], [0], [1], [0, 0, 1, 1], [], []>} : vector<12x32xf32>, vector<32x32xf32>, vector<12x32xf32> -> vector<12x32xf32>
    %609 = arith.addf %511, %608 : vector<12x32xf32>
    %610 = vector.extract_strided_slice %515 {offsets = [3, 0], sizes = [1, 32], strides = [1, 1]} : vector<10x32xf32> to vector<1x32xf32>
    %611 = vector.broadcast %610 : vector<1x32xf32> to vector<12x32xf32>
    %612 = arith.addf %609, %611 : vector<12x32xf32>
    %cst_187 = arith.constant dense<0.000000e+00> : vector<12xf32>
    %613 = vector.multi_reduction <add>, %612, %cst_187 [1] : vector<12x32xf32> to vector<12xf32>
    %614 = vector.shape_cast %613 : vector<12xf32> to vector<12x1xf32>
    %cst_188 = arith.constant 3.200000e+01 : f32
    %615 = vector.broadcast %cst_188 : f32 to vector<12x1xf32>
    %616 = arith.divf %614, %615 : vector<12x1xf32>
    %617 = vector.broadcast %616 : vector<12x1xf32> to vector<12x32xf32>
    %618 = arith.subf %612, %617 : vector<12x32xf32>
    %619 = arith.mulf %618, %618 : vector<12x32xf32>
    %cst_189 = arith.constant dense<0.000000e+00> : vector<12xf32>
    %620 = vector.multi_reduction <add>, %619, %cst_189 [1] : vector<12x32xf32> to vector<12xf32>
    %621 = vector.shape_cast %620 : vector<12xf32> to vector<12x1xf32>
    %cst_190 = arith.constant 3.200000e+01 : f32
    %622 = vector.broadcast %cst_190 : f32 to vector<12x1xf32>
    %623 = arith.divf %621, %622 : vector<12x1xf32>
    %cst_191 = arith.constant 9.99999974E-6 : f32
    %624 = vector.broadcast %cst_191 : f32 to vector<12x1xf32>
    %625 = arith.addf %623, %624 : vector<12x1xf32>
    %626 = math.rsqrt %625 : vector<12x1xf32>
    %627 = vector.broadcast %626 : vector<12x1xf32> to vector<12x32xf32>
    %628 = arith.mulf %618, %627 : vector<12x32xf32>
    %629 = vector.extract_strided_slice %515 {offsets = [6, 0], sizes = [1, 32], strides = [1, 1]} : vector<10x32xf32> to vector<1x32xf32>
    %630 = vector.broadcast %629 : vector<1x32xf32> to vector<12x32xf32>
    %631 = arith.mulf %628, %630 : vector<12x32xf32>
    %632 = vector.extract_strided_slice %515 {offsets = [7, 0], sizes = [1, 32], strides = [1, 1]} : vector<10x32xf32> to vector<1x32xf32>
    %633 = vector.broadcast %632 : vector<1x32xf32> to vector<12x32xf32>
    %634 = arith.addf %631, %633 : vector<12x32xf32>
    %c1_192 = arith.constant 1 : index
    %c0_193 = arith.constant 0 : index
    %c0_194 = arith.constant 0 : index
    %635 = vector.load %arg7[%c1_192, %c0_193, %c0_194] : memref<2x32x8xf32, #tpu.memory_space<vmem>>, vector<1x32x8xf32>
    %636 = vector.shape_cast %635 : vector<1x32x8xf32> to vector<32x8xf32>
    %cst_195 = arith.constant dense<0.000000e+00> : vector<12x8xf32>
    %637 = tpu.matmul %634, %636, %cst_195 {dimension_numbers = #tpu.dot_dimension_numbers<[1], [0], [0], [1], [0, 0, 1, 1], [], []>} : vector<12x32xf32>, vector<32x8xf32>, vector<12x8xf32> -> vector<12x8xf32>
    %638 = vector.extract_strided_slice %515 {offsets = [4, 0], sizes = [1, 8], strides = [1, 1]} : vector<10x32xf32> to vector<1x8xf32>
    %639 = vector.broadcast %638 : vector<1x8xf32> to vector<12x8xf32>
    %640 = arith.addf %637, %639 : vector<12x8xf32>
    %cst_196 = arith.constant 0.000000e+00 : f32
    %641 = vector.broadcast %cst_196 : f32 to vector<12x8xf32>
    %642 = arith.maximumf %640, %641 : vector<12x8xf32>
    %c1_197 = arith.constant 1 : index
    %c0_198 = arith.constant 0 : index
    %c0_199 = arith.constant 0 : index
    %643 = vector.load %arg8[%c1_197, %c0_198, %c0_199] : memref<2x8x32xf32, #tpu.memory_space<vmem>>, vector<1x8x32xf32>
    %644 = vector.shape_cast %643 : vector<1x8x32xf32> to vector<8x32xf32>
    %cst_200 = arith.constant dense<0.000000e+00> : vector<12x32xf32>
    %645 = tpu.matmul %642, %644, %cst_200 {dimension_numbers = #tpu.dot_dimension_numbers<[1], [0], [0], [1], [0, 0, 1, 1], [], []>} : vector<12x8xf32>, vector<8x32xf32>, vector<12x32xf32> -> vector<12x32xf32>
    %646 = vector.extract_strided_slice %515 {offsets = [5, 0], sizes = [1, 32], strides = [1, 1]} : vector<10x32xf32> to vector<1x32xf32>
    %647 = vector.broadcast %646 : vector<1x32xf32> to vector<12x32xf32>
    %648 = arith.addf %645, %647 : vector<12x32xf32>
    %649 = arith.addf %634, %648 : vector<12x32xf32>
    %cst_201 = arith.constant dense<0.000000e+00> : vector<12xf32>
    %650 = vector.multi_reduction <add>, %649, %cst_201 [1] : vector<12x32xf32> to vector<12xf32>
    %651 = vector.shape_cast %650 : vector<12xf32> to vector<12x1xf32>
    %cst_202 = arith.constant 3.200000e+01 : f32
    %652 = vector.broadcast %cst_202 : f32 to vector<12x1xf32>
    %653 = arith.divf %651, %652 : vector<12x1xf32>
    %654 = vector.broadcast %653 : vector<12x1xf32> to vector<12x32xf32>
    %655 = arith.subf %649, %654 : vector<12x32xf32>
    %656 = arith.mulf %655, %655 : vector<12x32xf32>
    %cst_203 = arith.constant dense<0.000000e+00> : vector<12xf32>
    %657 = vector.multi_reduction <add>, %656, %cst_203 [1] : vector<12x32xf32> to vector<12xf32>
    %658 = vector.shape_cast %657 : vector<12xf32> to vector<12x1xf32>
    %cst_204 = arith.constant 3.200000e+01 : f32
    %659 = vector.broadcast %cst_204 : f32 to vector<12x1xf32>
    %660 = arith.divf %658, %659 : vector<12x1xf32>
    %cst_205 = arith.constant 9.99999974E-6 : f32
    %661 = vector.broadcast %cst_205 : f32 to vector<12x1xf32>
    %662 = arith.addf %660, %661 : vector<12x1xf32>
    %663 = math.rsqrt %662 : vector<12x1xf32>
    %664 = vector.broadcast %663 : vector<12x1xf32> to vector<12x32xf32>
    %665 = arith.mulf %655, %664 : vector<12x32xf32>
    %666 = vector.extract_strided_slice %515 {offsets = [8, 0], sizes = [1, 32], strides = [1, 1]} : vector<10x32xf32> to vector<1x32xf32>
    %667 = vector.broadcast %666 : vector<1x32xf32> to vector<12x32xf32>
    %668 = arith.mulf %665, %667 : vector<12x32xf32>
    %669 = vector.extract_strided_slice %515 {offsets = [9, 0], sizes = [1, 32], strides = [1, 1]} : vector<10x32xf32> to vector<1x32xf32>
    %670 = vector.broadcast %669 : vector<1x32xf32> to vector<12x32xf32>
    %671 = arith.addf %668, %670 : vector<12x32xf32>
    %672 = vector.extract_strided_slice %671 {offsets = [9, 0], sizes = [3, 32], strides = [1, 1]} : vector<12x32xf32> to vector<3x32xf32>
    %673 = vector.extract_strided_slice %350 {offsets = [9, 0], sizes = [3, 32], strides = [1, 1]} : vector<12x32xf32> to vector<3x32xf32>
    %674 = arith.addf %673, %672 : vector<3x32xf32>
    %c0_206 = arith.constant 0 : index
    %c1_207 = arith.constant 1 : index
    %c0_208 = arith.constant 0 : index
    %c0_209 = arith.constant 0 : index
    %675 = vector.load %arg10[%c0_206, %c1_207, %c0_208, %c0_209] : memref<1x3x3x32xf32, #tpu.memory_space<vmem>>, vector<1x1x3x32xf32>
    %676 = vector.shape_cast %675 : vector<1x1x3x32xf32> to vector<3x32xf32>
    %677 = vector.shape_cast %674 : vector<3x32xf32> to vector<1x1x3x32xf32>
    tpu.vector_store %arg10[%c0_206, %c1_207, %c0_208, %c0_209], %677 {strides = array<i32>} : memref<1x3x3x32xf32, #tpu.memory_space<vmem>>, vector<1x1x3x32xf32>,
    %c0_210 = arith.constant 0 : index
    %c1_211 = arith.constant 1 : index
    %c0_212 = arith.constant 0 : index
    %c0_213 = arith.constant 0 : index
    %678 = vector.load %arg2[%c0_210, %c1_211, %c0_212, %c0_213] : memref<1x3x3x32xf32, #tpu.memory_space<vmem>>, vector<1x1x3x32xf32>
    %679 = vector.shape_cast %678 : vector<1x1x3x32xf32> to vector<3x32xf32>
    %680 = arith.subf %674, %679 : vector<3x32xf32>
    %c0_214 = arith.constant 0 : index
    %c1_215 = arith.constant 1 : index
    %c0_216 = arith.constant 0 : index
    %c0_217 = arith.constant 0 : index
    %681 = vector.load %arg3[%c0_214, %c1_215, %c0_216, %c0_217] : memref<1x3x3x32xf32, #tpu.memory_space<vmem>>, vector<1x1x3x32xf32>
    %682 = vector.shape_cast %681 : vector<1x1x3x32xf32> to vector<3x32xf32>
    %683 = arith.subf %674, %682 : vector<3x32xf32>
    %684 = arith.mulf %680, %680 : vector<3x32xf32>
    %685 = vector.shape_cast %684 : vector<3x32xf32> to vector<1x3x32xf32>
    %cst_218 = arith.constant dense<0.000000e+00> : vector<1xf32>
    %686 = vector.multi_reduction <add>, %685, %cst_218 [1, 2] : vector<1x3x32xf32> to vector<1xf32>
    %687 = vector.shape_cast %686 : vector<1xf32> to vector<1x1x1xf32>
    %688 = vector.extract %687[0, 0, 0] : f32 from vector<1x1x1xf32>
    %689 = vector.broadcast %688 : f32 to vector<1x1xf32>
    %690 = arith.mulf %683, %683 : vector<3x32xf32>
    %691 = vector.shape_cast %690 : vector<3x32xf32> to vector<1x3x32xf32>
    %cst_219 = arith.constant dense<0.000000e+00> : vector<1xf32>
    %692 = vector.multi_reduction <add>, %691, %cst_219 [1, 2] : vector<1x3x32xf32> to vector<1xf32>
    %693 = vector.shape_cast %692 : vector<1xf32> to vector<1x1x1xf32>
    %694 = vector.extract %693[0, 0, 0] : f32 from vector<1x1x1xf32>
    %695 = vector.broadcast %694 : f32 to vector<1x1xf32>
    %696 = vector.extract_strided_slice %350 {offsets = [3, 0], sizes = [9, 32], strides = [1, 1]} : vector<12x32xf32> to vector<9x32xf32>
    %697 = tpu.concatenate %696, %674 in 0 : vector<9x32xf32>, vector<3x32xf32> -> vector<12x32xf32>
    %698 = arith.addf %697, %0 : vector<12x32xf32>
    %c0_220 = arith.constant 0 : index
    %c0_221 = arith.constant 0 : index
    %c0_222 = arith.constant 0 : index
    %699 = vector.load %arg6[%c0_220, %c0_221, %c0_222] : memref<2x32x128xf32, #tpu.memory_space<vmem>>, vector<1x32x128xf32>
    %700 = vector.shape_cast %699 : vector<1x32x128xf32> to vector<32x128xf32>
    %c0_223 = arith.constant 0 : index
    %c0_224 = arith.constant 0 : index
    %c0_225 = arith.constant 0 : index
    %701 = vector.load %arg9[%c0_223, %c0_224, %c0_225] : memref<2x10x32xf32, #tpu.memory_space<vmem>>, vector<1x10x32xf32>
    %702 = vector.shape_cast %701 : vector<1x10x32xf32> to vector<10x32xf32>
    %703 = vector.extract_strided_slice %700 {offsets = [0, 0], sizes = [32, 96], strides = [1, 1]} : vector<32x128xf32> to vector<32x96xf32>
    %704 = vector.extract_strided_slice %700 {offsets = [0, 96], sizes = [32, 32], strides = [1, 1]} : vector<32x128xf32> to vector<32x32xf32>
    %cst_226 = arith.constant dense<0.000000e+00> : vector<12x96xf32>
    %705 = tpu.matmul %698, %703, %cst_226 {dimension_numbers = #tpu.dot_dimension_numbers<[1], [0], [0], [1], [0, 0, 1, 1], [], []>} : vector<12x32xf32>, vector<32x96xf32>, vector<12x96xf32> -> vector<12x96xf32>
    %706 = vector.extract_strided_slice %705 {offsets = [0, 0], sizes = [12, 32], strides = [1, 1]} : vector<12x96xf32> to vector<12x32xf32>
    %707 = vector.extract_strided_slice %702 {offsets = [0, 0], sizes = [1, 32], strides = [1, 1]} : vector<10x32xf32> to vector<1x32xf32>
    %708 = vector.broadcast %707 : vector<1x32xf32> to vector<12x32xf32>
    %709 = arith.addf %706, %708 : vector<12x32xf32>
    %710 = vector.extract_strided_slice %705 {offsets = [0, 32], sizes = [12, 32], strides = [1, 1]} : vector<12x96xf32> to vector<12x32xf32>
    %711 = vector.extract_strided_slice %702 {offsets = [1, 0], sizes = [1, 32], strides = [1, 1]} : vector<10x32xf32> to vector<1x32xf32>
    %712 = vector.broadcast %711 : vector<1x32xf32> to vector<12x32xf32>
    %713 = arith.addf %710, %712 : vector<12x32xf32>
    %714 = vector.extract_strided_slice %705 {offsets = [0, 64], sizes = [12, 32], strides = [1, 1]} : vector<12x96xf32> to vector<12x32xf32>
    %715 = vector.extract_strided_slice %702 {offsets = [2, 0], sizes = [1, 32], strides = [1, 1]} : vector<10x32xf32> to vector<1x32xf32>
    %716 = vector.broadcast %715 : vector<1x32xf32> to vector<12x32xf32>
    %717 = arith.addf %714, %716 : vector<12x32xf32>
    %718 = vector.extract_strided_slice %709 {offsets = [0, 0], sizes = [12, 8], strides = [1, 1]} : vector<12x32xf32> to vector<12x8xf32>
    %719 = vector.extract_strided_slice %713 {offsets = [0, 0], sizes = [12, 8], strides = [1, 1]} : vector<12x32xf32> to vector<12x8xf32>
    %720 = vector.extract_strided_slice %717 {offsets = [0, 0], sizes = [12, 8], strides = [1, 1]} : vector<12x32xf32> to vector<12x8xf32>
    %721 = tpu.transpose %719, [1, 0] : vector<12x8xf32> -> vector<8x12xf32>
    %cst_227 = arith.constant dense<0.000000e+00> : vector<12x12xf32>
    %722 = tpu.matmul %718, %721, %cst_227 {dimension_numbers = #tpu.dot_dimension_numbers<[1], [0], [0], [1], [0, 0, 1, 1], [], []>} : vector<12x8xf32>, vector<8x12xf32>, vector<12x12xf32> -> vector<12x12xf32>
    %cst_228 = arith.constant 0.353553385 : f32
    %723 = vector.broadcast %cst_228 : f32 to vector<12x12xf32>
    %724 = arith.mulf %722, %723 : vector<12x12xf32>
    %725 = arith.addf %724, %1 : vector<12x12xf32>
    %cst_229 = arith.constant dense<0xFF800000> : vector<12xf32>
    %726 = vector.multi_reduction <maximumf>, %725, %cst_229 [1] : vector<12x12xf32> to vector<12xf32>
    %727 = vector.shape_cast %726 : vector<12xf32> to vector<12x1xf32>
    %728 = vector.broadcast %727 : vector<12x1xf32> to vector<12x12xf32>
    %729 = arith.subf %725, %728 : vector<12x12xf32>
    %730 = math.exp %729 : vector<12x12xf32>
    %cst_230 = arith.constant dense<0.000000e+00> : vector<12xf32>
    %731 = vector.multi_reduction <add>, %730, %cst_230 [1] : vector<12x12xf32> to vector<12xf32>
    %732 = vector.shape_cast %731 : vector<12xf32> to vector<12x1xf32>
    %733 = tpu.reciprocal %732 {approx = true} : vector<12x1xf32> -> vector<12x1xf32>
    %734 = vector.broadcast %733 : vector<12x1xf32> to vector<12x12xf32>
    %735 = arith.mulf %730, %734 : vector<12x12xf32>
    %cst_231 = arith.constant dense<0.000000e+00> : vector<12x8xf32>
    %736 = tpu.matmul %735, %720, %cst_231 {dimension_numbers = #tpu.dot_dimension_numbers<[1], [0], [0], [1], [0, 0, 1, 1], [], []>} : vector<12x12xf32>, vector<12x8xf32>, vector<12x8xf32> -> vector<12x8xf32>
    %737 = vector.extract_strided_slice %709 {offsets = [0, 8], sizes = [12, 8], strides = [1, 1]} : vector<12x32xf32> to vector<12x8xf32>
    %738 = vector.extract_strided_slice %713 {offsets = [0, 8], sizes = [12, 8], strides = [1, 1]} : vector<12x32xf32> to vector<12x8xf32>
    %739 = vector.extract_strided_slice %717 {offsets = [0, 8], sizes = [12, 8], strides = [1, 1]} : vector<12x32xf32> to vector<12x8xf32>
    %740 = tpu.transpose %738, [1, 0] : vector<12x8xf32> -> vector<8x12xf32>
    %cst_232 = arith.constant dense<0.000000e+00> : vector<12x12xf32>
    %741 = tpu.matmul %737, %740, %cst_232 {dimension_numbers = #tpu.dot_dimension_numbers<[1], [0], [0], [1], [0, 0, 1, 1], [], []>} : vector<12x8xf32>, vector<8x12xf32>, vector<12x12xf32> -> vector<12x12xf32>
    %cst_233 = arith.constant 0.353553385 : f32
    %742 = vector.broadcast %cst_233 : f32 to vector<12x12xf32>
    %743 = arith.mulf %741, %742 : vector<12x12xf32>
    %744 = arith.addf %743, %1 : vector<12x12xf32>
    %cst_234 = arith.constant dense<0xFF800000> : vector<12xf32>
    %745 = vector.multi_reduction <maximumf>, %744, %cst_234 [1] : vector<12x12xf32> to vector<12xf32>
    %746 = vector.shape_cast %745 : vector<12xf32> to vector<12x1xf32>
    %747 = vector.broadcast %746 : vector<12x1xf32> to vector<12x12xf32>
    %748 = arith.subf %744, %747 : vector<12x12xf32>
    %749 = math.exp %748 : vector<12x12xf32>
    %cst_235 = arith.constant dense<0.000000e+00> : vector<12xf32>
    %750 = vector.multi_reduction <add>, %749, %cst_235 [1] : vector<12x12xf32> to vector<12xf32>
    %751 = vector.shape_cast %750 : vector<12xf32> to vector<12x1xf32>
    %752 = tpu.reciprocal %751 {approx = true} : vector<12x1xf32> -> vector<12x1xf32>
    %753 = vector.broadcast %752 : vector<12x1xf32> to vector<12x12xf32>
    %754 = arith.mulf %749, %753 : vector<12x12xf32>
    %cst_236 = arith.constant dense<0.000000e+00> : vector<12x8xf32>
    %755 = tpu.matmul %754, %739, %cst_236 {dimension_numbers = #tpu.dot_dimension_numbers<[1], [0], [0], [1], [0, 0, 1, 1], [], []>} : vector<12x12xf32>, vector<12x8xf32>, vector<12x8xf32> -> vector<12x8xf32>
    %756 = vector.extract_strided_slice %709 {offsets = [0, 16], sizes = [12, 8], strides = [1, 1]} : vector<12x32xf32> to vector<12x8xf32>
    %757 = vector.extract_strided_slice %713 {offsets = [0, 16], sizes = [12, 8], strides = [1, 1]} : vector<12x32xf32> to vector<12x8xf32>
    %758 = vector.extract_strided_slice %717 {offsets = [0, 16], sizes = [12, 8], strides = [1, 1]} : vector<12x32xf32> to vector<12x8xf32>
    %759 = tpu.transpose %757, [1, 0] : vector<12x8xf32> -> vector<8x12xf32>
    %cst_237 = arith.constant dense<0.000000e+00> : vector<12x12xf32>
    %760 = tpu.matmul %756, %759, %cst_237 {dimension_numbers = #tpu.dot_dimension_numbers<[1], [0], [0], [1], [0, 0, 1, 1], [], []>} : vector<12x8xf32>, vector<8x12xf32>, vector<12x12xf32> -> vector<12x12xf32>
    %cst_238 = arith.constant 0.353553385 : f32
    %761 = vector.broadcast %cst_238 : f32 to vector<12x12xf32>
    %762 = arith.mulf %760, %761 : vector<12x12xf32>
    %763 = arith.addf %762, %1 : vector<12x12xf32>
    %cst_239 = arith.constant dense<0xFF800000> : vector<12xf32>
    %764 = vector.multi_reduction <maximumf>, %763, %cst_239 [1] : vector<12x12xf32> to vector<12xf32>
    %765 = vector.shape_cast %764 : vector<12xf32> to vector<12x1xf32>
    %766 = vector.broadcast %765 : vector<12x1xf32> to vector<12x12xf32>
    %767 = arith.subf %763, %766 : vector<12x12xf32>
    %768 = math.exp %767 : vector<12x12xf32>
    %cst_240 = arith.constant dense<0.000000e+00> : vector<12xf32>
    %769 = vector.multi_reduction <add>, %768, %cst_240 [1] : vector<12x12xf32> to vector<12xf32>
    %770 = vector.shape_cast %769 : vector<12xf32> to vector<12x1xf32>
    %771 = tpu.reciprocal %770 {approx = true} : vector<12x1xf32> -> vector<12x1xf32>
    %772 = vector.broadcast %771 : vector<12x1xf32> to vector<12x12xf32>
    %773 = arith.mulf %768, %772 : vector<12x12xf32>
    %cst_241 = arith.constant dense<0.000000e+00> : vector<12x8xf32>
    %774 = tpu.matmul %773, %758, %cst_241 {dimension_numbers = #tpu.dot_dimension_numbers<[1], [0], [0], [1], [0, 0, 1, 1], [], []>} : vector<12x12xf32>, vector<12x8xf32>, vector<12x8xf32> -> vector<12x8xf32>
    %775 = vector.extract_strided_slice %709 {offsets = [0, 24], sizes = [12, 8], strides = [1, 1]} : vector<12x32xf32> to vector<12x8xf32>
    %776 = vector.extract_strided_slice %713 {offsets = [0, 24], sizes = [12, 8], strides = [1, 1]} : vector<12x32xf32> to vector<12x8xf32>
    %777 = vector.extract_strided_slice %717 {offsets = [0, 24], sizes = [12, 8], strides = [1, 1]} : vector<12x32xf32> to vector<12x8xf32>
    %778 = tpu.transpose %776, [1, 0] : vector<12x8xf32> -> vector<8x12xf32>
    %cst_242 = arith.constant dense<0.000000e+00> : vector<12x12xf32>
    %779 = tpu.matmul %775, %778, %cst_242 {dimension_numbers = #tpu.dot_dimension_numbers<[1], [0], [0], [1], [0, 0, 1, 1], [], []>} : vector<12x8xf32>, vector<8x12xf32>, vector<12x12xf32> -> vector<12x12xf32>
    %cst_243 = arith.constant 0.353553385 : f32
    %780 = vector.broadcast %cst_243 : f32 to vector<12x12xf32>
    %781 = arith.mulf %779, %780 : vector<12x12xf32>
    %782 = arith.addf %781, %1 : vector<12x12xf32>
    %cst_244 = arith.constant dense<0xFF800000> : vector<12xf32>
    %783 = vector.multi_reduction <maximumf>, %782, %cst_244 [1] : vector<12x12xf32> to vector<12xf32>
    %784 = vector.shape_cast %783 : vector<12xf32> to vector<12x1xf32>
    %785 = vector.broadcast %784 : vector<12x1xf32> to vector<12x12xf32>
    %786 = arith.subf %782, %785 : vector<12x12xf32>
    %787 = math.exp %786 : vector<12x12xf32>
    %cst_245 = arith.constant dense<0.000000e+00> : vector<12xf32>
    %788 = vector.multi_reduction <add>, %787, %cst_245 [1] : vector<12x12xf32> to vector<12xf32>
    %789 = vector.shape_cast %788 : vector<12xf32> to vector<12x1xf32>
    %790 = tpu.reciprocal %789 {approx = true} : vector<12x1xf32> -> vector<12x1xf32>
    %791 = vector.broadcast %790 : vector<12x1xf32> to vector<12x12xf32>
    %792 = arith.mulf %787, %791 : vector<12x12xf32>
    %cst_246 = arith.constant dense<0.000000e+00> : vector<12x8xf32>
    %793 = tpu.matmul %792, %777, %cst_246 {dimension_numbers = #tpu.dot_dimension_numbers<[1], [0], [0], [1], [0, 0, 1, 1], [], []>} : vector<12x12xf32>, vector<12x8xf32>, vector<12x8xf32> -> vector<12x8xf32>
    %794 = tpu.concatenate %736, %755, %774, %793 in 1 : vector<12x8xf32>, vector<12x8xf32>, vector<12x8xf32>, vector<12x8xf32> -> vector<12x32xf32>
    %cst_247 = arith.constant dense<0.000000e+00> : vector<12x32xf32>
    %795 = tpu.matmul %794, %704, %cst_247 {dimension_numbers = #tpu.dot_dimension_numbers<[1], [0], [0], [1], [0, 0, 1, 1], [], []>} : vector<12x32xf32>, vector<32x32xf32>, vector<12x32xf32> -> vector<12x32xf32>
    %796 = arith.addf %698, %795 : vector<12x32xf32>
    %797 = vector.extract_strided_slice %702 {offsets = [3, 0], sizes = [1, 32], strides = [1, 1]} : vector<10x32xf32> to vector<1x32xf32>
    %798 = vector.broadcast %797 : vector<1x32xf32> to vector<12x32xf32>
    %799 = arith.addf %796, %798 : vector<12x32xf32>
    %cst_248 = arith.constant dense<0.000000e+00> : vector<12xf32>
    %800 = vector.multi_reduction <add>, %799, %cst_248 [1] : vector<12x32xf32> to vector<12xf32>
    %801 = vector.shape_cast %800 : vector<12xf32> to vector<12x1xf32>
    %cst_249 = arith.constant 3.200000e+01 : f32
    %802 = vector.broadcast %cst_249 : f32 to vector<12x1xf32>
    %803 = arith.divf %801, %802 : vector<12x1xf32>
    %804 = vector.broadcast %803 : vector<12x1xf32> to vector<12x32xf32>
    %805 = arith.subf %799, %804 : vector<12x32xf32>
    %806 = arith.mulf %805, %805 : vector<12x32xf32>
    %cst_250 = arith.constant dense<0.000000e+00> : vector<12xf32>
    %807 = vector.multi_reduction <add>, %806, %cst_250 [1] : vector<12x32xf32> to vector<12xf32>
    %808 = vector.shape_cast %807 : vector<12xf32> to vector<12x1xf32>
    %cst_251 = arith.constant 3.200000e+01 : f32
    %809 = vector.broadcast %cst_251 : f32 to vector<12x1xf32>
    %810 = arith.divf %808, %809 : vector<12x1xf32>
    %cst_252 = arith.constant 9.99999974E-6 : f32
    %811 = vector.broadcast %cst_252 : f32 to vector<12x1xf32>
    %812 = arith.addf %810, %811 : vector<12x1xf32>
    %813 = math.rsqrt %812 : vector<12x1xf32>
    %814 = vector.broadcast %813 : vector<12x1xf32> to vector<12x32xf32>
    %815 = arith.mulf %805, %814 : vector<12x32xf32>
    %816 = vector.extract_strided_slice %702 {offsets = [6, 0], sizes = [1, 32], strides = [1, 1]} : vector<10x32xf32> to vector<1x32xf32>
    %817 = vector.broadcast %816 : vector<1x32xf32> to vector<12x32xf32>
    %818 = arith.mulf %815, %817 : vector<12x32xf32>
    %819 = vector.extract_strided_slice %702 {offsets = [7, 0], sizes = [1, 32], strides = [1, 1]} : vector<10x32xf32> to vector<1x32xf32>
    %820 = vector.broadcast %819 : vector<1x32xf32> to vector<12x32xf32>
    %821 = arith.addf %818, %820 : vector<12x32xf32>
    %c0_253 = arith.constant 0 : index
    %c0_254 = arith.constant 0 : index
    %c0_255 = arith.constant 0 : index
    %822 = vector.load %arg7[%c0_253, %c0_254, %c0_255] : memref<2x32x8xf32, #tpu.memory_space<vmem>>, vector<1x32x8xf32>
    %823 = vector.shape_cast %822 : vector<1x32x8xf32> to vector<32x8xf32>
    %cst_256 = arith.constant dense<0.000000e+00> : vector<12x8xf32>
    %824 = tpu.matmul %821, %823, %cst_256 {dimension_numbers = #tpu.dot_dimension_numbers<[1], [0], [0], [1], [0, 0, 1, 1], [], []>} : vector<12x32xf32>, vector<32x8xf32>, vector<12x8xf32> -> vector<12x8xf32>
    %825 = vector.extract_strided_slice %702 {offsets = [4, 0], sizes = [1, 8], strides = [1, 1]} : vector<10x32xf32> to vector<1x8xf32>
    %826 = vector.broadcast %825 : vector<1x8xf32> to vector<12x8xf32>
    %827 = arith.addf %824, %826 : vector<12x8xf32>
    %cst_257 = arith.constant 0.000000e+00 : f32
    %828 = vector.broadcast %cst_257 : f32 to vector<12x8xf32>
    %829 = arith.maximumf %827, %828 : vector<12x8xf32>
    %c0_258 = arith.constant 0 : index
    %c0_259 = arith.constant 0 : index
    %c0_260 = arith.constant 0 : index
    %830 = vector.load %arg8[%c0_258, %c0_259, %c0_260] : memref<2x8x32xf32, #tpu.memory_space<vmem>>, vector<1x8x32xf32>
    %831 = vector.shape_cast %830 : vector<1x8x32xf32> to vector<8x32xf32>
    %cst_261 = arith.constant dense<0.000000e+00> : vector<12x32xf32>
    %832 = tpu.matmul %829, %831, %cst_261 {dimension_numbers = #tpu.dot_dimension_numbers<[1], [0], [0], [1], [0, 0, 1, 1], [], []>} : vector<12x8xf32>, vector<8x32xf32>, vector<12x32xf32> -> vector<12x32xf32>
    %833 = vector.extract_strided_slice %702 {offsets = [5, 0], sizes = [1, 32], strides = [1, 1]} : vector<10x32xf32> to vector<1x32xf32>
    %834 = vector.broadcast %833 : vector<1x32xf32> to vector<12x32xf32>
    %835 = arith.addf %832, %834 : vector<12x32xf32>
    %836 = arith.addf %821, %835 : vector<12x32xf32>
    %cst_262 = arith.constant dense<0.000000e+00> : vector<12xf32>
    %837 = vector.multi_reduction <add>, %836, %cst_262 [1] : vector<12x32xf32> to vector<12xf32>
    %838 = vector.shape_cast %837 : vector<12xf32> to vector<12x1xf32>
    %cst_263 = arith.constant 3.200000e+01 : f32
    %839 = vector.broadcast %cst_263 : f32 to vector<12x1xf32>
    %840 = arith.divf %838, %839 : vector<12x1xf32>
    %841 = vector.broadcast %840 : vector<12x1xf32> to vector<12x32xf32>
    %842 = arith.subf %836, %841 : vector<12x32xf32>
    %843 = arith.mulf %842, %842 : vector<12x32xf32>
    %cst_264 = arith.constant dense<0.000000e+00> : vector<12xf32>
    %844 = vector.multi_reduction <add>, %843, %cst_264 [1] : vector<12x32xf32> to vector<12xf32>
    %845 = vector.shape_cast %844 : vector<12xf32> to vector<12x1xf32>
    %cst_265 = arith.constant 3.200000e+01 : f32
    %846 = vector.broadcast %cst_265 : f32 to vector<12x1xf32>
    %847 = arith.divf %845, %846 : vector<12x1xf32>
    %cst_266 = arith.constant 9.99999974E-6 : f32
    %848 = vector.broadcast %cst_266 : f32 to vector<12x1xf32>
    %849 = arith.addf %847, %848 : vector<12x1xf32>
    %850 = math.rsqrt %849 : vector<12x1xf32>
    %851 = vector.broadcast %850 : vector<12x1xf32> to vector<12x32xf32>
    %852 = arith.mulf %842, %851 : vector<12x32xf32>
    %853 = vector.extract_strided_slice %702 {offsets = [8, 0], sizes = [1, 32], strides = [1, 1]} : vector<10x32xf32> to vector<1x32xf32>
    %854 = vector.broadcast %853 : vector<1x32xf32> to vector<12x32xf32>
    %855 = arith.mulf %852, %854 : vector<12x32xf32>
    %856 = vector.extract_strided_slice %702 {offsets = [9, 0], sizes = [1, 32], strides = [1, 1]} : vector<10x32xf32> to vector<1x32xf32>
    %857 = vector.broadcast %856 : vector<1x32xf32> to vector<12x32xf32>
    %858 = arith.addf %855, %857 : vector<12x32xf32>
    %c1_267 = arith.constant 1 : index
    %c0_268 = arith.constant 0 : index
    %c0_269 = arith.constant 0 : index
    %859 = vector.load %arg6[%c1_267, %c0_268, %c0_269] : memref<2x32x128xf32, #tpu.memory_space<vmem>>, vector<1x32x128xf32>
    %860 = vector.shape_cast %859 : vector<1x32x128xf32> to vector<32x128xf32>
    %c1_270 = arith.constant 1 : index
    %c0_271 = arith.constant 0 : index
    %c0_272 = arith.constant 0 : index
    %861 = vector.load %arg9[%c1_270, %c0_271, %c0_272] : memref<2x10x32xf32, #tpu.memory_space<vmem>>, vector<1x10x32xf32>
    %862 = vector.shape_cast %861 : vector<1x10x32xf32> to vector<10x32xf32>
    %863 = vector.extract_strided_slice %860 {offsets = [0, 0], sizes = [32, 96], strides = [1, 1]} : vector<32x128xf32> to vector<32x96xf32>
    %864 = vector.extract_strided_slice %860 {offsets = [0, 96], sizes = [32, 32], strides = [1, 1]} : vector<32x128xf32> to vector<32x32xf32>
    %cst_273 = arith.constant dense<0.000000e+00> : vector<12x96xf32>
    %865 = tpu.matmul %858, %863, %cst_273 {dimension_numbers = #tpu.dot_dimension_numbers<[1], [0], [0], [1], [0, 0, 1, 1], [], []>} : vector<12x32xf32>, vector<32x96xf32>, vector<12x96xf32> -> vector<12x96xf32>
    %866 = vector.extract_strided_slice %865 {offsets = [0, 0], sizes = [12, 32], strides = [1, 1]} : vector<12x96xf32> to vector<12x32xf32>
    %867 = vector.extract_strided_slice %862 {offsets = [0, 0], sizes = [1, 32], strides = [1, 1]} : vector<10x32xf32> to vector<1x32xf32>
    %868 = vector.broadcast %867 : vector<1x32xf32> to vector<12x32xf32>
    %869 = arith.addf %866, %868 : vector<12x32xf32>
    %870 = vector.extract_strided_slice %865 {offsets = [0, 32], sizes = [12, 32], strides = [1, 1]} : vector<12x96xf32> to vector<12x32xf32>
    %871 = vector.extract_strided_slice %862 {offsets = [1, 0], sizes = [1, 32], strides = [1, 1]} : vector<10x32xf32> to vector<1x32xf32>
    %872 = vector.broadcast %871 : vector<1x32xf32> to vector<12x32xf32>
    %873 = arith.addf %870, %872 : vector<12x32xf32>
    %874 = vector.extract_strided_slice %865 {offsets = [0, 64], sizes = [12, 32], strides = [1, 1]} : vector<12x96xf32> to vector<12x32xf32>
    %875 = vector.extract_strided_slice %862 {offsets = [2, 0], sizes = [1, 32], strides = [1, 1]} : vector<10x32xf32> to vector<1x32xf32>
    %876 = vector.broadcast %875 : vector<1x32xf32> to vector<12x32xf32>
    %877 = arith.addf %874, %876 : vector<12x32xf32>
    %878 = vector.extract_strided_slice %869 {offsets = [0, 0], sizes = [12, 8], strides = [1, 1]} : vector<12x32xf32> to vector<12x8xf32>
    %879 = vector.extract_strided_slice %873 {offsets = [0, 0], sizes = [12, 8], strides = [1, 1]} : vector<12x32xf32> to vector<12x8xf32>
    %880 = vector.extract_strided_slice %877 {offsets = [0, 0], sizes = [12, 8], strides = [1, 1]} : vector<12x32xf32> to vector<12x8xf32>
    %881 = tpu.transpose %879, [1, 0] : vector<12x8xf32> -> vector<8x12xf32>
    %cst_274 = arith.constant dense<0.000000e+00> : vector<12x12xf32>
    %882 = tpu.matmul %878, %881, %cst_274 {dimension_numbers = #tpu.dot_dimension_numbers<[1], [0], [0], [1], [0, 0, 1, 1], [], []>} : vector<12x8xf32>, vector<8x12xf32>, vector<12x12xf32> -> vector<12x12xf32>
    %cst_275 = arith.constant 0.353553385 : f32
    %883 = vector.broadcast %cst_275 : f32 to vector<12x12xf32>
    %884 = arith.mulf %882, %883 : vector<12x12xf32>
    %885 = arith.addf %884, %1 : vector<12x12xf32>
    %cst_276 = arith.constant dense<0xFF800000> : vector<12xf32>
    %886 = vector.multi_reduction <maximumf>, %885, %cst_276 [1] : vector<12x12xf32> to vector<12xf32>
    %887 = vector.shape_cast %886 : vector<12xf32> to vector<12x1xf32>
    %888 = vector.broadcast %887 : vector<12x1xf32> to vector<12x12xf32>
    %889 = arith.subf %885, %888 : vector<12x12xf32>
    %890 = math.exp %889 : vector<12x12xf32>
    %cst_277 = arith.constant dense<0.000000e+00> : vector<12xf32>
    %891 = vector.multi_reduction <add>, %890, %cst_277 [1] : vector<12x12xf32> to vector<12xf32>
    %892 = vector.shape_cast %891 : vector<12xf32> to vector<12x1xf32>
    %893 = tpu.reciprocal %892 {approx = true} : vector<12x1xf32> -> vector<12x1xf32>
    %894 = vector.broadcast %893 : vector<12x1xf32> to vector<12x12xf32>
    %895 = arith.mulf %890, %894 : vector<12x12xf32>
    %cst_278 = arith.constant dense<0.000000e+00> : vector<12x8xf32>
    %896 = tpu.matmul %895, %880, %cst_278 {dimension_numbers = #tpu.dot_dimension_numbers<[1], [0], [0], [1], [0, 0, 1, 1], [], []>} : vector<12x12xf32>, vector<12x8xf32>, vector<12x8xf32> -> vector<12x8xf32>
    %897 = vector.extract_strided_slice %869 {offsets = [0, 8], sizes = [12, 8], strides = [1, 1]} : vector<12x32xf32> to vector<12x8xf32>
    %898 = vector.extract_strided_slice %873 {offsets = [0, 8], sizes = [12, 8], strides = [1, 1]} : vector<12x32xf32> to vector<12x8xf32>
    %899 = vector.extract_strided_slice %877 {offsets = [0, 8], sizes = [12, 8], strides = [1, 1]} : vector<12x32xf32> to vector<12x8xf32>
    %900 = tpu.transpose %898, [1, 0] : vector<12x8xf32> -> vector<8x12xf32>
    %cst_279 = arith.constant dense<0.000000e+00> : vector<12x12xf32>
    %901 = tpu.matmul %897, %900, %cst_279 {dimension_numbers = #tpu.dot_dimension_numbers<[1], [0], [0], [1], [0, 0, 1, 1], [], []>} : vector<12x8xf32>, vector<8x12xf32>, vector<12x12xf32> -> vector<12x12xf32>
    %cst_280 = arith.constant 0.353553385 : f32
    %902 = vector.broadcast %cst_280 : f32 to vector<12x12xf32>
    %903 = arith.mulf %901, %902 : vector<12x12xf32>
    %904 = arith.addf %903, %1 : vector<12x12xf32>
    %cst_281 = arith.constant dense<0xFF800000> : vector<12xf32>
    %905 = vector.multi_reduction <maximumf>, %904, %cst_281 [1] : vector<12x12xf32> to vector<12xf32>
    %906 = vector.shape_cast %905 : vector<12xf32> to vector<12x1xf32>
    %907 = vector.broadcast %906 : vector<12x1xf32> to vector<12x12xf32>
    %908 = arith.subf %904, %907 : vector<12x12xf32>
    %909 = math.exp %908 : vector<12x12xf32>
    %cst_282 = arith.constant dense<0.000000e+00> : vector<12xf32>
    %910 = vector.multi_reduction <add>, %909, %cst_282 [1] : vector<12x12xf32> to vector<12xf32>
    %911 = vector.shape_cast %910 : vector<12xf32> to vector<12x1xf32>
    %912 = tpu.reciprocal %911 {approx = true} : vector<12x1xf32> -> vector<12x1xf32>
    %913 = vector.broadcast %912 : vector<12x1xf32> to vector<12x12xf32>
    %914 = arith.mulf %909, %913 : vector<12x12xf32>
    %cst_283 = arith.constant dense<0.000000e+00> : vector<12x8xf32>
    %915 = tpu.matmul %914, %899, %cst_283 {dimension_numbers = #tpu.dot_dimension_numbers<[1], [0], [0], [1], [0, 0, 1, 1], [], []>} : vector<12x12xf32>, vector<12x8xf32>, vector<12x8xf32> -> vector<12x8xf32>
    %916 = vector.extract_strided_slice %869 {offsets = [0, 16], sizes = [12, 8], strides = [1, 1]} : vector<12x32xf32> to vector<12x8xf32>
    %917 = vector.extract_strided_slice %873 {offsets = [0, 16], sizes = [12, 8], strides = [1, 1]} : vector<12x32xf32> to vector<12x8xf32>
    %918 = vector.extract_strided_slice %877 {offsets = [0, 16], sizes = [12, 8], strides = [1, 1]} : vector<12x32xf32> to vector<12x8xf32>
    %919 = tpu.transpose %917, [1, 0] : vector<12x8xf32> -> vector<8x12xf32>
    %cst_284 = arith.constant dense<0.000000e+00> : vector<12x12xf32>
    %920 = tpu.matmul %916, %919, %cst_284 {dimension_numbers = #tpu.dot_dimension_numbers<[1], [0], [0], [1], [0, 0, 1, 1], [], []>} : vector<12x8xf32>, vector<8x12xf32>, vector<12x12xf32> -> vector<12x12xf32>
    %cst_285 = arith.constant 0.353553385 : f32
    %921 = vector.broadcast %cst_285 : f32 to vector<12x12xf32>
    %922 = arith.mulf %920, %921 : vector<12x12xf32>
    %923 = arith.addf %922, %1 : vector<12x12xf32>
    %cst_286 = arith.constant dense<0xFF800000> : vector<12xf32>
    %924 = vector.multi_reduction <maximumf>, %923, %cst_286 [1] : vector<12x12xf32> to vector<12xf32>
    %925 = vector.shape_cast %924 : vector<12xf32> to vector<12x1xf32>
    %926 = vector.broadcast %925 : vector<12x1xf32> to vector<12x12xf32>
    %927 = arith.subf %923, %926 : vector<12x12xf32>
    %928 = math.exp %927 : vector<12x12xf32>
    %cst_287 = arith.constant dense<0.000000e+00> : vector<12xf32>
    %929 = vector.multi_reduction <add>, %928, %cst_287 [1] : vector<12x12xf32> to vector<12xf32>
    %930 = vector.shape_cast %929 : vector<12xf32> to vector<12x1xf32>
    %931 = tpu.reciprocal %930 {approx = true} : vector<12x1xf32> -> vector<12x1xf32>
    %932 = vector.broadcast %931 : vector<12x1xf32> to vector<12x12xf32>
    %933 = arith.mulf %928, %932 : vector<12x12xf32>
    %cst_288 = arith.constant dense<0.000000e+00> : vector<12x8xf32>
    %934 = tpu.matmul %933, %918, %cst_288 {dimension_numbers = #tpu.dot_dimension_numbers<[1], [0], [0], [1], [0, 0, 1, 1], [], []>} : vector<12x12xf32>, vector<12x8xf32>, vector<12x8xf32> -> vector<12x8xf32>
    %935 = vector.extract_strided_slice %869 {offsets = [0, 24], sizes = [12, 8], strides = [1, 1]} : vector<12x32xf32> to vector<12x8xf32>
    %936 = vector.extract_strided_slice %873 {offsets = [0, 24], sizes = [12, 8], strides = [1, 1]} : vector<12x32xf32> to vector<12x8xf32>
    %937 = vector.extract_strided_slice %877 {offsets = [0, 24], sizes = [12, 8], strides = [1, 1]} : vector<12x32xf32> to vector<12x8xf32>
    %938 = tpu.transpose %936, [1, 0] : vector<12x8xf32> -> vector<8x12xf32>
    %cst_289 = arith.constant dense<0.000000e+00> : vector<12x12xf32>
    %939 = tpu.matmul %935, %938, %cst_289 {dimension_numbers = #tpu.dot_dimension_numbers<[1], [0], [0], [1], [0, 0, 1, 1], [], []>} : vector<12x8xf32>, vector<8x12xf32>, vector<12x12xf32> -> vector<12x12xf32>
    %cst_290 = arith.constant 0.353553385 : f32
    %940 = vector.broadcast %cst_290 : f32 to vector<12x12xf32>
    %941 = arith.mulf %939, %940 : vector<12x12xf32>
    %942 = arith.addf %941, %1 : vector<12x12xf32>
    %cst_291 = arith.constant dense<0xFF800000> : vector<12xf32>
    %943 = vector.multi_reduction <maximumf>, %942, %cst_291 [1] : vector<12x12xf32> to vector<12xf32>
    %944 = vector.shape_cast %943 : vector<12xf32> to vector<12x1xf32>
    %945 = vector.broadcast %944 : vector<12x1xf32> to vector<12x12xf32>
    %946 = arith.subf %942, %945 : vector<12x12xf32>
    %947 = math.exp %946 : vector<12x12xf32>
    %cst_292 = arith.constant dense<0.000000e+00> : vector<12xf32>
    %948 = vector.multi_reduction <add>, %947, %cst_292 [1] : vector<12x12xf32> to vector<12xf32>
    %949 = vector.shape_cast %948 : vector<12xf32> to vector<12x1xf32>
    %950 = tpu.reciprocal %949 {approx = true} : vector<12x1xf32> -> vector<12x1xf32>
    %951 = vector.broadcast %950 : vector<12x1xf32> to vector<12x12xf32>
    %952 = arith.mulf %947, %951 : vector<12x12xf32>
    %cst_293 = arith.constant dense<0.000000e+00> : vector<12x8xf32>
    %953 = tpu.matmul %952, %937, %cst_293 {dimension_numbers = #tpu.dot_dimension_numbers<[1], [0], [0], [1], [0, 0, 1, 1], [], []>} : vector<12x12xf32>, vector<12x8xf32>, vector<12x8xf32> -> vector<12x8xf32>
    %954 = tpu.concatenate %896, %915, %934, %953 in 1 : vector<12x8xf32>, vector<12x8xf32>, vector<12x8xf32>, vector<12x8xf32> -> vector<12x32xf32>
    %cst_294 = arith.constant dense<0.000000e+00> : vector<12x32xf32>
    %955 = tpu.matmul %954, %864, %cst_294 {dimension_numbers = #tpu.dot_dimension_numbers<[1], [0], [0], [1], [0, 0, 1, 1], [], []>} : vector<12x32xf32>, vector<32x32xf32>, vector<12x32xf32> -> vector<12x32xf32>
    %956 = arith.addf %858, %955 : vector<12x32xf32>
    %957 = vector.extract_strided_slice %862 {offsets = [3, 0], sizes = [1, 32], strides = [1, 1]} : vector<10x32xf32> to vector<1x32xf32>
    %958 = vector.broadcast %957 : vector<1x32xf32> to vector<12x32xf32>
    %959 = arith.addf %956, %958 : vector<12x32xf32>
    %cst_295 = arith.constant dense<0.000000e+00> : vector<12xf32>
    %960 = vector.multi_reduction <add>, %959, %cst_295 [1] : vector<12x32xf32> to vector<12xf32>
    %961 = vector.shape_cast %960 : vector<12xf32> to vector<12x1xf32>
    %cst_296 = arith.constant 3.200000e+01 : f32
    %962 = vector.broadcast %cst_296 : f32 to vector<12x1xf32>
    %963 = arith.divf %961, %962 : vector<12x1xf32>
    %964 = vector.broadcast %963 : vector<12x1xf32> to vector<12x32xf32>
    %965 = arith.subf %959, %964 : vector<12x32xf32>
    %966 = arith.mulf %965, %965 : vector<12x32xf32>
    %cst_297 = arith.constant dense<0.000000e+00> : vector<12xf32>
    %967 = vector.multi_reduction <add>, %966, %cst_297 [1] : vector<12x32xf32> to vector<12xf32>
    %968 = vector.shape_cast %967 : vector<12xf32> to vector<12x1xf32>
    %cst_298 = arith.constant 3.200000e+01 : f32
    %969 = vector.broadcast %cst_298 : f32 to vector<12x1xf32>
    %970 = arith.divf %968, %969 : vector<12x1xf32>
    %cst_299 = arith.constant 9.99999974E-6 : f32
    %971 = vector.broadcast %cst_299 : f32 to vector<12x1xf32>
    %972 = arith.addf %970, %971 : vector<12x1xf32>
    %973 = math.rsqrt %972 : vector<12x1xf32>
    %974 = vector.broadcast %973 : vector<12x1xf32> to vector<12x32xf32>
    %975 = arith.mulf %965, %974 : vector<12x32xf32>
    %976 = vector.extract_strided_slice %862 {offsets = [6, 0], sizes = [1, 32], strides = [1, 1]} : vector<10x32xf32> to vector<1x32xf32>
    %977 = vector.broadcast %976 : vector<1x32xf32> to vector<12x32xf32>
    %978 = arith.mulf %975, %977 : vector<12x32xf32>
    %979 = vector.extract_strided_slice %862 {offsets = [7, 0], sizes = [1, 32], strides = [1, 1]} : vector<10x32xf32> to vector<1x32xf32>
    %980 = vector.broadcast %979 : vector<1x32xf32> to vector<12x32xf32>
    %981 = arith.addf %978, %980 : vector<12x32xf32>
    %c1_300 = arith.constant 1 : index
    %c0_301 = arith.constant 0 : index
    %c0_302 = arith.constant 0 : index
    %982 = vector.load %arg7[%c1_300, %c0_301, %c0_302] : memref<2x32x8xf32, #tpu.memory_space<vmem>>, vector<1x32x8xf32>
    %983 = vector.shape_cast %982 : vector<1x32x8xf32> to vector<32x8xf32>
    %cst_303 = arith.constant dense<0.000000e+00> : vector<12x8xf32>
    %984 = tpu.matmul %981, %983, %cst_303 {dimension_numbers = #tpu.dot_dimension_numbers<[1], [0], [0], [1], [0, 0, 1, 1], [], []>} : vector<12x32xf32>, vector<32x8xf32>, vector<12x8xf32> -> vector<12x8xf32>
    %985 = vector.extract_strided_slice %862 {offsets = [4, 0], sizes = [1, 8], strides = [1, 1]} : vector<10x32xf32> to vector<1x8xf32>
    %986 = vector.broadcast %985 : vector<1x8xf32> to vector<12x8xf32>
    %987 = arith.addf %984, %986 : vector<12x8xf32>
    %cst_304 = arith.constant 0.000000e+00 : f32
    %988 = vector.broadcast %cst_304 : f32 to vector<12x8xf32>
    %989 = arith.maximumf %987, %988 : vector<12x8xf32>
    %c1_305 = arith.constant 1 : index
    %c0_306 = arith.constant 0 : index
    %c0_307 = arith.constant 0 : index
    %990 = vector.load %arg8[%c1_305, %c0_306, %c0_307] : memref<2x8x32xf32, #tpu.memory_space<vmem>>, vector<1x8x32xf32>
    %991 = vector.shape_cast %990 : vector<1x8x32xf32> to vector<8x32xf32>
    %cst_308 = arith.constant dense<0.000000e+00> : vector<12x32xf32>
    %992 = tpu.matmul %989, %991, %cst_308 {dimension_numbers = #tpu.dot_dimension_numbers<[1], [0], [0], [1], [0, 0, 1, 1], [], []>} : vector<12x8xf32>, vector<8x32xf32>, vector<12x32xf32> -> vector<12x32xf32>
    %993 = vector.extract_strided_slice %862 {offsets = [5, 0], sizes = [1, 32], strides = [1, 1]} : vector<10x32xf32> to vector<1x32xf32>
    %994 = vector.broadcast %993 : vector<1x32xf32> to vector<12x32xf32>
    %995 = arith.addf %992, %994 : vector<12x32xf32>
    %996 = arith.addf %981, %995 : vector<12x32xf32>
    %cst_309 = arith.constant dense<0.000000e+00> : vector<12xf32>
    %997 = vector.multi_reduction <add>, %996, %cst_309 [1] : vector<12x32xf32> to vector<12xf32>
    %998 = vector.shape_cast %997 : vector<12xf32> to vector<12x1xf32>
    %cst_310 = arith.constant 3.200000e+01 : f32
    %999 = vector.broadcast %cst_310 : f32 to vector<12x1xf32>
    %1000 = arith.divf %998, %999 : vector<12x1xf32>
    %1001 = vector.broadcast %1000 : vector<12x1xf32> to vector<12x32xf32>
    %1002 = arith.subf %996, %1001 : vector<12x32xf32>
    %1003 = arith.mulf %1002, %1002 : vector<12x32xf32>
    %cst_311 = arith.constant dense<0.000000e+00> : vector<12xf32>
    %1004 = vector.multi_reduction <add>, %1003, %cst_311 [1] : vector<12x32xf32> to vector<12xf32>
    %1005 = vector.shape_cast %1004 : vector<12xf32> to vector<12x1xf32>
    %cst_312 = arith.constant 3.200000e+01 : f32
    %1006 = vector.broadcast %cst_312 : f32 to vector<12x1xf32>
    %1007 = arith.divf %1005, %1006 : vector<12x1xf32>
    %cst_313 = arith.constant 9.99999974E-6 : f32
    %1008 = vector.broadcast %cst_313 : f32 to vector<12x1xf32>
    %1009 = arith.addf %1007, %1008 : vector<12x1xf32>
    %1010 = math.rsqrt %1009 : vector<12x1xf32>
    %1011 = vector.broadcast %1010 : vector<12x1xf32> to vector<12x32xf32>
    %1012 = arith.mulf %1002, %1011 : vector<12x32xf32>
    %1013 = vector.extract_strided_slice %862 {offsets = [8, 0], sizes = [1, 32], strides = [1, 1]} : vector<10x32xf32> to vector<1x32xf32>
    %1014 = vector.broadcast %1013 : vector<1x32xf32> to vector<12x32xf32>
    %1015 = arith.mulf %1012, %1014 : vector<12x32xf32>
    %1016 = vector.extract_strided_slice %862 {offsets = [9, 0], sizes = [1, 32], strides = [1, 1]} : vector<10x32xf32> to vector<1x32xf32>
    %1017 = vector.broadcast %1016 : vector<1x32xf32> to vector<12x32xf32>
    %1018 = arith.addf %1015, %1017 : vector<12x32xf32>
    %1019 = vector.extract_strided_slice %1018 {offsets = [9, 0], sizes = [3, 32], strides = [1, 1]} : vector<12x32xf32> to vector<3x32xf32>
    %1020 = vector.extract_strided_slice %697 {offsets = [9, 0], sizes = [3, 32], strides = [1, 1]} : vector<12x32xf32> to vector<3x32xf32>
    %1021 = arith.addf %1020, %1019 : vector<3x32xf32>
    %c0_314 = arith.constant 0 : index
    %c2 = arith.constant 2 : index
    %c0_315 = arith.constant 0 : index
    %c0_316 = arith.constant 0 : index
    %1022 = vector.load %arg10[%c0_314, %c2, %c0_315, %c0_316] : memref<1x3x3x32xf32, #tpu.memory_space<vmem>>, vector<1x1x3x32xf32>
    %1023 = vector.shape_cast %1022 : vector<1x1x3x32xf32> to vector<3x32xf32>
    %1024 = vector.shape_cast %1021 : vector<3x32xf32> to vector<1x1x3x32xf32>
    tpu.vector_store %arg10[%c0_314, %c2, %c0_315, %c0_316], %1024 {strides = array<i32>} : memref<1x3x3x32xf32, #tpu.memory_space<vmem>>, vector<1x1x3x32xf32>,
    %c0_317 = arith.constant 0 : index
    %c2_318 = arith.constant 2 : index
    %c0_319 = arith.constant 0 : index
    %c0_320 = arith.constant 0 : index
    %1025 = vector.load %arg2[%c0_317, %c2_318, %c0_319, %c0_320] : memref<1x3x3x32xf32, #tpu.memory_space<vmem>>, vector<1x1x3x32xf32>
    %1026 = vector.shape_cast %1025 : vector<1x1x3x32xf32> to vector<3x32xf32>
    %1027 = arith.subf %1021, %1026 : vector<3x32xf32>
    %c0_321 = arith.constant 0 : index
    %c2_322 = arith.constant 2 : index
    %c0_323 = arith.constant 0 : index
    %c0_324 = arith.constant 0 : index
    %1028 = vector.load %arg3[%c0_321, %c2_322, %c0_323, %c0_324] : memref<1x3x3x32xf32, #tpu.memory_space<vmem>>, vector<1x1x3x32xf32>
    %1029 = vector.shape_cast %1028 : vector<1x1x3x32xf32> to vector<3x32xf32>
    %1030 = arith.subf %1021, %1029 : vector<3x32xf32>
    %1031 = arith.mulf %1027, %1027 : vector<3x32xf32>
    %1032 = vector.shape_cast %1031 : vector<3x32xf32> to vector<1x3x32xf32>
    %cst_325 = arith.constant dense<0.000000e+00> : vector<1xf32>
    %1033 = vector.multi_reduction <add>, %1032, %cst_325 [1, 2] : vector<1x3x32xf32> to vector<1xf32>
    %1034 = vector.shape_cast %1033 : vector<1xf32> to vector<1x1x1xf32>
    %1035 = vector.extract %1034[0, 0, 0] : f32 from vector<1x1x1xf32>
    %1036 = vector.broadcast %1035 : f32 to vector<1x1xf32>
    %1037 = arith.mulf %1030, %1030 : vector<3x32xf32>
    %1038 = vector.shape_cast %1037 : vector<3x32xf32> to vector<1x3x32xf32>
    %cst_326 = arith.constant dense<0.000000e+00> : vector<1xf32>
    %1039 = vector.multi_reduction <add>, %1038, %cst_326 [1, 2] : vector<1x3x32xf32> to vector<1xf32>
    %1040 = vector.shape_cast %1039 : vector<1xf32> to vector<1x1x1xf32>
    %1041 = vector.extract %1040[0, 0, 0] : f32 from vector<1x1x1xf32>
    %1042 = vector.broadcast %1041 : f32 to vector<1x1xf32>
    %1043 = tpu.concatenate %342, %689, %1036 in 1 : vector<1x1xf32>, vector<1x1xf32>, vector<1x1xf32> -> vector<1x3xf32>
    %c0_327 = arith.constant 0 : index
    %c0_328 = arith.constant 0 : index
    %c0_329 = arith.constant 0 : index
    %1044 = vector.load %arg11[%c0_327, %c0_328, %c0_329] : memref<1x1x3xf32, #tpu.memory_space<vmem>>, vector<1x1x3xf32>
    %1045 = vector.shape_cast %1044 : vector<1x1x3xf32> to vector<1x3xf32>
    %1046 = vector.shape_cast %1043 : vector<1x3xf32> to vector<1x1x3xf32>
    tpu.vector_store %arg11[%c0_327, %c0_328, %c0_329], %1046 {strides = array<i32>} : memref<1x1x3xf32, #tpu.memory_space<vmem>>, vector<1x1x3xf32>,
    %1047 = tpu.concatenate %348, %695, %1042 in 1 : vector<1x1xf32>, vector<1x1xf32>, vector<1x1xf32> -> vector<1x3xf32>
    %c0_330 = arith.constant 0 : index
    %c0_331 = arith.constant 0 : index
    %c0_332 = arith.constant 0 : index
    %1048 = vector.load %arg12[%c0_330, %c0_331, %c0_332] : memref<1x1x3xf32, #tpu.memory_space<vmem>>, vector<1x1x3xf32>
    %1049 = vector.shape_cast %1048 : vector<1x1x3xf32> to vector<1x3xf32>
    %1050 = vector.shape_cast %1047 : vector<1x3xf32> to vector<1x1x3xf32>
    tpu.vector_store %arg12[%c0_330, %c0_331, %c0_332], %1050 {strides = array<i32>} : memref<1x1x3xf32, #tpu.memory_space<vmem>>, vector<1x1x3xf32>,
    return
  }
  func.func @transform_0(%arg0: i32) -> (i32, i32, i32) {
    %c0_i32 = arith.constant 0 : i32
    %c0_i32_0 = arith.constant 0 : i32
    %c0_i32_1 = arith.constant 0 : i32
    return %arg0, %c0_i32, %c0_i32_0 : i32, i32, i32
  }
  func.func @transform_1(%arg0: i32) -> (i32, i32, i32, i32) {
    %c0_i32 = arith.constant 0 : i32
    %c0_i32_0 = arith.constant 0 : i32
    %c0_i32_1 = arith.constant 0 : i32
    %c0_i32_2 = arith.constant 0 : i32
    return %arg0, %c0_i32, %c0_i32_0, %c0_i32_1 : i32, i32, i32, i32
  }
  func.func @transform_2(%arg0: i32) -> (i32, i32, i32, i32) {
    %c0_i32 = arith.constant 0 : i32
    %c0_i32_0 = arith.constant 0 : i32
    %c0_i32_1 = arith.constant 0 : i32
    %c0_i32_2 = arith.constant 0 : i32
    return %arg0, %c0_i32, %c0_i32_0, %c0_i32_1 : i32, i32, i32, i32
  }
  func.func @transform_3(%arg0: i32) -> (i32, i32) {
    %c0_i32 = arith.constant 0 : i32
    %c0_i32_0 = arith.constant 0 : i32
    %c0_i32_1 = arith.constant 0 : i32
    return %c0_i32, %c0_i32_0 : i32, i32
  }
  func.func @transform_4(%arg0: i32) -> (i32, i32) {
    %c0_i32 = arith.constant 0 : i32
    %c0_i32_0 = arith.constant 0 : i32
    %c0_i32_1 = arith.constant 0 : i32
    return %c0_i32, %c0_i32_0 : i32, i32
  }
  func.func @transform_5(%arg0: i32) -> (i32, i32, i32) {
    %c0_i32 = arith.constant 0 : i32
    %c0_i32_0 = arith.constant 0 : i32
    %c0_i32_1 = arith.constant 0 : i32
    %c0_i32_2 = arith.constant 0 : i32
    return %c0_i32, %c0_i32_0, %c0_i32_1 : i32, i32, i32
  }
  func.func @transform_6(%arg0: i32) -> (i32, i32, i32) {
    %c0_i32 = arith.constant 0 : i32
    %c0_i32_0 = arith.constant 0 : i32
    %c0_i32_1 = arith.constant 0 : i32
    %c0_i32_2 = arith.constant 0 : i32
    return %c0_i32, %c0_i32_0, %c0_i32_1 : i32, i32, i32
  }
  func.func @transform_7(%arg0: i32) -> (i32, i32, i32) {
    %c0_i32 = arith.constant 0 : i32
    %c0_i32_0 = arith.constant 0 : i32
    %c0_i32_1 = arith.constant 0 : i32
    %c0_i32_2 = arith.constant 0 : i32
    return %c0_i32, %c0_i32_0, %c0_i32_1 : i32, i32, i32
  }
  func.func @transform_8(%arg0: i32) -> (i32, i32, i32) {
    %c0_i32 = arith.constant 0 : i32
    %c0_i32_0 = arith.constant 0 : i32
    %c0_i32_1 = arith.constant 0 : i32
    %c0_i32_2 = arith.constant 0 : i32
    return %c0_i32, %c0_i32_0, %c0_i32_1 : i32, i32, i32
  }
  func.func @transform_9(%arg0: i32) -> (i32, i32, i32, i32) {
    %c0_i32 = arith.constant 0 : i32
    %c0_i32_0 = arith.constant 0 : i32
    %c0_i32_1 = arith.constant 0 : i32
    %c0_i32_2 = arith.constant 0 : i32
    return %arg0, %c0_i32, %c0_i32_0, %c0_i32_1 : i32, i32, i32, i32
  }
  func.func @transform_10(%arg0: i32) -> (i32, i32, i32) {
    %c0_i32 = arith.constant 0 : i32
    %c0_i32_0 = arith.constant 0 : i32
    %c0_i32_1 = arith.constant 0 : i32
    return %arg0, %c0_i32, %c0_i32_0 : i32, i32, i32
  }
  func.func @transform_11(%arg0: i32) -> (i32, i32, i32) {
    %c0_i32 = arith.constant 0 : i32
    %c0_i32_0 = arith.constant 0 : i32
    %c0_i32_1 = arith.constant 0 : i32
    return %arg0, %c0_i32, %c0_i32_0 : i32, i32, i32
  }
}

</mosaic_0001>

<bundles_post_ra>
// kernel: contrastive_forward.1
= control target key start
LH: loop header
LB: loop body
LE: loop exit
PB: predicated region body
PF: predicated region fallthrough
CT: control target
= control target key end

     0   :  { %s10906_s17 = smov 0   ;;  %s12578_s0 = inlined_call_operand.vmem [shape: f32[2,12,32], index: 0, kind: input, shape index: {}]   ;;  %s12579_s1 = inlined_call_operand.vmem [shape: f32[2,3,3,32], index: 1, kind: input, shape index: {}]   ;;  %s12580_s2 = inlined_call_operand.vmem [shape: f32[2,3,3,32], index: 2, kind: input, shape index: {}]   ;;  %s12581_s3 = inlined_call_operand.vmem [shape: f32[12,32], index: 3, kind: input, shape index: {}]   ;;  %s12582_s4 = inlined_call_operand.vmem [shape: f32[12,12], index: 4, kind: input, shape index: {}]   ;;  %s12583_s5 = inlined_call_operand.vmem [shape: f32[2,32,128], index: 5, kind: input, shape index: {}]   ;;  %s12584_s6 = inlined_call_operand.vmem [shape: f32[2,32,8], index: 6, kind: input, shape index: {}]   ;;  %s12585_s7 = inlined_call_operand.vmem [shape: f32[2,8,32], index: 7, kind: input, shape index: {}]   ;;  %s12586_s8 = inlined_call_operand.vmem [shape: f32[2,10,32], index: 8, kind: input, shape index: {}]   ;;  %s12587_s9 = inlined_call_operand.vmem [shape: f32[2,3,3,32], index: 9, kind: output, shape index: {0}]   ;;  %s12588_s10 = inlined_call_operand.vmem [shape: f32[2,1,3], index: 10, kind: output, shape index: {1}]   ;;  %s12589_s11 = inlined_call_operand.vmem [shape: f32[2,1,3], index: 11, kind: output, shape index: {2}]  }
   0x1   :  { %12623 = sst [smem:[#allocation4_spill]] %s12578_s0 }
   0x2   :  { %12624 = sst [smem:[#allocation5_spill]] %s12579_s1 }
   0x3   :  { %12625 = sst [smem:[#allocation6_spill]] %s12580_s2 }
   0x4   :  { %12626 = sst [smem:[#allocation7_spill]] %s12587_s9 }
   0x5   :  { %12627 = sst [smem:[#allocation8_spill]] %s12588_s10 }
   0x6   :  { %12628 = sst [smem:[#allocation9_spill]] %s12589_s11 }
   0x7 LB: > { %12629 = sst [smem:[#allocation2_spill]] %s10828_s17  ;;  %s8657_s18 = sadd.s32 4294967295, %s10828_s17   ;;  %s10828_s17 = sphi %s10906_s17, %s22_s17  }
   0x8   : > { %p8661_p0 = scmp.ge.s32.totalorder %s10828_s17, 1  ;;  %p362_p1 = scmp.lt.s32.totalorder %s10828_s17, 3 }
   0xa   : > { %p363_p2 = pnand %p8661_p0, %p362_p1 }
   0xc   : > { %366 = sbr.rel (%p363_p2) target bundleno = 21791 (0x551f), region = 56 }
  0x13   : > { %v10917_v0 = vld [vmem:[%s12583_s5] sm:$0xff]  ;;  %v10922_v1 = vld [vmem:[%s12583_s5 + $0x8] sm:$0xff]  ;;  %v10927_v2 = vld [vmem:[%s12583_s5 + $0x10] sm:$0xff]  ;;  %p418_p3 = scmp.lt.s32.totalorder %s8657_s18, 1  ;;  %v540_v3 = vlaneseq  ;;  %s12631_s0 = sld [smem:[#allocation4_spill]]  ;;  %vm458_vm0 = vcmask 261120  }
  0x14   : > { %v10316_v4 = vpack.i.bf16 %v10922_v1, %v10917_v0  ;;  %v9807_v5 = vpack.c.bf16 %v10922_v1, %v10917_v0  ;;  %v10936_v6 = vld [vmem:[%s12583_s5 + $0x18] sm:$0xff]  ;;  %v10947_v9 = vld [vmem:[%s12586_s8] sm:$0xff]  ;;  %v445_v11 = vld [vmem:[%s12581_s3 + $0x8] sm:$0xf]  ;;  %s12618_s20 = smov 32   ;;  %vm572_vm1 = vcmask 64512  }
  0x15   : > { %v9811_v7 = vpack.c.bf16 %v10936_v6, %v10927_v2  ;;  %s12659_s18 = smov (!%p418_p3, %s8657_s18), 1  ;;  %v10942_v8 = vshrl.u32 %v540_v3, 7  ;;  %v444_v10 = vld [vmem:[%s12581_s3] sm:$0xff]  ;;  %s12616_s21 = smov 88   ;;  %vm11008_vm2 = vmpackc.low %vm572_vm1, %vm572_vm1  ;;  %v11027_v40 = vld [vmem:[%s12582_s4 + $0x8] sm:$0xf] }
  0x16   : > { %12630 = sst [smem:[#allocation3_spill]] %s12659_s18  ;;  %9808 = vmatprep.subr.bf16.mxu0 %v9807_v5  ;;  %s8924_s29 = sshll.u32 %s12659_s18, 4  ;;  %v11032_v43 = vld [vmem:[%s12582_s4] sm:$0xff]  ;;  %vm666_vm3 = vcmask 93184   ;;  %vm662_vm4 = vcmask 97280   ;;  %vm699_vm5 = vcmask 1043456  }
  0x17   : > { %9810 = vmatpush3.bf16.msra.mxu0 %v9807_v5  ;;  %v10957_v12 = vsub.s32 1, %v10942_v8  ;;  %v10978_v18 = vsub.s32 0, %v10942_v8  ;;  %s12614_s22 = smov 96   ;;  %s12612_s23 = smov 120   ;;  %v11043_v57 = vsub.s32 2, %v10942_v8  ;;  %vm10838_vm6 = vmmov 1  }
  0x18   : > { %9812 = vmatprep.subr.bf16.mxu0 %v9811_v7  ;;  %s12610_s28 = smov 64   ;;  %s12606_s30 = smov 80   ;;  %vm11067_vm7 = vmpackc.low %vm699_vm5, %vm10838_vm6  ;;  %vm1418_vm8 = vcmask 130048   ;;  %vm1421_vm9 = vcmask 195584   ;;  %vm1532_vm10 = vcmask 257024   ;;  %vm3144_vm11 = vcmask 1044480  }
  0x19   : > { %s10962_s19 = scalar_lea.vmem %s12631_s0, %s8924_s29  ;;  %v549_v15 = vrot.slane %v10947_v9, %v10957_v12  ;;  %v543_v20 = vrot.slane %v10947_v9, %v10978_v18  ;;  %v559_v58 = vrot.slane %v10947_v9, %v11043_v57  ;;  %s12608_s29 = smov 56   ;;  %vm3150_vm12 = vcmask 1040384  }
  0x1a   : > { %v448_v13 = vld [vmem:[%s10962_s19] sm:$0xff]  ;;  %v449_v14 = vld [vmem:[%s10962_s19 + $0x8] sm:$0xf]  ;;  %s12604_s12 = smov 112   ;;  %s12602_s13 = smov 72   ;;  %vm3099_vm13 = vcmask 257025  }
  0x1b   : > { %v10968_v16 = vadd.f32 %v448_v13, %v444_v10  ;;  %v10970_v17 = vadd.f32 %v449_v14, %v445_v11  ;;  %9814 = vmatpush3.bf16.msra.mxu0 %v9811_v7  ;;  %551 = vrot.lane.b32.xlu0 %v549_v15, %s12618_s20  ;;  %s12600_s14 = smov 104   ;;  %s12598_s15 = smov 48   ;;  %vm3115_vm14 = vcmask 256000   ;;  %vm8519_vm15 = vcmask 7168  }
  0x1c   : > { %s12596_s16 = smov 40   ;;  %s12594_s24 = smov 8  }
  0x1d   : > { %9251 = vmatprep.mubr.msk.f32.mxu0 %vm458_vm0, %v10968_v16  ;;  %s12592_s25 = smov 16   ;;  %s12590_s26 = smov 24  }
  0x1e   : > { %9252 = vmatmul.mubr.msk.f32.vlgmr.msra.gmra.mrb[0].mxu0 %vm458_vm0, %v10970_v17  ;;  %s12641_s27 = smov 16   ;;  %s12643_s9 = sld [smem:[#allocation7_spill]] }
  0x1f   : > { %s12651_s11 = smov 32   ;;  %s12653_s0 = sld [smem:[#allocation6_spill]] }
  0x8d   : > { %v552_v19 = vpop.permute.xlu0 %551 }
  0xf1   : > { %v10982_v21 = vpop.f32.mrb[0].mxu0 }
  0xf2   : > { %v555_v22 = vadd.f32 %v10982_v21, %v552_v19  ;;  %v10985_v23 = vpop.f32.mrb[1].mxu0  ;;  %v11000_v27 = vadd.f32 %v10982_v21, %v543_v20 }
  0xf3   : > { %v10988_v24 = vadd.f32 %v543_v20, %v10985_v23  ;;  %v554_v25 = vadd.f32 %v552_v19, %v10985_v23 }
  0xf5   : > { %9258 = vmatprep.mubr.msk.f32.mxu1 %vm572_vm1, %v10988_v24  ;;  %v10993_v26 = vpack.i.bf16 %v555_v22, %v554_v25 }
  0xf7   : > { %10282 = vrot.lane.b32.xlu1 %v10993_v26, %s12616_s21  ;;  %10277 = vrot.lane.b32.xlu0 %v10993_v26, %s12614_s22 }
  0xfb   : > { %779 = vrot.lane.b32.xlu0 %v11000_v27, %s12612_s23  ;;  %777 = vrot.lane.b32.xlu1 %v10988_v24, %s12612_s23 }
 0x169   : > { %v10283_v28 = vpop.permute.xlu1 %10282  ;;  %v10278_v29 = vpop.permute.xlu0 %10277 }
 0x16a   : > { %v10285_v30 = vunpack.i.h.bf16 %v10283_v28  ;;  %v10284_v31 = vunpack.i.l.bf16 %v10283_v28  ;;  %v10280_v32 = vunpack.i.h.bf16 %v10278_v29  ;;  %v10279_v33 = vunpack.i.l.bf16 %v10278_v29 }
 0x16c   : > { %v9815_v35 = vpack.c.bf16 %v10280_v32, %v10279_v33  ;;  %v9827_v36 = vpack.c.bf16 %v10285_v30, %v10284_v31 }
 0x16d   : > { %v778_v37 = vpop.permute.xlu1 %777  ;;  %v780_v38 = vpop.permute.xlu0 %779 }
 0x16e   : > { %9817 = vmatprep.subr.msk.bf16.mxu1 %vm11008_vm2, %v9815_v35 }
 0x16f   : > { %9820 = vmatpush3.bf16.xpose.msk.msra.mxu1 %vm11008_vm2, %v9815_v35 }
 0x170   : > { %9829 = vmatprep.subr.msk.bf16.mxu1 %vm11008_vm2, %v9827_v36 }
 0x176   : > { %9259 = vmatmul.mubr.msk.f32.vlgmr.msra.gmra.mrb[0].mxu1 %vm572_vm1, %v11000_v27 }
 0x177   : > { %9832 = vmatpush3.bf16.xpose.msk.msra.mxu1 %vm11008_vm2, %v9827_v36  ;;  %9272 = vmatprep.mubr.msk.f32.mxu1 %vm572_vm1, %v778_v37 }
 0x17e   : > { %9273 = vmatmul.mubr.msk.f32.vlgmr.msra.gmra.mrb[2].mxu1 %vm572_vm1, %v780_v38 }
 0x249   : > { %v9260_v39 = vpop.f32.mrb[0].mxu1 }
 0x24a   : > { %v659_v41 = vmul.f32 0.35355338, %v9260_v39  ;;  %v649_v42 = vpop.f32.mrb[1].mxu1 }
 0x24b   : > { %v658_v44 = vmul.f32 0.35355338, %v649_v42 }
 0x24c   : > { %v661_v45 = vadd.f32 %v659_v41, %v11027_v40 }
 0x24d   : > { %v660_v46 = vadd.f32 %v658_v44, %v11032_v43 }
 0x24e   : > { %v667_v47 = vsel %vm666_vm3, %v661_v45, -inf }
 0x24f   : > { %668 = vmax.xlane.f32.xlu0 %v667_v47  ;;  %v663_v48 = vsel %vm662_vm4, %v660_v46, -inf }
 0x250   : > { %664 = vmax.xlane.f32.xlu1 %v663_v48 }
 0x251   : > { %v9274_v49 = vpop.f32.mrb[2].mxu1 }
 0x252   : > { %v869_v50 = vmul.f32 0.35355338, %v9274_v49  ;;  %v859_v51 = vpop.f32.mrb[3].mxu1 }
 0x253   : > { %v868_v52 = vmul.f32 0.35355338, %v859_v51 }
 0x254   : > { %v871_v53 = vadd.f32 %v869_v50, %v11027_v40 }
 0x255   : > { %v870_v54 = vadd.f32 %v868_v52, %v11032_v43 }
 0x256   : > { %v875_v55 = vsel %vm666_vm3, %v871_v53, -inf }
 0x257   : > { %876 = vmax.xlane.f32.xlu1 %v875_v55  ;;  %v872_v56 = vsel %vm662_vm4, %v870_v54, -inf }
 0x258   : > { %873 = vmax.xlane.f32.xlu0 %v872_v56 }
 0x26e   : > { %561 = vrot.lane.b32.xlu0 %v559_v58, %s12610_s28 }
 0x2dc   : > { %v669_v59 = vpop.xlane.xlu0 %668 }
 0x2dd   : > { %v671_v60 = vsub.f32 %v661_v45, %v669_v59  ;;  %v665_v61 = vpop.xlane.xlu1 %664 }
 0x2de   : > { %v670_v62 = vsub.f32 %v660_v46, %v665_v61 }
 0x2df   : > { %v674_v63 = vmul.f32 1.442695, %v671_v60 }
 0x2e0   : > { %v672_v3 = vmul.f32 1.442695, %v670_v62 }
 0x2e1   : > { %10576 = vpow2.f32 %v674_v63 }
 0x2e2   : > { %10578 = vpow2.f32 %v672_v3 }
 0x2e4   : > { %v877_v5 = vpop.xlane.xlu1 %876 }
 0x2e5   : > { %v879_v7 = vsub.f32 %v871_v53, %v877_v5  ;;  %v874_v10 = vpop.xlane.xlu0 %873 }
 0x2e6   : > { %v878_v11 = vsub.f32 %v870_v54, %v874_v10 }
 0x2e7   : > { %v882_v13 = vmul.f32 1.442695, %v879_v7 }
 0x2e8   : > { %v880_v14 = vmul.f32 1.442695, %v878_v11 }
 0x2e9   : > { %10580 = vpow2.f32 %v882_v13  ;;  %v562_v15 = vpop.permute.xlu0 %561 }
 0x2ea   : > { %v564_v19 = vadd.f32 %v562_v15, %v10985_v23  ;;  %v565_v20 = vadd.f32 %v10982_v21, %v562_v15  ;;  %10582 = vpow2.f32 %v880_v14 }
 0x2eb   : > { %v10577_v22 = vpop.eup %10576 }
 0x2ec   : > { %v679_v25 = vsel %vm666_vm3, %v10577_v22, 0.0  ;;  %v11051_v28 = vpack.i.bf16 %v565_v20, %v564_v19  ;;  %v10579_v29 = vpop.eup %10578 }
 0x2ed   : > { %680 = vadd.xlane.f32.xlu1 %v679_v25  ;;  %v676_v30 = vsel %vm662_vm4, %v10579_v29, 0.0 }
 0x2ee   : > { %10292 = vrot.lane.b32.xlu0 %v11051_v28, %s12608_s29 }
 0x2f1   : > { %677 = vadd.xlane.f32.xlu1 %v676_v30 }
 0x2f2   : > { %10297 = vrot.lane.b32.xlu0 %v10993_v26, %s12606_s30 }
 0x2f3   : > { %v10581_v21 = vpop.eup %10580 }
 0x2f4   : > { %v887_v23 = vsel %vm666_vm3, %v10581_v21, 0.0  ;;  %v10583_v31 = vpop.eup %10582 }
 0x2f5   : > { %888 = vadd.xlane.f32.xlu1 %v887_v23  ;;  %v884_v32 = vsel %vm662_vm4, %v10583_v31, 0.0 }
 0x2f6   : > { %982 = vrot.lane.b32.xlu0 %v10988_v24, %s12604_s12 }
 0x2f9   : > { %885 = vadd.xlane.f32.xlu1 %v884_v32 }
 0x2fa   : > { %984 = vrot.lane.b32.xlu0 %v11000_v27, %s12604_s12 }
 0x30a   : > { %10287 = vrot.lane.b32.xlu1 %v11051_v28, %s12610_s28 }
 0x360   : > { %v10293_v37 = vpop.permute.xlu0 %10292 }
 0x361   : > { %v10295_v44 = vunpack.i.h.bf16 %v10293_v37  ;;  %v10294_v45 = vunpack.i.l.bf16 %v10293_v37 }
 0x363   : > { %v9833_v52 = vpack.c.bf16 %v10295_v44, %v10294_v45 }
 0x364   : > { %v10298_v48 = vpop.permute.xlu0 %10297 }
 0x365   : > { %v10300_v53 = vunpack.i.h.bf16 %v10298_v48  ;;  %v10299_v54 = vunpack.i.l.bf16 %v10298_v48 }
 0x367   : > { %v9839_v60 = vpack.c.bf16 %v10300_v53, %v10299_v54 }
 0x368   : > { %v983_v62 = vpop.permute.xlu0 %982 }
 0x36c   : > { %v985_v63 = vpop.permute.xlu0 %984 }
 0x37a   : > { %v681_v33 = vpop.xlane.xlu1 %680 }
 0x37e   : > { %v678_v35 = vpop.xlane.xlu1 %677 }
 0x37f   : > { %10584 = vrcp.f32 %v678_v35 }
 0x380   : > { %10586 = vrcp.f32 %v681_v33 }
 0x382   : > { %v889_v36 = vpop.xlane.xlu1 %888 }
 0x386   : > { %v886_v38 = vpop.xlane.xlu1 %885 }
 0x387   : > { %10588 = vrcp.f32 %v886_v38 }
 0x388   : > { %10590 = vrcp.f32 %v889_v36 }
 0x389   : > { %v10585_v39 = vpop.eup %10584 }
 0x38a   : > { %v10288_v41 = vpop.permute.xlu1 %10287  ;;  %v684_v42 = vmul.f32 %v10585_v39, %v10579_v29  ;;  %v10587_v51 = vpop.eup %10586 }
 0x38b   : > { %v10290_v46 = vunpack.i.h.bf16 %v10288_v41  ;;  %v10289_v47 = vunpack.i.l.bf16 %v10288_v41  ;;  %v685_v56 = vmul.f32 %v10587_v51, %v10577_v22 }
 0x38c   : > { %9265 = vmatprep.mubr.msk.f32.mxu0 %vm662_vm4, %v684_v42 }
 0x38d   : > { %v9821_v50 = vpack.c.bf16 %v10290_v46, %v10289_v47 }
 0x38f   : > { %9823 = vmatprep.subr.msk.bf16.mxu0 %vm11067_vm7, %v9821_v50 }
 0x390   : > { %9826 = vmatpush3.bf16.msk.msra.mxu0 %vm11067_vm7, %v9821_v50 }
 0x391   : > { %v10589_v55 = vpop.eup %10588  ;;  %9835 = vmatprep.subr.msk.bf16.mxu0 %vm11067_vm7, %v9833_v52 }
 0x392   : > { %v10591_v58 = vpop.eup %10590  ;;  %v892_v59 = vmul.f32 %v10589_v55, %v10583_v31 }
 0x393   : > { %9266 = vmatmul.mubr.msk.f32.vlgmr.msra.gmra.mrb[2].mxu0 %vm662_vm4, %v685_v56  ;;  %v893_v61 = vmul.f32 %v10591_v58, %v10581_v21 }
 0x394   : > { %9838 = vmatpush3.bf16.msk.msra.mxu0 %vm11067_vm7, %v9833_v52  ;;  %9279 = vmatprep.mubr.msk.f32.mxu0 %vm662_vm4, %v892_v59 }
 0x395   : > { %9841 = vmatprep.subr.msk.bf16.mxu0 %vm11008_vm2, %v9839_v60 }
 0x397   : > { %9280 = vmatmul.mubr.msk.f32.vlgmr.msra.gmra.mrb[4].mxu0 %vm662_vm4, %v893_v61 }
 0x398   : > { %9286 = vmatprep.mubr.msk.f32.mxu0 %vm572_vm1, %v983_v62 }
 0x39d   : > { %9844 = vmatpush3.bf16.xpose.msk.msra.mxu0 %vm11008_vm2, %v9839_v60 }
 0x3a4   : > { %9287 = vmatmul.mubr.msk.f32.vlgmr.msra.gmra.mrb[6].mxu0 %vm572_vm1, %v985_v63 }
 0x466   : > { %v11088_v3 = vpop.f32.mrb[2].mxu0 }
 0x467   : > { %v11090_v5 = vpop.f32.mrb[3].mxu0 }
 0x46a   : > { %v11092_v7 = vpop.f32.mrb[4].mxu0 }
 0x46b   : > { %v11094_v10 = vpop.f32.mrb[5].mxu0 }
 0x477   : > { %v9288_v11 = vpop.f32.mrb[6].mxu0 }
 0x478   : > { %v1074_v13 = vmul.f32 0.35355338, %v9288_v11  ;;  %v1064_v14 = vpop.f32.mrb[7].mxu0 }
 0x479   : > { %v1073_v15 = vmul.f32 0.35355338, %v1064_v14 }
 0x47a   : > { %v1076_v19 = vadd.f32 %v1074_v13, %v11027_v40 }
 0x47b   : > { %v1075_v20 = vadd.f32 %v1073_v15, %v11032_v43 }
 0x47c   : > { %v1080_v22 = vsel %vm666_vm3, %v1076_v19, -inf }
 0x47d   : > { %1081 = vmax.xlane.f32.xlu0 %v1080_v22  ;;  %v1077_v25 = vsel %vm662_vm4, %v1075_v20, -inf }
 0x47e   : > { %1078 = vmax.xlane.f32.xlu1 %v1077_v25 }
 0x50a   : > { %v1082_v29 = vpop.xlane.xlu0 %1081 }
 0x50b   : > { %v1084_v30 = vsub.f32 %v1076_v19, %v1082_v29  ;;  %v1079_v21 = vpop.xlane.xlu1 %1078 }
 0x50c   : > { %v1083_v23 = vsub.f32 %v1075_v20, %v1079_v21 }
 0x50d   : > { %v1087_v31 = vmul.f32 1.442695, %v1084_v30 }
 0x50e   : > { %v1085_v32 = vmul.f32 1.442695, %v1083_v23  ;;  %v10321_v23 = vpack.i.bf16 %v10936_v6, %v10927_v2 }
 0x50f   : > { %10592 = vpow2.f32 %v1087_v31 }
 0x510   : > { %10594 = vpow2.f32 %v1085_v32 }
 0x519   : > { %v10593_v33 = vpop.eup %10592 }
 0x51a   : > { %v10595_v35 = vpop.eup %10594  ;;  %v1092_v36 = vsel %vm666_vm3, %v10593_v33, 0.0 }
 0x51b   : > { %1093 = vadd.xlane.f32.xlu1 %v1092_v36  ;;  %v1089_v37 = vsel %vm662_vm4, %v10595_v35, 0.0 }
 0x51c   : > { %1090 = vadd.xlane.f32.xlu0 %v1089_v37 }
 0x52c   : > { %10307 = vrot.lane.b32.xlu1 %v10993_v26, %s12602_s13  ;;  %s12642_s13 = smov 24  }
 0x530   : > { %1187 = vrot.lane.b32.xlu1 %v10988_v24, %s12600_s14 }
 0x532   : > { %10302 = vrot.lane.b32.xlu0 %v11051_v28, %s12598_s15  ;;  %s12636_s15 = smov 72  }
 0x536   : > { %1189 = vrot.lane.b32.xlu0 %v11000_v27, %s12600_s14  ;;  %s12647_s14 = smov 64  }
 0x5a8   : > { %v1094_v38 = vpop.xlane.xlu1 %1093 }
 0x5a9   : > { %10596 = vrcp.f32 %v1094_v38  ;;  %v1091_v39 = vpop.xlane.xlu0 %1090 }
 0x5aa   : > { %10598 = vrcp.f32 %v1091_v39 }
 0x5ac   : > { %v10308_v41 = vpop.permute.xlu1 %10307 }
 0x5ad   : > { %v10303_v42 = vpop.permute.xlu0 %10302  ;;  %v10310_v44 = vunpack.i.h.bf16 %v10308_v41  ;;  %v10309_v45 = vunpack.i.l.bf16 %v10308_v41 }
 0x5ae   : > { %v10305_v26 = vunpack.i.h.bf16 %v10303_v42  ;;  %v10304_v46 = vunpack.i.l.bf16 %v10303_v42 }
 0x5af   : > { %v9851_v48 = vpack.c.bf16 %v10310_v44, %v10309_v45 }
 0x5b0   : > { %v9845_v47 = vpack.c.bf16 %v10305_v26, %v10304_v46  ;;  %v1188_v52 = vpop.permute.xlu1 %1187 }
 0x5b1   : > { %v1190_v53 = vpop.permute.xlu0 %1189 }
 0x5b2   : > { %9847 = vmatprep.subr.msk.bf16.mxu1 %vm11067_vm7, %v9845_v47 }
 0x5b3   : > { %v10597_v24 = vpop.eup %10596  ;;  %9850 = vmatpush3.bf16.msk.msra.mxu1 %vm11067_vm7, %v9845_v47 }
 0x5b4   : > { %v10599_v27 = vpop.eup %10598  ;;  %9853 = vmatprep.subr.msk.bf16.mxu1 %vm11008_vm2, %v9851_v48  ;;  %v1098_v51 = vmul.f32 %v10597_v24, %v10593_v33 }
 0x5b5   : > { %v1097_v50 = vmul.f32 %v10599_v27, %v10595_v35 }
 0x5b7   : > { %9293 = vmatprep.mubr.msk.f32.mxu1 %vm662_vm4, %v1097_v50 }
 0x5b8   : > { %9294 = vmatmul.mubr.msk.f32.vlgmr.msra.gmra.mrb[4].mxu1 %vm662_vm4, %v1098_v51 }
 0x5b9   : > { %9300 = vmatprep.mubr.msk.f32.mxu1 %vm572_vm1, %v1188_v52 }
 0x5bc   : > { %9856 = vmatpush3.bf16.xpose.msk.msra.mxu1 %vm11008_vm2, %v9851_v48 }
 0x5c3   : > { %9301 = vmatmul.mubr.msk.f32.vlgmr.msra.gmra.mrb[6].mxu1 %vm572_vm1, %v1190_v53 }
 0x68b   : > { %v9295_v54 = vpop.f32.mrb[4].mxu1 }
 0x68c   : > { %v1178_v55 = vpop.f32.mrb[5].mxu1 }
 0x696   : > { %v9302_v56 = vpop.f32.mrb[6].mxu1 }
 0x697   : > { %v1279_v58 = vmul.f32 0.35355338, %v9302_v56  ;;  %v1269_v59 = vpop.f32.mrb[7].mxu1  ;;  %v11162_v56 = vsub.s32 3, %v10942_v8 }
 0x698   : > { %v1278_v60 = vmul.f32 0.35355338, %v1269_v59 }
 0x699   : > { %v1281_v61 = vadd.f32 %v1279_v58, %v11027_v40 }
 0x69a   : > { %v1280_v62 = vadd.f32 %v1278_v60, %v11032_v43 }
 0x69b   : > { %v1285_v63 = vsel %vm666_vm3, %v1281_v61, -inf }
 0x69c   : > { %1286 = vmax.xlane.f32.xlu0 %v1285_v63  ;;  %v1282_v11 = vsel %vm662_vm4, %v1280_v62, -inf }
 0x69d   : > { %1283 = vmax.xlane.f32.xlu1 %v1282_v11 }
 0x729   : > { %v1287_v13 = vpop.xlane.xlu0 %1286 }
 0x72a   : > { %v1289_v14 = vsub.f32 %v1281_v61, %v1287_v13  ;;  %v1284_v15 = vpop.xlane.xlu1 %1283 }
 0x72b   : > { %v1288_v19 = vsub.f32 %v1280_v62, %v1284_v15 }
 0x72c   : > { %v1292_v20 = vmul.f32 1.442695, %v1289_v14 }
 0x72d   : > { %v1290_v22 = vmul.f32 1.442695, %v1288_v19 }
 0x72e   : > { %10600 = vpow2.f32 %v1292_v20 }
 0x72f   : > { %10602 = vpow2.f32 %v1290_v22 }
 0x738   : > { %v10601_v25 = vpop.eup %10600 }
 0x739   : > { %v10603_v29 = vpop.eup %10602  ;;  %v1297_v30 = vsel %vm666_vm3, %v10601_v25, 0.0 }
 0x73a   : > { %1298 = vadd.xlane.f32.xlu1 %v1297_v30  ;;  %v1294_v21 = vsel %vm662_vm4, %v10603_v29, 0.0  ;;  %v1569_v30 = vld [vmem:[%s12584_s6] sm:$0xff] }
 0x73b   : > { %1295 = vadd.xlane.f32.xlu0 %v1294_v21  ;;  %v1570_v21 = vld [vmem:[%s12584_s6 + $0x8] sm:$0xff] }
 0x74b   : > { %10317 = vrot.lane.b32.xlu1 %v10316_v4, %s12618_s20 }
 0x74f   : > { %10322 = vrot.lane.b32.xlu1 %v10321_v23, %s12618_s20  ;;  %v9871_v23 = vpack.c.bf16 %v1570_v21, %v1569_v30  ;;  %v11230_v30 = vld [vmem:[%s12583_s5 + $0x30] sm:$0xff]  ;;  %v11235_v21 = vld [vmem:[%s12583_s5 + $0x38] sm:$0xff] }
 0x751   : > { %10312 = vrot.lane.b32.xlu0 %v11051_v28, %s12596_s16  ;;  %9872 = vmatprep.subr.bf16.mxu1 %v9871_v23  ;;  %s12637_s16 = smov 104  }
 0x752   : > { %9874 = vmatpush3.bf16.msra.mxu1 %v9871_v23  ;;  %v9883_v23 = vpack.c.bf16 %v11235_v21, %v11230_v30 }
 0x753   : > { %1396 = vrot.lane.b32.xlu1 %v11092_v7, %s12594_s24 }
 0x755   : > { %1394 = vrot.lane.b32.xlu0 %v11094_v10, %s12594_s24  ;;  %s12638_s24 = smov 48  }
 0x757   : > { %1404 = vrot.lane.b32.xlu1 %v9295_v54, %s12592_s25 }
 0x759   : > { %1402 = vrot.lane.b32.xlu0 %v1178_v55, %s12592_s25  ;;  %s12639_s25 = smov 40  }
 0x7c7   : > { %v1299_v0 = vpop.xlane.xlu1 %1298 }
 0x7c8   : > { %10604 = vrcp.f32 %v1299_v0  ;;  %v1296_v1 = vpop.xlane.xlu0 %1295  ;;  %v1571_v0 = vld [vmem:[%s12584_s6 + $0x10] sm:$0xff] }
 0x7c9   : > { %10606 = vrcp.f32 %v1296_v1  ;;  %v1572_v1 = vld [vmem:[%s12584_s6 + $0x18] sm:$0xff] }
 0x7cb   : > { %v10318_v33 = vpop.permute.xlu1 %10317 }
 0x7cc   : > { %v10313_v2 = vpop.permute.xlu0 %10312  ;;  %v10320_v36 = vunpack.i.h.bf16 %v10318_v33  ;;  %v10319_v37 = vunpack.i.l.bf16 %v10318_v33  ;;  %v11188_v33 = vsub.s32 7, %v10942_v8 }
 0x7cd   : > { %v10315_v4 = vunpack.i.h.bf16 %v10313_v2  ;;  %v10314_v6 = vunpack.i.l.bf16 %v10313_v2  ;;  %v9875_v2 = vpack.c.bf16 %v1572_v1, %v1571_v0  ;;  %v11242_v0 = vld [vmem:[%s12586_s8 + $0x10] sm:$0xff] }
 0x7ce   : > { %v9863_v41 = vpack.c.bf16 %v10320_v36, %v10319_v37  ;;  %v1884_v1 = vrot.slane %v11242_v0, %v10957_v12 }
 0x7cf   : > { %v9857_v28 = vpack.c.bf16 %v10315_v4, %v10314_v6  ;;  %v10323_v35 = vpop.permute.xlu1 %10322  ;;  %9876 = vmatprep.subr.bf16.mxu1 %v9875_v2 }
 0x7d0   : > { %v10325_v38 = vunpack.i.h.bf16 %v10323_v35  ;;  %v10324_v39 = vunpack.i.l.bf16 %v10323_v35  ;;  %v1395_v46 = vpop.permute.xlu0 %1394  ;;  %9878 = vmatpush3.bf16.msra.mxu1 %v9875_v2 }
 0x7d1   : > { %9859 = vmatprep.subr.msk.bf16.mxu0 %vm11067_vm7, %v9857_v28  ;;  %v1416_v24 = vsel %vm572_vm1, %v11090_v5, %v1395_v46  ;;  %v1526_v5 = vrot.slane %v10947_v9, %v11162_v56  ;;  %v1660_v46 = vld [vmem:[%s12585_s7] sm:$0xff] }
 0x7d2   : > { %v10605_v7 = vpop.eup %10604  ;;  %9862 = vmatpush3.bf16.msk.msra.mxu0 %vm11067_vm7, %v9857_v28  ;;  %v9867_v42 = vpack.c.bf16 %v10325_v38, %v10324_v39  ;;  %v1566_v38 = vrot.slane %v10947_v9, %v11188_v33 }
 0x7d3   : > { %v10607_v10 = vpop.eup %10606  ;;  %v1303_v32 = vmul.f32 %v10605_v7, %v10601_v25  ;;  %9864 = vmatprep.subr.bf16.mxu0 %v9863_v41  ;;  %v1397_v26 = vpop.permute.xlu1 %1396 }
 0x7d4   : > { %v1302_v31 = vmul.f32 %v10607_v10, %v10603_v29  ;;  %v1403_v48 = vpop.permute.xlu0 %1402  ;;  %v1417_v50 = vsel %vm572_vm1, %v11088_v3, %v1397_v26 }
 0x7d5   : > { %v1419_v51 = vsel %vm1418_vm8, %v1416_v24, %v1403_v48 }
 0x7d6   : > { %9307 = vmatprep.mubr.msk.f32.mxu0 %vm662_vm4, %v1302_v31 }
 0x7d7   : > { %9308 = vmatmul.mubr.msk.f32.vlgmr.msra.gmra.mrb[8].mxu0 %vm662_vm4, %v1303_v32  ;;  %v1405_v47 = vpop.permute.xlu1 %1404  ;;  %v11185_v32 = vsub.s32 6, %v10942_v8 }
 0x7d8   : > { %9866 = vmatpush3.bf16.msra.mxu0 %v9863_v41  ;;  %v1420_v53 = vsel %vm1418_vm8, %v1417_v50, %v1405_v47  ;;  %v11200_v47 = vsub.s32 4, %v10942_v8 }
 0x7d9   : > { %9868 = vmatprep.subr.bf16.mxu0 %v9867_v42  ;;  %v1560_v35 = vrot.slane %v10947_v9, %v11185_v32 }
 0x7da   : > { %v1576_v48 = vrot.slane %v10947_v9, %v11200_v47 }
 0x7dc   : > { %9870 = vmatpush3.bf16.msra.mxu0 %v9867_v42 }
 0x7dd   : > { %9332 = vmatprep.subr.mxu0 %v1660_v46 }
 0x8aa   : > { %v9309_v44 = vpop.f32.mrb[8].mxu0 }
 0x8ab   : > { %1412 = vrot.lane.b32.xlu1 %v9309_v44, %s12590_s26  ;;  %v1383_v45 = vpop.f32.mrb[9].mxu0 }
 0x8ac   : > { %1410 = vrot.lane.b32.xlu0 %v1383_v45, %s12590_s26  ;;  %s12640_s26 = smov 8  }
 0x91d   : > { %v1413_v27 = vpop.permute.xlu1 %1412 }
 0x91e   : > { %v1411_v52 = vpop.permute.xlu0 %1410  ;;  %v1423_v55 = vsel %vm1421_vm9, %v1420_v53, %v1413_v27 }
 0x91f   : > { %v1422_v54 = vsel %vm1421_vm9, %v1419_v51, %v1411_v52 }
 0x920   : > { %9318 = vmatprep.mubr.msk.f32.mxu0 %vm458_vm0, %v1422_v54  ;;  %v11207_v54 = vsub.s32 5, %v10942_v8 }
 0x921   : > { %9319 = vmatmul.mubr.msk.f32.vlgmr.msra.gmra.mrb[10].mxu0 %vm458_vm0, %v1423_v55 }
 0x922   : > { %9333 = vmatpush3.msra.mxu0 %v1660_v46  ;;  %v1664_v55 = vrot.slane %v10947_v9, %v11207_v54  ;;  %v1878_v46 = vrot.slane %v11242_v0, %v10978_v18 }
 0x9f4   : > { %v9320_v3 = vpop.f32.mrb[10].mxu0 }
 0x9f5   : > { %v1522_v58 = vadd.f32 %v9320_v3, %v10970_v17  ;;  %v1512_v59 = vpop.f32.mrb[11].mxu0 }
 0x9f6   : > { %v1521_v60 = vadd.f32 %v1512_v59, %v10968_v16 }
 0x9f7   : > { %v1528_v61 = vadd.f32 %v1526_v5, %v1522_v58 }
 0x9f8   : > { %v1527_v62 = vadd.f32 %v1526_v5, %v1521_v60 }
 0x9f9   : > { %v1533_v63 = vsel %vm1532_vm10, %v1528_v61, 0.0 }
 0x9fa   : > { %1534 = vadd.xlane.f32.xlu1 %v1533_v63  ;;  %v1529_v11 = vsel %vm458_vm0, %v1527_v62, 0.0 }
 0x9fb   : > { %1530 = vadd.xlane.f32.xlu0 %v1529_v11 }
 0xa87   : > { %v1535_v13 = vpop.xlane.xlu1 %1534 }
 0xa88   : > { %v1538_v14 = vmul.f32 0.03125, %v1535_v13  ;;  %v1531_v15 = vpop.xlane.xlu0 %1530 }
 0xa89   : > { %v1537_v19 = vmul.f32 0.03125, %v1531_v15 }
 0xa8a   : > { %v1540_v20 = vsub.f32 %v1528_v61, %v1538_v14 }
 0xa8b   : > { %v1539_v22 = vsub.f32 %v1527_v62, %v1537_v19 }
 0xa8c   : > { %v1542_v29 = vmul.f32 %v1540_v20, %v1540_v20 }
 0xa8d   : > { %v1541_v25 = vmul.f32 %v1539_v22, %v1539_v22 }
 0xa8e   : > { %v1546_v16 = vsel %vm1532_vm10, %v1542_v29, 0.0  ;;  %v11223_v29 = vld [vmem:[%s12583_s5 + $0x28] sm:$0xff] }
 0xa8f   : > { %v1543_v17 = vsel %vm458_vm0, %v1541_v25, 0.0 }
 0xa90   : > { %1544 = vadd.xlane.f32.xlu0 %v1543_v17  ;;  %v11218_v17 = vld [vmem:[%s12583_s5 + $0x20] sm:$0xff] }
 0xa94   : > { %1547 = vadd.xlane.f32.xlu0 %v1546_v16  ;;  %v9879_v16 = vpack.c.bf16 %v11223_v29, %v11218_v17 }
 0xa96   : > { %9880 = vmatprep.subr.bf16.mxu1 %v9879_v16 }
 0xb1d   : > { %v1545_v4 = vpop.xlane.xlu0 %1544 }
 0xb1e   : > { %v1549_v6 = vmul.f32 0.03125, %v1545_v4 }
 0xb20   : > { %v1551_v28 = vadd.f32 1e-05, %v1549_v6 }
 0xb21   : > { %v1548_v7 = vpop.xlane.xlu0 %1547 }
 0xb22   : > { %10608 = vrsqrt.f32 %v1551_v28  ;;  %v1550_v10 = vmul.f32 0.03125, %v1548_v7 }
 0xb24   : > { %v1552_v31 = vadd.f32 1e-05, %v1550_v10 }
 0xb26   : > { %10610 = vrsqrt.f32 %v1552_v31  ;;  %v457_v31 = vld [vmem:[%s12586_s8 + $0x8] sm:$0x3] }
 0xb2c   : > { %v10609_v36 = vpop.eup %10608 }
 0xb2d   : > { %v1555_v37 = vmul.f32 %v10609_v36, %v1539_v22 }
 0xb2f   : > { %v1561_v39 = vmul.f32 %v1560_v35, %v1555_v37 }
 0xb30   : > { %v10611_v41 = vpop.eup %10610 }
 0xb31   : > { %v1556_v42 = vmul.f32 %v10611_v41, %v1540_v20  ;;  %v1567_v44 = vadd.f32 %v1566_v38, %v1561_v39  ;;  %v1783_v41 = vrot.slane %v457_v31, %v10957_v12 }
 0xb33   : > { %v1562_v45 = vmul.f32 %v1560_v35, %v1556_v42  ;;  %9329 = vmatprep.mubr.msk.f32.mxu1 %vm458_vm0, %v1567_v44  ;;  %v1777_v35 = vrot.slane %v457_v31, %v10978_v18 }
 0xb35   : > { %v1568_v26 = vadd.f32 %v1566_v38, %v1562_v45 }
 0xb37   : > { %9330 = vmatmul.mubr.msk.f32.vlgmr.msra.gmra.mrb[8].mxu1 %vm458_vm0, %v1568_v26 }
 0xb38   : > { %9882 = vmatpush3.bf16.msra.mxu1 %v9879_v16 }
 0xb39   : > { %9884 = vmatprep.subr.bf16.mxu1 %v9883_v23 }
 0xb3c   : > { %9886 = vmatpush3.bf16.msra.mxu1 %v9883_v23 }
 0xc0a   : > { %v9331_v24 = vpop.f32.mrb[8].mxu1 }
 0xc0b   : > { %v1655_v27 = vadd.f32 %v9331_v24, %v1576_v48  ;;  %v1649_v50 = vpop.f32.mrb[9].mxu1 }
 0xc0c   : > { %v1650_v51 = vadd.f32 %v1649_v50, %v1576_v48 }
 0xc0d   : > { %v1659_v53 = vmax.f32 %v1655_v27, 0.0 }
 0xc0e   : > { %v1658_v52 = vmax.f32 %v1650_v51, 0.0 }
 0xc10   : > { %9334 = vmatprep.mubr.msk.f32.mxu0 %vm572_vm1, %v1658_v52 }
 0xc11   : > { %9335 = vmatmul.mubr.msk.f32.vlgmr.msra.gmra.mrb[12].mxu0 %vm572_vm1, %v1659_v53 }
 0xce4   : > { %v9336_v5 = vpop.f32.mrb[12].mxu0 }
 0xce5   : > { %v1743_v3 = vadd.f32 %v9336_v5, %v1664_v55  ;;  %v1737_v58 = vpop.f32.mrb[13].mxu0 }
 0xce6   : > { %v1738_v59 = vadd.f32 %v1737_v58, %v1664_v55 }
 0xce7   : > { %v1747_v60 = vadd.f32 %v1743_v3, %v1568_v26 }
 0xce8   : > { %v1746_v61 = vadd.f32 %v1738_v59, %v1567_v44 }
 0xce9   : > { %v1751_v62 = vsel %vm1532_vm10, %v1747_v60, 0.0 }
 0xcea   : > { %1752 = vadd.xlane.f32.xlu0 %v1751_v62  ;;  %v1748_v63 = vsel %vm458_vm0, %v1746_v61, 0.0 }
 0xceb   : > { %1749 = vadd.xlane.f32.xlu1 %v1748_v63 }
 0xd77   : > { %v1753_v11 = vpop.xlane.xlu0 %1752 }
 0xd78   : > { %v1755_v13 = vmul.f32 0.03125, %v1753_v11  ;;  %v1750_v14 = vpop.xlane.xlu1 %1749 }
 0xd79   : > { %v1754_v8 = vmul.f32 0.03125, %v1750_v14 }
 0xd7a   : > { %v1757_v15 = vsub.f32 %v1747_v60, %v1755_v13 }
 0xd7b   : > { %v1756_v19 = vsub.f32 %v1746_v61, %v1754_v8 }
 0xd7c   : > { %v1759_v20 = vmul.f32 %v1757_v15, %v1757_v15 }
 0xd7d   : > { %v1758_v9 = vmul.f32 %v1756_v19, %v1756_v19 }
 0xd7e   : > { %v1763_v22 = vsel %vm1532_vm10, %v1759_v20, 0.0 }
 0xd7f   : > { %1764 = vadd.xlane.f32.xlu0 %v1763_v22  ;;  %v1760_v25 = vsel %vm458_vm0, %v1758_v9, 0.0 }
 0xd80   : > { %1761 = vadd.xlane.f32.xlu1 %v1760_v25 }
 0xd91   : > { %1886 = vrot.lane.b32.xlu1 %v1884_v1, %s12618_s20 }
 0xe0c   : > { %v1765_v2 = vpop.xlane.xlu0 %1764 }
 0xe0d   : > { %v1767_v4 = vmul.f32 0.03125, %v1765_v2  ;;  %v1762_v6 = vpop.xlane.xlu1 %1761 }
 0xe0e   : > { %v1766_v28 = vmul.f32 0.03125, %v1762_v6 }
 0xe0f   : > { %v1769_v7 = vadd.f32 1e-05, %v1767_v4 }
 0xe10   : > { %v1768_v10 = vadd.f32 1e-05, %v1766_v28 }
 0xe11   : > { %10612 = vrsqrt.f32 %v1769_v7  ;;  %v1887_v48 = vpop.permute.xlu1 %1886 }
 0xe12   : > { %10614 = vrsqrt.f32 %v1768_v10  ;;  %v1894_v10 = vrot.slane %v11242_v0, %v11043_v57 }
 0xe1b   : > { %v10613_v36 = vpop.eup %10612 }
 0xe1c   : > { %v10615_v37 = vpop.eup %10614  ;;  %v1773_v38 = vmul.f32 %v10613_v36, %v1757_v15 }
 0xe1d   : > { %v1772_v39 = vmul.f32 %v10615_v37, %v1756_v19 }
 0xe1e   : > { %v1779_v42 = vmul.f32 %v1777_v35, %v1773_v38 }
 0xe1f   : > { %v1778_v44 = vmul.f32 %v1777_v35, %v1772_v39 }
 0xe20   : > { %v11254_v26 = vadd.f32 %v1783_v41, %v1779_v42 }
 0xe21   : > { %v11252_v45 = vadd.f32 %v1783_v41, %v1778_v44 }
 0xe23   : > { %9345 = vmatprep.mubr.msk.f32.mxu1 %vm458_vm0, %v11252_v45 }
 0xe24   : > { %9346 = vmatmul.mubr.msk.f32.vlgmr.msra.gmra.mrb[10].mxu1 %vm458_vm0, %v11254_v26 }
 0xef7   : > { %v11262_v24 = vpop.f32.mrb[10].mxu1 }
 0xef8   : > { %v1890_v27 = vadd.f32 %v11262_v24, %v1887_v48  ;;  %v11265_v50 = vpop.f32.mrb[11].mxu1  ;;  %v11280_v55 = vadd.f32 %v11262_v24, %v1878_v46 }
 0xef9   : > { %v11268_v51 = vadd.f32 %v1878_v46, %v11265_v50  ;;  %v1889_v52 = vadd.f32 %v1887_v48, %v11265_v50 }
 0xefb   : > { %9352 = vmatprep.mubr.msk.f32.mxu0 %vm572_vm1, %v11268_v51  ;;  %v11273_v53 = vpack.i.bf16 %v1890_v27, %v1889_v52 }
 0xefd   : > { %10332 = vrot.lane.b32.xlu1 %v11273_v53, %s12616_s21  ;;  %10327 = vrot.lane.b32.xlu0 %v11273_v53, %s12614_s22  ;;  %s12649_s22 = smov 80  }
 0xf01   : > { %2108 = vrot.lane.b32.xlu1 %v11268_v51, %s12612_s23  ;;  %2110 = vrot.lane.b32.xlu0 %v11280_v55, %s12612_s23  ;;  %s12650_s23 = smov 112  }
 0xf6f   : > { %v10333_v5 = vpop.permute.xlu1 %10332  ;;  %v10328_v3 = vpop.permute.xlu0 %10327 }
 0xf70   : > { %v10335_v58 = vunpack.i.h.bf16 %v10333_v5  ;;  %v10334_v59 = vunpack.i.l.bf16 %v10333_v5  ;;  %v10330_v60 = vunpack.i.h.bf16 %v10328_v3  ;;  %v10329_v61 = vunpack.i.l.bf16 %v10328_v3 }
 0xf72   : > { %v9887_v62 = vpack.c.bf16 %v10330_v60, %v10329_v61  ;;  %v9899_v63 = vpack.c.bf16 %v10335_v58, %v10334_v59 }
 0xf73   : > { %v2109_v11 = vpop.permute.xlu1 %2108  ;;  %v2111_v13 = vpop.permute.xlu0 %2110 }
 0xf74   : > { %9889 = vmatprep.subr.msk.bf16.mxu0 %vm11008_vm2, %v9887_v62 }
 0xf75   : > { %9892 = vmatpush3.bf16.xpose.msk.msra.mxu0 %vm11008_vm2, %v9887_v62 }
 0xf76   : > { %9901 = vmatprep.subr.msk.bf16.mxu0 %vm11008_vm2, %v9899_v63 }
 0xf7c   : > { %9353 = vmatmul.mubr.msk.f32.vlgmr.msra.gmra.mrb[14].mxu0 %vm572_vm1, %v11280_v55 }
 0xf7d   : > { %9904 = vmatpush3.bf16.xpose.msk.msra.mxu0 %vm11008_vm2, %v9899_v63  ;;  %9366 = vmatprep.mubr.msk.f32.mxu0 %vm572_vm1, %v2109_v11 }
 0xf84   : > { %9367 = vmatmul.mubr.msk.f32.vlgmr.msra.gmra.mrb[16].mxu0 %vm572_vm1, %v2111_v13 }
0x104f   : > { %v9354_v14 = vpop.f32.mrb[14].mxu0 }
0x1050   : > { %v1993_v8 = vmul.f32 0.35355338, %v9354_v14  ;;  %v1983_v15 = vpop.f32.mrb[15].mxu0 }
0x1051   : > { %v1992_v19 = vmul.f32 0.35355338, %v1983_v15 }
0x1052   : > { %v1995_v20 = vadd.f32 %v1993_v8, %v11027_v40 }
0x1053   : > { %v1994_v9 = vadd.f32 %v1992_v19, %v11032_v43 }
0x1054   : > { %v1999_v22 = vsel %vm666_vm3, %v1995_v20, -inf }
0x1055   : > { %2000 = vmax.xlane.f32.xlu0 %v1999_v22  ;;  %v1996_v25 = vsel %vm662_vm4, %v1994_v9, -inf }
0x1056   : > { %1997 = vmax.xlane.f32.xlu1 %v1996_v25 }
0x1057   : > { %v9368_v16 = vpop.f32.mrb[16].mxu0 }
0x1058   : > { %v2200_v23 = vmul.f32 0.35355338, %v9368_v16  ;;  %v2190_v1 = vpop.f32.mrb[17].mxu0 }
0x1059   : > { %v2199_v2 = vmul.f32 0.35355338, %v2190_v1 }
0x105a   : > { %v2202_v4 = vadd.f32 %v2200_v23, %v11027_v40 }
0x105b   : > { %v2201_v6 = vadd.f32 %v2199_v2, %v11032_v43 }
0x105c   : > { %v2206_v28 = vsel %vm666_vm3, %v2202_v4, -inf }
0x105d   : > { %2207 = vmax.xlane.f32.xlu1 %v2206_v28  ;;  %v2203_v7 = vsel %vm662_vm4, %v2201_v6, -inf }
0x105e   : > { %2204 = vmax.xlane.f32.xlu0 %v2203_v7 }
0x1074   : > { %1896 = vrot.lane.b32.xlu0 %v1894_v10, %s12610_s28 }
0x10e2   : > { %v2001_v31 = vpop.xlane.xlu0 %2000 }
0x10e3   : > { %v2003_v35 = vsub.f32 %v1995_v20, %v2001_v31  ;;  %v1998_v36 = vpop.xlane.xlu1 %1997 }
0x10e4   : > { %v2002_v37 = vsub.f32 %v1994_v9, %v1998_v36 }
0x10e5   : > { %v2006_v38 = vmul.f32 1.442695, %v2003_v35 }
0x10e6   : > { %v2004_v39 = vmul.f32 1.442695, %v2002_v37 }
0x10e7   : > { %10616 = vpow2.f32 %v2006_v38 }
0x10e8   : > { %10618 = vpow2.f32 %v2004_v39 }
0x10ea   : > { %v2208_v40 = vpop.xlane.xlu1 %2207 }
0x10eb   : > { %v2210_v43 = vsub.f32 %v2202_v4, %v2208_v40  ;;  %v2205_v41 = vpop.xlane.xlu0 %2204 }
0x10ec   : > { %v2209_v42 = vsub.f32 %v2201_v6, %v2205_v41 }
0x10ed   : > { %v2213_v44 = vmul.f32 1.442695, %v2210_v43 }
0x10ee   : > { %v2211_v46 = vmul.f32 1.442695, %v2209_v42 }
0x10ef   : > { %10620 = vpow2.f32 %v2213_v44  ;;  %v1897_v48 = vpop.permute.xlu0 %1896 }
0x10f0   : > { %v1899_v27 = vadd.f32 %v1897_v48, %v11265_v50  ;;  %v1900_v52 = vadd.f32 %v11262_v24, %v1897_v48  ;;  %10622 = vpow2.f32 %v2211_v46 }
0x10f1   : > { %v10617_v5 = vpop.eup %10616 }
0x10f2   : > { %v2011_v3 = vsel %vm666_vm3, %v10617_v5, 0.0  ;;  %v11312_v58 = vpack.i.bf16 %v1900_v52, %v1899_v27  ;;  %v10619_v59 = vpop.eup %10618  ;;  %v11356_v52 = vld [vmem:[%s12582_s4 + $0x8] sm:$0xf] }
0x10f3   : > { %2012 = vadd.xlane.f32.xlu1 %v2011_v3  ;;  %v2008_v60 = vsel %vm662_vm4, %v10619_v59, 0.0  ;;  %v11362_v3 = vld [vmem:[%s12582_s4] sm:$0xff] }
0x10f4   : > { %10342 = vrot.lane.b32.xlu0 %v11312_v58, %s12608_s29  ;;  %s12645_s29 = smov 96  }
0x10f7   : > { %2009 = vadd.xlane.f32.xlu1 %v2008_v60 }
0x10f8   : > { %10347 = vrot.lane.b32.xlu0 %v11273_v53, %s12606_s30  ;;  %s12646_s30 = smov 120  }
0x10f9   : > { %v10621_v50 = vpop.eup %10620 }
0x10fa   : > { %v2218_v24 = vsel %vm666_vm3, %v10621_v50, 0.0  ;;  %v10623_v61 = vpop.eup %10622 }
0x10fb   : > { %2219 = vadd.xlane.f32.xlu1 %v2218_v24  ;;  %v2215_v62 = vsel %vm662_vm4, %v10623_v61, 0.0 }
0x10fc   : > { %2313 = vrot.lane.b32.xlu0 %v11268_v51, %s12604_s12 }
0x10ff   : > { %2216 = vadd.xlane.f32.xlu1 %v2215_v62 }
0x1100   : > { %2315 = vrot.lane.b32.xlu0 %v11280_v55, %s12604_s12  ;;  %s11524_s12 = smul.u32 12, %s12659_s18 }
0x1102   : > { %s11530_s21 = scalar_lea.vmem %s12643_s9, %s11524_s12  ;;  %s12546_s2 = scalar_lea.vmem %s12653_s0, %s11524_s12 }
0x1110   : > { %10337 = vrot.lane.b32.xlu1 %v11312_v58, %s12610_s28  ;;  %s12644_s28 = smov 88  }
0x1166   : > { %v10343_v14 = vpop.permute.xlu0 %10342 }
0x1167   : > { %v10345_v9 = vunpack.i.h.bf16 %v10343_v14  ;;  %v10344_v22 = vunpack.i.l.bf16 %v10343_v14 }
0x1169   : > { %v9905_v4 = vpack.c.bf16 %v10345_v9, %v10344_v22 }
0x116a   : > { %v10348_v23 = vpop.permute.xlu0 %10347 }
0x116b   : > { %v10350_v6 = vunpack.i.h.bf16 %v10348_v23  ;;  %v10349_v28 = vunpack.i.l.bf16 %v10348_v23 }
0x116d   : > { %v9911_v36 = vpack.c.bf16 %v10350_v6, %v10349_v28 }
0x116e   : > { %v2314_v38 = vpop.permute.xlu0 %2313 }
0x1172   : > { %v2316_v39 = vpop.permute.xlu0 %2315 }
0x1180   : > { %v2013_v63 = vpop.xlane.xlu1 %2012 }
0x1184   : > { %v2010_v11 = vpop.xlane.xlu1 %2009 }
0x1185   : > { %10624 = vrcp.f32 %v2010_v11 }
0x1186   : > { %10626 = vrcp.f32 %v2013_v63 }
0x1188   : > { %v2220_v13 = vpop.xlane.xlu1 %2219 }
0x118c   : > { %v2217_v8 = vpop.xlane.xlu1 %2216 }
0x118d   : > { %10628 = vrcp.f32 %v2217_v8 }
0x118e   : > { %10630 = vrcp.f32 %v2220_v13 }
0x118f   : > { %v10625_v15 = vpop.eup %10624 }
0x1190   : > { %v10338_v19 = vpop.permute.xlu1 %10337  ;;  %v2016_v20 = vmul.f32 %v10625_v15, %v10619_v59  ;;  %v10627_v2 = vpop.eup %10626 }
0x1191   : > { %v10340_v25 = vunpack.i.h.bf16 %v10338_v19  ;;  %v10339_v16 = vunpack.i.l.bf16 %v10338_v19  ;;  %v2017_v10 = vmul.f32 %v10627_v2, %v10617_v5 }
0x1192   : > { %9359 = vmatprep.mubr.msk.f32.mxu1 %vm662_vm4, %v2016_v20 }
0x1193   : > { %v9893_v1 = vpack.c.bf16 %v10340_v25, %v10339_v16 }
0x1195   : > { %9895 = vmatprep.subr.msk.bf16.mxu1 %vm11067_vm7, %v9893_v1 }
0x1196   : > { %9898 = vmatpush3.bf16.msk.msra.mxu1 %vm11067_vm7, %v9893_v1 }
0x1197   : > { %v10629_v7 = vpop.eup %10628  ;;  %9907 = vmatprep.subr.msk.bf16.mxu1 %vm11067_vm7, %v9905_v4 }
0x1198   : > { %v10631_v31 = vpop.eup %10630  ;;  %v2223_v35 = vmul.f32 %v10629_v7, %v10623_v61 }
0x1199   : > { %9360 = vmatmul.mubr.msk.f32.vlgmr.msra.gmra.mrb[12].mxu1 %vm662_vm4, %v2017_v10  ;;  %v2224_v37 = vmul.f32 %v10631_v31, %v10621_v50 }
0x119a   : > { %9910 = vmatpush3.bf16.msk.msra.mxu1 %vm11067_vm7, %v9905_v4  ;;  %9373 = vmatprep.mubr.msk.f32.mxu1 %vm662_vm4, %v2223_v35 }
0x119b   : > { %9913 = vmatprep.subr.msk.bf16.mxu1 %vm11008_vm2, %v9911_v36 }
0x119d   : > { %9374 = vmatmul.mubr.msk.f32.vlgmr.msra.gmra.mrb[14].mxu1 %vm662_vm4, %v2224_v37 }
0x119e   : > { %9380 = vmatprep.mubr.msk.f32.mxu1 %vm572_vm1, %v2314_v38 }
0x11a3   : > { %9916 = vmatpush3.bf16.xpose.msk.msra.mxu1 %vm11008_vm2, %v9911_v36 }
0x11aa   : > { %9381 = vmatmul.mubr.msk.f32.vlgmr.msra.gmra.mrb[16].mxu1 %vm572_vm1, %v2316_v39 }
0x126c   : > { %v11345_v40 = vpop.f32.mrb[12].mxu1 }
0x126d   : > { %v11347_v43 = vpop.f32.mrb[13].mxu1 }
0x1270   : > { %v11349_v41 = vpop.f32.mrb[14].mxu1 }
0x1271   : > { %v11351_v42 = vpop.f32.mrb[15].mxu1 }
0x127d   : > { %v9382_v44 = vpop.f32.mrb[16].mxu1 }
0x127e   : > { %v2405_v46 = vmul.f32 0.35355338, %v9382_v44  ;;  %v2395_v48 = vpop.f32.mrb[17].mxu1 }
0x127f   : > { %v2404_v27 = vmul.f32 0.35355338, %v2395_v48 }
0x1280   : > { %v2407_v5 = vadd.f32 %v11356_v52, %v2405_v46 }
0x1281   : > { %v2406_v59 = vadd.f32 %v11362_v3, %v2404_v27 }
0x1282   : > { %v2411_v60 = vsel %vm666_vm3, %v2407_v5, -inf }
0x1283   : > { %2412 = vmax.xlane.f32.xlu0 %v2411_v60  ;;  %v2408_v50 = vsel %vm662_vm4, %v2406_v59, -inf }
0x1284   : > { %2409 = vmax.xlane.f32.xlu1 %v2408_v50 }
0x1310   : > { %v2413_v24 = vpop.xlane.xlu0 %2412 }
0x1311   : > { %v2415_v61 = vsub.f32 %v2407_v5, %v2413_v24  ;;  %v2410_v62 = vpop.xlane.xlu1 %2409 }
0x1312   : > { %v2414_v63 = vsub.f32 %v2406_v59, %v2410_v62 }
0x1313   : > { %v2418_v11 = vmul.f32 1.442695, %v2415_v61 }
0x1314   : > { %v2416_v13 = vmul.f32 1.442695, %v2414_v63 }
0x1315   : > { %10632 = vpow2.f32 %v2418_v11 }
0x1316   : > { %10634 = vpow2.f32 %v2416_v13 }
0x131f   : > { %v10633_v14 = vpop.eup %10632 }
0x1320   : > { %v10635_v8 = vpop.eup %10634  ;;  %v2423_v15 = vsel %vm666_vm3, %v10633_v14, 0.0 }
0x1321   : > { %2424 = vadd.xlane.f32.xlu1 %v2423_v15  ;;  %v2420_v19 = vsel %vm662_vm4, %v10635_v8, 0.0 }
0x1322   : > { %2421 = vadd.xlane.f32.xlu0 %v2420_v19 }
0x1332   : > { %10357 = vrot.lane.b32.xlu1 %v11273_v53, %s12636_s15 }
0x1336   : > { %2518 = vrot.lane.b32.xlu1 %v11268_v51, %s12637_s16 }
0x1338   : > { %10352 = vrot.lane.b32.xlu0 %v11312_v58, %s12638_s24 }
0x133c   : > { %2520 = vrot.lane.b32.xlu0 %v11280_v55, %s12637_s16 }
0x13ae   : > { %v2425_v20 = vpop.xlane.xlu1 %2424 }
0x13af   : > { %10636 = vrcp.f32 %v2425_v20  ;;  %v2422_v9 = vpop.xlane.xlu0 %2421 }
0x13b0   : > { %10638 = vrcp.f32 %v2422_v9 }
0x13b2   : > { %v10358_v22 = vpop.permute.xlu1 %10357 }
0x13b3   : > { %v10353_v25 = vpop.permute.xlu0 %10352  ;;  %v10360_v16 = vunpack.i.h.bf16 %v10358_v22  ;;  %v10359_v23 = vunpack.i.l.bf16 %v10358_v22 }
0x13b4   : > { %v10355_v1 = vunpack.i.h.bf16 %v10353_v25  ;;  %v10354_v2 = vunpack.i.l.bf16 %v10353_v25 }
0x13b5   : > { %v9923_v4 = vpack.c.bf16 %v10360_v16, %v10359_v23 }
0x13b6   : > { %v9917_v53 = vpack.c.bf16 %v10355_v1, %v10354_v2  ;;  %v2519_v7 = vpop.permute.xlu1 %2518 }
0x13b7   : > { %v2521_v10 = vpop.permute.xlu0 %2520 }
0x13b8   : > { %9919 = vmatprep.subr.msk.bf16.mxu0 %vm11067_vm7, %v9917_v53 }
0x13b9   : > { %v10637_v51 = vpop.eup %10636  ;;  %9922 = vmatpush3.bf16.msk.msra.mxu0 %vm11067_vm7, %v9917_v53 }
0x13ba   : > { %v10639_v55 = vpop.eup %10638  ;;  %9925 = vmatprep.subr.msk.bf16.mxu0 %vm11008_vm2, %v9923_v4  ;;  %v2429_v28 = vmul.f32 %v10637_v51, %v10633_v14  ;;  %v10366_v14 = vpack.i.bf16 %v11223_v29, %v11218_v17 }
0x13bb   : > { %v2428_v6 = vmul.f32 %v10639_v55, %v10635_v8  ;;  %v10371_v8 = vpack.i.bf16 %v11235_v21, %v11230_v30 }
0x13bd   : > { %9387 = vmatprep.mubr.msk.f32.mxu0 %vm662_vm4, %v2428_v6 }
0x13be   : > { %9388 = vmatmul.mubr.msk.f32.vlgmr.msra.gmra.mrb[18].mxu0 %vm662_vm4, %v2429_v28 }
0x13bf   : > { %9394 = vmatprep.mubr.msk.f32.mxu0 %vm572_vm1, %v2519_v7 }
0x13c2   : > { %9928 = vmatpush3.bf16.xpose.msk.msra.mxu0 %vm11008_vm2, %v9923_v4 }
0x13c9   : > { %9395 = vmatmul.mubr.msk.f32.vlgmr.msra.gmra.mrb[20].mxu0 %vm572_vm1, %v2521_v10 }
0x1491   : > { %v9389_v31 = vpop.f32.mrb[18].mxu0 }
0x1492   : > { %v2509_v35 = vpop.f32.mrb[19].mxu0 }
0x149c   : > { %v9396_v36 = vpop.f32.mrb[20].mxu0 }
0x149d   : > { %v2610_v37 = vmul.f32 0.35355338, %v9396_v36  ;;  %v2600_v38 = vpop.f32.mrb[21].mxu0 }
0x149e   : > { %v2609_v39 = vmul.f32 0.35355338, %v2600_v38 }
0x149f   : > { %v2612_v44 = vadd.f32 %v11356_v52, %v2610_v37 }
0x14a0   : > { %v2611_v46 = vadd.f32 %v11362_v3, %v2609_v39 }
0x14a1   : > { %v2616_v48 = vsel %vm666_vm3, %v2612_v44, -inf }
0x14a2   : > { %2617 = vmax.xlane.f32.xlu0 %v2616_v48  ;;  %v2613_v27 = vsel %vm662_vm4, %v2611_v46, -inf }
0x14a3   : > { %2614 = vmax.xlane.f32.xlu1 %v2613_v27 }
0x152f   : > { %v2618_v5 = vpop.xlane.xlu0 %2617 }
0x1530   : > { %v2620_v59 = vsub.f32 %v2612_v44, %v2618_v5  ;;  %v2615_v60 = vpop.xlane.xlu1 %2614 }
0x1531   : > { %v2619_v50 = vsub.f32 %v2611_v46, %v2615_v60 }
0x1532   : > { %v2623_v24 = vmul.f32 1.442695, %v2620_v59 }
0x1533   : > { %v2621_v61 = vmul.f32 1.442695, %v2619_v50 }
0x1534   : > { %10640 = vpow2.f32 %v2623_v24 }
0x1535   : > { %10642 = vpow2.f32 %v2621_v61 }
0x153e   : > { %v10641_v62 = vpop.eup %10640 }
0x153f   : > { %v10643_v63 = vpop.eup %10642  ;;  %v2628_v11 = vsel %vm666_vm3, %v10641_v62, 0.0 }
0x1540   : > { %2629 = vadd.xlane.f32.xlu1 %v2628_v11  ;;  %v2625_v13 = vsel %vm662_vm4, %v10643_v63, 0.0 }
0x1541   : > { %2626 = vadd.xlane.f32.xlu0 %v2625_v13 }
0x1551   : > { %10367 = vrot.lane.b32.xlu1 %v10366_v14, %s12618_s20 }
0x1555   : > { %10372 = vrot.lane.b32.xlu1 %v10371_v8, %s12618_s20 }
0x1557   : > { %10362 = vrot.lane.b32.xlu0 %v11312_v58, %s12639_s25 }
0x1559   : > { %2727 = vrot.lane.b32.xlu1 %v11349_v41, %s12640_s26 }
0x155b   : > { %2725 = vrot.lane.b32.xlu0 %v11351_v42, %s12640_s26 }
0x155d   : > { %2735 = vrot.lane.b32.xlu1 %v9389_v31, %s12641_s27 }
0x155f   : > { %2733 = vrot.lane.b32.xlu0 %v2509_v35, %s12641_s27 }
0x15cd   : > { %v2630_v17 = vpop.xlane.xlu1 %2629 }
0x15ce   : > { %10644 = vrcp.f32 %v2630_v17  ;;  %v2627_v29 = vpop.xlane.xlu0 %2626  ;;  %v8741_v17 = vld [vmem:[%s12584_s6 + $0x20] sm:$0xff] }
0x15cf   : > { %10646 = vrcp.f32 %v2627_v29  ;;  %v8742_v29 = vld [vmem:[%s12584_s6 + $0x28] sm:$0xff] }
0x15d1   : > { %v10368_v9 = vpop.permute.xlu1 %10367 }
0x15d2   : > { %v10363_v30 = vpop.permute.xlu0 %10362  ;;  %v10370_v25 = vunpack.i.h.bf16 %v10368_v9  ;;  %v10369_v16 = vunpack.i.l.bf16 %v10368_v9 }
0x15d3   : > { %v10365_v21 = vunpack.i.h.bf16 %v10363_v30  ;;  %v10364_v15 = vunpack.i.l.bf16 %v10363_v30  ;;  %v9943_v30 = vpack.c.bf16 %v8742_v29, %v8741_v17  ;;  %v11502_v17 = vld [vmem:[%s12583_s5 + $0x18] sm:$0xff] }
0x15d4   : > { %v9935_v2 = vpack.c.bf16 %v10370_v25, %v10369_v16  ;;  %v2887_v25 = vrot.slane %v11242_v0, %v11185_v32 }
0x15d5   : > { %v9929_v19 = vpack.c.bf16 %v10365_v21, %v10364_v15  ;;  %v10373_v22 = vpop.permute.xlu1 %10372  ;;  %9944 = vmatprep.subr.bf16.mxu0 %v9943_v30  ;;  %v8743_v21 = vld [vmem:[%s12584_s6 + $0x30] sm:$0xff]  ;;  %v8744_v15 = vld [vmem:[%s12584_s6 + $0x38] sm:$0xff] }
0x15d6   : > { %v10375_v23 = vunpack.i.h.bf16 %v10373_v22  ;;  %v10374_v1 = vunpack.i.l.bf16 %v10373_v22  ;;  %v2726_v6 = vpop.permute.xlu0 %2725  ;;  %9946 = vmatpush3.bf16.msra.mxu0 %v9943_v30 }
0x15d7   : > { %9931 = vmatprep.subr.msk.bf16.mxu1 %vm11067_vm7, %v9929_v19  ;;  %v2747_v10 = vsel %vm572_vm1, %v11347_v43, %v2726_v6  ;;  %v2855_v43 = vrot.slane %v11242_v0, %v11162_v56 }
0x15d8   : > { %v10645_v58 = vpop.eup %10644  ;;  %9934 = vmatpush3.bf16.msk.msra.mxu1 %vm11067_vm7, %v9929_v19  ;;  %v9939_v53 = vpack.c.bf16 %v10375_v23, %v10374_v1  ;;  %v9947_v19 = vpack.c.bf16 %v8744_v15, %v8743_v21  ;;  %v10812_v23 = vld [vmem:[%s10962_s19] sm:$0xff] }
0x15d9   : > { %v10647_v41 = vpop.eup %10646  ;;  %v2634_v20 = vmul.f32 %v10645_v58, %v10641_v62  ;;  %9936 = vmatprep.subr.bf16.mxu1 %v9935_v2  ;;  %v2728_v55 = vpop.permute.xlu1 %2727  ;;  %v3145_v1 = vrot.slane %v10812_v23, 3  ;;  %v11513_v15 = vld [vmem:[%s12586_s8] sm:$0xff] }
0x15da   : > { %v2633_v42 = vmul.f32 %v10647_v41, %v10643_v63  ;;  %v2734_v7 = vpop.permute.xlu0 %2733  ;;  %v2748_v35 = vsel %vm572_vm1, %v11345_v40, %v2728_v55  ;;  %9948 = vmatprep.subr.bf16.mxu0 %v9947_v19 }
0x15db   : > { %v2749_v36 = vsel %vm1418_vm8, %v2747_v10, %v2734_v7  ;;  %9950 = vmatpush3.bf16.msra.mxu0 %v9947_v19  ;;  %v3250_v19 = vrot.slane %v11513_v15, %v10957_v12 }
0x15dc   : > { %9401 = vmatprep.mubr.msk.f32.mxu1 %vm662_vm4, %v2633_v42 }
0x15dd   : > { %9402 = vmatmul.mubr.msk.f32.vlgmr.msra.gmra.mrb[18].mxu1 %vm662_vm4, %v2634_v20  ;;  %v2736_v28 = vpop.permute.xlu1 %2735 }
0x15de   : > { %9938 = vmatpush3.bf16.msra.mxu1 %v9935_v2  ;;  %v2750_v38 = vsel %vm1418_vm8, %v2748_v35, %v2736_v28  ;;  %v11451_v2 = vld [vmem:[%s10962_s19 + $0x8] sm:$0xf]  ;;  %v10814_v35 = vld [vmem:[%s12581_s3] sm:$0xff]  ;;  %s12648_s19 = smov 56  }
0x15df   : > { %9940 = vmatprep.subr.bf16.mxu1 %v9939_v53 }
0x15e2   : > { %9942 = vmatpush3.bf16.msra.mxu1 %v9939_v53  ;;  %v3146_v53 = vrot.slane %v11451_v2, 3 }
0x15e4   : > { %v11459_v28 = vsel %vm3144_vm11, %v3145_v1, %v3146_v53 }
0x16b0   : > { %v9403_v4 = vpop.f32.mrb[18].mxu1 }
0x16b1   : > { %2743 = vrot.lane.b32.xlu1 %v9403_v4, %s12642_s13  ;;  %v2714_v51 = vpop.f32.mrb[19].mxu1 }
0x16b2   : > { %2741 = vrot.lane.b32.xlu0 %v2714_v51, %s12642_s13  ;;  %v2893_v51 = vrot.slane %v11242_v0, %v11188_v33 }
0x1723   : > { %v2744_v31 = vpop.permute.xlu1 %2743 }
0x1724   : > { %v2742_v37 = vpop.permute.xlu0 %2741  ;;  %v2752_v44 = vsel %vm1421_vm9, %v2750_v38, %v2744_v31  ;;  %v8747_v38 = vld [vmem:[%s12585_s7 + $0x8] sm:$0xff] }
0x1725   : > { %v2751_v39 = vsel %vm1421_vm9, %v2749_v36, %v2742_v37  ;;  %v11466_v36 = vadd.f32 %v10814_v35, %v11459_v28  ;;  %9426 = vmatprep.subr.mxu1 %v8747_v38 }
0x1726   : > { %9412 = vmatprep.mubr.msk.f32.mxu1 %vm458_vm0, %v2751_v39  ;;  %v2904_v39 = vrot.slane %v11242_v0, %v11200_v47 }
0x1727   : > { %9413 = vmatmul.mubr.msk.f32.vlgmr.msra.gmra.mrb[20].mxu1 %vm458_vm0, %v2752_v44 }
0x1728   : > { %9427 = vmatpush3.msra.mxu1 %v8747_v38 }
0x17fa   : > { %v9414_v46 = vpop.f32.mrb[20].mxu1 }
0x17fb   : > { %v2851_v48 = vadd.f32 %v9414_v46, %v11254_v26  ;;  %v2841_v40 = vpop.f32.mrb[21].mxu1 }
0x17fc   : > { %v2850_v27 = vadd.f32 %v2841_v40, %v11252_v45 }
0x17fd   : > { %v2857_v5 = vadd.f32 %v2855_v43, %v2851_v48 }
0x17fe   : > { %v2856_v59 = vadd.f32 %v2855_v43, %v2850_v27 }
0x17ff   : > { %v2861_v60 = vsel %vm1532_vm10, %v2857_v5, 0.0 }
0x1800   : > { %2862 = vadd.xlane.f32.xlu1 %v2861_v60  ;;  %v2858_v50 = vsel %vm458_vm0, %v2856_v59, 0.0 }
0x1801   : > { %2859 = vadd.xlane.f32.xlu0 %v2858_v50 }
0x188d   : > { %v2863_v24 = vpop.xlane.xlu1 %2862 }
0x188e   : > { %v2865_v61 = vmul.f32 0.03125, %v2863_v24  ;;  %v2860_v62 = vpop.xlane.xlu0 %2859 }
0x188f   : > { %v2864_v63 = vmul.f32 0.03125, %v2860_v62 }
0x1890   : > { %v2867_v11 = vsub.f32 %v2857_v5, %v2865_v61  ;;  %v2993_v5 = vrot.slane %v11242_v0, %v11207_v54  ;;  %v11490_v0 = vld [vmem:[%s12583_s5 + $0x8] sm:$0xff] }
0x1891   : > { %v2866_v13 = vsub.f32 %v2856_v59, %v2864_v63 }
0x1892   : > { %v2869_v8 = vmul.f32 %v2867_v11, %v2867_v11 }
0x1893   : > { %v2868_v14 = vmul.f32 %v2866_v13, %v2866_v13 }
0x1894   : > { %v2873_v45 = vsel %vm1532_vm10, %v2869_v8, 0.0 }
0x1895   : > { %v2870_v26 = vsel %vm458_vm0, %v2868_v14, 0.0 }
0x1896   : > { %2871 = vadd.xlane.f32.xlu0 %v2870_v26  ;;  %v11485_v26 = vld [vmem:[%s12583_s5] sm:$0xff] }
0x1897   : > { %v9951_v8 = vpack.c.bf16 %v11490_v0, %v11485_v26  ;;  %v10416_v29 = vpack.i.bf16 %v11490_v0, %v11485_v26 }
0x1899   : > { %9952 = vmatprep.subr.bf16.mxu0 %v9951_v8 }
0x189a   : > { %2874 = vadd.xlane.f32.xlu0 %v2873_v45  ;;  %v11497_v45 = vld [vmem:[%s12583_s5 + $0x10] sm:$0xff] }
0x189b   : > { %v10421_v30 = vpack.i.bf16 %v11502_v17, %v11497_v45  ;;  %v9955_v21 = vpack.c.bf16 %v11502_v17, %v11497_v45 }
0x1923   : > { %v2872_v58 = vpop.xlane.xlu0 %2871 }
0x1924   : > { %v2876_v41 = vmul.f32 0.03125, %v2872_v58 }
0x1926   : > { %v2878_v42 = vadd.f32 1e-05, %v2876_v41 }
0x1927   : > { %v2875_v20 = vpop.xlane.xlu0 %2874 }
0x1928   : > { %10648 = vrsqrt.f32 %v2878_v42  ;;  %v2877_v9 = vmul.f32 0.03125, %v2875_v20  ;;  %v8708_v20 = vld [vmem:[%s12586_s8 + $0x18] sm:$0x3] }
0x192a   : > { %v2879_v22 = vadd.f32 1e-05, %v2877_v9  ;;  %v3091_v9 = vrot.slane %v8708_v20, %v10978_v18 }
0x192c   : > { %10650 = vrsqrt.f32 %v2879_v22 }
0x1932   : > { %v10649_v16 = vpop.eup %10648 }
0x1933   : > { %v2882_v4 = vmul.f32 %v10649_v16, %v2866_v13 }
0x1935   : > { %v2888_v55 = vmul.f32 %v2887_v25, %v2882_v4 }
0x1936   : > { %v10651_v6 = vpop.eup %10650 }
0x1937   : > { %v2883_v7 = vmul.f32 %v10651_v6, %v2867_v11  ;;  %v2894_v10 = vadd.f32 %v2893_v51, %v2888_v55  ;;  %v10815_v55 = vld [vmem:[%s12581_s3 + $0x8] sm:$0xf] }
0x1939   : > { %v2889_v31 = vmul.f32 %v2887_v25, %v2883_v7  ;;  %9423 = vmatprep.mubr.msk.f32.mxu0 %vm458_vm0, %v2894_v10  ;;  %v3096_v25 = vrot.slane %v8708_v20, %v10957_v12  ;;  %v3244_v7 = vrot.slane %v11513_v15, %v10978_v18 }
0x193b   : > { %v2895_v37 = vadd.f32 %v2893_v51, %v2889_v31 }
0x193d   : > { %9424 = vmatmul.mubr.msk.f32.vlgmr.msra.gmra.mrb[22].mxu0 %vm458_vm0, %v2895_v37 }
0x193e   : > { %9439 = vmatprep.mubr.msk.f32.mxu0 %vm458_vm0, %v11466_v36  ;;  %9954 = vmatpush3.bf16.msra.mxu0 %v9951_v8 }
0x193f   : > { %9956 = vmatprep.subr.bf16.mxu0 %v9955_v21 }
0x1942   : > { %9958 = vmatpush3.bf16.msra.mxu0 %v9955_v21 }
0x1a10   : > { %v9425_v44 = vpop.f32.mrb[22].mxu0 }
0x1a11   : > { %v2983_v43 = vadd.f32 %v9425_v44, %v2904_v39  ;;  %v2977_v46 = vpop.f32.mrb[23].mxu0 }
0x1a12   : > { %v2978_v48 = vadd.f32 %v2977_v46, %v2904_v39 }
0x1a13   : > { %v2987_v27 = vmax.f32 %v2983_v43, 0.0 }
0x1a14   : > { %v2986_v40 = vmax.f32 %v2978_v48, 0.0 }
0x1a16   : > { %9428 = vmatprep.mubr.msk.f32.mxu1 %vm572_vm1, %v2986_v40 }
0x1a17   : > { %9429 = vmatmul.mubr.msk.f32.vlgmr.msra.gmra.mrb[22].mxu1 %vm572_vm1, %v2987_v27 }
0x1aea   : > { %v9430_v59 = vpop.f32.mrb[22].mxu1 }
0x1aeb   : > { %v3071_v60 = vadd.f32 %v9430_v59, %v2993_v5  ;;  %v3066_v50 = vpop.f32.mrb[23].mxu1 }
0x1aed   : > { %v3074_v24 = vadd.f32 %v3071_v60, %v2895_v37 }
0x1aef   : > { %v3075_v61 = vsel %vm1532_vm10, %v3074_v24, 0.0 }
0x1af0   : > { %3076 = vadd.xlane.f32.xlu1 %v3075_v61 }
0x1b01   : > { %3252 = vrot.lane.b32.xlu1 %v3250_v19, %s12618_s20 }
0x1b7d   : > { %v3077_v62 = vpop.xlane.xlu1 %3076 }
0x1b7e   : > { %v3078_v63 = vmul.f32 0.03125, %v3077_v62 }
0x1b80   : > { %v3079_v11 = vsub.f32 %v3074_v24, %v3078_v63 }
0x1b82   : > { %v3080_v13 = vmul.f32 %v3079_v11, %v3079_v11 }
0x1b84   : > { %v3081_v14 = vsel %vm1532_vm10, %v3080_v13, 0.0 }
0x1b85   : > { %3082 = vadd.xlane.f32.xlu0 %v3081_v14 }
0x1c12   : > { %v3083_v58 = vpop.xlane.xlu0 %3082 }
0x1c13   : > { %v3084_v41 = vmul.f32 0.03125, %v3083_v58 }
0x1c15   : > { %v3085_v42 = vadd.f32 1e-05, %v3084_v41 }
0x1c17   : > { %10652 = vrsqrt.f32 %v3085_v42 }
0x1c21   : > { %v10653_v22 = vpop.eup %10652 }
0x1c22   : > { %v3087_v16 = vmul.f32 %v10653_v22, %v3079_v11 }
0x1c24   : > { %v3092_v23 = vmul.f32 %v3091_v9, %v3087_v16 }
0x1c26   : > { %v3097_v1 = vadd.f32 %v3096_v25, %v3092_v23  ;;  %v3260_v25 = vrot.slane %v11513_v15, %v11043_v57 }
0x1c28   : > { %v11533_v4 = vadd.f32 %v11451_v2, %v3097_v1  ;;  %v3253_v2 = vpop.permute.xlu1 %3252 }
0x1c2a   : > { %v11539_v51 = vsel %vm3150_vm12, %v3146_v53, %v11533_v4  ;;  %3100 = vst.msk [vmem:[%s11530_s21 - $0x1] sm:$0xe] %vm3099_vm13, %v11533_v4 }
0x1c2b   : > { %v11548_v6 = vadd.f32 %v10815_v55, %v11539_v51 }
0x1c2d   : > { %9440 = vmatmul.mubr.msk.f32.vlgmr.msra.gmra.mrb[24].mxu0 %vm458_vm0, %v11548_v6 }
0x1d00   : > { %v11554_v10 = vpop.f32.mrb[24].mxu0 }
0x1d01   : > { %v3256_v53 = vadd.f32 %v11554_v10, %v3253_v2  ;;  %v11557_v31 = vpop.f32.mrb[25].mxu0  ;;  %v11572_v39 = vadd.f32 %v11554_v10, %v3244_v7 }
0x1d02   : > { %v11560_v35 = vadd.f32 %v3244_v7, %v11557_v31  ;;  %v3255_v37 = vadd.f32 %v3253_v2, %v11557_v31 }
0x1d04   : > { %9446 = vmatprep.mubr.msk.f32.mxu1 %vm572_vm1, %v11560_v35  ;;  %v11565_v38 = vpack.i.bf16 %v3256_v53, %v3255_v37 }
0x1d06   : > { %10382 = vrot.lane.b32.xlu1 %v11565_v38, %s12644_s28  ;;  %10377 = vrot.lane.b32.xlu0 %v11565_v38, %s12645_s29 }
0x1d0a   : > { %3474 = vrot.lane.b32.xlu1 %v11560_v35, %s12646_s30  ;;  %3476 = vrot.lane.b32.xlu0 %v11572_v39, %s12646_s30 }
0x1d78   : > { %v10383_v44 = vpop.permute.xlu1 %10382  ;;  %v10378_v43 = vpop.permute.xlu0 %10377 }
0x1d79   : > { %v10385_v46 = vunpack.i.h.bf16 %v10383_v44  ;;  %v10384_v48 = vunpack.i.l.bf16 %v10383_v44  ;;  %v10380_v40 = vunpack.i.h.bf16 %v10378_v43  ;;  %v10379_v27 = vunpack.i.l.bf16 %v10378_v43 }
0x1d7b   : > { %v9959_v5 = vpack.c.bf16 %v10380_v40, %v10379_v27  ;;  %v9971_v59 = vpack.c.bf16 %v10385_v46, %v10384_v48 }
0x1d7c   : > { %v3475_v60 = vpop.permute.xlu1 %3474  ;;  %v3477_v50 = vpop.permute.xlu0 %3476 }
0x1d7d   : > { %9961 = vmatprep.subr.msk.bf16.mxu1 %vm11008_vm2, %v9959_v5 }
0x1d7e   : > { %9964 = vmatpush3.bf16.xpose.msk.msra.mxu1 %vm11008_vm2, %v9959_v5 }
0x1d7f   : > { %9973 = vmatprep.subr.msk.bf16.mxu1 %vm11008_vm2, %v9971_v59 }
0x1d85   : > { %9447 = vmatmul.mubr.msk.f32.vlgmr.msra.gmra.mrb[24].mxu1 %vm572_vm1, %v11572_v39 }
0x1d86   : > { %9976 = vmatpush3.bf16.xpose.msk.msra.mxu1 %vm11008_vm2, %v9971_v59  ;;  %9460 = vmatprep.mubr.msk.f32.mxu1 %vm572_vm1, %v3475_v60 }
0x1d8d   : > { %9461 = vmatmul.mubr.msk.f32.vlgmr.msra.gmra.mrb[26].mxu1 %vm572_vm1, %v3477_v50 }
0x1e58   : > { %v9448_v24 = vpop.f32.mrb[24].mxu1 }
0x1e59   : > { %v3359_v61 = vmul.f32 0.35355338, %v9448_v24  ;;  %v3349_v62 = vpop.f32.mrb[25].mxu1 }
0x1e5a   : > { %v3358_v63 = vmul.f32 0.35355338, %v3349_v62 }
0x1e5b   : > { %v3361_v11 = vadd.f32 %v11356_v52, %v3359_v61 }
0x1e5c   : > { %v3360_v13 = vadd.f32 %v11362_v3, %v3358_v63 }
0x1e5d   : > { %v3365_v14 = vsel %vm666_vm3, %v3361_v11, -inf }
0x1e5e   : > { %3366 = vmax.xlane.f32.xlu0 %v3365_v14  ;;  %v3362_v8 = vsel %vm662_vm4, %v3360_v13, -inf }
0x1e5f   : > { %3363 = vmax.xlane.f32.xlu1 %v3362_v8 }
0x1e60   : > { %v9462_v21 = vpop.f32.mrb[26].mxu1 }
0x1e61   : > { %v3566_v19 = vmul.f32 0.35355338, %v9462_v21  ;;  %v3556_v58 = vpop.f32.mrb[27].mxu1 }
0x1e62   : > { %v3565_v41 = vmul.f32 0.35355338, %v3556_v58 }
0x1e63   : > { %v3568_v42 = vadd.f32 %v11356_v52, %v3566_v19 }
0x1e64   : > { %v3567_v20 = vadd.f32 %v11362_v3, %v3565_v41 }
0x1e65   : > { %v3572_v9 = vsel %vm666_vm3, %v3568_v42, -inf }
0x1e66   : > { %3573 = vmax.xlane.f32.xlu1 %v3572_v9  ;;  %v3569_v22 = vsel %vm662_vm4, %v3567_v20, -inf }
0x1e67   : > { %3570 = vmax.xlane.f32.xlu0 %v3569_v22 }
0x1e7d   : > { %3262 = vrot.lane.b32.xlu0 %v3260_v25, %s12647_s14 }
0x1eeb   : > { %v3367_v16 = vpop.xlane.xlu0 %3366 }
0x1eec   : > { %v3369_v23 = vsub.f32 %v3361_v11, %v3367_v16  ;;  %v3364_v1 = vpop.xlane.xlu1 %3363 }
0x1eed   : > { %v3368_v55 = vsub.f32 %v3360_v13, %v3364_v1 }
0x1eee   : > { %v3372_v7 = vmul.f32 1.442695, %v3369_v23 }
0x1eef   : > { %v3370_v2 = vmul.f32 1.442695, %v3368_v55 }
0x1ef0   : > { %10654 = vpow2.f32 %v3372_v7 }
0x1ef1   : > { %10656 = vpow2.f32 %v3370_v2 }
0x1ef3   : > { %v3574_v53 = vpop.xlane.xlu1 %3573 }
0x1ef4   : > { %v3576_v37 = vsub.f32 %v3568_v42, %v3574_v53  ;;  %v3571_v44 = vpop.xlane.xlu0 %3570 }
0x1ef5   : > { %v3575_v43 = vsub.f32 %v3567_v20, %v3571_v44 }
0x1ef6   : > { %v3579_v46 = vmul.f32 1.442695, %v3576_v37 }
0x1ef7   : > { %v3577_v48 = vmul.f32 1.442695, %v3575_v43 }
0x1ef8   : > { %10658 = vpow2.f32 %v3579_v46  ;;  %v3263_v40 = vpop.permute.xlu0 %3262 }
0x1ef9   : > { %v3265_v27 = vadd.f32 %v3263_v40, %v11557_v31  ;;  %v3266_v5 = vadd.f32 %v11554_v10, %v3263_v40  ;;  %10660 = vpow2.f32 %v3577_v48 }
0x1efa   : > { %v10655_v59 = vpop.eup %10654 }
0x1efb   : > { %v3377_v60 = vsel %vm666_vm3, %v10655_v59, 0.0  ;;  %v11604_v50 = vpack.i.bf16 %v3266_v5, %v3265_v27  ;;  %v10657_v24 = vpop.eup %10656 }
0x1efc   : > { %3378 = vadd.xlane.f32.xlu1 %v3377_v60  ;;  %v3374_v61 = vsel %vm662_vm4, %v10657_v24, 0.0 }
0x1efd   : > { %10392 = vrot.lane.b32.xlu0 %v11604_v50, %s12648_s19 }
0x1f00   : > { %3375 = vadd.xlane.f32.xlu1 %v3374_v61 }
0x1f01   : > { %10397 = vrot.lane.b32.xlu0 %v11565_v38, %s12649_s22 }
0x1f02   : > { %v10659_v31 = vpop.eup %10658 }
0x1f03   : > { %v3584_v10 = vsel %vm666_vm3, %v10659_v31, 0.0  ;;  %v10661_v62 = vpop.eup %10660 }
0x1f04   : > { %3585 = vadd.xlane.f32.xlu1 %v3584_v10  ;;  %v3581_v63 = vsel %vm662_vm4, %v10661_v62, 0.0 }
0x1f05   : > { %3679 = vrot.lane.b32.xlu0 %v11560_v35, %s12650_s23 }
0x1f08   : > { %3582 = vadd.xlane.f32.xlu1 %v3581_v63 }
0x1f09   : > { %3681 = vrot.lane.b32.xlu0 %v11572_v39, %s12650_s23 }
0x1f19   : > { %10387 = vrot.lane.b32.xlu1 %v11604_v50, %s12647_s14 }
0x1f6f   : > { %v10393_v8 = vpop.permute.xlu0 %10392 }
0x1f70   : > { %v10395_v42 = vunpack.i.h.bf16 %v10393_v8  ;;  %v10394_v20 = vunpack.i.l.bf16 %v10393_v8 }
0x1f72   : > { %v9977_v1 = vpack.c.bf16 %v10395_v42, %v10394_v20 }
0x1f73   : > { %v10398_v25 = vpop.permute.xlu0 %10397 }
0x1f74   : > { %v10400_v55 = vunpack.i.h.bf16 %v10398_v25  ;;  %v10399_v7 = vunpack.i.l.bf16 %v10398_v25 }
0x1f76   : > { %v9983_v43 = vpack.c.bf16 %v10400_v55, %v10399_v7 }
0x1f77   : > { %v3680_v48 = vpop.permute.xlu0 %3679 }
0x1f7b   : > { %v3682_v40 = vpop.permute.xlu0 %3681 }
0x1f89   : > { %v3379_v11 = vpop.xlane.xlu1 %3378 }
0x1f8d   : > { %v3376_v13 = vpop.xlane.xlu1 %3375 }
0x1f8e   : > { %10662 = vrcp.f32 %v3376_v13 }
0x1f8f   : > { %10664 = vrcp.f32 %v3379_v11 }
0x1f91   : > { %v3586_v14 = vpop.xlane.xlu1 %3585 }
0x1f95   : > { %v3583_v21 = vpop.xlane.xlu1 %3582 }
0x1f96   : > { %10666 = vrcp.f32 %v3583_v21 }
0x1f97   : > { %10668 = vrcp.f32 %v3586_v14 }
0x1f98   : > { %v10663_v19 = vpop.eup %10662 }
0x1f99   : > { %v10388_v58 = vpop.permute.xlu1 %10387  ;;  %v3382_v41 = vmul.f32 %v10663_v19, %v10657_v24  ;;  %v10665_v23 = vpop.eup %10664 }
0x1f9a   : > { %v10390_v9 = vunpack.i.h.bf16 %v10388_v58  ;;  %v10389_v22 = vunpack.i.l.bf16 %v10388_v58  ;;  %v3383_v53 = vmul.f32 %v10665_v23, %v10655_v59 }
0x1f9b   : > { %9453 = vmatprep.mubr.msk.f32.mxu0 %vm662_vm4, %v3382_v41 }
0x1f9c   : > { %v9965_v16 = vpack.c.bf16 %v10390_v9, %v10389_v22 }
0x1f9e   : > { %9967 = vmatprep.subr.msk.bf16.mxu0 %vm11067_vm7, %v9965_v16 }
0x1f9f   : > { %9970 = vmatpush3.bf16.msk.msra.mxu0 %vm11067_vm7, %v9965_v16 }
0x1fa0   : > { %v10667_v2 = vpop.eup %10666  ;;  %9979 = vmatprep.subr.msk.bf16.mxu0 %vm11067_vm7, %v9977_v1 }
0x1fa1   : > { %v10669_v37 = vpop.eup %10668  ;;  %v3589_v44 = vmul.f32 %v10667_v2, %v10661_v62 }
0x1fa2   : > { %9454 = vmatmul.mubr.msk.f32.vlgmr.msra.gmra.mrb[26].mxu0 %vm662_vm4, %v3383_v53  ;;  %v3590_v46 = vmul.f32 %v10669_v37, %v10659_v31 }
0x1fa3   : > { %9982 = vmatpush3.bf16.msk.msra.mxu0 %vm11067_vm7, %v9977_v1  ;;  %9467 = vmatprep.mubr.msk.f32.mxu0 %vm662_vm4, %v3589_v44 }
0x1fa4   : > { %9985 = vmatprep.subr.msk.bf16.mxu0 %vm11008_vm2, %v9983_v43 }
0x1fa6   : > { %9468 = vmatmul.mubr.msk.f32.vlgmr.msra.gmra.mrb[28].mxu0 %vm662_vm4, %v3590_v46 }
0x1fa7   : > { %9474 = vmatprep.mubr.msk.f32.mxu0 %vm572_vm1, %v3680_v48 }
0x1fac   : > { %9988 = vmatpush3.bf16.xpose.msk.msra.mxu0 %vm11008_vm2, %v9983_v43 }
0x1fb3   : > { %9475 = vmatmul.mubr.msk.f32.vlgmr.msra.gmra.mrb[30].mxu0 %vm572_vm1, %v3682_v40 }
0x2075   : > { %v11637_v27 = vpop.f32.mrb[26].mxu0 }
0x2076   : > { %v11639_v5 = vpop.f32.mrb[27].mxu0 }
0x2079   : > { %v11641_v59 = vpop.f32.mrb[28].mxu0 }
0x207a   : > { %v11643_v60 = vpop.f32.mrb[29].mxu0 }
0x2086   : > { %v9476_v24 = vpop.f32.mrb[30].mxu0 }
0x2087   : > { %v3771_v61 = vmul.f32 0.35355338, %v9476_v24  ;;  %v3761_v31 = vpop.f32.mrb[31].mxu0 }
0x2088   : > { %v3770_v10 = vmul.f32 0.35355338, %v3761_v31 }
0x2089   : > { %v3773_v62 = vadd.f32 %v11356_v52, %v3771_v61 }
0x208a   : > { %v3772_v63 = vadd.f32 %v11362_v3, %v3770_v10 }
0x208b   : > { %v3777_v11 = vsel %vm666_vm3, %v3773_v62, -inf }
0x208c   : > { %3778 = vmax.xlane.f32.xlu0 %v3777_v11  ;;  %v3774_v13 = vsel %vm662_vm4, %v3772_v63, -inf }
0x208d   : > { %3775 = vmax.xlane.f32.xlu1 %v3774_v13 }
0x2119   : > { %v3779_v14 = vpop.xlane.xlu0 %3778 }
0x211a   : > { %v3781_v8 = vsub.f32 %v3773_v62, %v3779_v14  ;;  %v3776_v21 = vpop.xlane.xlu1 %3775 }
0x211b   : > { %v3780_v19 = vsub.f32 %v3772_v63, %v3776_v21 }
0x211c   : > { %v3784_v58 = vmul.f32 1.442695, %v3781_v8 }
0x211d   : > { %v3782_v41 = vmul.f32 1.442695, %v3780_v19 }
0x211e   : > { %10670 = vpow2.f32 %v3784_v58 }
0x211f   : > { %10672 = vpow2.f32 %v3782_v41 }
0x2128   : > { %v10671_v42 = vpop.eup %10670 }
0x2129   : > { %v10673_v20 = vpop.eup %10672  ;;  %v3789_v9 = vsel %vm666_vm3, %v10671_v42, 0.0 }
0x212a   : > { %3790 = vadd.xlane.f32.xlu1 %v3789_v9  ;;  %v3786_v22 = vsel %vm662_vm4, %v10673_v20, 0.0 }
0x212b   : > { %3787 = vadd.xlane.f32.xlu0 %v3786_v22 }
0x213b   : > { %10407 = vrot.lane.b32.xlu1 %v11565_v38, %s12636_s15 }
0x213f   : > { %3884 = vrot.lane.b32.xlu1 %v11560_v35, %s12637_s16 }
0x2141   : > { %10402 = vrot.lane.b32.xlu0 %v11604_v50, %s12638_s24 }
0x2145   : > { %3886 = vrot.lane.b32.xlu0 %v11572_v39, %s12637_s16 }
0x21b7   : > { %v3791_v25 = vpop.xlane.xlu1 %3790 }
0x21b8   : > { %10674 = vrcp.f32 %v3791_v25  ;;  %v3788_v16 = vpop.xlane.xlu0 %3787 }
0x21b9   : > { %10676 = vrcp.f32 %v3788_v16 }
0x21bb   : > { %v10408_v23 = vpop.permute.xlu1 %10407 }
0x21bc   : > { %v10403_v1 = vpop.permute.xlu0 %10402  ;;  %v10410_v55 = vunpack.i.h.bf16 %v10408_v23  ;;  %v10409_v7 = vunpack.i.l.bf16 %v10408_v23 }
0x21bd   : > { %v10405_v2 = vunpack.i.h.bf16 %v10403_v1  ;;  %v10404_v53 = vunpack.i.l.bf16 %v10403_v1 }
0x21be   : > { %v9995_v37 = vpack.c.bf16 %v10410_v55, %v10409_v7 }
0x21bf   : > { %v9989_v38 = vpack.c.bf16 %v10405_v2, %v10404_v53  ;;  %v3885_v46 = vpop.permute.xlu1 %3884 }
0x21c0   : > { %v3887_v48 = vpop.permute.xlu0 %3886 }
0x21c1   : > { %9991 = vmatprep.subr.msk.bf16.mxu1 %vm11067_vm7, %v9989_v38 }
0x21c2   : > { %v10675_v35 = vpop.eup %10674  ;;  %9994 = vmatpush3.bf16.msk.msra.mxu1 %vm11067_vm7, %v9989_v38 }
0x21c3   : > { %v10677_v39 = vpop.eup %10676  ;;  %9997 = vmatprep.subr.msk.bf16.mxu1 %vm11008_vm2, %v9995_v37  ;;  %v3795_v43 = vmul.f32 %v10675_v35, %v10671_v42 }
0x21c4   : > { %v3794_v44 = vmul.f32 %v10677_v39, %v10673_v20 }
0x21c6   : > { %9481 = vmatprep.mubr.msk.f32.mxu1 %vm662_vm4, %v3794_v44 }
0x21c7   : > { %9482 = vmatmul.mubr.msk.f32.vlgmr.msra.gmra.mrb[28].mxu1 %vm662_vm4, %v3795_v43 }
0x21c8   : > { %9488 = vmatprep.mubr.msk.f32.mxu1 %vm572_vm1, %v3885_v46 }
0x21cb   : > { %10000 = vmatpush3.bf16.xpose.msk.msra.mxu1 %vm11008_vm2, %v9995_v37 }
0x21d2   : > { %9489 = vmatmul.mubr.msk.f32.vlgmr.msra.gmra.mrb[30].mxu1 %vm572_vm1, %v3887_v48 }
0x229a   : > { %v9483_v40 = vpop.f32.mrb[28].mxu1 }
0x229b   : > { %v3875_v24 = vpop.f32.mrb[29].mxu1 }
0x22a5   : > { %v9490_v61 = vpop.f32.mrb[30].mxu1 }
0x22a6   : > { %v3976_v31 = vmul.f32 0.35355338, %v9490_v61  ;;  %v3966_v10 = vpop.f32.mrb[31].mxu1 }
0x22a7   : > { %v3975_v62 = vmul.f32 0.35355338, %v3966_v10 }
0x22a8   : > { %v3978_v63 = vadd.f32 %v11356_v52, %v3976_v31 }
0x22a9   : > { %v3977_v11 = vadd.f32 %v11362_v3, %v3975_v62 }
0x22aa   : > { %v3982_v13 = vsel %vm666_vm3, %v3978_v63, -inf }
0x22ab   : > { %3983 = vmax.xlane.f32.xlu0 %v3982_v13  ;;  %v3979_v14 = vsel %vm662_vm4, %v3977_v11, -inf }
0x22ac   : > { %3980 = vmax.xlane.f32.xlu1 %v3979_v14 }
0x2338   : > { %v3984_v8 = vpop.xlane.xlu0 %3983 }
0x2339   : > { %v3986_v21 = vsub.f32 %v3978_v63, %v3984_v8  ;;  %v3981_v19 = vpop.xlane.xlu1 %3980 }
0x233a   : > { %v3985_v58 = vsub.f32 %v3977_v11, %v3981_v19 }
0x233b   : > { %v3989_v41 = vmul.f32 1.442695, %v3986_v21 }
0x233c   : > { %v3987_v42 = vmul.f32 1.442695, %v3985_v58 }
0x233d   : > { %10678 = vpow2.f32 %v3989_v41 }
0x233e   : > { %10680 = vpow2.f32 %v3987_v42 }
0x2347   : > { %v10679_v20 = vpop.eup %10678 }
0x2348   : > { %v10681_v9 = vpop.eup %10680  ;;  %v3994_v52 = vsel %vm666_vm3, %v10679_v20, 0.0 }
0x2349   : > { %3995 = vadd.xlane.f32.xlu1 %v3994_v52  ;;  %v3991_v3 = vsel %vm662_vm4, %v10681_v9, 0.0 }
0x234a   : > { %3992 = vadd.xlane.f32.xlu0 %v3991_v3 }
0x235a   : > { %10417 = vrot.lane.b32.xlu1 %v10416_v29, %s12618_s20 }
0x235e   : > { %10422 = vrot.lane.b32.xlu1 %v10421_v30, %s12618_s20 }
0x2360   : > { %10412 = vrot.lane.b32.xlu0 %v11604_v50, %s12639_s25 }
0x2362   : > { %4093 = vrot.lane.b32.xlu1 %v11641_v59, %s12640_s26 }
0x2364   : > { %4091 = vrot.lane.b32.xlu0 %v11643_v60, %s12640_s26 }
0x2366   : > { %4101 = vrot.lane.b32.xlu1 %v9483_v40, %s12641_s27 }
0x2368   : > { %4099 = vrot.lane.b32.xlu0 %v3875_v24, %s12641_s27 }
0x23d6   : > { %v3996_v26 = vpop.xlane.xlu1 %3995 }
0x23d7   : > { %10682 = vrcp.f32 %v3996_v26  ;;  %v3993_v0 = vpop.xlane.xlu0 %3992 }
0x23d8   : > { %10684 = vrcp.f32 %v3993_v0  ;;  %v4262_v0 = vld [vmem:[%s12584_s6] sm:$0xff] }
0x23da   : > { %v10418_v25 = vpop.permute.xlu1 %10417 }
0x23db   : > { %v10413_v29 = vpop.permute.xlu0 %10412  ;;  %v10420_v23 = vunpack.i.h.bf16 %v10418_v25  ;;  %v10419_v1 = vunpack.i.l.bf16 %v10418_v25 }
0x23dc   : > { %v10415_v45 = vunpack.i.h.bf16 %v10413_v29  ;;  %v10414_v17 = vunpack.i.l.bf16 %v10413_v29  ;;  %v4263_v29 = vld [vmem:[%s12584_s6 + $0x8] sm:$0xff] }
0x23dd   : > { %v10007_v2 = vpack.c.bf16 %v10420_v23, %v10419_v1  ;;  %v4253_v1 = vrot.slane %v11513_v15, %v11185_v32 }
0x23de   : > { %v10001_v30 = vpack.c.bf16 %v10415_v45, %v10414_v17  ;;  %v10423_v16 = vpop.permute.xlu1 %10422  ;;  %v10015_v45 = vpack.c.bf16 %v4263_v29, %v4262_v0  ;;  %v4264_v17 = vld [vmem:[%s12584_s6 + $0x10] sm:$0xff] }
0x23df   : > { %v10425_v55 = vunpack.i.h.bf16 %v10423_v16  ;;  %v10424_v7 = vunpack.i.l.bf16 %v10423_v16  ;;  %v4092_v39 = vpop.permute.xlu0 %4091 }
0x23e0   : > { %10003 = vmatprep.subr.msk.bf16.mxu0 %vm11067_vm7, %v10001_v30  ;;  %v4113_v46 = vsel %vm572_vm1, %v11639_v5, %v4092_v39  ;;  %v4221_v5 = vrot.slane %v11513_v15, %v11162_v56  ;;  %10016 = vmatprep.subr.bf16.mxu1 %v10015_v45 }
0x23e1   : > { %v10683_v50 = vpop.eup %10682  ;;  %10006 = vmatpush3.bf16.msk.msra.mxu0 %vm11067_vm7, %v10001_v30  ;;  %v10011_v53 = vpack.c.bf16 %v10425_v55, %v10424_v7  ;;  %10018 = vmatpush3.bf16.msra.mxu1 %v10015_v45  ;;  %v4265_v30 = vld [vmem:[%s12584_s6 + $0x18] sm:$0xff]  ;;  %v11767_v45 = vld [vmem:[%s12583_s5 + $0x30] sm:$0xff] }
0x23e2   : > { %v10685_v59 = vpop.eup %10684  ;;  %v4000_v22 = vmul.f32 %v10683_v50, %v10679_v20  ;;  %10008 = vmatprep.subr.bf16.mxu0 %v10007_v2  ;;  %v4094_v35 = vpop.permute.xlu1 %4093  ;;  %v10019_v50 = vpack.c.bf16 %v4265_v30, %v4264_v17  ;;  %v11772_v17 = vld [vmem:[%s12583_s5 + $0x38] sm:$0xff] }
0x23e3   : > { %v3999_v60 = vmul.f32 %v10685_v59, %v10681_v9  ;;  %v4100_v43 = vpop.permute.xlu0 %4099  ;;  %v4114_v40 = vsel %vm572_vm1, %v11637_v27, %v4094_v35  ;;  %v10471_v30 = vpack.i.bf16 %v11772_v17, %v11767_v45 }
0x23e4   : > { %v4115_v24 = vsel %vm1418_vm8, %v4113_v46, %v4100_v43  ;;  %10020 = vmatprep.subr.bf16.mxu1 %v10019_v50  ;;  %v4353_v43 = vld [vmem:[%s12585_s7] sm:$0xff]  ;;  %v4269_v46 = vrot.slane %v11513_v15, %v11200_v47 }
0x23e5   : > { %9495 = vmatprep.mubr.msk.f32.mxu0 %vm662_vm4, %v3999_v60  ;;  %10022 = vmatpush3.bf16.msra.mxu1 %v10019_v50  ;;  %v10027_v50 = vpack.c.bf16 %v11772_v17, %v11767_v45 }
0x23e6   : > { %9496 = vmatmul.mubr.msk.f32.vlgmr.msra.gmra.mrb[32].mxu0 %vm662_vm4, %v4000_v22  ;;  %v4102_v44 = vpop.permute.xlu1 %4101 }
0x23e7   : > { %10010 = vmatpush3.bf16.msra.mxu0 %v10007_v2  ;;  %v4116_v31 = vsel %vm1418_vm8, %v4114_v40, %v4102_v44  ;;  %v4259_v2 = vrot.slane %v11513_v15, %v11188_v33 }
0x23e8   : > { %10012 = vmatprep.subr.bf16.mxu0 %v10011_v53 }
0x23eb   : > { %10014 = vmatpush3.bf16.msra.mxu0 %v10011_v53 }
0x23ec   : > { %9520 = vmatprep.subr.mxu0 %v4353_v43 }
0x24b9   : > { %v9497_v38 = vpop.f32.mrb[32].mxu0 }
0x24ba   : > { %4109 = vrot.lane.b32.xlu1 %v9497_v38, %s12642_s13  ;;  %v4080_v37 = vpop.f32.mrb[33].mxu0 }
0x24bb   : > { %4107 = vrot.lane.b32.xlu0 %v4080_v37, %s12642_s13 }
0x252c   : > { %v4110_v48 = vpop.permute.xlu1 %4109 }
0x252d   : > { %v4108_v61 = vpop.permute.xlu0 %4107  ;;  %v4118_v62 = vsel %vm1421_vm9, %v4116_v31, %v4110_v48 }
0x252e   : > { %v4117_v10 = vsel %vm1421_vm9, %v4115_v24, %v4108_v61 }
0x252f   : > { %9506 = vmatprep.mubr.msk.f32.mxu0 %vm458_vm0, %v4117_v10 }
0x2530   : > { %9507 = vmatmul.mubr.msk.f32.vlgmr.msra.gmra.mrb[34].mxu0 %vm458_vm0, %v4118_v62  ;;  %v4357_v62 = vrot.slane %v11513_v15, %v11207_v54 }
0x2531   : > { %9521 = vmatpush3.msra.mxu0 %v4353_v43 }
0x2603   : > { %v9508_v63 = vpop.f32.mrb[34].mxu0 }
0x2604   : > { %v4217_v11 = vadd.f32 %v9508_v63, %v11548_v6  ;;  %v4207_v27 = vpop.f32.mrb[35].mxu0 }
0x2605   : > { %v4216_v13 = vadd.f32 %v4207_v27, %v11466_v36 }
0x2606   : > { %v4223_v14 = vadd.f32 %v4221_v5, %v4217_v11 }
0x2607   : > { %v4222_v8 = vadd.f32 %v4221_v5, %v4216_v13 }
0x2608   : > { %v4227_v21 = vsel %vm1532_vm10, %v4223_v14, 0.0 }
0x2609   : > { %4228 = vadd.xlane.f32.xlu1 %v4227_v21  ;;  %v4224_v19 = vsel %vm458_vm0, %v4222_v8, 0.0 }
0x260a   : > { %4225 = vadd.xlane.f32.xlu0 %v4224_v19 }
0x2696   : > { %v4229_v58 = vpop.xlane.xlu1 %4228 }
0x2697   : > { %v4231_v41 = vmul.f32 0.03125, %v4229_v58  ;;  %v4226_v42 = vpop.xlane.xlu0 %4225 }
0x2698   : > { %v4230_v20 = vmul.f32 0.03125, %v4226_v42 }
0x2699   : > { %v4233_v9 = vsub.f32 %v4223_v14, %v4231_v41 }
0x269a   : > { %v4232_v52 = vsub.f32 %v4222_v8, %v4230_v20 }
0x269b   : > { %v4235_v26 = vmul.f32 %v4233_v9, %v4233_v9 }
0x269c   : > { %v4234_v3 = vmul.f32 %v4232_v52, %v4232_v52 }
0x269d   : > { %v4239_v36 = vsel %vm1532_vm10, %v4235_v26, 0.0  ;;  %v11753_v26 = vld [vmem:[%s12583_s5 + $0x20] sm:$0xff] }
0x269e   : > { %v4236_v6 = vsel %vm458_vm0, %v4234_v3, 0.0 }
0x269f   : > { %4237 = vadd.xlane.f32.xlu0 %v4236_v6 }
0x26a3   : > { %4240 = vadd.xlane.f32.xlu0 %v4239_v36  ;;  %v11758_v36 = vld [vmem:[%s12583_s5 + $0x28] sm:$0xff] }
0x26a4   : > { %v10023_v0 = vpack.c.bf16 %v11758_v36, %v11753_v26  ;;  %v10466_v29 = vpack.i.bf16 %v11758_v36, %v11753_v26 }
0x26a6   : > { %10024 = vmatprep.subr.bf16.mxu1 %v10023_v0 }
0x272c   : > { %v4238_v59 = vpop.xlane.xlu0 %4237 }
0x272d   : > { %v4242_v60 = vmul.f32 0.03125, %v4238_v59  ;;  %v11781_v59 = vld [vmem:[%s12586_s8 + $0x10] sm:$0xff] }
0x272f   : > { %v4244_v22 = vadd.f32 1e-05, %v4242_v60  ;;  %v4575_v60 = vrot.slane %v11781_v59, %v10957_v12 }
0x2730   : > { %v4241_v25 = vpop.xlane.xlu0 %4240 }
0x2731   : > { %10686 = vrsqrt.f32 %v4244_v22  ;;  %v4243_v16 = vmul.f32 0.03125, %v4241_v25 }
0x2733   : > { %v4245_v23 = vadd.f32 1e-05, %v4243_v16 }
0x2735   : > { %10688 = vrsqrt.f32 %v4245_v23 }
0x273b   : > { %v10687_v55 = vpop.eup %10686 }
0x273c   : > { %v4248_v7 = vmul.f32 %v10687_v55, %v4232_v52 }
0x273e   : > { %v4254_v53 = vmul.f32 %v4253_v1, %v4248_v7  ;;  %v3159_v7 = vld [vmem:[%s12586_s8 + $0x8] sm:$0x3] }
0x273f   : > { %v10689_v38 = vpop.eup %10688 }
0x2740   : > { %v4249_v37 = vmul.f32 %v10689_v38, %v4233_v9  ;;  %v4260_v35 = vadd.f32 %v4259_v2, %v4254_v53 }
0x2742   : > { %v4255_v39 = vmul.f32 %v4253_v1, %v4249_v37  ;;  %9517 = vmatprep.mubr.msk.f32.mxu1 %vm458_vm0, %v4260_v35 }
0x2744   : > { %v4261_v44 = vadd.f32 %v4259_v2, %v4255_v39  ;;  %v4470_v2 = vrot.slane %v3159_v7, %v10978_v18  ;;  %v4476_v39 = vrot.slane %v3159_v7, %v10957_v12 }
0x2746   : > { %9518 = vmatmul.mubr.msk.f32.vlgmr.msra.gmra.mrb[32].mxu1 %vm458_vm0, %v4261_v44 }
0x2747   : > { %10026 = vmatpush3.bf16.msra.mxu1 %v10023_v0 }
0x2748   : > { %10028 = vmatprep.subr.bf16.mxu1 %v10027_v50 }
0x274b   : > { %10030 = vmatpush3.bf16.msra.mxu1 %v10027_v50  ;;  %v11846_v50 = vld [vmem:[%s12582_s4] sm:$0xff] }
0x2819   : > { %v9519_v48 = vpop.f32.mrb[32].mxu1 }
0x281a   : > { %v4348_v40 = vadd.f32 %v9519_v48, %v4269_v46  ;;  %v4342_v24 = vpop.f32.mrb[33].mxu1 }
0x281b   : > { %v4343_v61 = vadd.f32 %v4342_v24, %v4269_v46 }
0x281c   : > { %v4352_v10 = vmax.f32 %v4348_v40, 0.0  ;;  %v4569_v40 = vrot.slane %v11781_v59, %v10978_v18 }
0x281d   : > { %v4351_v31 = vmax.f32 %v4343_v61, 0.0 }
0x281f   : > { %9522 = vmatprep.mubr.msk.f32.mxu0 %vm572_vm1, %v4351_v31 }
0x2820   : > { %9523 = vmatmul.mubr.msk.f32.vlgmr.msra.gmra.mrb[36].mxu0 %vm572_vm1, %v4352_v10 }
0x28f3   : > { %v9524_v5 = vpop.f32.mrb[36].mxu0 }
0x28f4   : > { %v4436_v63 = vadd.f32 %v9524_v5, %v4357_v62  ;;  %v4430_v11 = vpop.f32.mrb[37].mxu0 }
0x28f5   : > { %v4431_v27 = vadd.f32 %v4430_v11, %v4357_v62 }
0x28f6   : > { %v4440_v13 = vadd.f32 %v4436_v63, %v4261_v44 }
0x28f7   : > { %v4439_v14 = vadd.f32 %v4431_v27, %v4260_v35 }
0x28f8   : > { %v4444_v8 = vsel %vm1532_vm10, %v4440_v13, 0.0 }
0x28f9   : > { %4445 = vadd.xlane.f32.xlu0 %v4444_v8  ;;  %v4441_v21 = vsel %vm458_vm0, %v4439_v14, 0.0 }
0x28fa   : > { %4442 = vadd.xlane.f32.xlu1 %v4441_v21 }
0x2986   : > { %v4446_v19 = vpop.xlane.xlu0 %4445 }
0x2987   : > { %v4448_v58 = vmul.f32 0.03125, %v4446_v19  ;;  %v4443_v41 = vpop.xlane.xlu1 %4442 }
0x2988   : > { %v4447_v42 = vmul.f32 0.03125, %v4443_v41 }
0x2989   : > { %v4450_v20 = vsub.f32 %v4440_v13, %v4448_v58 }
0x298a   : > { %v4449_v9 = vsub.f32 %v4439_v14, %v4447_v42 }
0x298b   : > { %v4452_v52 = vmul.f32 %v4450_v20, %v4450_v20 }
0x298c   : > { %v4451_v15 = vmul.f32 %v4449_v9, %v4449_v9 }
0x298d   : > { %v4456_v3 = vsel %vm1532_vm10, %v4452_v52, 0.0 }
0x298e   : > { %4457 = vadd.xlane.f32.xlu0 %v4456_v3  ;;  %v4453_v6 = vsel %vm458_vm0, %v4451_v15, 0.0 }
0x298f   : > { %4454 = vadd.xlane.f32.xlu1 %v4453_v6  ;;  %v11840_v6 = vld [vmem:[%s12582_s4 + $0x8] sm:$0xf] }
0x29a0   : > { %4577 = vrot.lane.b32.xlu1 %v4575_v60, %s12651_s11 }
0x2a1b   : > { %v4458_v22 = vpop.xlane.xlu0 %4457 }
0x2a1c   : > { %v4460_v25 = vmul.f32 0.03125, %v4458_v22  ;;  %v4455_v16 = vpop.xlane.xlu1 %4454 }
0x2a1d   : > { %v4459_v23 = vmul.f32 0.03125, %v4455_v16 }
0x2a1e   : > { %v4462_v1 = vadd.f32 1e-05, %v4460_v25 }
0x2a1f   : > { %v4461_v55 = vadd.f32 1e-05, %v4459_v23 }
0x2a20   : > { %10690 = vrsqrt.f32 %v4462_v1  ;;  %v4578_v24 = vpop.permute.xlu1 %4577 }
0x2a21   : > { %10692 = vrsqrt.f32 %v4461_v55 }
0x2a2a   : > { %v10691_v53 = vpop.eup %10690 }
0x2a2b   : > { %v10693_v38 = vpop.eup %10692  ;;  %v4466_v37 = vmul.f32 %v10691_v53, %v4450_v20 }
0x2a2c   : > { %v4465_v35 = vmul.f32 %v10693_v38, %v4449_v9 }
0x2a2d   : > { %v4472_v44 = vmul.f32 %v4470_v2, %v4466_v37  ;;  %v4585_v37 = vrot.slane %v11781_v59, %v11043_v57 }
0x2a2e   : > { %v4471_v43 = vmul.f32 %v4470_v2, %v4465_v35 }
0x2a2f   : > { %v11793_v48 = vadd.f32 %v4476_v39, %v4472_v44 }
0x2a30   : > { %v11791_v46 = vadd.f32 %v4476_v39, %v4471_v43 }
0x2a32   : > { %9533 = vmatprep.mubr.msk.f32.mxu1 %vm458_vm0, %v11791_v46 }
0x2a33   : > { %9534 = vmatmul.mubr.msk.f32.vlgmr.msra.gmra.mrb[34].mxu1 %vm458_vm0, %v11793_v48 }
0x2b06   : > { %v11801_v61 = vpop.f32.mrb[34].mxu1 }
0x2b07   : > { %v4581_v31 = vadd.f32 %v11801_v61, %v4578_v24  ;;  %v11804_v10 = vpop.f32.mrb[35].mxu1  ;;  %v11819_v11 = vadd.f32 %v11801_v61, %v4569_v40 }
0x2b08   : > { %v11807_v62 = vadd.f32 %v4569_v40, %v11804_v10  ;;  %v4580_v5 = vadd.f32 %v4578_v24, %v11804_v10 }
0x2b0a   : > { %9540 = vmatprep.mubr.msk.f32.mxu0 %vm572_vm1, %v11807_v62  ;;  %v11812_v63 = vpack.i.bf16 %v4581_v31, %v4580_v5 }
0x2b0c   : > { %10432 = vrot.lane.b32.xlu1 %v11812_v63, %s12644_s28  ;;  %10427 = vrot.lane.b32.xlu0 %v11812_v63, %s12645_s29 }
0x2b10   : > { %4799 = vrot.lane.b32.xlu1 %v11807_v62, %s12646_s30  ;;  %4801 = vrot.lane.b32.xlu0 %v11819_v11, %s12646_s30 }
0x2b7e   : > { %v10433_v27 = vpop.permute.xlu1 %10432  ;;  %v10428_v13 = vpop.permute.xlu0 %10427 }
0x2b7f   : > { %v10435_v14 = vunpack.i.h.bf16 %v10433_v27  ;;  %v10434_v8 = vunpack.i.l.bf16 %v10433_v27  ;;  %v10430_v21 = vunpack.i.h.bf16 %v10428_v13  ;;  %v10429_v19 = vunpack.i.l.bf16 %v10428_v13 }
0x2b81   : > { %v10031_v58 = vpack.c.bf16 %v10430_v21, %v10429_v19  ;;  %v10043_v41 = vpack.c.bf16 %v10435_v14, %v10434_v8 }
0x2b82   : > { %v4800_v42 = vpop.permute.xlu1 %4799  ;;  %v4802_v20 = vpop.permute.xlu0 %4801 }
0x2b83   : > { %10033 = vmatprep.subr.msk.bf16.mxu0 %vm11008_vm2, %v10031_v58 }
0x2b84   : > { %10036 = vmatpush3.bf16.xpose.msk.msra.mxu0 %vm11008_vm2, %v10031_v58 }
0x2b85   : > { %10045 = vmatprep.subr.msk.bf16.mxu0 %vm11008_vm2, %v10043_v41 }
0x2b8b   : > { %9541 = vmatmul.mubr.msk.f32.vlgmr.msra.gmra.mrb[38].mxu0 %vm572_vm1, %v11819_v11 }
0x2b8c   : > { %10048 = vmatpush3.bf16.xpose.msk.msra.mxu0 %vm11008_vm2, %v10043_v41  ;;  %9554 = vmatprep.mubr.msk.f32.mxu0 %vm572_vm1, %v4800_v42 }
0x2b93   : > { %9555 = vmatmul.mubr.msk.f32.vlgmr.msra.gmra.mrb[40].mxu0 %vm572_vm1, %v4802_v20 }
0x2c5e   : > { %v9542_v9 = vpop.f32.mrb[38].mxu0 }
0x2c5f   : > { %v4684_v52 = vmul.f32 0.35355338, %v9542_v9  ;;  %v4674_v15 = vpop.f32.mrb[39].mxu0 }
0x2c60   : > { %v4683_v3 = vmul.f32 0.35355338, %v4674_v15 }
0x2c61   : > { %v4686_v0 = vadd.f32 %v11840_v6, %v4684_v52 }
0x2c62   : > { %v4685_v60 = vadd.f32 %v11846_v50, %v4683_v3 }
0x2c63   : > { %v4690_v22 = vsel %vm666_vm3, %v4686_v0, -inf }
0x2c64   : > { %4691 = vmax.xlane.f32.xlu0 %v4690_v22  ;;  %v4687_v25 = vsel %vm662_vm4, %v4685_v60, -inf }
0x2c65   : > { %4688 = vmax.xlane.f32.xlu1 %v4687_v25 }
0x2c66   : > { %v9556_v16 = vpop.f32.mrb[40].mxu0 }
0x2c67   : > { %v4891_v23 = vmul.f32 0.35355338, %v9556_v16  ;;  %v4881_v1 = vpop.f32.mrb[41].mxu0 }
0x2c68   : > { %v4890_v55 = vmul.f32 0.35355338, %v4881_v1 }
0x2c69   : > { %v4893_v7 = vadd.f32 %v11840_v6, %v4891_v23 }
0x2c6a   : > { %v4892_v2 = vadd.f32 %v11846_v50, %v4890_v55 }
0x2c6b   : > { %v4897_v53 = vsel %vm666_vm3, %v4893_v7, -inf }
0x2c6c   : > { %4898 = vmax.xlane.f32.xlu1 %v4897_v53  ;;  %v4894_v38 = vsel %vm662_vm4, %v4892_v2, -inf }
0x2c6d   : > { %4895 = vmax.xlane.f32.xlu0 %v4894_v38 }
0x2c83   : > { %4587 = vrot.lane.b32.xlu0 %v4585_v37, %s12647_s14 }
0x2cf1   : > { %v4692_v35 = vpop.xlane.xlu0 %4691 }
0x2cf2   : > { %v4694_v39 = vsub.f32 %v4686_v0, %v4692_v35  ;;  %v4689_v44 = vpop.xlane.xlu1 %4688 }
0x2cf3   : > { %v4693_v43 = vsub.f32 %v4685_v60, %v4689_v44 }
0x2cf4   : > { %v4697_v40 = vmul.f32 1.442695, %v4694_v39 }
0x2cf5   : > { %v4695_v24 = vmul.f32 1.442695, %v4693_v43 }
0x2cf6   : > { %10694 = vpow2.f32 %v4697_v40 }
0x2cf7   : > { %10696 = vpow2.f32 %v4695_v24 }
0x2cf9   : > { %v4899_v31 = vpop.xlane.xlu1 %4898 }
0x2cfa   : > { %v4901_v5 = vsub.f32 %v4893_v7, %v4899_v31  ;;  %v4896_v27 = vpop.xlane.xlu0 %4895 }
0x2cfb   : > { %v4900_v13 = vsub.f32 %v4892_v2, %v4896_v27 }
0x2cfc   : > { %v4904_v14 = vmul.f32 1.442695, %v4901_v5 }
0x2cfd   : > { %v4902_v8 = vmul.f32 1.442695, %v4900_v13 }
0x2cfe   : > { %10698 = vpow2.f32 %v4904_v14  ;;  %v4588_v21 = vpop.permute.xlu0 %4587 }
0x2cff   : > { %v4590_v19 = vadd.f32 %v4588_v21, %v11804_v10  ;;  %v4591_v58 = vadd.f32 %v11801_v61, %v4588_v21  ;;  %10700 = vpow2.f32 %v4902_v8 }
0x2d00   : > { %v10695_v41 = vpop.eup %10694 }
0x2d01   : > { %v4702_v42 = vsel %vm666_vm3, %v10695_v41, 0.0  ;;  %v11861_v20 = vpack.i.bf16 %v4591_v58, %v4590_v19  ;;  %v10697_v9 = vpop.eup %10696 }
0x2d02   : > { %4703 = vadd.xlane.f32.xlu1 %v4702_v42  ;;  %v4699_v52 = vsel %vm662_vm4, %v10697_v9, 0.0 }
0x2d03   : > { %10442 = vrot.lane.b32.xlu0 %v11861_v20, %s12648_s19 }
0x2d06   : > { %4700 = vadd.xlane.f32.xlu1 %v4699_v52 }
0x2d07   : > { %10447 = vrot.lane.b32.xlu0 %v11812_v63, %s12649_s22 }
0x2d08   : > { %v10699_v10 = vpop.eup %10698 }
0x2d09   : > { %v4909_v61 = vsel %vm666_vm3, %v10699_v10, 0.0  ;;  %v10701_v15 = vpop.eup %10700 }
0x2d0a   : > { %4910 = vadd.xlane.f32.xlu1 %v4909_v61  ;;  %v4906_v3 = vsel %vm662_vm4, %v10701_v15, 0.0 }
0x2d0b   : > { %5004 = vrot.lane.b32.xlu0 %v11807_v62, %s12650_s23 }
0x2d0e   : > { %4907 = vadd.xlane.f32.xlu1 %v4906_v3 }
0x2d0f   : > { %5006 = vrot.lane.b32.xlu0 %v11819_v11, %s12650_s23 }
0x2d1f   : > { %10437 = vrot.lane.b32.xlu1 %v11861_v20, %s12647_s14 }
0x2d75   : > { %v10443_v25 = vpop.permute.xlu0 %10442 }
0x2d76   : > { %v10445_v7 = vunpack.i.h.bf16 %v10443_v25  ;;  %v10444_v2 = vunpack.i.l.bf16 %v10443_v25 }
0x2d78   : > { %v10049_v44 = vpack.c.bf16 %v10445_v7, %v10444_v2 }
0x2d79   : > { %v10448_v37 = vpop.permute.xlu0 %10447 }
0x2d7a   : > { %v10450_v43 = vunpack.i.h.bf16 %v10448_v37  ;;  %v10449_v40 = vunpack.i.l.bf16 %v10448_v37 }
0x2d7c   : > { %v10055_v13 = vpack.c.bf16 %v10450_v43, %v10449_v40 }
0x2d7d   : > { %v5005_v8 = vpop.permute.xlu0 %5004 }
0x2d81   : > { %v5007_v21 = vpop.permute.xlu0 %5006 }
0x2d8f   : > { %v4704_v0 = vpop.xlane.xlu1 %4703 }
0x2d93   : > { %v4701_v60 = vpop.xlane.xlu1 %4700 }
0x2d94   : > { %10702 = vrcp.f32 %v4701_v60 }
0x2d95   : > { %10704 = vrcp.f32 %v4704_v0 }
0x2d97   : > { %v4911_v22 = vpop.xlane.xlu1 %4910 }
0x2d9b   : > { %v4908_v16 = vpop.xlane.xlu1 %4907 }
0x2d9c   : > { %10706 = vrcp.f32 %v4908_v16 }
0x2d9d   : > { %10708 = vrcp.f32 %v4911_v22 }
0x2d9e   : > { %v10703_v23 = vpop.eup %10702 }
0x2d9f   : > { %v10438_v1 = vpop.permute.xlu1 %10437  ;;  %v4707_v55 = vmul.f32 %v10703_v23, %v10697_v9  ;;  %v10705_v39 = vpop.eup %10704 }
0x2da0   : > { %v10440_v53 = vunpack.i.h.bf16 %v10438_v1  ;;  %v10439_v38 = vunpack.i.l.bf16 %v10438_v1  ;;  %v4708_v31 = vmul.f32 %v10705_v39, %v10695_v41 }
0x2da1   : > { %9547 = vmatprep.mubr.msk.f32.mxu1 %vm662_vm4, %v4707_v55 }
0x2da2   : > { %v10037_v35 = vpack.c.bf16 %v10440_v53, %v10439_v38 }
0x2da4   : > { %10039 = vmatprep.subr.msk.bf16.mxu1 %vm11067_vm7, %v10037_v35 }
0x2da5   : > { %10042 = vmatpush3.bf16.msk.msra.mxu1 %vm11067_vm7, %v10037_v35 }
0x2da6   : > { %v10707_v24 = vpop.eup %10706  ;;  %10051 = vmatprep.subr.msk.bf16.mxu1 %vm11067_vm7, %v10049_v44 }
0x2da7   : > { %v10709_v5 = vpop.eup %10708  ;;  %v4914_v27 = vmul.f32 %v10707_v24, %v10701_v15 }
0x2da8   : > { %9548 = vmatmul.mubr.msk.f32.vlgmr.msra.gmra.mrb[36].mxu1 %vm662_vm4, %v4708_v31  ;;  %v4915_v14 = vmul.f32 %v10709_v5, %v10699_v10 }
0x2da9   : > { %10054 = vmatpush3.bf16.msk.msra.mxu1 %vm11067_vm7, %v10049_v44  ;;  %9561 = vmatprep.mubr.msk.f32.mxu1 %vm662_vm4, %v4914_v27 }
0x2daa   : > { %10057 = vmatprep.subr.msk.bf16.mxu1 %vm11008_vm2, %v10055_v13 }
0x2dac   : > { %9562 = vmatmul.mubr.msk.f32.vlgmr.msra.gmra.mrb[38].mxu1 %vm662_vm4, %v4915_v14 }
0x2dad   : > { %9568 = vmatprep.mubr.msk.f32.mxu1 %vm572_vm1, %v5005_v8 }
0x2db2   : > { %10060 = vmatpush3.bf16.xpose.msk.msra.mxu1 %vm11008_vm2, %v10055_v13 }
0x2db9   : > { %9569 = vmatmul.mubr.msk.f32.vlgmr.msra.gmra.mrb[40].mxu1 %vm572_vm1, %v5007_v21 }
0x2e7b   : > { %v11894_v19 = vpop.f32.mrb[36].mxu1 }
0x2e7c   : > { %v11896_v58 = vpop.f32.mrb[37].mxu1 }
0x2e7f   : > { %v11898_v41 = vpop.f32.mrb[38].mxu1 }
0x2e80   : > { %v11900_v42 = vpop.f32.mrb[39].mxu1 }
0x2e8c   : > { %v9570_v9 = vpop.f32.mrb[40].mxu1 }
0x2e8d   : > { %v5096_v52 = vmul.f32 0.35355338, %v9570_v9  ;;  %v5086_v10 = vpop.f32.mrb[41].mxu1 }
0x2e8e   : > { %v5095_v61 = vmul.f32 0.35355338, %v5086_v10 }
0x2e8f   : > { %v5098_v15 = vadd.f32 %v11840_v6, %v5096_v52 }
0x2e90   : > { %v5097_v3 = vadd.f32 %v11846_v50, %v5095_v61 }
0x2e91   : > { %v5102_v0 = vsel %vm666_vm3, %v5098_v15, -inf }
0x2e92   : > { %5103 = vmax.xlane.f32.xlu0 %v5102_v0  ;;  %v5099_v60 = vsel %vm662_vm4, %v5097_v3, -inf }
0x2e93   : > { %5100 = vmax.xlane.f32.xlu1 %v5099_v60 }
0x2f1f   : > { %v5104_v22 = vpop.xlane.xlu0 %5103 }
0x2f20   : > { %v5106_v25 = vsub.f32 %v5098_v15, %v5104_v22  ;;  %v5101_v16 = vpop.xlane.xlu1 %5100 }
0x2f21   : > { %v5105_v23 = vsub.f32 %v5097_v3, %v5101_v16 }
0x2f22   : > { %v5109_v1 = vmul.f32 1.442695, %v5106_v25 }
0x2f23   : > { %v5107_v55 = vmul.f32 1.442695, %v5105_v23 }
0x2f24   : > { %10710 = vpow2.f32 %v5109_v1 }
0x2f25   : > { %10712 = vpow2.f32 %v5107_v55 }
0x2f2e   : > { %v10711_v7 = vpop.eup %10710 }
0x2f2f   : > { %v10713_v2 = vpop.eup %10712  ;;  %v5114_v53 = vsel %vm666_vm3, %v10711_v7, 0.0 }
0x2f30   : > { %5115 = vadd.xlane.f32.xlu1 %v5114_v53  ;;  %v5111_v38 = vsel %vm662_vm4, %v10713_v2, 0.0 }
0x2f31   : > { %5112 = vadd.xlane.f32.xlu0 %v5111_v38 }
0x2f41   : > { %10457 = vrot.lane.b32.xlu1 %v11812_v63, %s12636_s15 }
0x2f45   : > { %5209 = vrot.lane.b32.xlu1 %v11807_v62, %s12637_s16 }
0x2f47   : > { %10452 = vrot.lane.b32.xlu0 %v11861_v20, %s12638_s24 }
0x2f4b   : > { %5211 = vrot.lane.b32.xlu0 %v11819_v11, %s12637_s16 }
0x2fbd   : > { %v5116_v37 = vpop.xlane.xlu1 %5115 }
0x2fbe   : > { %10714 = vrcp.f32 %v5116_v37  ;;  %v5113_v35 = vpop.xlane.xlu0 %5112 }
0x2fbf   : > { %10716 = vrcp.f32 %v5113_v35 }
0x2fc1   : > { %v10458_v39 = vpop.permute.xlu1 %10457 }
0x2fc2   : > { %v10453_v44 = vpop.permute.xlu0 %10452  ;;  %v10460_v43 = vunpack.i.h.bf16 %v10458_v39  ;;  %v10459_v40 = vunpack.i.l.bf16 %v10458_v39 }
0x2fc3   : > { %v10455_v24 = vunpack.i.h.bf16 %v10453_v44  ;;  %v10454_v31 = vunpack.i.l.bf16 %v10453_v44 }
0x2fc4   : > { %v10067_v5 = vpack.c.bf16 %v10460_v43, %v10459_v40 }
0x2fc5   : > { %v10061_v63 = vpack.c.bf16 %v10455_v24, %v10454_v31  ;;  %v5210_v14 = vpop.permute.xlu1 %5209 }
0x2fc6   : > { %v5212_v8 = vpop.permute.xlu0 %5211 }
0x2fc7   : > { %10063 = vmatprep.subr.msk.bf16.mxu0 %vm11067_vm7, %v10061_v63 }
0x2fc8   : > { %v10715_v62 = vpop.eup %10714  ;;  %10066 = vmatpush3.bf16.msk.msra.mxu0 %vm11067_vm7, %v10061_v63 }
0x2fc9   : > { %v10717_v11 = vpop.eup %10716  ;;  %10069 = vmatprep.subr.msk.bf16.mxu0 %vm11008_vm2, %v10067_v5  ;;  %v5120_v13 = vmul.f32 %v10715_v62, %v10711_v7 }
0x2fca   : > { %v5119_v27 = vmul.f32 %v10717_v11, %v10713_v2 }
0x2fcc   : > { %9575 = vmatprep.mubr.msk.f32.mxu0 %vm662_vm4, %v5119_v27 }
0x2fcd   : > { %9576 = vmatmul.mubr.msk.f32.vlgmr.msra.gmra.mrb[42].mxu0 %vm662_vm4, %v5120_v13 }
0x2fce   : > { %9582 = vmatprep.mubr.msk.f32.mxu0 %vm572_vm1, %v5210_v14 }
0x2fd1   : > { %10072 = vmatpush3.bf16.xpose.msk.msra.mxu0 %vm11008_vm2, %v10067_v5 }
0x2fd8   : > { %9583 = vmatmul.mubr.msk.f32.vlgmr.msra.gmra.mrb[44].mxu0 %vm572_vm1, %v5212_v8 }
0x30a0   : > { %v9577_v21 = vpop.f32.mrb[42].mxu0 }
0x30a1   : > { %v5200_v9 = vpop.f32.mrb[43].mxu0 }
0x30ab   : > { %v9584_v52 = vpop.f32.mrb[44].mxu0 }
0x30ac   : > { %v5301_v10 = vmul.f32 0.35355338, %v9584_v52  ;;  %v5291_v61 = vpop.f32.mrb[45].mxu0 }
0x30ad   : > { %v5300_v15 = vmul.f32 0.35355338, %v5291_v61 }
0x30ae   : > { %v5303_v3 = vadd.f32 %v11840_v6, %v5301_v10 }
0x30af   : > { %v5302_v0 = vadd.f32 %v11846_v50, %v5300_v15 }
0x30b0   : > { %v5307_v60 = vsel %vm666_vm3, %v5303_v3, -inf }
0x30b1   : > { %5308 = vmax.xlane.f32.xlu0 %v5307_v60  ;;  %v5304_v22 = vsel %vm662_vm4, %v5302_v0, -inf }
0x30b2   : > { %5305 = vmax.xlane.f32.xlu1 %v5304_v22 }
0x313e   : > { %v5309_v25 = vpop.xlane.xlu0 %5308 }
0x313f   : > { %v5311_v16 = vsub.f32 %v5303_v3, %v5309_v25  ;;  %v5306_v23 = vpop.xlane.xlu1 %5305 }
0x3140   : > { %v5310_v1 = vsub.f32 %v5302_v0, %v5306_v23 }
0x3141   : > { %v5314_v55 = vmul.f32 1.442695, %v5311_v16 }
0x3142   : > { %v5312_v7 = vmul.f32 1.442695, %v5310_v1 }
0x3143   : > { %10718 = vpow2.f32 %v5314_v55 }
0x3144   : > { %10720 = vpow2.f32 %v5312_v7 }
0x314d   : > { %v10719_v2 = vpop.eup %10718 }
0x314e   : > { %v10721_v53 = vpop.eup %10720  ;;  %v5319_v38 = vsel %vm666_vm3, %v10719_v2, 0.0 }
0x314f   : > { %5320 = vadd.xlane.f32.xlu1 %v5319_v38  ;;  %v5316_v37 = vsel %vm662_vm4, %v10721_v53, 0.0 }
0x3150   : > { %5317 = vadd.xlane.f32.xlu0 %v5316_v37 }
0x3160   : > { %10467 = vrot.lane.b32.xlu1 %v10466_v29, %s12651_s11 }
0x3164   : > { %10472 = vrot.lane.b32.xlu1 %v10471_v30, %s12651_s11 }
0x3166   : > { %10462 = vrot.lane.b32.xlu0 %v11861_v20, %s12639_s25 }
0x3168   : > { %5418 = vrot.lane.b32.xlu1 %v11898_v41, %s12640_s26 }
0x316a   : > { %5416 = vrot.lane.b32.xlu0 %v11900_v42, %s12640_s26 }
0x316c   : > { %5426 = vrot.lane.b32.xlu1 %v9577_v21, %s12641_s27 }
0x316e   : > { %5424 = vrot.lane.b32.xlu0 %v5200_v9, %s12641_s27 }
0x31dc   : > { %v5321_v26 = vpop.xlane.xlu1 %5320 }
0x31dd   : > { %10722 = vrcp.f32 %v5321_v26  ;;  %v5318_v36 = vpop.xlane.xlu0 %5317 }
0x31de   : > { %10724 = vrcp.f32 %v5318_v36 }
0x31e0   : > { %v10468_v39 = vpop.permute.xlu1 %10467 }
0x31e1   : > { %v10463_v29 = vpop.permute.xlu0 %10462  ;;  %v10470_v43 = vunpack.i.h.bf16 %v10468_v39  ;;  %v10469_v40 = vunpack.i.l.bf16 %v10468_v39 }
0x31e2   : > { %v10465_v45 = vunpack.i.h.bf16 %v10463_v29  ;;  %v10464_v17 = vunpack.i.l.bf16 %v10463_v29 }
0x31e3   : > { %v10079_v63 = vpack.c.bf16 %v10470_v43, %v10469_v40 }
0x31e4   : > { %v10073_v30 = vpack.c.bf16 %v10465_v45, %v10464_v17  ;;  %v10473_v44 = vpop.permute.xlu1 %10472  ;;  %v8824_v45 = vld [vmem:[%s12584_s6 + $0x20] sm:$0xff]  ;;  %v8825_v17 = vld [vmem:[%s12584_s6 + $0x28] sm:$0xff] }
0x31e5   : > { %v10475_v24 = vunpack.i.h.bf16 %v10473_v44  ;;  %v10474_v31 = vunpack.i.l.bf16 %v10473_v44  ;;  %v5417_v13 = vpop.permute.xlu0 %5416 }
0x31e6   : > { %10075 = vmatprep.subr.msk.bf16.mxu1 %vm11067_vm7, %v10073_v30  ;;  %v5438_v21 = vsel %vm572_vm1, %v11896_v58, %v5417_v13  ;;  %v5546_v58 = vrot.slane %v11781_v59, %v11162_v56  ;;  %v5834_v13 = vrot.slane %v11539_v51, 3 }
0x31e7   : > { %v10723_v20 = vpop.eup %10722  ;;  %10078 = vmatpush3.bf16.msk.msra.mxu1 %vm11067_vm7, %v10073_v30  ;;  %v10083_v5 = vpack.c.bf16 %v10475_v24, %v10474_v31  ;;  %v10087_v30 = vpack.c.bf16 %v8825_v17, %v8824_v45  ;;  %v5578_v31 = vrot.slane %v11781_v59, %v11185_v32  ;;  %v12037_v45 = vld [vmem:[%s12583_s5 + $0x18] sm:$0xff] }
0x31e8   : > { %v10725_v41 = vpop.eup %10724  ;;  %v5325_v35 = vmul.f32 %v10723_v20, %v10719_v2  ;;  %10080 = vmatprep.subr.bf16.mxu1 %v10079_v63  ;;  %v5419_v27 = vpop.permute.xlu1 %5418  ;;  %v8826_v20 = vld [vmem:[%s12584_s6 + $0x30] sm:$0xff] }
0x31e9   : > { %v5324_v42 = vmul.f32 %v10725_v41, %v10721_v53  ;;  %v5425_v8 = vpop.permute.xlu0 %5424  ;;  %v5439_v52 = vsel %vm572_vm1, %v11894_v19, %v5419_v27  ;;  %10088 = vmatprep.subr.bf16.mxu0 %v10087_v30  ;;  %v8827_v41 = vld [vmem:[%s12584_s6 + $0x38] sm:$0xff] }
0x31ea   : > { %v5440_v10 = vsel %vm1418_vm8, %v5438_v21, %v5425_v8  ;;  %10090 = vmatpush3.bf16.msra.mxu0 %v10087_v30 }
0x31eb   : > { %9589 = vmatprep.mubr.msk.f32.mxu1 %vm662_vm4, %v5324_v42  ;;  %v10091_v42 = vpack.c.bf16 %v8827_v41, %v8826_v20  ;;  %v12048_v41 = vld [vmem:[%s12586_s8] sm:$0xff] }
0x31ec   : > { %9590 = vmatmul.mubr.msk.f32.vlgmr.msra.gmra.mrb[42].mxu1 %vm662_vm4, %v5325_v35  ;;  %v5427_v14 = vpop.permute.xlu1 %5426 }
0x31ed   : > { %10082 = vmatpush3.bf16.msra.mxu1 %v10079_v63  ;;  %v5441_v15 = vsel %vm1418_vm8, %v5439_v52, %v5427_v14  ;;  %10092 = vmatprep.subr.bf16.mxu0 %v10091_v42 }
0x31ee   : > { %10084 = vmatprep.subr.bf16.mxu1 %v10083_v5  ;;  %10094 = vmatpush3.bf16.msra.mxu0 %v10091_v42  ;;  %v5937_v42 = vrot.slane %v12048_v41, %v10957_v12 }
0x31f1   : > { %10086 = vmatpush3.bf16.msra.mxu1 %v10083_v5 }
0x32bf   : > { %v9591_v62 = vpop.f32.mrb[42].mxu1 }
0x32c0   : > { %5434 = vrot.lane.b32.xlu1 %v9591_v62, %s12642_s13  ;;  %v5405_v11 = vpop.f32.mrb[43].mxu1  ;;  %v5584_v62 = vrot.slane %v11781_v59, %v11188_v33 }
0x32c1   : > { %5432 = vrot.lane.b32.xlu0 %v5405_v11, %s12642_s13  ;;  %v5833_v11 = vrot.slane %v11459_v28, 3  ;;  %v8830_v28 = vld [vmem:[%s12585_s7 + $0x8] sm:$0xff] }
0x32c2   : > { %9614 = vmatprep.subr.mxu1 %v8830_v28 }
0x32c3   : > { %v5835_v52 = vsel %vm3144_vm11, %v5833_v11, %v5834_v13 }
0x3332   : > { %v5435_v9 = vpop.permute.xlu1 %5434 }
0x3333   : > { %v5433_v61 = vpop.permute.xlu0 %5432  ;;  %v5443_v0 = vsel %vm1421_vm9, %v5441_v15, %v5435_v9 }
0x3334   : > { %v5442_v3 = vsel %vm1421_vm9, %v5440_v10, %v5433_v61  ;;  %v10818_v61 = vld [vmem:[%s12581_s3] sm:$0xff] }
0x3335   : > { %9600 = vmatprep.mubr.msk.f32.mxu1 %vm458_vm0, %v5442_v3  ;;  %v12001_v15 = vadd.f32 %v10818_v61, %v5835_v52  ;;  %v5594_v3 = vrot.slane %v11781_v59, %v11200_v47 }
0x3336   : > { %9601 = vmatmul.mubr.msk.f32.vlgmr.msra.gmra.mrb[44].mxu1 %vm458_vm0, %v5443_v0 }
0x3337   : > { %9615 = vmatpush3.msra.mxu1 %v8830_v28 }
0x3409   : > { %v9602_v60 = vpop.f32.mrb[44].mxu1 }
0x340a   : > { %v5542_v22 = vadd.f32 %v9602_v60, %v11793_v48  ;;  %v5532_v19 = vpop.f32.mrb[45].mxu1 }
0x340b   : > { %v5541_v25 = vadd.f32 %v5532_v19, %v11791_v46 }
0x340c   : > { %v5548_v16 = vadd.f32 %v5546_v58, %v5542_v22 }
0x340d   : > { %v5547_v23 = vadd.f32 %v5546_v58, %v5541_v25 }
0x340e   : > { %v5552_v1 = vsel %vm1532_vm10, %v5548_v16, 0.0 }
0x340f   : > { %5553 = vadd.xlane.f32.xlu1 %v5552_v1  ;;  %v5549_v55 = vsel %vm458_vm0, %v5547_v23, 0.0 }
0x3410   : > { %5550 = vadd.xlane.f32.xlu0 %v5549_v55 }
0x349c   : > { %v5554_v7 = vpop.xlane.xlu1 %5553 }
0x349d   : > { %v5556_v2 = vmul.f32 0.03125, %v5554_v7  ;;  %v5551_v53 = vpop.xlane.xlu0 %5550 }
0x349e   : > { %v5555_v38 = vmul.f32 0.03125, %v5551_v53 }
0x349f   : > { %v5558_v37 = vsub.f32 %v5548_v16, %v5556_v2  ;;  %v5682_v16 = vrot.slane %v11781_v59, %v11207_v54  ;;  %v12025_v59 = vld [vmem:[%s12583_s5 + $0x8] sm:$0xff] }
0x34a0   : > { %v5557_v26 = vsub.f32 %v5547_v23, %v5555_v38 }
0x34a1   : > { %v5560_v29 = vmul.f32 %v5558_v37, %v5558_v37 }
0x34a2   : > { %v5559_v36 = vmul.f32 %v5557_v26, %v5557_v26 }
0x34a3   : > { %v5564_v46 = vsel %vm1532_vm10, %v5560_v29, 0.0 }
0x34a4   : > { %v5561_v48 = vsel %vm458_vm0, %v5559_v36, 0.0 }
0x34a5   : > { %5562 = vadd.xlane.f32.xlu0 %v5561_v48  ;;  %v12020_v48 = vld [vmem:[%s12583_s5] sm:$0xff] }
0x34a6   : > { %v10095_v29 = vpack.c.bf16 %v12025_v59, %v12020_v48  ;;  %v10516_v17 = vpack.i.bf16 %v12025_v59, %v12020_v48 }
0x34a8   : > { %10096 = vmatprep.subr.bf16.mxu0 %v10095_v29 }
0x34a9   : > { %5565 = vadd.xlane.f32.xlu0 %v5564_v46  ;;  %v12032_v46 = vld [vmem:[%s12583_s5 + $0x10] sm:$0xff] }
0x34aa   : > { %v10521_v30 = vpack.i.bf16 %v12037_v45, %v12032_v46  ;;  %v10099_v20 = vpack.c.bf16 %v12037_v45, %v12032_v46 }
0x3532   : > { %v5563_v35 = vpop.xlane.xlu0 %5562 }
0x3533   : > { %v5567_v39 = vmul.f32 0.03125, %v5563_v35 }
0x3535   : > { %v5569_v44 = vadd.f32 1e-05, %v5567_v39 }
0x3536   : > { %v5566_v43 = vpop.xlane.xlu0 %5565 }
0x3537   : > { %10726 = vrsqrt.f32 %v5569_v44  ;;  %v5568_v40 = vmul.f32 0.03125, %v5566_v43  ;;  %v8791_v43 = vld [vmem:[%s12586_s8 + $0x18] sm:$0x3] }
0x3539   : > { %v5570_v24 = vadd.f32 1e-05, %v5568_v40  ;;  %v5780_v40 = vrot.slane %v8791_v43, %v10978_v18 }
0x353b   : > { %10728 = vrsqrt.f32 %v5570_v24 }
0x3541   : > { %v10727_v63 = vpop.eup %10726 }
0x3542   : > { %v5573_v5 = vmul.f32 %v10727_v63, %v5557_v26 }
0x3544   : > { %v5579_v27 = vmul.f32 %v5578_v31, %v5573_v5 }
0x3545   : > { %v10729_v14 = vpop.eup %10728 }
0x3546   : > { %v5574_v8 = vmul.f32 %v10729_v14, %v5558_v37  ;;  %v5585_v21 = vadd.f32 %v5584_v62, %v5579_v27  ;;  %v10819_v14 = vld [vmem:[%s12581_s3 + $0x8] sm:$0xf] }
0x3548   : > { %v5580_v9 = vmul.f32 %v5578_v31, %v5574_v8  ;;  %9611 = vmatprep.mubr.msk.f32.mxu0 %vm458_vm0, %v5585_v21  ;;  %v5785_v31 = vrot.slane %v8791_v43, %v10957_v12  ;;  %v5931_v21 = vrot.slane %v12048_v41, %v10978_v18 }
0x354a   : > { %v5586_v10 = vadd.f32 %v5584_v62, %v5580_v9 }
0x354c   : > { %9612 = vmatmul.mubr.msk.f32.vlgmr.msra.gmra.mrb[46].mxu0 %vm458_vm0, %v5586_v10 }
0x354d   : > { %9627 = vmatprep.mubr.msk.f32.mxu0 %vm458_vm0, %v12001_v15  ;;  %10098 = vmatpush3.bf16.msra.mxu0 %v10095_v29 }
0x354e   : > { %10100 = vmatprep.subr.bf16.mxu0 %v10099_v20 }
0x3551   : > { %10102 = vmatpush3.bf16.msra.mxu0 %v10099_v20 }
0x361f   : > { %v9613_v0 = vpop.f32.mrb[46].mxu0 }
0x3620   : > { %v5673_v58 = vadd.f32 %v9613_v0, %v5594_v3  ;;  %v5667_v60 = vpop.f32.mrb[47].mxu0 }
0x3621   : > { %v5668_v22 = vadd.f32 %v5667_v60, %v5594_v3 }
0x3622   : > { %v5677_v25 = vmax.f32 %v5673_v58, 0.0 }
0x3623   : > { %v5676_v19 = vmax.f32 %v5668_v22, 0.0 }
0x3625   : > { %9616 = vmatprep.mubr.msk.f32.mxu1 %vm572_vm1, %v5676_v19 }
0x3626   : > { %9617 = vmatmul.mubr.msk.f32.vlgmr.msra.gmra.mrb[46].mxu1 %vm572_vm1, %v5677_v25 }
0x36f9   : > { %v9618_v23 = vpop.f32.mrb[46].mxu1 }
0x36fa   : > { %v5760_v1 = vadd.f32 %v9618_v23, %v5682_v16  ;;  %v5755_v55 = vpop.f32.mrb[47].mxu1 }
0x36fc   : > { %v5763_v7 = vadd.f32 %v5760_v1, %v5586_v10 }
0x36fe   : > { %v5764_v2 = vsel %vm1532_vm10, %v5763_v7, 0.0 }
0x36ff   : > { %5765 = vadd.xlane.f32.xlu1 %v5764_v2 }
0x3710   : > { %5939 = vrot.lane.b32.xlu1 %v5937_v42, %s12651_s11 }
0x378c   : > { %v5766_v53 = vpop.xlane.xlu1 %5765 }
0x378d   : > { %v5767_v38 = vmul.f32 0.03125, %v5766_v53 }
0x378f   : > { %v5768_v37 = vsub.f32 %v5763_v7, %v5767_v38 }
0x3791   : > { %v5769_v26 = vmul.f32 %v5768_v37, %v5768_v37 }
0x3793   : > { %v5770_v36 = vsel %vm1532_vm10, %v5769_v26, 0.0 }
0x3794   : > { %5771 = vadd.xlane.f32.xlu0 %v5770_v36 }
0x3821   : > { %v5772_v35 = vpop.xlane.xlu0 %5771 }
0x3822   : > { %v5773_v39 = vmul.f32 0.03125, %v5772_v35 }
0x3824   : > { %v5774_v44 = vadd.f32 1e-05, %v5773_v39 }
0x3826   : > { %10730 = vrsqrt.f32 %v5774_v44 }
0x3830   : > { %v10731_v24 = vpop.eup %10730 }
0x3831   : > { %v5776_v63 = vmul.f32 %v10731_v24, %v5768_v37 }
0x3833   : > { %v5781_v5 = vmul.f32 %v5780_v40, %v5776_v63 }
0x3835   : > { %v5786_v62 = vadd.f32 %v5785_v31, %v5781_v5  ;;  %v5947_v31 = vrot.slane %v12048_v41, %v11043_v57 }
0x3837   : > { %v12059_v11 = vadd.f32 %v5786_v62, %v11539_v51  ;;  %v5940_v51 = vpop.permute.xlu1 %5939 }
0x3839   : > { %v12065_v27 = vsel %vm3150_vm12, %v5834_v13, %v12059_v11  ;;  %8833 = vst.msk [vmem:[%s11530_s21 + $0x3] sm:$0xe] %vm3099_vm13, %v12059_v11 }
0x383a   : > { %v12074_v8 = vadd.f32 %v10819_v14, %v12065_v27 }
0x383c   : > { %9628 = vmatmul.mubr.msk.f32.vlgmr.msra.gmra.mrb[48].mxu0 %vm458_vm0, %v12074_v8 }
0x390f   : > { %v12080_v9 = vpop.f32.mrb[48].mxu0 }
0x3910   : > { %v5943_v13 = vadd.f32 %v12080_v9, %v5940_v51  ;;  %v12083_v52 = vpop.f32.mrb[49].mxu0  ;;  %v12098_v3 = vadd.f32 %v12080_v9, %v5931_v21 }
0x3911   : > { %v12086_v10 = vadd.f32 %v5931_v21, %v12083_v52  ;;  %v5942_v61 = vadd.f32 %v5940_v51, %v12083_v52 }
0x3913   : > { %9634 = vmatprep.mubr.msk.f32.mxu1 %vm572_vm1, %v12086_v10  ;;  %v12091_v28 = vpack.i.bf16 %v5943_v13, %v5942_v61 }
0x3915   : > { %10482 = vrot.lane.b32.xlu1 %v12091_v28, %s12644_s28  ;;  %10477 = vrot.lane.b32.xlu0 %v12091_v28, %s12645_s29 }
0x3919   : > { %6161 = vrot.lane.b32.xlu1 %v12086_v10, %s12646_s30  ;;  %6163 = vrot.lane.b32.xlu0 %v12098_v3, %s12646_s30 }
0x3987   : > { %v10483_v0 = vpop.permute.xlu1 %10482  ;;  %v10478_v58 = vpop.permute.xlu0 %10477 }
0x3988   : > { %v10485_v60 = vunpack.i.h.bf16 %v10483_v0  ;;  %v10484_v22 = vunpack.i.l.bf16 %v10483_v0  ;;  %v10480_v19 = vunpack.i.h.bf16 %v10478_v58  ;;  %v10479_v25 = vunpack.i.l.bf16 %v10478_v58 }
0x398a   : > { %v10103_v16 = vpack.c.bf16 %v10480_v19, %v10479_v25  ;;  %v10115_v23 = vpack.c.bf16 %v10485_v60, %v10484_v22 }
0x398b   : > { %v6162_v1 = vpop.permute.xlu1 %6161  ;;  %v6164_v55 = vpop.permute.xlu0 %6163 }
0x398c   : > { %10105 = vmatprep.subr.msk.bf16.mxu1 %vm11008_vm2, %v10103_v16 }
0x398d   : > { %10108 = vmatpush3.bf16.xpose.msk.msra.mxu1 %vm11008_vm2, %v10103_v16 }
0x398e   : > { %10117 = vmatprep.subr.msk.bf16.mxu1 %vm11008_vm2, %v10115_v23 }
0x3994   : > { %9635 = vmatmul.mubr.msk.f32.vlgmr.msra.gmra.mrb[48].mxu1 %vm572_vm1, %v12098_v3 }
0x3995   : > { %10120 = vmatpush3.bf16.xpose.msk.msra.mxu1 %vm11008_vm2, %v10115_v23  ;;  %9648 = vmatprep.mubr.msk.f32.mxu1 %vm572_vm1, %v6162_v1 }
0x399c   : > { %9649 = vmatmul.mubr.msk.f32.vlgmr.msra.gmra.mrb[50].mxu1 %vm572_vm1, %v6164_v55 }
0x3a67   : > { %v9636_v7 = vpop.f32.mrb[48].mxu1 }
0x3a68   : > { %v6046_v2 = vmul.f32 0.35355338, %v9636_v7  ;;  %v6036_v53 = vpop.f32.mrb[49].mxu1 }
0x3a69   : > { %v6045_v38 = vmul.f32 0.35355338, %v6036_v53 }
0x3a6a   : > { %v6048_v37 = vadd.f32 %v11840_v6, %v6046_v2 }
0x3a6b   : > { %v6047_v26 = vadd.f32 %v11846_v50, %v6045_v38 }
0x3a6c   : > { %v6052_v36 = vsel %vm666_vm3, %v6048_v37, -inf }
0x3a6d   : > { %6053 = vmax.xlane.f32.xlu0 %v6052_v36  ;;  %v6049_v29 = vsel %vm662_vm4, %v6047_v26, -inf }
0x3a6e   : > { %6050 = vmax.xlane.f32.xlu1 %v6049_v29 }
0x3a6f   : > { %v9650_v20 = vpop.f32.mrb[50].mxu1 }
0x3a70   : > { %v6253_v42 = vmul.f32 0.35355338, %v9650_v20  ;;  %v6243_v35 = vpop.f32.mrb[51].mxu1 }
0x3a71   : > { %v6252_v39 = vmul.f32 0.35355338, %v6243_v35 }
0x3a72   : > { %v6255_v44 = vadd.f32 %v11840_v6, %v6253_v42 }
0x3a73   : > { %v6254_v43 = vadd.f32 %v11846_v50, %v6252_v39 }
0x3a74   : > { %v6259_v40 = vsel %vm666_vm3, %v6255_v44, -inf }
0x3a75   : > { %6260 = vmax.xlane.f32.xlu1 %v6259_v40  ;;  %v6256_v24 = vsel %vm662_vm4, %v6254_v43, -inf }
0x3a76   : > { %6257 = vmax.xlane.f32.xlu0 %v6256_v24 }
0x3a8c   : > { %5949 = vrot.lane.b32.xlu0 %v5947_v31, %s12647_s14 }
0x3afa   : > { %v6054_v63 = vpop.xlane.xlu0 %6053 }
0x3afb   : > { %v6056_v5 = vsub.f32 %v6048_v37, %v6054_v63  ;;  %v6051_v62 = vpop.xlane.xlu1 %6050 }
0x3afc   : > { %v6055_v14 = vsub.f32 %v6047_v26, %v6051_v62 }
0x3afd   : > { %v6059_v21 = vmul.f32 1.442695, %v6056_v5 }
0x3afe   : > { %v6057_v51 = vmul.f32 1.442695, %v6055_v14 }
0x3aff   : > { %10732 = vpow2.f32 %v6059_v21 }
0x3b00   : > { %10734 = vpow2.f32 %v6057_v51 }
0x3b02   : > { %v6261_v13 = vpop.xlane.xlu1 %6260 }
0x3b03   : > { %v6263_v61 = vsub.f32 %v6255_v44, %v6261_v13  ;;  %v6258_v0 = vpop.xlane.xlu0 %6257 }
0x3b04   : > { %v6262_v58 = vsub.f32 %v6254_v43, %v6258_v0 }
0x3b05   : > { %v6266_v60 = vmul.f32 1.442695, %v6263_v61 }
0x3b06   : > { %v6264_v22 = vmul.f32 1.442695, %v6262_v58 }
0x3b07   : > { %10736 = vpow2.f32 %v6266_v60  ;;  %v5950_v19 = vpop.permute.xlu0 %5949 }
0x3b08   : > { %v5952_v25 = vadd.f32 %v5950_v19, %v12083_v52  ;;  %v5953_v16 = vadd.f32 %v12080_v9, %v5950_v19  ;;  %10738 = vpow2.f32 %v6264_v22 }
0x3b09   : > { %v10733_v23 = vpop.eup %10732 }
0x3b0a   : > { %v6064_v1 = vsel %vm666_vm3, %v10733_v23, 0.0  ;;  %v12130_v55 = vpack.i.bf16 %v5953_v16, %v5952_v25  ;;  %v10735_v7 = vpop.eup %10734 }
0x3b0b   : > { %6065 = vadd.xlane.f32.xlu1 %v6064_v1  ;;  %v6061_v2 = vsel %vm662_vm4, %v10735_v7, 0.0 }
0x3b0c   : > { %10492 = vrot.lane.b32.xlu0 %v12130_v55, %s12648_s19 }
0x3b0f   : > { %6062 = vadd.xlane.f32.xlu1 %v6061_v2 }
0x3b10   : > { %10497 = vrot.lane.b32.xlu0 %v12091_v28, %s12649_s22 }
0x3b11   : > { %v10737_v52 = vpop.eup %10736 }
0x3b12   : > { %v6271_v9 = vsel %vm666_vm3, %v10737_v52, 0.0  ;;  %v10739_v53 = vpop.eup %10738 }
0x3b13   : > { %6272 = vadd.xlane.f32.xlu1 %v6271_v9  ;;  %v6268_v38 = vsel %vm662_vm4, %v10739_v53, 0.0 }
0x3b14   : > { %6366 = vrot.lane.b32.xlu0 %v12086_v10, %s12650_s23 }
0x3b17   : > { %6269 = vadd.xlane.f32.xlu1 %v6268_v38 }
0x3b18   : > { %6368 = vrot.lane.b32.xlu0 %v12098_v3, %s12650_s23 }
0x3b28   : > { %10487 = vrot.lane.b32.xlu1 %v12130_v55, %s12647_s14 }
0x3b7e   : > { %v10493_v29 = vpop.permute.xlu0 %10492 }
0x3b7f   : > { %v10495_v44 = vunpack.i.h.bf16 %v10493_v29  ;;  %v10494_v43 = vunpack.i.l.bf16 %v10493_v29 }
0x3b81   : > { %v10121_v62 = vpack.c.bf16 %v10495_v44, %v10494_v43 }
0x3b82   : > { %v10498_v31 = vpop.permute.xlu0 %10497 }
0x3b83   : > { %v10500_v14 = vunpack.i.h.bf16 %v10498_v31  ;;  %v10499_v21 = vunpack.i.l.bf16 %v10498_v31 }
0x3b85   : > { %v10127_v58 = vpack.c.bf16 %v10500_v14, %v10499_v21 }
0x3b86   : > { %v6367_v22 = vpop.permute.xlu0 %6366 }
0x3b8a   : > { %v6369_v19 = vpop.permute.xlu0 %6368 }
0x3b98   : > { %v6066_v37 = vpop.xlane.xlu1 %6065 }
0x3b9c   : > { %v6063_v26 = vpop.xlane.xlu1 %6062 }
0x3b9d   : > { %10740 = vrcp.f32 %v6063_v26 }
0x3b9e   : > { %10742 = vrcp.f32 %v6066_v37 }
0x3ba0   : > { %v6273_v36 = vpop.xlane.xlu1 %6272 }
0x3ba4   : > { %v6270_v20 = vpop.xlane.xlu1 %6269 }
0x3ba5   : > { %10744 = vrcp.f32 %v6270_v20 }
0x3ba6   : > { %10746 = vrcp.f32 %v6273_v36 }
0x3ba7   : > { %v10741_v42 = vpop.eup %10740 }
0x3ba8   : > { %v10488_v35 = vpop.permute.xlu1 %10487  ;;  %v6069_v39 = vmul.f32 %v10741_v42, %v10735_v7  ;;  %v10743_v5 = vpop.eup %10742 }
0x3ba9   : > { %v10490_v40 = vunpack.i.h.bf16 %v10488_v35  ;;  %v10489_v24 = vunpack.i.l.bf16 %v10488_v35  ;;  %v6070_v13 = vmul.f32 %v10743_v5, %v10733_v23 }
0x3baa   : > { %9641 = vmatprep.mubr.msk.f32.mxu0 %vm662_vm4, %v6069_v39 }
0x3bab   : > { %v10109_v63 = vpack.c.bf16 %v10490_v40, %v10489_v24 }
0x3bad   : > { %10111 = vmatprep.subr.msk.bf16.mxu0 %vm11067_vm7, %v10109_v63 }
0x3bae   : > { %10114 = vmatpush3.bf16.msk.msra.mxu0 %vm11067_vm7, %v10109_v63 }
0x3baf   : > { %v10745_v51 = vpop.eup %10744  ;;  %10123 = vmatprep.subr.msk.bf16.mxu0 %vm11067_vm7, %v10121_v62 }
0x3bb0   : > { %v10747_v61 = vpop.eup %10746  ;;  %v6276_v0 = vmul.f32 %v10745_v51, %v10739_v53 }
0x3bb1   : > { %9642 = vmatmul.mubr.msk.f32.vlgmr.msra.gmra.mrb[50].mxu0 %vm662_vm4, %v6070_v13  ;;  %v6277_v60 = vmul.f32 %v10747_v61, %v10737_v52 }
0x3bb2   : > { %10126 = vmatpush3.bf16.msk.msra.mxu0 %vm11067_vm7, %v10121_v62  ;;  %9655 = vmatprep.mubr.msk.f32.mxu0 %vm662_vm4, %v6276_v0 }
0x3bb3   : > { %10129 = vmatprep.subr.msk.bf16.mxu0 %vm11008_vm2, %v10127_v58 }
0x3bb5   : > { %9656 = vmatmul.mubr.msk.f32.vlgmr.msra.gmra.mrb[52].mxu0 %vm662_vm4, %v6277_v60 }
0x3bb6   : > { %9662 = vmatprep.mubr.msk.f32.mxu0 %vm572_vm1, %v6367_v22 }
0x3bbb   : > { %10132 = vmatpush3.bf16.xpose.msk.msra.mxu0 %vm11008_vm2, %v10127_v58 }
0x3bc2   : > { %9663 = vmatmul.mubr.msk.f32.vlgmr.msra.gmra.mrb[54].mxu0 %vm572_vm1, %v6369_v19 }
0x3c84   : > { %v12163_v25 = vpop.f32.mrb[50].mxu0 }
0x3c85   : > { %v12165_v16 = vpop.f32.mrb[51].mxu0 }
0x3c88   : > { %v12167_v23 = vpop.f32.mrb[52].mxu0 }
0x3c89   : > { %v12169_v1 = vpop.f32.mrb[53].mxu0 }
0x3c95   : > { %v9664_v7 = vpop.f32.mrb[54].mxu0 }
0x3c96   : > { %v6458_v2 = vmul.f32 0.35355338, %v9664_v7  ;;  %v6448_v52 = vpop.f32.mrb[55].mxu0 }
0x3c97   : > { %v6457_v9 = vmul.f32 0.35355338, %v6448_v52 }
0x3c98   : > { %v6460_v53 = vadd.f32 %v11840_v6, %v6458_v2 }
0x3c99   : > { %v6459_v38 = vadd.f32 %v11846_v50, %v6457_v9  ;;  %v12200_v9 = vld [vmem:[%s12582_s4 + $0x8] sm:$0xf] }
0x3c9a   : > { %v6464_v37 = vsel %vm666_vm3, %v6460_v53, -inf }
0x3c9b   : > { %6465 = vmax.xlane.f32.xlu0 %v6464_v37  ;;  %v6461_v26 = vsel %vm662_vm4, %v6459_v38, -inf }
0x3c9c   : > { %6462 = vmax.xlane.f32.xlu1 %v6461_v26 }
0x3d28   : > { %v6466_v36 = vpop.xlane.xlu0 %6465 }
0x3d29   : > { %v6468_v29 = vsub.f32 %v6460_v53, %v6466_v36  ;;  %v6463_v20 = vpop.xlane.xlu1 %6462 }
0x3d2a   : > { %v6467_v42 = vsub.f32 %v6459_v38, %v6463_v20  ;;  %v12206_v38 = vld [vmem:[%s12582_s4] sm:$0xff] }
0x3d2b   : > { %v6471_v35 = vmul.f32 1.442695, %v6468_v29 }
0x3d2c   : > { %v6469_v39 = vmul.f32 1.442695, %v6467_v42 }
0x3d2d   : > { %10748 = vpow2.f32 %v6471_v35 }
0x3d2e   : > { %10750 = vpow2.f32 %v6469_v39 }
0x3d37   : > { %v10749_v44 = vpop.eup %10748 }
0x3d38   : > { %v10751_v43 = vpop.eup %10750  ;;  %v6476_v6 = vsel %vm666_vm3, %v10749_v44, 0.0 }
0x3d39   : > { %6477 = vadd.xlane.f32.xlu1 %v6476_v6  ;;  %v6473_v50 = vsel %vm662_vm4, %v10751_v43, 0.0 }
0x3d3a   : > { %6474 = vadd.xlane.f32.xlu0 %v6473_v50 }
0x3d4a   : > { %10507 = vrot.lane.b32.xlu1 %v12091_v28, %s12636_s15 }
0x3d4e   : > { %6571 = vrot.lane.b32.xlu1 %v12086_v10, %s12637_s16 }
0x3d50   : > { %10502 = vrot.lane.b32.xlu0 %v12130_v55, %s12638_s24 }
0x3d54   : > { %6573 = vrot.lane.b32.xlu0 %v12098_v3, %s12637_s16 }
0x3dc6   : > { %v6478_v40 = vpop.xlane.xlu1 %6477 }
0x3dc7   : > { %10752 = vrcp.f32 %v6478_v40  ;;  %v6475_v24 = vpop.xlane.xlu0 %6474 }
0x3dc8   : > { %10754 = vrcp.f32 %v6475_v24 }
0x3dca   : > { %v10508_v31 = vpop.permute.xlu1 %10507 }
0x3dcb   : > { %v10503_v63 = vpop.permute.xlu0 %10502  ;;  %v10510_v5 = vunpack.i.h.bf16 %v10508_v31  ;;  %v10509_v62 = vunpack.i.l.bf16 %v10508_v31 }
0x3dcc   : > { %v10505_v14 = vunpack.i.h.bf16 %v10503_v63  ;;  %v10504_v21 = vunpack.i.l.bf16 %v10503_v63 }
0x3dcd   : > { %v10139_v51 = vpack.c.bf16 %v10510_v5, %v10509_v62 }
0x3dce   : > { %v10133_v28 = vpack.c.bf16 %v10505_v14, %v10504_v21  ;;  %v6572_v0 = vpop.permute.xlu1 %6571 }
0x3dcf   : > { %v6574_v58 = vpop.permute.xlu0 %6573 }
0x3dd0   : > { %10135 = vmatprep.subr.msk.bf16.mxu1 %vm11067_vm7, %v10133_v28 }
0x3dd1   : > { %v10753_v10 = vpop.eup %10752  ;;  %10138 = vmatpush3.bf16.msk.msra.mxu1 %vm11067_vm7, %v10133_v28 }
0x3dd2   : > { %v10755_v3 = vpop.eup %10754  ;;  %10141 = vmatprep.subr.msk.bf16.mxu1 %vm11008_vm2, %v10139_v51  ;;  %v6482_v61 = vmul.f32 %v10753_v10, %v10749_v44 }
0x3dd3   : > { %v6481_v13 = vmul.f32 %v10755_v3, %v10751_v43 }
0x3dd5   : > { %9669 = vmatprep.mubr.msk.f32.mxu1 %vm662_vm4, %v6481_v13 }
0x3dd6   : > { %9670 = vmatmul.mubr.msk.f32.vlgmr.msra.gmra.mrb[52].mxu1 %vm662_vm4, %v6482_v61 }
0x3dd7   : > { %9676 = vmatprep.mubr.msk.f32.mxu1 %vm572_vm1, %v6572_v0 }
0x3dda   : > { %10144 = vmatpush3.bf16.xpose.msk.msra.mxu1 %vm11008_vm2, %v10139_v51 }
0x3de1   : > { %9677 = vmatmul.mubr.msk.f32.vlgmr.msra.gmra.mrb[54].mxu1 %vm572_vm1, %v6574_v58 }
0x3ea9   : > { %v9671_v60 = vpop.f32.mrb[52].mxu1 }
0x3eaa   : > { %v6562_v22 = vpop.f32.mrb[53].mxu1 }
0x3eb4   : > { %v9678_v19 = vpop.f32.mrb[54].mxu1 }
0x3eb5   : > { %v6663_v7 = vmul.f32 0.35355338, %v9678_v19  ;;  %v6653_v2 = vpop.f32.mrb[55].mxu1 }
0x3eb6   : > { %v6662_v52 = vmul.f32 0.35355338, %v6653_v2 }
0x3eb7   : > { %v6665_v53 = vadd.f32 %v12200_v9, %v6663_v7 }
0x3eb8   : > { %v6664_v37 = vadd.f32 %v12206_v38, %v6662_v52 }
0x3eb9   : > { %v6669_v26 = vsel %vm666_vm3, %v6665_v53, -inf }
0x3eba   : > { %6670 = vmax.xlane.f32.xlu0 %v6669_v26  ;;  %v6666_v36 = vsel %vm662_vm4, %v6664_v37, -inf }
0x3ebb   : > { %6667 = vmax.xlane.f32.xlu1 %v6666_v36 }
0x3f47   : > { %v6671_v29 = vpop.xlane.xlu0 %6670 }
0x3f48   : > { %v6673_v20 = vsub.f32 %v6665_v53, %v6671_v29  ;;  %v6668_v42 = vpop.xlane.xlu1 %6667 }
0x3f49   : > { %v6672_v35 = vsub.f32 %v6664_v37, %v6668_v42 }
0x3f4a   : > { %v6676_v39 = vmul.f32 1.442695, %v6673_v20 }
0x3f4b   : > { %v6674_v44 = vmul.f32 1.442695, %v6672_v35 }
0x3f4c   : > { %10756 = vpow2.f32 %v6676_v39 }
0x3f4d   : > { %10758 = vpow2.f32 %v6674_v44 }
0x3f56   : > { %v10757_v43 = vpop.eup %10756 }
0x3f57   : > { %v10759_v6 = vpop.eup %10758  ;;  %v6681_v50 = vsel %vm666_vm3, %v10757_v43, 0.0 }
0x3f58   : > { %6682 = vadd.xlane.f32.xlu1 %v6681_v50  ;;  %v6678_v40 = vsel %vm662_vm4, %v10759_v6, 0.0 }
0x3f59   : > { %6679 = vadd.xlane.f32.xlu0 %v6678_v40 }
0x3f69   : > { %10517 = vrot.lane.b32.xlu1 %v10516_v17, %s12651_s11 }
0x3f6d   : > { %10522 = vrot.lane.b32.xlu1 %v10521_v30, %s12651_s11 }
0x3f6f   : > { %10512 = vrot.lane.b32.xlu0 %v12130_v55, %s12639_s25 }
0x3f71   : > { %6780 = vrot.lane.b32.xlu1 %v12167_v23, %s12640_s26 }
0x3f73   : > { %6778 = vrot.lane.b32.xlu0 %v12169_v1, %s12640_s26 }
0x3f75   : > { %6788 = vrot.lane.b32.xlu1 %v9671_v60, %s12641_s27 }
0x3f77   : > { %6786 = vrot.lane.b32.xlu0 %v6562_v22, %s12641_s27 }
0x3fe5   : > { %v6683_v48 = vpop.xlane.xlu1 %6682 }
0x3fe6   : > { %10760 = vrcp.f32 %v6683_v48  ;;  %v6680_v59 = vpop.xlane.xlu0 %6679 }
0x3fe7   : > { %10762 = vrcp.f32 %v6680_v59 }
0x3fe9   : > { %v10518_v17 = vpop.permute.xlu1 %10517 }
0x3fea   : > { %v10520_v46 = vunpack.i.h.bf16 %v10518_v17  ;;  %v10519_v45 = vunpack.i.l.bf16 %v10518_v17  ;;  %v10513_v30 = vpop.permute.xlu0 %10512 }
0x3feb   : > { %v10515_v24 = vunpack.i.h.bf16 %v10513_v30  ;;  %v10514_v55 = vunpack.i.l.bf16 %v10513_v30 }
0x3fec   : > { %v10151_v31 = vpack.c.bf16 %v10520_v46, %v10519_v45  ;;  %v6949_v46 = vld [vmem:[%s12584_s6] sm:$0xff]  ;;  %v6950_v45 = vld [vmem:[%s12584_s6 + $0x8] sm:$0xff] }
0x3fed   : > { %v10145_v63 = vpack.c.bf16 %v10515_v24, %v10514_v55  ;;  %v10523_v23 = vpop.permute.xlu1 %10522  ;;  %v10159_v30 = vpack.c.bf16 %v6950_v45, %v6949_v46  ;;  %v6951_v24 = vld [vmem:[%s12584_s6 + $0x10] sm:$0xff]  ;;  %v6952_v55 = vld [vmem:[%s12584_s6 + $0x18] sm:$0xff]  ;;  %v12289_v46 = vld [vmem:[%s12583_s5 + $0x20] sm:$0xff] }
0x3fee   : > { %v10525_v5 = vunpack.i.h.bf16 %v10523_v23  ;;  %v10524_v62 = vunpack.i.l.bf16 %v10523_v23  ;;  %v6779_v61 = vpop.permute.xlu0 %6778  ;;  %v12294_v45 = vld [vmem:[%s12583_s5 + $0x28] sm:$0xff] }
0x3fef   : > { %10147 = vmatprep.subr.msk.bf16.mxu0 %vm11067_vm7, %v10145_v63  ;;  %v6800_v60 = vsel %vm572_vm1, %v12165_v16, %v6779_v61  ;;  %v6908_v16 = vrot.slane %v12048_v41, %v11162_v56  ;;  %10160 = vmatprep.subr.bf16.mxu1 %v10159_v30 }
0x3ff0   : > { %v10761_v1 = vpop.eup %10760  ;;  %10150 = vmatpush3.bf16.msk.msra.mxu0 %vm11067_vm7, %v10145_v63  ;;  %v10155_v51 = vpack.c.bf16 %v10525_v5, %v10524_v62  ;;  %10162 = vmatpush3.bf16.msra.mxu1 %v10159_v30  ;;  %v10167_v30 = vpack.c.bf16 %v12294_v45, %v12289_v46 }
0x3ff1   : > { %v10763_v14 = vpop.eup %10762  ;;  %10152 = vmatprep.subr.bf16.mxu0 %v10151_v31  ;;  %v6687_v28 = vmul.f32 %v10761_v1, %v10757_v43  ;;  %v6781_v13 = vpop.permute.xlu1 %6780 }
0x3ff2   : > { %v6686_v21 = vmul.f32 %v10763_v14, %v10759_v6  ;;  %v6787_v58 = vpop.permute.xlu0 %6786  ;;  %v6801_v19 = vsel %vm572_vm1, %v12163_v25, %v6781_v13 }
0x3ff3   : > { %v6802_v7 = vsel %vm1418_vm8, %v6800_v60, %v6787_v58 }
0x3ff4   : > { %9683 = vmatprep.mubr.msk.f32.mxu0 %vm662_vm4, %v6686_v21  ;;  %v6940_v21 = vrot.slane %v12048_v41, %v11185_v32 }
0x3ff5   : > { %9684 = vmatmul.mubr.msk.f32.vlgmr.msra.gmra.mrb[56].mxu0 %vm662_vm4, %v6687_v28  ;;  %v6789_v0 = vpop.permute.xlu1 %6788 }
0x3ff6   : > { %10154 = vmatpush3.bf16.msra.mxu0 %v10151_v31  ;;  %v6803_v52 = vsel %vm1418_vm8, %v6801_v19, %v6789_v0  ;;  %v10163_v31 = vpack.c.bf16 %v6952_v55, %v6951_v24  ;;  %v6956_v19 = vrot.slane %v12048_v41, %v11200_v47  ;;  %v10566_v24 = vpack.i.bf16 %v12294_v45, %v12289_v46  ;;  %v12303_v55 = vld [vmem:[%s12583_s5 + $0x30] sm:$0xff] }
0x3ff7   : > { %10156 = vmatprep.subr.bf16.mxu0 %v10155_v51 }
0x3ff8   : > { %10164 = vmatprep.subr.bf16.mxu1 %v10163_v31 }
0x3ff9   : > { %10166 = vmatpush3.bf16.msra.mxu1 %v10163_v31  ;;  %v12308_v31 = vld [vmem:[%s12583_s5 + $0x38] sm:$0xff] }
0x3ffa   : > { %10158 = vmatpush3.bf16.msra.mxu0 %v10155_v51  ;;  %10168 = vmatprep.subr.bf16.mxu1 %v10167_v30 }
0x40c8   : > { %v9685_v10 = vpop.f32.mrb[56].mxu0 }
0x40c9   : > { %6796 = vrot.lane.b32.xlu1 %v9685_v10, %s12642_s13  ;;  %v6767_v3 = vpop.f32.mrb[57].mxu0  ;;  %v6946_v10 = vrot.slane %v12048_v41, %v11188_v33 }
0x40ca   : > { %6794 = vrot.lane.b32.xlu0 %v6767_v3, %s12642_s13 }
0x413b   : > { %v6797_v22 = vpop.permute.xlu1 %6796 }
0x413c   : > { %v6795_v2 = vpop.permute.xlu0 %6794  ;;  %v6805_v37 = vsel %vm1421_vm9, %v6803_v52, %v6797_v22  ;;  %v7040_v22 = vld [vmem:[%s12585_s7] sm:$0xff] }
0x413d   : > { %v6804_v53 = vsel %vm1421_vm9, %v6802_v7, %v6795_v2  ;;  %9708 = vmatprep.subr.mxu0 %v7040_v22 }
0x413e   : > { %9694 = vmatprep.mubr.msk.f32.mxu0 %vm458_vm0, %v6804_v53 }
0x413f   : > { %9695 = vmatmul.mubr.msk.f32.vlgmr.msra.gmra.mrb[58].mxu0 %vm458_vm0, %v6805_v37 }
0x4140   : > { %9709 = vmatpush3.msra.mxu0 %v7040_v22 }
0x4212   : > { %v9696_v26 = vpop.f32.mrb[58].mxu0 }
0x4213   : > { %v6904_v36 = vadd.f32 %v9696_v26, %v12074_v8  ;;  %v6894_v25 = vpop.f32.mrb[59].mxu0  ;;  %v7044_v26 = vrot.slane %v12048_v41, %v11207_v54 }
0x4214   : > { %v6903_v29 = vadd.f32 %v6894_v25, %v12001_v15 }
0x4215   : > { %v6910_v20 = vadd.f32 %v6908_v16, %v6904_v36 }
0x4216   : > { %v6909_v42 = vadd.f32 %v6908_v16, %v6903_v29 }
0x4217   : > { %v6914_v35 = vsel %vm1532_vm10, %v6910_v20, 0.0 }
0x4218   : > { %6915 = vadd.xlane.f32.xlu1 %v6914_v35  ;;  %v6911_v39 = vsel %vm458_vm0, %v6909_v42, 0.0 }
0x4219   : > { %6912 = vadd.xlane.f32.xlu0 %v6911_v39 }
0x42a5   : > { %v6916_v44 = vpop.xlane.xlu1 %6915 }
0x42a6   : > { %v6918_v43 = vmul.f32 0.03125, %v6916_v44  ;;  %v6913_v6 = vpop.xlane.xlu0 %6912 }
0x42a7   : > { %v6917_v50 = vmul.f32 0.03125, %v6913_v6 }
0x42a8   : > { %v6920_v40 = vsub.f32 %v6910_v20, %v6918_v43 }
0x42a9   : > { %v6919_v48 = vsub.f32 %v6909_v42, %v6917_v50 }
0x42aa   : > { %v6922_v17 = vmul.f32 %v6920_v40, %v6920_v40 }
0x42ab   : > { %v6921_v59 = vmul.f32 %v6919_v48, %v6919_v48 }
0x42ac   : > { %v6926_v15 = vsel %vm1532_vm10, %v6922_v17, 0.0 }
0x42ad   : > { %v6923_v8 = vsel %vm458_vm0, %v6921_v59, 0.0 }
0x42ae   : > { %6924 = vadd.xlane.f32.xlu0 %v6923_v8 }
0x42b2   : > { %6927 = vadd.xlane.f32.xlu0 %v6926_v15 }
0x433b   : > { %v6925_v63 = vpop.xlane.xlu0 %6924 }
0x433c   : > { %v6929_v23 = vmul.f32 0.03125, %v6925_v63  ;;  %v10571_v63 = vpack.i.bf16 %v12308_v31, %v12303_v55 }
0x433e   : > { %v6931_v5 = vadd.f32 1e-05, %v6929_v23  ;;  %v10171_v23 = vpack.c.bf16 %v12308_v31, %v12303_v55 }
0x433f   : > { %v6928_v62 = vpop.xlane.xlu0 %6927 }
0x4340   : > { %10764 = vrsqrt.f32 %v6931_v5  ;;  %v6930_v1 = vmul.f32 0.03125, %v6928_v62  ;;  %v12317_v5 = vld [vmem:[%s12586_s8 + $0x10] sm:$0xff] }
0x4341   : > { %v7262_v62 = vrot.slane %v12317_v5, %v10957_v12 }
0x4342   : > { %v6932_v14 = vadd.f32 1e-05, %v6930_v1 }
0x4344   : > { %10766 = vrsqrt.f32 %v6932_v14 }
0x434a   : > { %v10765_v28 = vpop.eup %10764 }
0x434b   : > { %v6935_v51 = vmul.f32 %v10765_v28, %v6919_v48 }
0x434d   : > { %v6941_v3 = vmul.f32 %v6940_v21, %v6935_v51 }
0x434e   : > { %v10767_v13 = vpop.eup %10766 }
0x434f   : > { %v6936_v61 = vmul.f32 %v10767_v13, %v6920_v40  ;;  %v6947_v0 = vadd.f32 %v6946_v10, %v6941_v3  ;;  %v5846_v3 = vld [vmem:[%s12586_s8 + $0x8] sm:$0x3] }
0x4350   : > { %v7157_v13 = vrot.slane %v5846_v3, %v10978_v18  ;;  %v7163_v22 = vrot.slane %v5846_v3, %v10957_v12 }
0x4351   : > { %v6942_v58 = vmul.f32 %v6940_v21, %v6936_v61  ;;  %9705 = vmatprep.mubr.msk.f32.mxu1 %vm458_vm0, %v6947_v0 }
0x4353   : > { %v6948_v60 = vadd.f32 %v6946_v10, %v6942_v58 }
0x4355   : > { %9706 = vmatmul.mubr.msk.f32.vlgmr.msra.gmra.mrb[56].mxu1 %vm458_vm0, %v6948_v60 }
0x4356   : > { %10170 = vmatpush3.bf16.msra.mxu1 %v10167_v30 }
0x4357   : > { %10172 = vmatprep.subr.bf16.mxu1 %v10171_v23 }
0x435a   : > { %10174 = vmatpush3.bf16.msra.mxu1 %v10171_v23 }
0x4428   : > { %v9707_v7 = vpop.f32.mrb[56].mxu1 }
0x4429   : > { %v7035_v2 = vadd.f32 %v9707_v7, %v6956_v19  ;;  %v7029_v52 = vpop.f32.mrb[57].mxu1 }
0x442a   : > { %v7030_v53 = vadd.f32 %v7029_v52, %v6956_v19 }
0x442b   : > { %v7039_v16 = vmax.f32 %v7035_v2, 0.0 }
0x442c   : > { %v7038_v37 = vmax.f32 %v7030_v53, 0.0  ;;  %v7256_v53 = vrot.slane %v12317_v5, %v10978_v18 }
0x442e   : > { %9710 = vmatprep.mubr.msk.f32.mxu0 %vm572_vm1, %v7038_v37 }
0x442f   : > { %9711 = vmatmul.mubr.msk.f32.vlgmr.msra.gmra.mrb[60].mxu0 %vm572_vm1, %v7039_v16 }
0x4502   : > { %v9712_v36 = vpop.f32.mrb[60].mxu0 }
0x4503   : > { %v7123_v25 = vadd.f32 %v9712_v36, %v7044_v26  ;;  %v7117_v29 = vpop.f32.mrb[61].mxu0 }
0x4504   : > { %v7118_v20 = vadd.f32 %v7117_v29, %v7044_v26 }
0x4505   : > { %v7127_v42 = vadd.f32 %v7123_v25, %v6948_v60 }
0x4506   : > { %v7126_v35 = vadd.f32 %v7118_v20, %v6947_v0 }
0x4507   : > { %v7131_v39 = vsel %vm1532_vm10, %v7127_v42, 0.0 }
0x4508   : > { %7132 = vadd.xlane.f32.xlu0 %v7131_v39  ;;  %v7128_v44 = vsel %vm458_vm0, %v7126_v35, 0.0 }
0x4509   : > { %7129 = vadd.xlane.f32.xlu1 %v7128_v44 }
0x4595   : > { %v7133_v43 = vpop.xlane.xlu0 %7132 }
0x4596   : > { %v7135_v6 = vmul.f32 0.03125, %v7133_v43  ;;  %v7130_v50 = vpop.xlane.xlu1 %7129 }
0x4597   : > { %v7134_v40 = vmul.f32 0.03125, %v7130_v50 }
0x4598   : > { %v7137_v48 = vsub.f32 %v7127_v42, %v7135_v6 }
0x4599   : > { %v7136_v59 = vsub.f32 %v7126_v35, %v7134_v40 }
0x459a   : > { %v7139_v8 = vmul.f32 %v7137_v48, %v7137_v48 }
0x459b   : > { %v7138_v41 = vmul.f32 %v7136_v59, %v7136_v59 }
0x459c   : > { %v7143_v17 = vsel %vm1532_vm10, %v7139_v8, 0.0 }
0x459d   : > { %7144 = vadd.xlane.f32.xlu0 %v7143_v17  ;;  %v7140_v15 = vsel %vm458_vm0, %v7138_v41, 0.0 }
0x459e   : > { %7141 = vadd.xlane.f32.xlu1 %v7140_v15 }
0x45af   : > { %7264 = vrot.lane.b32.xlu1 %v7262_v62, %s12651_s11 }
0x462a   : > { %v7145_v1 = vpop.xlane.xlu0 %7144 }
0x462b   : > { %v7147_v14 = vmul.f32 0.03125, %v7145_v1  ;;  %v7142_v21 = vpop.xlane.xlu1 %7141 }
0x462c   : > { %v7146_v28 = vmul.f32 0.03125, %v7142_v21 }
0x462d   : > { %v7149_v51 = vadd.f32 1e-05, %v7147_v14 }
0x462e   : > { %v7148_v10 = vadd.f32 1e-05, %v7146_v28 }
0x462f   : > { %10768 = vrsqrt.f32 %v7149_v51  ;;  %v7265_v37 = vpop.permute.xlu1 %7264 }
0x4630   : > { %10770 = vrsqrt.f32 %v7148_v10 }
0x4639   : > { %v10769_v61 = vpop.eup %10768 }
0x463a   : > { %v10771_v0 = vpop.eup %10770  ;;  %v7153_v58 = vmul.f32 %v10769_v61, %v7137_v48 }
0x463b   : > { %v7152_v60 = vmul.f32 %v10771_v0, %v7136_v59 }
0x463c   : > { %v7159_v19 = vmul.f32 %v7157_v13, %v7153_v58  ;;  %v7272_v58 = vrot.slane %v12317_v5, %v11043_v57 }
0x463d   : > { %v7158_v7 = vmul.f32 %v7157_v13, %v7152_v60 }
0x463e   : > { %v12329_v52 = vadd.f32 %v7163_v22, %v7159_v19 }
0x463f   : > { %v12327_v2 = vadd.f32 %v7163_v22, %v7158_v7 }
0x4641   : > { %9721 = vmatprep.mubr.msk.f32.mxu1 %vm458_vm0, %v12327_v2 }
0x4642   : > { %9722 = vmatmul.mubr.msk.f32.vlgmr.msra.gmra.mrb[58].mxu1 %vm458_vm0, %v12329_v52 }
0x4715   : > { %v12337_v16 = vpop.f32.mrb[58].mxu1 }
0x4716   : > { %v7268_v26 = vadd.f32 %v12337_v16, %v7265_v37  ;;  %v12340_v36 = vpop.f32.mrb[59].mxu1  ;;  %v12355_v42 = vadd.f32 %v12337_v16, %v7256_v53 }
0x4717   : > { %v12343_v25 = vadd.f32 %v7256_v53, %v12340_v36  ;;  %v7267_v29 = vadd.f32 %v7265_v37, %v12340_v36 }
0x4719   : > { %9728 = vmatprep.mubr.msk.f32.mxu0 %vm572_vm1, %v12343_v25  ;;  %v12348_v20 = vpack.i.bf16 %v7268_v26, %v7267_v29 }
0x471b   : > { %10532 = vrot.lane.b32.xlu1 %v12348_v20, %s12644_s28  ;;  %10527 = vrot.lane.b32.xlu0 %v12348_v20, %s12645_s29  ;;  %s12656_s28 = sld [smem:[#allocation9_spill]] }
0x471f   : > { %7486 = vrot.lane.b32.xlu1 %v12343_v25, %s12646_s30  ;;  %7488 = vrot.lane.b32.xlu0 %v12355_v42, %s12646_s30 }
0x478d   : > { %v10533_v35 = vpop.permute.xlu1 %10532  ;;  %v10528_v39 = vpop.permute.xlu0 %10527 }
0x478e   : > { %v10535_v44 = vunpack.i.h.bf16 %v10533_v35  ;;  %v10534_v43 = vunpack.i.l.bf16 %v10533_v35  ;;  %v10530_v6 = vunpack.i.h.bf16 %v10528_v39  ;;  %v10529_v50 = vunpack.i.l.bf16 %v10528_v39 }
0x4790   : > { %v10175_v40 = vpack.c.bf16 %v10530_v6, %v10529_v50  ;;  %v10187_v48 = vpack.c.bf16 %v10535_v44, %v10534_v43 }
0x4791   : > { %v7487_v59 = vpop.permute.xlu1 %7486  ;;  %v7489_v8 = vpop.permute.xlu0 %7488 }
0x4792   : > { %10177 = vmatprep.subr.msk.bf16.mxu0 %vm11008_vm2, %v10175_v40 }
0x4793   : > { %10180 = vmatpush3.bf16.xpose.msk.msra.mxu0 %vm11008_vm2, %v10175_v40 }
0x4794   : > { %10189 = vmatprep.subr.msk.bf16.mxu0 %vm11008_vm2, %v10187_v48 }
0x479a   : > { %9729 = vmatmul.mubr.msk.f32.vlgmr.msra.gmra.mrb[62].mxu0 %vm572_vm1, %v12355_v42 }
0x479b   : > { %10192 = vmatpush3.bf16.xpose.msk.msra.mxu0 %vm11008_vm2, %v10187_v48  ;;  %9742 = vmatprep.mubr.msk.f32.mxu0 %vm572_vm1, %v7487_v59 }
0x47a2   : > { %9743 = vmatmul.mubr.msk.f32.vlgmr.msra.gmra.mrb[64].mxu0 %vm572_vm1, %v7489_v8 }
0x486d   : > { %v9730_v41 = vpop.f32.mrb[62].mxu0 }
0x486e   : > { %v7371_v17 = vmul.f32 0.35355338, %v9730_v41  ;;  %v7361_v15 = vpop.f32.mrb[63].mxu0 }
0x486f   : > { %v7370_v30 = vmul.f32 0.35355338, %v7361_v15 }
0x4870   : > { %v7373_v23 = vadd.f32 %v12200_v9, %v7371_v17 }
0x4871   : > { %v7372_v62 = vadd.f32 %v12206_v38, %v7370_v30 }
0x4872   : > { %v7377_v1 = vsel %vm666_vm3, %v7373_v23, -inf }
0x4873   : > { %7378 = vmax.xlane.f32.xlu0 %v7377_v1  ;;  %v7374_v14 = vsel %vm662_vm4, %v7372_v62, -inf }
0x4874   : > { %7375 = vmax.xlane.f32.xlu1 %v7374_v14 }
0x4875   : > { %v9744_v21 = vpop.f32.mrb[64].mxu0 }
0x4876   : > { %v7578_v28 = vmul.f32 0.35355338, %v9744_v21  ;;  %v7568_v51 = vpop.f32.mrb[65].mxu0 }
0x4877   : > { %v7577_v10 = vmul.f32 0.35355338, %v7568_v51 }
0x4878   : > { %v7580_v3 = vadd.f32 %v12200_v9, %v7578_v28 }
0x4879   : > { %v7579_v13 = vadd.f32 %v12206_v38, %v7577_v10 }
0x487a   : > { %v7584_v61 = vsel %vm666_vm3, %v7580_v3, -inf }
0x487b   : > { %7585 = vmax.xlane.f32.xlu1 %v7584_v61  ;;  %v7581_v0 = vsel %vm662_vm4, %v7579_v13, -inf }
0x487c   : > { %7582 = vmax.xlane.f32.xlu0 %v7581_v0 }
0x4892   : > { %7274 = vrot.lane.b32.xlu0 %v7272_v58, %s12647_s14 }
0x4900   : > { %v7379_v60 = vpop.xlane.xlu0 %7378 }
0x4901   : > { %v7381_v22 = vsub.f32 %v7373_v23, %v7379_v60  ;;  %v7376_v19 = vpop.xlane.xlu1 %7375 }
0x4902   : > { %v7380_v7 = vsub.f32 %v7372_v62, %v7376_v19 }
0x4903   : > { %v7384_v53 = vmul.f32 1.442695, %v7381_v22 }
0x4904   : > { %v7382_v37 = vmul.f32 1.442695, %v7380_v7 }
0x4905   : > { %10772 = vpow2.f32 %v7384_v53 }
0x4906   : > { %10774 = vpow2.f32 %v7382_v37 }
0x4908   : > { %v7586_v26 = vpop.xlane.xlu1 %7585 }
0x4909   : > { %v7588_v29 = vsub.f32 %v7580_v3, %v7586_v26  ;;  %v7583_v35 = vpop.xlane.xlu0 %7582 }
0x490a   : > { %v7587_v39 = vsub.f32 %v7579_v13, %v7583_v35 }
0x490b   : > { %v7591_v44 = vmul.f32 1.442695, %v7588_v29 }
0x490c   : > { %v7589_v43 = vmul.f32 1.442695, %v7587_v39 }
0x490d   : > { %10776 = vpow2.f32 %v7591_v44  ;;  %v7275_v6 = vpop.permute.xlu0 %7274 }
0x490e   : > { %v7277_v57 = vadd.f32 %v7275_v6, %v12340_v36  ;;  %v7278_v50 = vadd.f32 %v12337_v16, %v7275_v6  ;;  %10778 = vpow2.f32 %v7589_v43 }
0x490f   : > { %v10773_v40 = vpop.eup %10772 }
0x4910   : > { %v7389_v48 = vsel %vm666_vm3, %v10773_v40, 0.0  ;;  %v12387_v59 = vpack.i.bf16 %v7278_v50, %v7277_v57  ;;  %v10775_v8 = vpop.eup %10774 }
0x4911   : > { %7390 = vadd.xlane.f32.xlu1 %v7389_v48  ;;  %v7386_v41 = vsel %vm662_vm4, %v10775_v8, 0.0 }
0x4912   : > { %10542 = vrot.lane.b32.xlu0 %v12387_v59, %s12648_s19 }
0x4915   : > { %7387 = vadd.xlane.f32.xlu1 %v7386_v41 }
0x4916   : > { %10547 = vrot.lane.b32.xlu0 %v12348_v20, %s12649_s22  ;;  %s12652_s22 = sld [smem:[#allocation5_spill]] }
0x4917   : > { %v10777_v36 = vpop.eup %10776 }
0x4918   : > { %v7596_v16 = vsel %vm666_vm3, %v10777_v36, 0.0  ;;  %v10779_v17 = vpop.eup %10778 }
0x4919   : > { %7597 = vadd.xlane.f32.xlu1 %v7596_v16  ;;  %v7593_v15 = vsel %vm662_vm4, %v10779_v17, 0.0 }
0x491a   : > { %7691 = vrot.lane.b32.xlu0 %v12343_v25, %s12650_s23 }
0x491d   : > { %7594 = vadd.xlane.f32.xlu1 %v7593_v15 }
0x491e   : > { %7693 = vrot.lane.b32.xlu0 %v12355_v42, %s12650_s23  ;;  %s12531_s23 = scalar_lea.vmem %s12652_s22, %s11524_s12 }
0x492e   : > { %10537 = vrot.lane.b32.xlu1 %v12387_v59, %s12647_s14 }
0x4984   : > { %v10543_v1 = vpop.permute.xlu0 %10542 }
0x4985   : > { %v10545_v10 = vunpack.i.h.bf16 %v10543_v1  ;;  %v10544_v3 = vunpack.i.l.bf16 %v10543_v1 }
0x4987   : > { %v10193_v22 = vpack.c.bf16 %v10545_v10, %v10544_v3 }
0x4988   : > { %v10548_v0 = vpop.permute.xlu0 %10547 }
0x4989   : > { %v10550_v19 = vunpack.i.h.bf16 %v10548_v0  ;;  %v10549_v7 = vunpack.i.l.bf16 %v10548_v0 }
0x498b   : > { %v10199_v35 = vpack.c.bf16 %v10550_v19, %v10549_v7 }
0x498c   : > { %v7692_v44 = vpop.permute.xlu0 %7691 }
0x4990   : > { %v7694_v43 = vpop.permute.xlu0 %7693 }
0x499e   : > { %v7391_v30 = vpop.xlane.xlu1 %7390 }
0x49a2   : > { %v7388_v23 = vpop.xlane.xlu1 %7387 }
0x49a3   : > { %10780 = vrcp.f32 %v7388_v23 }
0x49a4   : > { %10782 = vrcp.f32 %v7391_v30 }
0x49a6   : > { %v7598_v62 = vpop.xlane.xlu1 %7597 }
0x49aa   : > { %v7595_v14 = vpop.xlane.xlu1 %7594 }
0x49ab   : > { %10784 = vrcp.f32 %v7595_v14 }
0x49ac   : > { %10786 = vrcp.f32 %v7598_v62 }
0x49ad   : > { %v10781_v21 = vpop.eup %10780 }
0x49ae   : > { %v10538_v28 = vpop.permute.xlu1 %10537  ;;  %v7394_v51 = vmul.f32 %v10781_v21, %v10775_v8  ;;  %v10783_v60 = vpop.eup %10782 }
0x49af   : > { %v10540_v13 = vunpack.i.h.bf16 %v10538_v28  ;;  %v10539_v61 = vunpack.i.l.bf16 %v10538_v28  ;;  %v7395_v37 = vmul.f32 %v10783_v60, %v10773_v40 }
0x49b0   : > { %9735 = vmatprep.mubr.msk.f32.mxu1 %vm662_vm4, %v7394_v51 }
0x49b1   : > { %v10181_v58 = vpack.c.bf16 %v10540_v13, %v10539_v61 }
0x49b3   : > { %10183 = vmatprep.subr.msk.bf16.mxu1 %vm11067_vm7, %v10181_v58 }
0x49b4   : > { %10186 = vmatpush3.bf16.msk.msra.mxu1 %vm11067_vm7, %v10181_v58 }
0x49b5   : > { %v10785_v53 = vpop.eup %10784  ;;  %10195 = vmatprep.subr.msk.bf16.mxu1 %vm11067_vm7, %v10193_v22 }
0x49b6   : > { %v10787_v26 = vpop.eup %10786  ;;  %v7601_v29 = vmul.f32 %v10785_v53, %v10779_v17 }
0x49b7   : > { %9736 = vmatmul.mubr.msk.f32.vlgmr.msra.gmra.mrb[60].mxu1 %vm662_vm4, %v7395_v37  ;;  %v7602_v39 = vmul.f32 %v10787_v26, %v10777_v36 }
0x49b8   : > { %10198 = vmatpush3.bf16.msk.msra.mxu1 %vm11067_vm7, %v10193_v22  ;;  %9749 = vmatprep.mubr.msk.f32.mxu1 %vm662_vm4, %v7601_v29 }
0x49b9   : > { %10201 = vmatprep.subr.msk.bf16.mxu1 %vm11008_vm2, %v10199_v35 }
0x49bb   : > { %9750 = vmatmul.mubr.msk.f32.vlgmr.msra.gmra.mrb[62].mxu1 %vm662_vm4, %v7602_v39 }
0x49bc   : > { %9756 = vmatprep.mubr.msk.f32.mxu1 %vm572_vm1, %v7692_v44 }
0x49c1   : > { %10204 = vmatpush3.bf16.xpose.msk.msra.mxu1 %vm11008_vm2, %v10199_v35 }
0x49c8   : > { %9757 = vmatmul.mubr.msk.f32.vlgmr.msra.gmra.mrb[64].mxu1 %vm572_vm1, %v7694_v43 }
0x4a8a   : > { %v12420_v6 = vpop.f32.mrb[60].mxu1 }
0x4a8b   : > { %v12422_v57 = vpop.f32.mrb[61].mxu1 }
0x4a8e   : > { %v12424_v50 = vpop.f32.mrb[62].mxu1 }
0x4a8f   : > { %v12426_v40 = vpop.f32.mrb[63].mxu1 }
0x4a9b   : > { %v9758_v48 = vpop.f32.mrb[64].mxu1 }
0x4a9c   : > { %v7783_v8 = vmul.f32 0.35355338, %v9758_v48  ;;  %v7773_v41 = vpop.f32.mrb[65].mxu1 }
0x4a9d   : > { %v7782_v36 = vmul.f32 0.35355338, %v7773_v41 }
0x4a9e   : > { %v7785_v16 = vadd.f32 %v12200_v9, %v7783_v8 }
0x4a9f   : > { %v7784_v17 = vadd.f32 %v12206_v38, %v7782_v36 }
0x4aa0   : > { %v7789_v15 = vsel %vm666_vm3, %v7785_v16, -inf }
0x4aa1   : > { %7790 = vmax.xlane.f32.xlu0 %v7789_v15  ;;  %v7786_v30 = vsel %vm662_vm4, %v7784_v17, -inf }
0x4aa2   : > { %7787 = vmax.xlane.f32.xlu1 %v7786_v30 }
0x4b2e   : > { %v7791_v23 = vpop.xlane.xlu0 %7790 }
0x4b2f   : > { %v7793_v62 = vsub.f32 %v7785_v16, %v7791_v23  ;;  %v7788_v1 = vpop.xlane.xlu1 %7787 }
0x4b30   : > { %v7792_v14 = vsub.f32 %v7784_v17, %v7788_v1 }
0x4b31   : > { %v7796_v21 = vmul.f32 1.442695, %v7793_v62 }
0x4b32   : > { %v7794_v28 = vmul.f32 1.442695, %v7792_v14 }
0x4b33   : > { %10788 = vpow2.f32 %v7796_v21 }
0x4b34   : > { %10790 = vpow2.f32 %v7794_v28 }
0x4b3d   : > { %v10789_v51 = vpop.eup %10788 }
0x4b3e   : > { %v10791_v10 = vpop.eup %10790  ;;  %v7801_v3 = vsel %vm666_vm3, %v10789_v51, 0.0 }
0x4b3f   : > { %7802 = vadd.xlane.f32.xlu1 %v7801_v3  ;;  %v7798_v13 = vsel %vm662_vm4, %v10791_v10, 0.0 }
0x4b40   : > { %7799 = vadd.xlane.f32.xlu0 %v7798_v13 }
0x4b50   : > { %10557 = vrot.lane.b32.xlu1 %v12348_v20, %s12636_s15 }
0x4b54   : > { %7896 = vrot.lane.b32.xlu1 %v12343_v25, %s12637_s16 }
0x4b56   : > { %10552 = vrot.lane.b32.xlu0 %v12387_v59, %s12638_s24  ;;  %s12655_s24 = sld [smem:[#allocation8_spill]] }
0x4b5a   : > { %7898 = vrot.lane.b32.xlu0 %v12355_v42, %s12637_s16 }
0x4bcc   : > { %v7803_v61 = vpop.xlane.xlu1 %7802 }
0x4bcd   : > { %10792 = vrcp.f32 %v7803_v61  ;;  %v7800_v0 = vpop.xlane.xlu0 %7799 }
0x4bce   : > { %10794 = vrcp.f32 %v7800_v0 }
0x4bd0   : > { %v10558_v58 = vpop.permute.xlu1 %10557 }
0x4bd1   : > { %v10553_v60 = vpop.permute.xlu0 %10552  ;;  %v10560_v22 = vunpack.i.h.bf16 %v10558_v58  ;;  %v10559_v19 = vunpack.i.l.bf16 %v10558_v58 }
0x4bd2   : > { %v10555_v7 = vunpack.i.h.bf16 %v10553_v60  ;;  %v10554_v53 = vunpack.i.l.bf16 %v10553_v60 }
0x4bd3   : > { %v10211_v37 = vpack.c.bf16 %v10560_v22, %v10559_v19 }
0x4bd4   : > { %v10205_v20 = vpack.c.bf16 %v10555_v7, %v10554_v53  ;;  %v7897_v35 = vpop.permute.xlu1 %7896 }
0x4bd5   : > { %v7899_v39 = vpop.permute.xlu0 %7898 }
0x4bd6   : > { %10207 = vmatprep.subr.msk.bf16.mxu0 %vm11067_vm7, %v10205_v20 }
0x4bd7   : > { %v10793_v25 = vpop.eup %10792  ;;  %10210 = vmatpush3.bf16.msk.msra.mxu0 %vm11067_vm7, %v10205_v20 }
0x4bd8   : > { %v10795_v42 = vpop.eup %10794  ;;  %10213 = vmatprep.subr.msk.bf16.mxu0 %vm11008_vm2, %v10211_v37  ;;  %v7807_v29 = vmul.f32 %v10793_v25, %v10789_v51 }
0x4bd9   : > { %v7806_v26 = vmul.f32 %v10795_v42, %v10791_v10 }
0x4bdb   : > { %9763 = vmatprep.mubr.msk.f32.mxu0 %vm662_vm4, %v7806_v26 }
0x4bdc   : > { %9764 = vmatmul.mubr.msk.f32.vlgmr.msra.gmra.mrb[66].mxu0 %vm662_vm4, %v7807_v29 }
0x4bdd   : > { %9770 = vmatprep.mubr.msk.f32.mxu0 %vm572_vm1, %v7897_v35 }
0x4be0   : > { %10216 = vmatpush3.bf16.xpose.msk.msra.mxu0 %vm11008_vm2, %v10211_v37 }
0x4be7   : > { %9771 = vmatmul.mubr.msk.f32.vlgmr.msra.gmra.mrb[68].mxu0 %vm572_vm1, %v7899_v39 }
0x4caf   : > { %v9765_v44 = vpop.f32.mrb[66].mxu0 }
0x4cb0   : > { %v7887_v43 = vpop.f32.mrb[67].mxu0 }
0x4cba   : > { %v9772_v48 = vpop.f32.mrb[68].mxu0 }
0x4cbb   : > { %v7988_v8 = vmul.f32 0.35355338, %v9772_v48  ;;  %v7978_v41 = vpop.f32.mrb[69].mxu0 }
0x4cbc   : > { %v7987_v36 = vmul.f32 0.35355338, %v7978_v41 }
0x4cbd   : > { %v7990_v16 = vadd.f32 %v12200_v9, %v7988_v8 }
0x4cbe   : > { %v7989_v17 = vadd.f32 %v12206_v38, %v7987_v36 }
0x4cbf   : > { %v7994_v15 = vsel %vm666_vm3, %v7990_v16, -inf }
0x4cc0   : > { %7995 = vmax.xlane.f32.xlu0 %v7994_v15  ;;  %v7991_v30 = vsel %vm662_vm4, %v7989_v17, -inf }
0x4cc1   : > { %7992 = vmax.xlane.f32.xlu1 %v7991_v30 }
0x4d4d   : > { %v7996_v34 = vpop.xlane.xlu0 %7995 }
0x4d4e   : > { %v7998_v23 = vsub.f32 %v7990_v16, %v7996_v34  ;;  %v7993_v62 = vpop.xlane.xlu1 %7992 }
0x4d4f   : > { %v7997_v1 = vsub.f32 %v7989_v17, %v7993_v62 }
0x4d50   : > { %v8001_v14 = vmul.f32 1.442695, %v7998_v23 }
0x4d51   : > { %v7999_v21 = vmul.f32 1.442695, %v7997_v1 }
0x4d52   : > { %10796 = vpow2.f32 %v8001_v14 }
0x4d53   : > { %10798 = vpow2.f32 %v7999_v21 }
0x4d5c   : > { %v10797_v28 = vpop.eup %10796 }
0x4d5d   : > { %v10799_v51 = vpop.eup %10798  ;;  %v8006_v9 = vsel %vm666_vm3, %v10797_v28, 0.0 }
0x4d5e   : > { %8007 = vadd.xlane.f32.xlu1 %v8006_v9  ;;  %v8003_v38 = vsel %vm662_vm4, %v10799_v51, 0.0  ;;  %v8911_v9 = vld [vmem:[%s12584_s6 + $0x28] sm:$0xff] }
0x4d5f   : > { %8004 = vadd.xlane.f32.xlu0 %v8003_v38 }
0x4d6f   : > { %10567 = vrot.lane.b32.xlu1 %v10566_v24, %s12651_s11 }
0x4d73   : > { %10572 = vrot.lane.b32.xlu1 %v10571_v63, %s12651_s11 }
0x4d75   : > { %10562 = vrot.lane.b32.xlu0 %v12387_v59, %s12639_s25 }
0x4d77   : > { %8105 = vrot.lane.b32.xlu1 %v12424_v50, %s12640_s26 }
0x4d79   : > { %8103 = vrot.lane.b32.xlu0 %v12426_v40, %s12640_s26 }
0x4d7b   : > { %8113 = vrot.lane.b32.xlu1 %v9765_v44, %s12641_s27 }
0x4d7d   : > { %8111 = vrot.lane.b32.xlu0 %v7887_v43, %s12641_s27 }
0x4deb   : > { %v8008_v46 = vpop.xlane.xlu1 %8007 }
0x4dec   : > { %10800 = vrcp.f32 %v8008_v46  ;;  %v8005_v45 = vpop.xlane.xlu0 %8004  ;;  %v8912_v46 = vld [vmem:[%s12584_s6 + $0x30] sm:$0xff] }
0x4ded   : > { %10802 = vrcp.f32 %v8005_v45  ;;  %v8913_v45 = vld [vmem:[%s12584_s6 + $0x38] sm:$0xff] }
0x4def   : > { %v10568_v24 = vpop.permute.xlu1 %10567 }
0x4df0   : > { %v10570_v55 = vunpack.i.h.bf16 %v10568_v24  ;;  %v10569_v31 = vunpack.i.l.bf16 %v10568_v24  ;;  %v10563_v63 = vpop.permute.xlu0 %10562  ;;  %v10235_v24 = vpack.c.bf16 %v8913_v45, %v8912_v46 }
0x4df1   : > { %v10565_v10 = vunpack.i.h.bf16 %v10563_v63  ;;  %v10564_v59 = vunpack.i.l.bf16 %v10563_v63 }
0x4df2   : > { %v10223_v3 = vpack.c.bf16 %v10570_v55, %v10569_v31 }
0x4df3   : > { %v10217_v13 = vpack.c.bf16 %v10565_v10, %v10564_v59  ;;  %v10573_v50 = vpop.permute.xlu1 %10572 }
0x4df4   : > { %v10575_v61 = vunpack.i.h.bf16 %v10573_v50  ;;  %v10574_v0 = vunpack.i.l.bf16 %v10573_v50  ;;  %v8104_v20 = vpop.permute.xlu0 %8103 }
0x4df5   : > { %10219 = vmatprep.subr.msk.bf16.mxu1 %vm11067_vm7, %v10217_v13  ;;  %v8125_v42 = vsel %vm572_vm1, %v12422_v57, %v8104_v20  ;;  %v8233_v57 = vrot.slane %v12317_v5, %v11162_v56 }
0x4df6   : > { %v10801_v40 = vpop.eup %10800  ;;  %10222 = vmatpush3.bf16.msk.msra.mxu1 %vm11067_vm7, %v10217_v13  ;;  %v10227_v19 = vpack.c.bf16 %v10575_v61, %v10574_v0  ;;  %v8265_v13 = vrot.slane %v12317_v5, %v11185_v32  ;;  %v8271_v0 = vrot.slane %v12317_v5, %v11188_v33  ;;  %v8916_v32 = vld [vmem:[%s12585_s7 + $0x8] sm:$0xff]  ;;  %v8281_v33 = vrot.slane %v12317_v5, %v11200_v47  ;;  %v8834_v47 = vld [vmem:[%s12531_s23 + $0x4] sm:$0x7] }
0x4df7   : > { %v10803_v58 = vpop.eup %10802  ;;  %10224 = vmatprep.subr.bf16.mxu1 %v10223_v3  ;;  %v8012_v22 = vmul.f32 %v10801_v40, %v10797_v28  ;;  %v8106_v49 = vpop.permute.xlu1 %8105 }
0x4df8   : > { %v8011_v60 = vmul.f32 %v10803_v58, %v10799_v51  ;;  %v8112_v25 = vpop.permute.xlu0 %8111  ;;  %v8126_v29 = vsel %vm572_vm1, %v12420_v6, %v8106_v49  ;;  %v8910_v51 = vld [vmem:[%s12584_s6 + $0x20] sm:$0xff] }
0x4df9   : > { %v8127_v35 = vsel %vm1418_vm8, %v8125_v42, %v8112_v25  ;;  %v10231_v38 = vpack.c.bf16 %v8911_v9, %v8910_v51 }
0x4dfa   : > { %9777 = vmatprep.mubr.msk.f32.mxu1 %vm662_vm4, %v8011_v60 }
0x4dfb   : > { %9778 = vmatmul.mubr.msk.f32.vlgmr.msra.gmra.mrb[66].mxu1 %vm662_vm4, %v8012_v22  ;;  %v8114_v37 = vpop.permute.xlu1 %8113  ;;  %10232 = vmatprep.subr.bf16.mxu0 %v10231_v38 }
0x4dfc   : > { %10226 = vmatpush3.bf16.msra.mxu1 %v10223_v3  ;;  %v8128_v44 = vsel %vm1418_vm8, %v8126_v29, %v8114_v37  ;;  %10234 = vmatpush3.bf16.msra.mxu0 %v10231_v38 }
0x4dfd   : > { %10228 = vmatprep.subr.bf16.mxu1 %v10227_v19  ;;  %10236 = vmatprep.subr.bf16.mxu0 %v10235_v24 }
0x4e00   : > { %10230 = vmatpush3.bf16.msra.mxu1 %v10227_v19  ;;  %10238 = vmatpush3.bf16.msra.mxu0 %v10235_v24 }
0x4e01   : > { %9802 = vmatprep.subr.mxu1 %v8916_v32 }
0x4ece   : > { %v9779_v7 = vpop.f32.mrb[66].mxu1 }
0x4ecf   : > { %8121 = vrot.lane.b32.xlu1 %v9779_v7, %s12642_s13  ;;  %v8092_v53 = vpop.f32.mrb[67].mxu1 }
0x4ed0   : > { %8119 = vrot.lane.b32.xlu0 %v8092_v53, %s12642_s13 }
0x4f41   : > { %v8122_v26 = vpop.permute.xlu1 %8121 }
0x4f42   : > { %v8120_v39 = vpop.permute.xlu0 %8119  ;;  %v8130_v48 = vsel %vm1421_vm9, %v8128_v44, %v8122_v26  ;;  %v3101_v26 = vld [vmem:[%s12531_s23] sm:$0x7]  ;;  %v5793_v44 = vrot.slane %v8834_v47, 7 }
0x4f43   : > { %v8129_v43 = vsel %vm1421_vm9, %v8127_v35, %v8120_v39  ;;  %v3103_v29 = vrot.slane %v3101_v26, 7  ;;  %v8369_v35 = vrot.slane %v12317_v5, %v11207_v54 }
0x4f44   : > { %9788 = vmatprep.mubr.msk.f32.mxu1 %vm458_vm0, %v8129_v43 }
0x4f45   : > { %9789 = vmatmul.mubr.msk.f32.vlgmr.msra.gmra.mrb[68].mxu1 %vm458_vm0, %v8130_v48  ;;  %v3105_v39 = vsub.f32 %v11533_v4, %v3103_v29 }
0x4f46   : > { %9803 = vmatpush3.msra.mxu1 %v8916_v32 }
0x5018   : > { %v9790_v8 = vpop.f32.mrb[68].mxu1 }
0x5019   : > { %v8229_v41 = vadd.f32 %v9790_v8, %v12329_v52  ;;  %v8219_v6 = vpop.f32.mrb[69].mxu1  ;;  %v3111_v8 = vmul.f32 %v3105_v39, %v3105_v39 }
0x501a   : > { %v8228_v36 = vadd.f32 %v8219_v6, %v12327_v2 }
0x501b   : > { %v8235_v16 = vadd.f32 %v8233_v57, %v8229_v41  ;;  %v5795_v41 = vsub.f32 %v12059_v11, %v5793_v44 }
0x501c   : > { %v8234_v17 = vadd.f32 %v8233_v57, %v8228_v36 }
0x501d   : > { %v8239_v15 = vsel %vm1532_vm10, %v8235_v16, 0.0 }
0x501e   : > { %8240 = vadd.xlane.f32.xlu1 %v8239_v15  ;;  %v8236_v30 = vsel %vm458_vm0, %v8234_v17, 0.0 }
0x501f   : > { %8237 = vadd.xlane.f32.xlu0 %v8236_v30  ;;  %v3106_v30 = vld [vmem:[%s12546_s2] sm:$0x7] }
0x50ab   : > { %v8241_v34 = vpop.xlane.xlu1 %8240 }
0x50ac   : > { %v8243_v23 = vmul.f32 0.03125, %v8241_v34  ;;  %v8238_v62 = vpop.xlane.xlu0 %8237  ;;  %v3108_v34 = vrot.slane %v3106_v30, 7 }
0x50ad   : > { %v8242_v1 = vmul.f32 0.03125, %v8238_v62 }
0x50ae   : > { %v8245_v14 = vsub.f32 %v8235_v16, %v8243_v23  ;;  %v3113_v16 = vrot.slane %v3111_v8, 1  ;;  %v8835_v23 = vld [vmem:[%s12546_s2 + $0x4] sm:$0x7]  ;;  %v3110_v62 = vsub.f32 %v11533_v4, %v3108_v34  ;;  %v8921_v8 = vld [vmem:[%s12546_s2 + $0x8] sm:$0x7] }
0x50af   : > { %v8244_v56 = vsub.f32 %v8234_v17, %v8242_v1  ;;  %v5802_v17 = vmul.f32 %v5795_v41, %v5795_v41  ;;  %v5799_v1 = vrot.slane %v8835_v23, 7  ;;  %v8920_v41 = vld [vmem:[%s12531_s23 + $0x8] sm:$0x7] }
0x50b0   : > { %v8247_v28 = vmul.f32 %v8245_v14, %v8245_v14  ;;  %v3116_v15 = vsel %vm3115_vm14, %v3113_v16, 0.0 }
0x50b1   : > { %v8246_v21 = vmul.f32 %v8244_v56, %v8244_v56  ;;  %v5804_v54 = vrot.slane %v5802_v17, 1  ;;  %v8486_v17 = vrot.slane %v8921_v8, 7 }
0x50b2   : > { %v8251_v2 = vsel %vm1532_vm10, %v8247_v28, 0.0  ;;  %v5801_v28 = vsub.f32 %v12059_v11, %v5799_v1 }
0x50b3   : > { %v8248_v52 = vsel %vm458_vm0, %v8246_v21, 0.0  ;;  %v5806_v5 = vsel %vm3115_vm14, %v5804_v54, 0.0 }
0x50b4   : > { %8249 = vadd.xlane.f32.xlu0 %v8248_v52  ;;  %v3127_v52 = vmul.f32 %v3110_v62, %v3110_v62  ;;  %v5817_v24 = vmul.f32 %v5801_v28, %v5801_v28 }
0x50b6   : > { %v3129_v45 = vrot.slane %v3127_v52, 1  ;;  %v5819_v4 = vrot.slane %v5817_v24, 1 }
0x50b8   : > { %8252 = vadd.xlane.f32.xlu0 %v8251_v2 }
0x5141   : > { %v8250_v55 = vpop.xlane.xlu0 %8249 }
0x5142   : > { %v8254_v31 = vmul.f32 0.03125, %v8250_v55 }
0x5144   : > { %v8256_v63 = vadd.f32 1e-05, %v8254_v31  ;;  %v3131_v31 = vsel %vm3115_vm14, %v3129_v45, 0.0 }
0x5145   : > { %v8253_v10 = vpop.xlane.xlu0 %8252 }
0x5146   : > { %10804 = vrsqrt.f32 %v8256_v63  ;;  %v8255_v59 = vmul.f32 0.03125, %v8253_v10 }
0x5148   : > { %v8257_v3 = vadd.f32 1e-05, %v8255_v59  ;;  %v5821_v59 = vsel %vm3115_vm14, %v5819_v4, 0.0 }
0x514a   : > { %10806 = vrsqrt.f32 %v8257_v3 }
0x5150   : > { %v10805_v50 = vpop.eup %10804 }
0x5151   : > { %v8260_v61 = vmul.f32 %v10805_v50, %v8244_v56 }
0x5153   : > { %v8266_v40 = vmul.f32 %v8265_v13, %v8260_v61 }
0x5154   : > { %v10807_v58 = vpop.eup %10806 }
0x5155   : > { %v8261_v60 = vmul.f32 %v10807_v58, %v8245_v14  ;;  %v8272_v22 = vadd.f32 %v8271_v0, %v8266_v40 }
0x5157   : > { %v8267_v19 = vmul.f32 %v8265_v13, %v8261_v60  ;;  %9799 = vmatprep.mubr.msk.f32.mxu0 %vm458_vm0, %v8272_v22 }
0x5159   : > { %v8273_v7 = vadd.f32 %v8271_v0, %v8267_v19 }
0x515b   : > { %9800 = vmatmul.mubr.msk.f32.vlgmr.msra.gmra.mrb[70].mxu0 %vm458_vm0, %v8273_v7  ;;  %vm8521_vm0 = vcmask 15360  }
0x522e   : > { %v9801_v53 = vpop.f32.mrb[70].mxu0 }
0x522f   : > { %v8360_v49 = vadd.f32 %v9801_v53, %v8281_v33  ;;  %v8354_v20 = vpop.f32.mrb[71].mxu0 }
0x5230   : > { %v8355_v37 = vadd.f32 %v8354_v20, %v8281_v33 }
0x5231   : > { %v8364_v42 = vmax.f32 %v8360_v49, 0.0 }
0x5232   : > { %v8363_v25 = vmax.f32 %v8355_v37, 0.0  ;;  %v8877_v37 = vld [vmem:[%s12586_s8 + $0x18] sm:$0x3] }
0x5233   : > { %v8467_v29 = vrot.slane %v8877_v37, %v10978_v18 }
0x5234   : > { %9804 = vmatprep.mubr.msk.f32.mxu1 %vm572_vm1, %v8363_v25 }
0x5235   : > { %9805 = vmatmul.mubr.msk.f32.vlgmr.msra.gmra.mrb[70].mxu1 %vm572_vm1, %v8364_v42  ;;  %vm8523_vm1 = vcmask 16384  }
0x5308   : > { %v9806_v43 = vpop.f32.mrb[70].mxu1 }
0x5309   : > { %v8447_v48 = vadd.f32 %v9806_v43, %v8369_v35  ;;  %v8442_v57 = vpop.f32.mrb[71].mxu1 }
0x530b   : > { %v8450_v6 = vadd.f32 %v8447_v48, %v8273_v7  ;;  %v8472_v48 = vrot.slane %v8877_v37, %v10957_v12 }
0x530d   : > { %v8451_v36 = vsel %vm1532_vm10, %v8450_v6, 0.0 }
0x530e   : > { %8452 = vadd.xlane.f32.xlu1 %v8451_v36 }
0x5312   : > { %3117 = vadd.xlane.f32.xlu1 %v3116_v15  ;;  %v8480_v15 = vrot.slane %v8920_v41, 7 }
0x5316   : > { %5807 = vadd.xlane.f32.xlu1 %v5806_v5 }
0x539b   : > { %v8453_v14 = vpop.xlane.xlu1 %8452 }
0x539c   : > { %v8454_v56 = vmul.f32 0.03125, %v8453_v14 }
0x539e   : > { %v8455_v21 = vsub.f32 %v8450_v6, %v8454_v56 }
0x539f   : > { %v3118_v2 = vpop.xlane.xlu1 %3117 }
0x53a0   : > { %v3119_v51 = vrot.slane %v3118_v2, 4  ;;  %v8456_v9 = vmul.f32 %v8455_v21, %v8455_v21 }
0x53a2   : > { %v3120_v38 = vadd.f32 %v3119_v51, %v3118_v2  ;;  %v8457_v46 = vsel %vm1532_vm10, %v8456_v9, 0.0 }
0x53a3   : > { %8458 = vadd.xlane.f32.xlu0 %v8457_v46  ;;  %v5808_v11 = vpop.xlane.xlu1 %5807 }
0x53a4   : > { %v3121_v55 = vrot.slane %v3120_v38, 2  ;;  %v5809_v13 = vrot.slane %v5808_v11, 4 }
0x53a6   : > { %v3122_v63 = vadd.f32 %v3121_v55, %v3120_v38  ;;  %v5810_v50 = vadd.f32 %v5809_v13, %v5808_v11 }
0x53a7   : > { %3132 = vadd.xlane.f32.xlu0 %v3131_v31 }
0x53a8   : > { %v3123_v10 = vrot.slane %v3122_v63, 1  ;;  %v5811_v58 = vrot.slane %v5810_v50, 2 }
0x53aa   : > { %v3124_v3 = vadd.f32 %v3123_v10, %v3122_v63  ;;  %v5812_v32 = vadd.f32 %v5811_v58, %v5810_v50 }
0x53ab   : > { %5822 = vadd.xlane.f32.xlu0 %v5821_v59 }
0x53ac   : > { %10240 = vpush %v3124_v3  ;;  %v5813_v25 = vrot.slane %v5812_v32, 1 }
0x53ae   : > { %v5814_v43 = vadd.f32 %v5813_v25, %v5812_v32 }
0x53dd   : > { %s10241_s1 = spop %10240 }
0x53de   : > { %v3126_v63 = vstv %s10241_s1 }
0x5430   : > { %v8459_v61 = vpop.xlane.xlu0 %8458 }
0x5431   : > { %v8460_v0 = vmul.f32 0.03125, %v8459_v61 }
0x5433   : > { %v8461_v40 = vadd.f32 1e-05, %v8460_v0 }
0x5434   : > { %v3133_v60 = vpop.xlane.xlu0 %3132 }
0x5435   : > { %10808 = vrsqrt.f32 %v8461_v40  ;;  %v3134_v22 = vrot.slane %v3133_v60, 4 }
0x5437   : > { %v3135_v19 = vadd.f32 %v3134_v22, %v3133_v60 }
0x5438   : > { %v5823_v7 = vpop.xlane.xlu0 %5822 }
0x5439   : > { %v3136_v33 = vrot.slane %v3135_v19, 2  ;;  %v5824_v53 = vrot.slane %v5823_v7, 4 }
0x543b   : > { %v5825_v49 = vadd.f32 %v5824_v53, %v5823_v7  ;;  %v3137_v20 = vadd.f32 %v3136_v33, %v3135_v19 }
0x543d   : > { %v5826_v42 = vrot.slane %v5825_v49, 2  ;;  %v3138_v26 = vrot.slane %v3137_v20, 1 }
0x543f   : > { %v10809_v47 = vpop.eup %10808  ;;  %v3139_v35 = vadd.f32 %v3138_v26, %v3137_v20  ;;  %v5827_v39 = vadd.f32 %v5826_v42, %v5825_v49 }
0x5440   : > { %v8463_v44 = vmul.f32 %v10809_v47, %v8455_v21 }
0x5441   : > { %10242 = vpush %v3139_v35  ;;  %v5828_v57 = vrot.slane %v5827_v39, 1 }
0x5442   : > { %10244 = vpush %v5814_v43  ;;  %v8468_v6 = vmul.f32 %v8467_v29, %v8463_v44 }
0x5443   : > { %v5829_v36 = vadd.f32 %v5828_v57, %v5827_v39 }
0x5444   : > { %v8473_v16 = vadd.f32 %v8472_v48, %v8468_v6 }
0x5445   : > { %10246 = vpush %v5829_v36 }
0x5446   : > { %v8474_v18 = vadd.f32 %v8473_v16, %v12065_v27 }
0x5448   : > { %v8488_v54 = vsub.f32 %v8474_v18, %v8486_v17  ;;  %8919 = vst.msk [vmem:[%s11530_s21 + $0x7] sm:$0xe] %vm3099_vm13, %v8474_v18  ;;  %v8482_v5 = vsub.f32 %v8474_v18, %v8480_v15  ;;  %s12654_s21 = sld [smem:[#allocation3_spill]] }
0x544a   : > { %v8504_v30 = vmul.f32 %v8488_v54, %v8488_v54  ;;  %v8489_v34 = vmul.f32 %v8482_v5, %v8482_v5 }
0x544c   : > { %v8506_v12 = vrot.slane %v8504_v30, 1  ;;  %v8491_v23 = vrot.slane %v8489_v34, 1 }
0x544e   : > { %v8508_v62 = vsel %vm3115_vm14, %v8506_v12, 0.0  ;;  %v8493_v1 = vsel %vm3115_vm14, %v8491_v23, 0.0  ;;  %s440_s25 = scalar_lea.vmem %s12655_s24, %s12654_s21  ;;  %s443_s29 = scalar_lea.vmem %s12656_s28, %s12654_s21 }
0x544f   : > { %8509 = vadd.xlane.f32.xlu0 %v8508_v62  ;;  %8494 = vadd.xlane.f32.xlu1 %v8493_v1 }
0x5472   : > { %s10243_s10 = spop %10242 }
0x5473   : > { %s10245_s17 = spop %10244  ;;  %v3141_v10 = vstv %s10243_s10 }
0x5474   : > { %v5816_v31 = vstv %s10245_s17 }
0x5475   : > { %v8520_v59 = vsel %vm8519_vm15, %v3126_v63, %v5816_v31 }
0x5476   : > { %s10247_s18 = spop %10246 }
0x5477   : > { %v5831_v4 = vstv %s10247_s18 }
0x5478   : > { %v8525_v11 = vsel %vm8519_vm15, %v3141_v10, %v5831_v4 }
0x54dc   : > { %v8510_v14 = vpop.xlane.xlu0 %8509  ;;  %v8495_v56 = vpop.xlane.xlu1 %8494 }
0x54dd   : > { %v8511_v21 = vrot.slane %v8510_v14, 4  ;;  %v8496_v52 = vrot.slane %v8495_v56, 4 }
0x54df   : > { %v8512_v28 = vadd.f32 %v8511_v21, %v8510_v14  ;;  %v8497_v27 = vadd.f32 %v8496_v52, %v8495_v56 }
0x54e1   : > { %v8513_v2 = vrot.slane %v8512_v28, 2  ;;  %v8498_v51 = vrot.slane %v8497_v27, 2 }
0x54e3   : > { %v8514_v9 = vadd.f32 %v8513_v2, %v8512_v28  ;;  %v8499_v38 = vadd.f32 %v8498_v51, %v8497_v27 }
0x54e5   : > { %v8500_v46 = vrot.slane %v8499_v38, 1  ;;  %v8515_v45 = vrot.slane %v8514_v9, 1 }
0x54e7   : > { %v8501_v24 = vadd.f32 %v8500_v46, %v8499_v38  ;;  %v8516_v55 = vadd.f32 %v8515_v45, %v8514_v9 }
0x54e9   : > { %10248 = vpush %v8501_v24 }
0x54ea   : > { %10250 = vpush %v8516_v55 }
0x551a   : > { %s10249_s26 = spop %10248 }
0x551b   : > { %v8503_v3 = vstv %s10249_s26  ;;  %s10251_s30 = spop %10250 }
0x551c   : > { %v8522_v13 = vsel %vm8521_vm0, %v8520_v59, %v8503_v3  ;;  %v8518_v50 = vstv %s10251_s30 }
0x551d   : > { %8524 = vst.msk [vmem:[%s440_s25] sm:$0x1] %vm8523_vm1, %v8522_v13  ;;  %v8526_v61 = vsel %vm8521_vm0, %v8525_v11, %v8518_v50 }
0x551e   : > { %8527 = vst.msk [vmem:[%s443_s29] sm:$0x1] %vm8523_vm1, %v8526_v61 }
0x551f PF: > { %s12657_s14 = sld [smem:[#allocation2_spill]] }
0x5525   : > { %s22_s17 = sadd.s32 1, %s12657_s14  }
0x5526   : > { %p19_p4 = scmp.ge.s32.totalorder %s22_s17, 4  }
0x5528   :  { %21 = sbr.rel (!%p19_p4) target bundleno = 7 (0x7), region = 126 }

</bundles_post_ra>
